<compile_context>
chip_gen: v6e
topology: v6e:2x2x1
jax: 0.10.0
libtpu: 0.0.40
codegen_flags: <defaults>
</compile_context>

<pallas_src>
import functools
import math

import numpy as np
import jax
import jax.numpy as jnp
from jax.experimental import pallas as pl
from jax.experimental.pallas import tpu as pltpu

_BN_EPS = 1e-5
_VMEM_LIMIT = 32 * 1024 * 1024   # safe scoped-VMEM budget on v5e/v6e/v7x


def _gelu(x):
    # TODO(synk): PyTorch nn.GELU() defaults to the exact erf form; the tanh approximation
    # (max abs err ~1e-3) is used to guarantee Mosaic lowering.
    return 0.5 * x * (1.0 + jnp.tanh(0.7978845608028654 * (x + 0.044715 * x * x * x)))


def _pointwise_matmul(w, x):
    """(Cout, Cin) x (Cin, TM) -> (Cout, TM). Tiny contractions (Cin<=8) use VPU
    broadcast-MACs (MXU tile <1% utilized there); larger ones use the MXU."""
    cout, cin = w.shape
    if cin <= 8:
        acc = w[:, 0:1] * x[0:1, :]
        for ci in range(1, cin):
            acc = acc + w[:, ci:ci + 1] * x[ci:ci + 1, :]
        return acc
    return jnp.dot(w, x, preferred_element_type=jnp.float32)


def _choose_tile(length, cap=2048):
    """Largest lane tile <= cap that divides `length` and is a multiple of 128
    (or the full length when it is small)."""
    if length <= cap:
        return length
    t = (cap // 128) * 128
    while t >= 128:
        if length % t == 0:
            return t
        t -= 128
    return length   # TODO(synk): large non-divisible L falls back to one big block.


def _cparams(*sem):
    return pltpu.CompilerParams(dimension_semantics=sem, vmem_limit_bytes=_VMEM_LIMIT)


# ----------------------------------------------------------------------------
# Kernels
# ----------------------------------------------------------------------------
def _conv1x1_stats_kernel(x_ref, w_ref, sy_ref, qy_ref, sx_ref, qx_ref):
    """Pass 1 of 1x1 conv + BN: per-channel sum/sumsq of y = w @ x (y discarded), plus
    sum/sumsq of the raw input (reused by the identity path / x4 pooling). Accumulators
    are per-sample partials -> batch grid axis can stay 'parallel' (v7x megacore)."""
    @pl.when(pl.program_id(1) == 0)
    def _init():
        sy_ref[...] = jnp.zeros_like(sy_ref)
        qy_ref[...] = jnp.zeros_like(qy_ref)
        sx_ref[...] = jnp.zeros_like(sx_ref)
        qx_ref[...] = jnp.zeros_like(qx_ref)

    x = x_ref[...]
    y = _pointwise_matmul(w_ref[...], x)
    sy_ref[...] += jnp.sum(y, axis=1, keepdims=True)
    qy_ref[...] += jnp.sum(y * y, axis=1, keepdims=True)
    sx_ref[...] += jnp.sum(x, axis=1, keepdims=True)
    qx_ref[...] += jnp.sum(x * x, axis=1, keepdims=True)


def _conv1x1_bn_gelu_kernel(x_ref, w_ref, sc_ref, sh_ref, o_ref, so_ref, qo_ref):
    """Pass 2 of 1x1 conv + BN: o = GELU((w @ x)*scale + shift); also accumulates the
    per-channel sum/sumsq of o (feeds the tail BatchNorm for the x0 head)."""
    @pl.when(pl.program_id(1) == 0)
    def _init():
        so_ref[...] = jnp.zeros_like(so_ref)
        qo_ref[...] = jnp.zeros_like(qo_ref)

    y = _pointwise_matmul(w_ref[...], x_ref[...])
    o = _gelu(y * sc_ref[...] + sh_ref[...])
    o_ref[...] = o
    so_ref[...] += jnp.sum(o, axis=1, keepdims=True)
    qo_ref[...] += jnp.sum(o * o, axis=1, keepdims=True)


def _build_taps(mask_ref, zbuf, z, width, pad):
    """9-tap im2col of the flattened row-major image, built entirely in VMEM.
    zbuf is a zero-padded scratch: row over/under-flow lands in the zero pads while
    intra-row column wrap is killed by the precomputed (2, L) column masks."""
    c, L = z.shape
    zbuf[...] = jnp.zeros_like(zbuf)
    zbuf[:, pl.ds(pad, L)] = z                  # aligned center store (pad % 128 == 0)
    m_left = mask_ref[0:1, :]                   # 1.0 where w >= 1         (dx = -1)
    m_right = mask_ref[1:2, :]                  # 1.0 where w <= width - 2 (dx = +1)
    taps = []
    for a in range(3):          # dy = a - 1
        for b in range(3):      # dx = b - 1
            start = pad + (a - 1) * width + (b - 1)
            t = zbuf[:, pl.ds(start, L)]
            if b == 0:
                t = t * m_left
            elif b == 2:
                t = t * m_right
            taps.append(t)
    return jnp.concatenate(taps, axis=0)        # (9*C, L), tap-major / channel-minor


def _conv3x3_stats_kernel(mask_ref, up_ref, yp_ref, w_ref, sy_ref, qy_ref, zbuf,
                          *, width, pad):
    """Pass 1 of 3x3 conv + BN on z = up + y_prev (fused add; z / im2col never hit HBM)."""
    z = up_ref[...] + yp_ref[...]               # up broadcasts when it is (C, 1) (x4 path)
    zi = _build_taps(mask_ref, zbuf, z, width, pad)
    y = jnp.dot(w_ref[...], zi, preferred_element_type=jnp.float32)
    sy_ref[...] = jnp.sum(y, axis=1, keepdims=True)
    qy_ref[...] = jnp.sum(y * y, axis=1, keepdims=True)


def _conv3x3_bn_gelu_kernel(mask_ref, up_ref, yp_ref, w_ref, sc_ref, sh_ref,
                            o_ref, so_ref, qo_ref, zbuf, *, width, pad):
    """Pass 2 of 3x3 conv + BN: o = GELU(conv3x3(up + y_prev)*scale + shift), plus
    per-channel sum/sumsq of o for the tail BatchNorm."""
    z = up_ref[...] + yp_ref[...]
    zi = _build_taps(mask_ref, zbuf, z, width, pad)
    y = jnp.dot(w_ref[...], zi, preferred_element_type=jnp.float32)
    o = _gelu(y * sc_ref[...] + sh_ref[...])
    o_ref[...] = o
    so_ref[...] = jnp.sum(o, axis=1, keepdims=True)
    qo_ref[...] = jnp.sum(o * o, axis=1, keepdims=True)


def _bn_gelu_matmul_kernel(*refs, n_in):
    """BN(train, precomputed scale/shift) + GELU + 1x1 conv over the (virtual)
    concatenation of n_in input slabs (tail / identity heads); also accumulates the
    per-(sample, channel) output sum used by the ECA attention pooling."""
    x_refs = refs[:n_in]
    sc_ref, sh_ref, w_ref, o_ref, sum_ref = refs[n_in:]

    @pl.when(pl.program_id(1) == 0)
    def _init():
        sum_ref[...] = jnp.zeros_like(sum_ref)

    if n_in == 1:
        a = x_refs[0][...]
    else:
        a = jnp.concatenate([r[...] for r in x_refs], axis=0)   # cat lives in VMEM only
    a = _gelu(a * sc_ref[...] + sh_ref[...])
    o = _pointwise_matmul(w_ref[...], a)
    o_ref[...] = o
    sum_ref[...] += jnp.sum(o, axis=1, keepdims=True)


def _attn_combine_kernel(t_ref, i_ref, at_ref, ai_ref, o_ref):
    """out = tail*sigmoid_scale_tail + identity*sigmoid_scale_identity."""
    o_ref[...] = t_ref[...] * at_ref[...] + i_ref[...] * ai_ref[...]


# ----------------------------------------------------------------------------
# Pallas wrappers
# ----------------------------------------------------------------------------
def _slab_spec(c, tm):
    return pl.BlockSpec((None, c, tm), lambda i, j: (i, 0, j))


def _stat_spec(c):
    return pl.BlockSpec((None, c, 1), lambda i, j: (i, 0, 0))


def _col_spec(c):
    return pl.BlockSpec((c, 1), lambda i, j: (0, 0))


def conv1x1_stats(x3, w):
    n, cin, L = x3.shape
    cout = w.shape[0]
    tm = _choose_tile(L)
    nt = L // tm
    return pl.pallas_call(
        _conv1x1_stats_kernel,
        grid=(n, nt),
        in_specs=[_slab_spec(cin, tm), pl.BlockSpec((cout, cin), lambda i, j: (0, 0))],
        out_specs=[_stat_spec(cout), _stat_spec(cout), _stat_spec(cin), _stat_spec(cin)],
        out_shape=[jax.ShapeDtypeStruct((n, cout, 1), jnp.float32)] * 2
                  + [jax.ShapeDtypeStruct((n, cin, 1), jnp.float32)] * 2,
        compiler_params=_cparams("parallel", "arbitrary"),
    )(x3, w)


def conv1x1_bn_gelu(x3, w, scale, shift):
    n, cin, L = x3.shape
    cout = w.shape[0]
    tm = _choose_tile(L)
    nt = L // tm
    return pl.pallas_call(
        _conv1x1_bn_gelu_kernel,
        grid=(n, nt),
        in_specs=[_slab_spec(cin, tm), pl.BlockSpec((cout, cin), lambda i, j: (0, 0)),
                  _col_spec(cout), _col_spec(cout)],
        out_specs=[_slab_spec(cout, tm), _stat_spec(cout), _stat_spec(cout)],
        out_shape=[jax.ShapeDtypeStruct((n, cout, L), jnp.float32),
                   jax.ShapeDtypeStruct((n, cout, 1), jnp.float32),
                   jax.ShapeDtypeStruct((n, cout, 1), jnp.float32)],
        compiler_params=_cparams("parallel", "arbitrary"),
    )(x3, w, scale.reshape(cout, 1), shift.reshape(cout, 1))


def _conv3x3_specs(c, L, up_lanes):
    mask_s = pl.BlockSpec((2, L), lambda i: (0, 0))
    up_s = pl.BlockSpec((None, c, up_lanes), lambda i: (i, 0, 0))
    yp_s = pl.BlockSpec((None, c, L), lambda i: (i, 0, 0))
    w_s = pl.BlockSpec((c, 9 * c), lambda i: (0, 0))
    out_s = pl.BlockSpec((None, c, L), lambda i: (i, 0, 0))
    stat_s = pl.BlockSpec((None, c, 1), lambda i: (i, 0, 0))
    return mask_s, up_s, yp_s, w_s, out_s, stat_s


def conv3x3_stats(mask, up, y_prev, w, width):
    # TODO(synk): whole (C, H*W) sample per grid step; halo-tiled spatial blocking would be
    # needed for very large images, but is unnecessary at these shapes.
    n, c, L = y_prev.shape
    pad = ((width + 1 + 127) // 128) * 128
    mask_s, up_s, yp_s, w_s, _, stat_s = _conv3x3_specs(c, L, up.shape[2])
    return pl.pallas_call(
        functools.partial(_conv3x3_stats_kernel, width=width, pad=pad),
        grid=(n,),
        in_specs=[mask_s, up_s, yp_s, w_s],
        out_specs=[stat_s, stat_s],
        out_shape=[jax.ShapeDtypeStruct((n, c, 1), jnp.float32)] * 2,
        scratch_shapes=[pltpu.VMEM((c, L + 2 * pad), jnp.float32)],
        compiler_params=_cparams("parallel"),
    )(mask, up, y_prev, w)


def conv3x3_bn_gelu(mask, up, y_prev, w, scale, shift, width):
    n, c, L = y_prev.shape
    pad = ((width + 1 + 127) // 128) * 128
    mask_s, up_s, yp_s, w_s, out_s, stat_s = _conv3x3_specs(c, L, up.shape[2])
    col_s = pl.BlockSpec((c, 1), lambda i: (0, 0))
    return pl.pallas_call(
        functools.partial(_conv3x3_bn_gelu_kernel, width=width, pad=pad),
        grid=(n,),
        in_specs=[mask_s, up_s, yp_s, w_s, col_s, col_s],
        out_specs=[out_s, stat_s, stat_s],
        out_shape=[jax.ShapeDtypeStruct((n, c, L), jnp.float32),
                   jax.ShapeDtypeStruct((n, c, 1), jnp.float32),
                   jax.ShapeDtypeStruct((n, c, 1), jnp.float32)],
        scratch_shapes=[pltpu.VMEM((c, L + 2 * pad), jnp.float32)],
        compiler_params=_cparams("parallel"),
    )(mask, up, y_prev, w, scale.reshape(c, 1), shift.reshape(c, 1))


def bn_gelu_conv1x1_multi(slabs, scale, shift, w):
    """BN+GELU+1x1-conv over the virtual concatenation of `slabs` (never materialized)."""
    n, _, L = slabs[0].shape
    cin = sum(s.shape[1] for s in slabs)
    cout = w.shape[0]
    tm = _choose_tile(L)
    nt = L // tm
    in_specs = [_slab_spec(s.shape[1], tm) for s in slabs]
    in_specs += [_col_spec(cin), _col_spec(cin),
                 pl.BlockSpec((cout, cin), lambda i, j: (0, 0))]
    return pl.pallas_call(
        functools.partial(_bn_gelu_matmul_kernel, n_in=len(slabs)),
        grid=(n, nt),
        in_specs=in_specs,
        out_specs=[_slab_spec(cout, tm), _stat_spec(cout)],
        out_shape=[jax.ShapeDtypeStruct((n, cout, L), jnp.float32),
                   jax.ShapeDtypeStruct((n, cout, 1), jnp.float32)],
        compiler_params=_cparams("parallel", "arbitrary"),
    )(*slabs, scale.reshape(cin, 1), shift.reshape(cin, 1), w)


def attn_combine(t3, i3, at, ai):
    n, c, L = t3.shape
    tm = _choose_tile(L)
    nt = L // tm
    return pl.pallas_call(
        _attn_combine_kernel,
        grid=(n, nt),
        in_specs=[_slab_spec(c, tm), _slab_spec(c, tm),
                  pl.BlockSpec((None, c, 1), lambda i, j: (i, 0, 0)),
                  pl.BlockSpec((None, c, 1), lambda i, j: (i, 0, 0))],
        out_specs=_slab_spec(c, tm),
        out_shape=jax.ShapeDtypeStruct((n, c, L), jnp.float32),
        compiler_params=_cparams("parallel", "parallel"),
    )(t3, i3, at, ai)


# ----------------------------------------------------------------------------
# JAX glue (pooling / bilinear upsample / ECA vector / BN finalize) — tiny vs. kernels
# ----------------------------------------------------------------------------
def _bn_scale_shift(sum_, sq, gamma, beta, count):
    mean = sum_ / count
    var = jnp.maximum(sq / count - mean * mean, 0.0)
    scale = gamma * jax.lax.rsqrt(var + _BN_EPS)
    shift = beta - mean * scale
    return scale, shift


def _reduce_stat(p):
    return jnp.sum(p, axis=(0, 2))


def _avg_pool(x, k, s, p):
    # PyTorch AvgPool2d(count_include_pad=True): zero-pad, window sum, divide by k*k.
    summed = jax.lax.reduce_window(
        x, 0.0, jax.lax.add,
        window_dimensions=(1, 1, k, k), window_strides=(1, 1, s, s),
        padding=((0, 0), (0, 0), (p, p), (p, p)))
    return summed / float(k * k)


def _upsample_bilinear(x, out_h, out_w):
    # F.interpolate(..., mode='bilinear', align_corners=False) semantics.
    n, ch, h, w = x.shape

    def src_idx(osz, isz):
        scale = isz / osz
        s = (jnp.arange(osz, dtype=jnp.float32) + 0.5) * scale - 0.5
        s = jnp.maximum(s, 0.0)
        i0 = jnp.clip(jnp.floor(s).astype(jnp.int32), 0, isz - 1)
        i1 = jnp.clip(i0 + 1, 0, isz - 1)
        return i0, i1, s - i0.astype(jnp.float32)

    h0, h1, fh = src_idx(out_h, h)
    w0, w1, fw = src_idx(out_w, w)
    top = x[:, :, h0, :]
    bot = x[:, :, h1, :]
    tl, tr = top[:, :, :, w0], top[:, :, :, w1]
    bl, br = bot[:, :, :, w0], bot[:, :, :, w1]
    fw_ = fw.reshape(1, 1, 1, out_w)
    fh_ = fh.reshape(1, 1, out_h, 1)
    t_row = tl * (1.0 - fw_) + tr * fw_
    b_row = bl * (1.0 - fw_) + br * fw_
    return t_row * (1.0 - fh_) + b_row * fh_


def _eca_ksize(channel, gamma=2, b=1):
    t = int(abs((math.log(channel, 2) + b) / gamma))
    return t if t % 2 else t + 1


def _eca_from_sum(sum_nc1, count, w1d):
    # ECA Attn: AdaptiveAvgPool2d(1) (sum taken in-kernel) -> Conv1d over channels -> sigmoid.
    pooled = sum_nc1[:, :, 0] / float(count)           # (N, C)
    c = pooled.shape[1]
    k = w1d.shape[0]
    pad = (k - 1) // 2
    pp = jnp.pad(pooled, ((0, 0), (pad, pad)))
    conv = sum(w1d[j] * pp[:, j:j + c] for j in range(k))
    return jax.nn.sigmoid(conv)[:, :, None]            # (N, C, 1)


# ----------------------------------------------------------------------------
# Parameters (synthetic, PyTorch-shaped then converted) and forward pass
# ----------------------------------------------------------------------------
def init_params(key, inc, midc, ouc):
    ks = iter(jax.random.split(key, 64))

    def nrm(shape, scale=0.2):
        return scale * jax.random.normal(next(ks), shape, dtype=jnp.float32)

    p = {}
    for s in range(5):                                   # x0..x4: Conv2d(inc->midc,1)+BN
        p[f"x{s}_w"] = nrm((midc, inc))
        p[f"x{s}_g"] = 1.0 + nrm((midc,), 0.1)
        p[f"x{s}_b"] = nrm((midc,), 0.1)
    for s in range(1, 5):                                # p1..p4: Conv2d(midc->midc,3,pad=1)+BN
        w = nrm((midc, midc, 3, 3))                      # torch layout (Cout, Cin, 3, 3)
        p[f"p{s}_w"] = jnp.transpose(w, (0, 2, 3, 1)).reshape(midc, 9 * midc)
        p[f"p{s}_g"] = 1.0 + nrm((midc,), 0.1)
        p[f"p{s}_b"] = nrm((midc,), 0.1)
    p["tail_g"] = 1.0 + nrm((5 * midc,), 0.1)
    p["tail_b"] = nrm((5 * midc,), 0.1)
    p["tail_w"] = nrm((ouc, 5 * midc))
    p["idn_g"] = 1.0 + nrm((inc,), 0.1)
    p["idn_b"] = nrm((inc,), 0.1)
    p["idn_w"] = nrm((ouc, inc))
    k = _eca_ksize(ouc)
    p["tail_attn_w"] = nrm((k,))
    p["idn_attn_w"] = nrm((k,))
    return p


def msse_forward(x_nchw, params):
    n, inc, H, W = x_nchw.shape
    L = H * W
    midc = params["x0_w"].shape[0]
    ouc = params["tail_w"].shape[0]
    x3 = x_nchw.reshape(n, inc, L)                        # channel-major slab, no transpose

    # Column-wrap masks for the in-kernel 3x3 taps (depend only on static H, W).
    w_idx = np.arange(L) % W
    col_mask = jnp.asarray(
        np.stack([(w_idx >= 1), (w_idx <= W - 2)]).astype(np.float32))   # (2, L)

    # ---- s = 0: x0 head (its stats pass also yields raw-x stats for identity / x4) ----
    sy, qy, sx, qx = conv1x1_stats(x3, params["x0_w"])
    sc0, sh0 = _bn_scale_shift(_reduce_stat(sy), _reduce_stat(qy),
                               params["x0_g"], params["x0_b"], float(n * L))
    y0, s_out, q_out = conv1x1_bn_gelu(x3, params["x0_w"], sc0, sh0)

    ys = [y0]
    cat_sums = [_reduce_stat(s_out)]
    cat_sqs = [_reduce_stat(q_out)]

    pool_cfg = {1: (5, 2, 2), 2: (9, 4, 4), 3: (17, 8, 8)}
    y_prev = y0
    for s in range(1, 5):
        if s in pool_cfg:
            k, st, pd = pool_cfg[s]
            xp = _avg_pool(x_nchw, k, st, pd)             # (N, inc, hp, wp)
            hp, wp = xp.shape[2], xp.shape[3]
            xp3 = xp.reshape(n, inc, hp * wp)
            bsy, bqy, _, _ = conv1x1_stats(xp3, params[f"x{s}_w"])
            bsc, bsh = _bn_scale_shift(_reduce_stat(bsy), _reduce_stat(bqy),
                                       params[f"x{s}_g"], params[f"x{s}_b"],
                                       float(n * hp * wp))
            br, _, _ = conv1x1_bn_gelu(xp3, params[f"x{s}_w"], bsc, bsh)
            up = _upsample_bilinear(br.reshape(n, midc, hp, wp), H, W).reshape(n, midc, L)
        else:
            # s == 4: AdaptiveAvgPool2d((1,1)) branch (L=1) in plain JAX; pooled channel
            # means recovered from the x0 stats pass, result enters p4 as a (N,midc,1)
            # broadcast (the bilinear upsample of a 1x1 map is a constant).
            pooled = sx[:, :, 0] / float(L)               # (N, inc)
            y4 = pooled @ params["x4_w"].T                # (N, midc)
            m4 = jnp.mean(y4, axis=0)
            v4 = jnp.maximum(jnp.mean(y4 * y4, axis=0) - m4 * m4, 0.0)
            sc4 = params["x4_g"] * jax.lax.rsqrt(v4 + _BN_EPS)
            sh4 = params["x4_b"] - m4 * sc4
            up = _gelu(y4 * sc4 + sh4)[:, :, None]        # (N, midc, 1)

        # p_s: 3x3 conv on z = up + y_prev; z and its 9x im2col never hit HBM.
        psy, pqy = conv3x3_stats(col_mask, up, y_prev, params[f"p{s}_w"], W)
        psc, psh = _bn_scale_shift(_reduce_stat(psy), _reduce_stat(pqy),
                                   params[f"p{s}_g"], params[f"p{s}_b"], float(n * L))
        y_s, s_out, q_out = conv3x3_bn_gelu(col_mask, up, y_prev, params[f"p{s}_w"],
                                            psc, psh, W)
        ys.append(y_s)
        cat_sums.append(_reduce_stat(s_out))
        cat_sqs.append(_reduce_stat(q_out))
        y_prev = y_s

    # ---- tail: BN(cat(ys)) + GELU + 1x1 conv; cat never materialized, BN stats came
    #      for free from the producing kernels' output accumulators ----
    t_scale, t_shift = _bn_scale_shift(jnp.concatenate(cat_sums), jnp.concatenate(cat_sqs),
                                       params["tail_g"], params["tail_b"], float(n * L))
    t, sum_t = bn_gelu_conv1x1_multi(ys, t_scale, t_shift, params["tail_w"])

    # ---- identity: BN(x) + GELU + 1x1 conv (x stats reused from the x0 stats pass) ----
    i_scale, i_shift = _bn_scale_shift(_reduce_stat(sx), _reduce_stat(qx),
                                       params["idn_g"], params["idn_b"], float(n * L))
    idn, sum_i = bn_gelu_conv1x1_multi([x3], i_scale, i_shift, params["idn_w"])

    # ---- ECA attention (channel means taken in-kernel) + residual combine ----
    at = _eca_from_sum(sum_t, L, params["tail_attn_w"])   # (N, ouc, 1)
    ai = _eca_from_sum(sum_i, L, params["idn_attn_w"])
    out = attn_combine(t, idn, at, ai)                    # tail*Attn + identity*Attn
    return out.reshape(n, ouc, H, W)


if __name__ == "__main__":
    key = jax.random.PRNGKey(0)
    kx, kp = jax.random.split(key)

    N, INC, MIDC, OUC, H, W = 2, 4, 8, 16, 16, 16
    params = init_params(kp, INC, MIDC, OUC)
    x = jax.random.normal(kx, (N, INC, H, W), dtype=jnp.float32)   # NCHW like PyTorch

    fwd = jax.jit(msse_forward)
    out = fwd(x, params)
    jax.block_until_ready(out)
    assert out.shape == (N, OUC, H, W)
    assert bool(jnp.all(jnp.isfinite(out)))
    print("KERNEL_OK")
</pallas_src>

<mosaic_0001>
module attributes {stable_mosaic.version = 11 : i64} {
  func.func @_conv1x1_stats_kernel(%arg0: i32, %arg1: i32, %arg2: memref<1x4x64xf32, #tpu.memory_space<vmem>>, %arg3: memref<8x4xf32, #tpu.memory_space<vmem>>, %arg4: memref<1x8x1xf32, #tpu.memory_space<vmem>>, %arg5: memref<1x8x1xf32, #tpu.memory_space<vmem>>, %arg6: memref<1x4x1xf32, #tpu.memory_space<vmem>>, %arg7: memref<1x4x1xf32, #tpu.memory_space<vmem>>) attributes {dimension_semantics = [#tpu.dimension_semantics<parallel>, #tpu.dimension_semantics<arbitrary>], iteration_bounds = array<i64: 2, 1>, scalar_prefetch = 0 : i64, scratch_operands = 0 : i64, tpu.core_type = #tpu.core_type<tc>, window_params = [{transform_indices = @transform_0, window_bounds = array<i64: 1, 4, 64>}, {pipeline_mode = #tpu.pipeline_mode<synchronous>, transform_indices = @transform_1, window_bounds = array<i64: 8, 4>}, {transform_indices = @transform_2, window_bounds = array<i64: 1, 8, 1>}, {transform_indices = @transform_3, window_bounds = array<i64: 1, 8, 1>}, {transform_indices = @transform_4, window_bounds = array<i64: 1, 4, 1>}, {transform_indices = @transform_5, window_bounds = array<i64: 1, 4, 1>}]} {
    %c0_i32 = arith.constant 0 : i32
    %0 = arith.cmpi eq, %arg1, %c0_i32 : i32
    %1 = arith.extui %0 : i1 to i32
    %c0_i32_0 = arith.constant 0 : i32
    %2 = arith.cmpi ne, %1, %c0_i32_0 : i32
    scf.if %2 {
      %cst_32 = arith.constant 0.000000e+00 : f32
      %63 = vector.broadcast %cst_32 : f32 to vector<8x1xf32>
      %c0_33 = arith.constant 0 : index
      %c0_34 = arith.constant 0 : index
      %c0_35 = arith.constant 0 : index
      %64 = vector.load %arg4[%c0_33, %c0_34, %c0_35] : memref<1x8x1xf32, #tpu.memory_space<vmem>>, vector<1x8x1xf32>
      %65 = vector.shape_cast %64 : vector<1x8x1xf32> to vector<8x1xf32>
      %66 = vector.shape_cast %63 : vector<8x1xf32> to vector<1x8x1xf32>
      tpu.vector_store %arg4[%c0_33, %c0_34, %c0_35], %66 {strides = array<i32>} : memref<1x8x1xf32, #tpu.memory_space<vmem>>, vector<1x8x1xf32>,
      %cst_36 = arith.constant 0.000000e+00 : f32
      %67 = vector.broadcast %cst_36 : f32 to vector<8x1xf32>
      %c0_37 = arith.constant 0 : index
      %c0_38 = arith.constant 0 : index
      %c0_39 = arith.constant 0 : index
      %68 = vector.load %arg5[%c0_37, %c0_38, %c0_39] : memref<1x8x1xf32, #tpu.memory_space<vmem>>, vector<1x8x1xf32>
      %69 = vector.shape_cast %68 : vector<1x8x1xf32> to vector<8x1xf32>
      %70 = vector.shape_cast %67 : vector<8x1xf32> to vector<1x8x1xf32>
      tpu.vector_store %arg5[%c0_37, %c0_38, %c0_39], %70 {strides = array<i32>} : memref<1x8x1xf32, #tpu.memory_space<vmem>>, vector<1x8x1xf32>,
      %cst_40 = arith.constant 0.000000e+00 : f32
      %71 = vector.broadcast %cst_40 : f32 to vector<4x1xf32>
      %c0_41 = arith.constant 0 : index
      %c0_42 = arith.constant 0 : index
      %c0_43 = arith.constant 0 : index
      %72 = vector.load %arg6[%c0_41, %c0_42, %c0_43] : memref<1x4x1xf32, #tpu.memory_space<vmem>>, vector<1x4x1xf32>
      %73 = vector.shape_cast %72 : vector<1x4x1xf32> to vector<4x1xf32>
      %74 = vector.shape_cast %71 : vector<4x1xf32> to vector<1x4x1xf32>
      tpu.vector_store %arg6[%c0_41, %c0_42, %c0_43], %74 {strides = array<i32>} : memref<1x4x1xf32, #tpu.memory_space<vmem>>, vector<1x4x1xf32>,
      %cst_44 = arith.constant 0.000000e+00 : f32
      %75 = vector.broadcast %cst_44 : f32 to vector<4x1xf32>
      %c0_45 = arith.constant 0 : index
      %c0_46 = arith.constant 0 : index
      %c0_47 = arith.constant 0 : index
      %76 = vector.load %arg7[%c0_45, %c0_46, %c0_47] : memref<1x4x1xf32, #tpu.memory_space<vmem>>, vector<1x4x1xf32>
      %77 = vector.shape_cast %76 : vector<1x4x1xf32> to vector<4x1xf32>
      %78 = vector.shape_cast %75 : vector<4x1xf32> to vector<1x4x1xf32>
      tpu.vector_store %arg7[%c0_45, %c0_46, %c0_47], %78 {strides = array<i32>} : memref<1x4x1xf32, #tpu.memory_space<vmem>>, vector<1x4x1xf32>,
    } else {
    }
    %c0 = arith.constant 0 : index
    %c0_1 = arith.constant 0 : index
    %c0_2 = arith.constant 0 : index
    %3 = vector.load %arg2[%c0, %c0_1, %c0_2] : memref<1x4x64xf32, #tpu.memory_space<vmem>>, vector<1x4x64xf32>
    %4 = vector.shape_cast %3 : vector<1x4x64xf32> to vector<4x64xf32>
    %c0_3 = arith.constant 0 : index
    %c0_4 = arith.constant 0 : index
    %5 = vector.load %arg3[%c0_3, %c0_4] : memref<8x4xf32, #tpu.memory_space<vmem>>, vector<8x4xf32>
    %6 = vector.extract_strided_slice %5 {offsets = [0, 0], sizes = [8, 1], strides = [1, 1]} : vector<8x4xf32> to vector<8x1xf32>
    %7 = vector.extract_strided_slice %4 {offsets = [0, 0], sizes = [1, 64], strides = [1, 1]} : vector<4x64xf32> to vector<1x64xf32>
    %8 = vector.broadcast %6 : vector<8x1xf32> to vector<8x64xf32>
    %9 = vector.broadcast %7 : vector<1x64xf32> to vector<8x64xf32>
    %10 = arith.mulf %8, %9 : vector<8x64xf32>
    %11 = vector.extract_strided_slice %5 {offsets = [0, 1], sizes = [8, 1], strides = [1, 1]} : vector<8x4xf32> to vector<8x1xf32>
    %12 = vector.extract_strided_slice %4 {offsets = [1, 0], sizes = [1, 64], strides = [1, 1]} : vector<4x64xf32> to vector<1x64xf32>
    %13 = vector.broadcast %11 : vector<8x1xf32> to vector<8x64xf32>
    %14 = vector.broadcast %12 : vector<1x64xf32> to vector<8x64xf32>
    %15 = arith.mulf %13, %14 : vector<8x64xf32>
    %16 = arith.addf %10, %15 : vector<8x64xf32>
    %17 = vector.extract_strided_slice %5 {offsets = [0, 2], sizes = [8, 1], strides = [1, 1]} : vector<8x4xf32> to vector<8x1xf32>
    %18 = vector.extract_strided_slice %4 {offsets = [2, 0], sizes = [1, 64], strides = [1, 1]} : vector<4x64xf32> to vector<1x64xf32>
    %19 = vector.broadcast %17 : vector<8x1xf32> to vector<8x64xf32>
    %20 = vector.broadcast %18 : vector<1x64xf32> to vector<8x64xf32>
    %21 = arith.mulf %19, %20 : vector<8x64xf32>
    %22 = arith.addf %16, %21 : vector<8x64xf32>
    %23 = vector.extract_strided_slice %5 {offsets = [0, 3], sizes = [8, 1], strides = [1, 1]} : vector<8x4xf32> to vector<8x1xf32>
    %24 = vector.extract_strided_slice %4 {offsets = [3, 0], sizes = [1, 64], strides = [1, 1]} : vector<4x64xf32> to vector<1x64xf32>
    %25 = vector.broadcast %23 : vector<8x1xf32> to vector<8x64xf32>
    %26 = vector.broadcast %24 : vector<1x64xf32> to vector<8x64xf32>
    %27 = arith.mulf %25, %26 : vector<8x64xf32>
    %28 = arith.addf %22, %27 : vector<8x64xf32>
    %c0_5 = arith.constant 0 : index
    %c0_6 = arith.constant 0 : index
    %c0_7 = arith.constant 0 : index
    %29 = vector.load %arg4[%c0_5, %c0_6, %c0_7] : memref<1x8x1xf32, #tpu.memory_space<vmem>>, vector<1x8x1xf32>
    %30 = vector.shape_cast %29 : vector<1x8x1xf32> to vector<8x1xf32>
    %cst = arith.constant dense<0.000000e+00> : vector<8xf32>
    %31 = vector.multi_reduction <add>, %28, %cst [1] : vector<8x64xf32> to vector<8xf32>
    %32 = vector.shape_cast %31 : vector<8xf32> to vector<8x1xf32>
    %33 = arith.addf %30, %32 : vector<8x1xf32>
    %c0_8 = arith.constant 0 : index
    %c0_9 = arith.constant 0 : index
    %c0_10 = arith.constant 0 : index
    %34 = vector.load %arg4[%c0_8, %c0_9, %c0_10] : memref<1x8x1xf32, #tpu.memory_space<vmem>>, vector<1x8x1xf32>
    %35 = vector.shape_cast %34 : vector<1x8x1xf32> to vector<8x1xf32>
    %36 = vector.shape_cast %33 : vector<8x1xf32> to vector<1x8x1xf32>
    tpu.vector_store %arg4[%c0_8, %c0_9, %c0_10], %36 {strides = array<i32>} : memref<1x8x1xf32, #tpu.memory_space<vmem>>, vector<1x8x1xf32>,
    %c0_11 = arith.constant 0 : index
    %c0_12 = arith.constant 0 : index
    %c0_13 = arith.constant 0 : index
    %37 = vector.load %arg5[%c0_11, %c0_12, %c0_13] : memref<1x8x1xf32, #tpu.memory_space<vmem>>, vector<1x8x1xf32>
    %38 = vector.shape_cast %37 : vector<1x8x1xf32> to vector<8x1xf32>
    %39 = arith.mulf %28, %28 : vector<8x64xf32>
    %cst_14 = arith.constant dense<0.000000e+00> : vector<8xf32>
    %40 = vector.multi_reduction <add>, %39, %cst_14 [1] : vector<8x64xf32> to vector<8xf32>
    %41 = vector.shape_cast %40 : vector<8xf32> to vector<8x1xf32>
    %42 = arith.addf %38, %41 : vector<8x1xf32>
    %c0_15 = arith.constant 0 : index
    %c0_16 = arith.constant 0 : index
    %c0_17 = arith.constant 0 : index
    %43 = vector.load %arg5[%c0_15, %c0_16, %c0_17] : memref<1x8x1xf32, #tpu.memory_space<vmem>>, vector<1x8x1xf32>
    %44 = vector.shape_cast %43 : vector<1x8x1xf32> to vector<8x1xf32>
    %45 = vector.shape_cast %42 : vector<8x1xf32> to vector<1x8x1xf32>
    tpu.vector_store %arg5[%c0_15, %c0_16, %c0_17], %45 {strides = array<i32>} : memref<1x8x1xf32, #tpu.memory_space<vmem>>, vector<1x8x1xf32>,
    %c0_18 = arith.constant 0 : index
    %c0_19 = arith.constant 0 : index
    %c0_20 = arith.constant 0 : index
    %46 = vector.load %arg6[%c0_18, %c0_19, %c0_20] : memref<1x4x1xf32, #tpu.memory_space<vmem>>, vector<1x4x1xf32>
    %47 = vector.shape_cast %46 : vector<1x4x1xf32> to vector<4x1xf32>
    %cst_21 = arith.constant dense<0.000000e+00> : vector<4xf32>
    %48 = vector.multi_reduction <add>, %4, %cst_21 [1] : vector<4x64xf32> to vector<4xf32>
    %49 = vector.shape_cast %48 : vector<4xf32> to vector<4x1xf32>
    %50 = arith.addf %47, %49 : vector<4x1xf32>
    %c0_22 = arith.constant 0 : index
    %c0_23 = arith.constant 0 : index
    %c0_24 = arith.constant 0 : index
    %51 = vector.load %arg6[%c0_22, %c0_23, %c0_24] : memref<1x4x1xf32, #tpu.memory_space<vmem>>, vector<1x4x1xf32>
    %52 = vector.shape_cast %51 : vector<1x4x1xf32> to vector<4x1xf32>
    %53 = vector.shape_cast %50 : vector<4x1xf32> to vector<1x4x1xf32>
    tpu.vector_store %arg6[%c0_22, %c0_23, %c0_24], %53 {strides = array<i32>} : memref<1x4x1xf32, #tpu.memory_space<vmem>>, vector<1x4x1xf32>,
    %c0_25 = arith.constant 0 : index
    %c0_26 = arith.constant 0 : index
    %c0_27 = arith.constant 0 : index
    %54 = vector.load %arg7[%c0_25, %c0_26, %c0_27] : memref<1x4x1xf32, #tpu.memory_space<vmem>>, vector<1x4x1xf32>
    %55 = vector.shape_cast %54 : vector<1x4x1xf32> to vector<4x1xf32>
    %56 = arith.mulf %4, %4 : vector<4x64xf32>
    %cst_28 = arith.constant dense<0.000000e+00> : vector<4xf32>
    %57 = vector.multi_reduction <add>, %56, %cst_28 [1] : vector<4x64xf32> to vector<4xf32>
    %58 = vector.shape_cast %57 : vector<4xf32> to vector<4x1xf32>
    %59 = arith.addf %55, %58 : vector<4x1xf32>
    %c0_29 = arith.constant 0 : index
    %c0_30 = arith.constant 0 : index
    %c0_31 = arith.constant 0 : index
    %60 = vector.load %arg7[%c0_29, %c0_30, %c0_31] : memref<1x4x1xf32, #tpu.memory_space<vmem>>, vector<1x4x1xf32>
    %61 = vector.shape_cast %60 : vector<1x4x1xf32> to vector<4x1xf32>
    %62 = vector.shape_cast %59 : vector<4x1xf32> to vector<1x4x1xf32>
    tpu.vector_store %arg7[%c0_29, %c0_30, %c0_31], %62 {strides = array<i32>} : memref<1x4x1xf32, #tpu.memory_space<vmem>>, vector<1x4x1xf32>,
    return
  }
  func.func @transform_0(%arg0: i32, %arg1: i32) -> (i32, i32, i32) {
    %c0_i32 = arith.constant 0 : i32
    %c0_i32_0 = arith.constant 0 : i32
    return %arg0, %c0_i32, %arg1 : i32, i32, i32
  }
  func.func @transform_1(%arg0: i32, %arg1: i32) -> (i32, i32) {
    %c0_i32 = arith.constant 0 : i32
    %c0_i32_0 = arith.constant 0 : i32
    %c0_i32_1 = arith.constant 0 : i32
    return %c0_i32, %c0_i32_0 : i32, i32
  }
  func.func @transform_2(%arg0: i32, %arg1: i32) -> (i32, i32, i32) {
    %c0_i32 = arith.constant 0 : i32
    %c0_i32_0 = arith.constant 0 : i32
    %c0_i32_1 = arith.constant 0 : i32
    return %arg0, %c0_i32, %c0_i32_0 : i32, i32, i32
  }
  func.func @transform_3(%arg0: i32, %arg1: i32) -> (i32, i32, i32) {
    %c0_i32 = arith.constant 0 : i32
    %c0_i32_0 = arith.constant 0 : i32
    %c0_i32_1 = arith.constant 0 : i32
    return %arg0, %c0_i32, %c0_i32_0 : i32, i32, i32
  }
  func.func @transform_4(%arg0: i32, %arg1: i32) -> (i32, i32, i32) {
    %c0_i32 = arith.constant 0 : i32
    %c0_i32_0 = arith.constant 0 : i32
    %c0_i32_1 = arith.constant 0 : i32
    return %arg0, %c0_i32, %c0_i32_0 : i32, i32, i32
  }
  func.func @transform_5(%arg0: i32, %arg1: i32) -> (i32, i32, i32) {
    %c0_i32 = arith.constant 0 : i32
    %c0_i32_0 = arith.constant 0 : i32
    %c0_i32_1 = arith.constant 0 : i32
    return %arg0, %c0_i32, %c0_i32_0 : i32, i32, i32
  }
}

module attributes {stable_mosaic.version = 11 : i64} {
  func.func @_conv1x1_bn_gelu_kernel(%arg0: i32, %arg1: i32, %arg2: memref<1x4x64xf32, #tpu.memory_space<vmem>>, %arg3: memref<8x4xf32, #tpu.memory_space<vmem>>, %arg4: memref<8x1xf32, #tpu.memory_space<vmem>>, %arg5: memref<8x1xf32, #tpu.memory_space<vmem>>, %arg6: memref<1x8x64xf32, #tpu.memory_space<vmem>>, %arg7: memref<1x8x1xf32, #tpu.memory_space<vmem>>, %arg8: memref<1x8x1xf32, #tpu.memory_space<vmem>>) attributes {dimension_semantics = [#tpu.dimension_semantics<parallel>, #tpu.dimension_semantics<arbitrary>], iteration_bounds = array<i64: 2, 1>, scalar_prefetch = 0 : i64, scratch_operands = 0 : i64, tpu.core_type = #tpu.core_type<tc>, window_params = [{transform_indices = @transform_0, window_bounds = array<i64: 1, 4, 64>}, {pipeline_mode = #tpu.pipeline_mode<synchronous>, transform_indices = @transform_1, window_bounds = array<i64: 8, 4>}, {pipeline_mode = #tpu.pipeline_mode<synchronous>, transform_indices = @transform_2, window_bounds = array<i64: 8, 1>}, {pipeline_mode = #tpu.pipeline_mode<synchronous>, transform_indices = @transform_3, window_bounds = array<i64: 8, 1>}, {transform_indices = @transform_4, window_bounds = array<i64: 1, 8, 64>}, {transform_indices = @transform_5, window_bounds = array<i64: 1, 8, 1>}, {transform_indices = @transform_6, window_bounds = array<i64: 1, 8, 1>}]} {
    %c0_i32 = arith.constant 0 : i32
    %0 = arith.cmpi eq, %arg1, %c0_i32 : i32
    %1 = arith.extui %0 : i1 to i32
    %c0_i32_0 = arith.constant 0 : i32
    %2 = arith.cmpi ne, %1, %c0_i32_0 : i32
    scf.if %2 {
      %cst_29 = arith.constant 0.000000e+00 : f32
      %68 = vector.broadcast %cst_29 : f32 to vector<8x1xf32>
      %c0_30 = arith.constant 0 : index
      %c0_31 = arith.constant 0 : index
      %c0_32 = arith.constant 0 : index
      %69 = vector.load %arg7[%c0_30, %c0_31, %c0_32] : memref<1x8x1xf32, #tpu.memory_space<vmem>>, vector<1x8x1xf32>
      %70 = vector.shape_cast %69 : vector<1x8x1xf32> to vector<8x1xf32>
      %71 = vector.shape_cast %68 : vector<8x1xf32> to vector<1x8x1xf32>
      tpu.vector_store %arg7[%c0_30, %c0_31, %c0_32], %71 {strides = array<i32>} : memref<1x8x1xf32, #tpu.memory_space<vmem>>, vector<1x8x1xf32>,
      %cst_33 = arith.constant 0.000000e+00 : f32
      %72 = vector.broadcast %cst_33 : f32 to vector<8x1xf32>
      %c0_34 = arith.constant 0 : index
      %c0_35 = arith.constant 0 : index
      %c0_36 = arith.constant 0 : index
      %73 = vector.load %arg8[%c0_34, %c0_35, %c0_36] : memref<1x8x1xf32, #tpu.memory_space<vmem>>, vector<1x8x1xf32>
      %74 = vector.shape_cast %73 : vector<1x8x1xf32> to vector<8x1xf32>
      %75 = vector.shape_cast %72 : vector<8x1xf32> to vector<1x8x1xf32>
      tpu.vector_store %arg8[%c0_34, %c0_35, %c0_36], %75 {strides = array<i32>} : memref<1x8x1xf32, #tpu.memory_space<vmem>>, vector<1x8x1xf32>,
    } else {
    }
    %c0 = arith.constant 0 : index
    %c0_1 = arith.constant 0 : index
    %3 = vector.load %arg3[%c0, %c0_1] : memref<8x4xf32, #tpu.memory_space<vmem>>, vector<8x4xf32>
    %c0_2 = arith.constant 0 : index
    %c0_3 = arith.constant 0 : index
    %c0_4 = arith.constant 0 : index
    %4 = vector.load %arg2[%c0_2, %c0_3, %c0_4] : memref<1x4x64xf32, #tpu.memory_space<vmem>>, vector<1x4x64xf32>
    %5 = vector.shape_cast %4 : vector<1x4x64xf32> to vector<4x64xf32>
    %6 = vector.extract_strided_slice %3 {offsets = [0, 0], sizes = [8, 1], strides = [1, 1]} : vector<8x4xf32> to vector<8x1xf32>
    %7 = vector.extract_strided_slice %5 {offsets = [0, 0], sizes = [1, 64], strides = [1, 1]} : vector<4x64xf32> to vector<1x64xf32>
    %8 = vector.broadcast %6 : vector<8x1xf32> to vector<8x64xf32>
    %9 = vector.broadcast %7 : vector<1x64xf32> to vector<8x64xf32>
    %10 = arith.mulf %8, %9 : vector<8x64xf32>
    %11 = vector.extract_strided_slice %3 {offsets = [0, 1], sizes = [8, 1], strides = [1, 1]} : vector<8x4xf32> to vector<8x1xf32>
    %12 = vector.extract_strided_slice %5 {offsets = [1, 0], sizes = [1, 64], strides = [1, 1]} : vector<4x64xf32> to vector<1x64xf32>
    %13 = vector.broadcast %11 : vector<8x1xf32> to vector<8x64xf32>
    %14 = vector.broadcast %12 : vector<1x64xf32> to vector<8x64xf32>
    %15 = arith.mulf %13, %14 : vector<8x64xf32>
    %16 = arith.addf %10, %15 : vector<8x64xf32>
    %17 = vector.extract_strided_slice %3 {offsets = [0, 2], sizes = [8, 1], strides = [1, 1]} : vector<8x4xf32> to vector<8x1xf32>
    %18 = vector.extract_strided_slice %5 {offsets = [2, 0], sizes = [1, 64], strides = [1, 1]} : vector<4x64xf32> to vector<1x64xf32>
    %19 = vector.broadcast %17 : vector<8x1xf32> to vector<8x64xf32>
    %20 = vector.broadcast %18 : vector<1x64xf32> to vector<8x64xf32>
    %21 = arith.mulf %19, %20 : vector<8x64xf32>
    %22 = arith.addf %16, %21 : vector<8x64xf32>
    %23 = vector.extract_strided_slice %3 {offsets = [0, 3], sizes = [8, 1], strides = [1, 1]} : vector<8x4xf32> to vector<8x1xf32>
    %24 = vector.extract_strided_slice %5 {offsets = [3, 0], sizes = [1, 64], strides = [1, 1]} : vector<4x64xf32> to vector<1x64xf32>
    %25 = vector.broadcast %23 : vector<8x1xf32> to vector<8x64xf32>
    %26 = vector.broadcast %24 : vector<1x64xf32> to vector<8x64xf32>
    %27 = arith.mulf %25, %26 : vector<8x64xf32>
    %28 = arith.addf %22, %27 : vector<8x64xf32>
    %c0_5 = arith.constant 0 : index
    %c0_6 = arith.constant 0 : index
    %29 = vector.load %arg4[%c0_5, %c0_6] : memref<8x1xf32, #tpu.memory_space<vmem>>, vector<8x1xf32>
    %30 = vector.broadcast %29 : vector<8x1xf32> to vector<8x64xf32>
    %31 = arith.mulf %28, %30 : vector<8x64xf32>
    %c0_7 = arith.constant 0 : index
    %c0_8 = arith.constant 0 : index
    %32 = vector.load %arg5[%c0_7, %c0_8] : memref<8x1xf32, #tpu.memory_space<vmem>>, vector<8x1xf32>
    %33 = vector.broadcast %32 : vector<8x1xf32> to vector<8x64xf32>
    %34 = arith.addf %31, %33 : vector<8x64xf32>
    %cst = arith.constant 5.000000e-01 : f32
    %35 = vector.broadcast %cst : f32 to vector<8x64xf32>
    %36 = arith.mulf %35, %34 : vector<8x64xf32>
    %cst_9 = arith.constant 4.471500e-02 : f32
    %37 = vector.broadcast %cst_9 : f32 to vector<8x64xf32>
    %38 = arith.mulf %37, %34 : vector<8x64xf32>
    %39 = arith.mulf %38, %34 : vector<8x64xf32>
    %40 = arith.mulf %39, %34 : vector<8x64xf32>
    %41 = arith.addf %34, %40 : vector<8x64xf32>
    %cst_10 = arith.constant 0.797884583 : f32
    %42 = vector.broadcast %cst_10 : f32 to vector<8x64xf32>
    %43 = arith.mulf %42, %41 : vector<8x64xf32>
    %44 = math.tanh %43 : vector<8x64xf32>
    %cst_11 = arith.constant 1.000000e+00 : f32
    %45 = vector.broadcast %cst_11 : f32 to vector<8x64xf32>
    %46 = arith.addf %45, %44 : vector<8x64xf32>
    %47 = arith.mulf %36, %46 : vector<8x64xf32>
    %c0_12 = arith.constant 0 : index
    %c0_13 = arith.constant 0 : index
    %c0_14 = arith.constant 0 : index
    %48 = vector.load %arg6[%c0_12, %c0_13, %c0_14] : memref<1x8x64xf32, #tpu.memory_space<vmem>>, vector<1x8x64xf32>
    %49 = vector.shape_cast %48 : vector<1x8x64xf32> to vector<8x64xf32>
    %50 = vector.shape_cast %47 : vector<8x64xf32> to vector<1x8x64xf32>
    tpu.vector_store %arg6[%c0_12, %c0_13, %c0_14], %50 {strides = array<i32>} : memref<1x8x64xf32, #tpu.memory_space<vmem>>, vector<1x8x64xf32>,
    %c0_15 = arith.constant 0 : index
    %c0_16 = arith.constant 0 : index
    %c0_17 = arith.constant 0 : index
    %51 = vector.load %arg7[%c0_15, %c0_16, %c0_17] : memref<1x8x1xf32, #tpu.memory_space<vmem>>, vector<1x8x1xf32>
    %52 = vector.shape_cast %51 : vector<1x8x1xf32> to vector<8x1xf32>
    %cst_18 = arith.constant dense<0.000000e+00> : vector<8xf32>
    %53 = vector.multi_reduction <add>, %47, %cst_18 [1] : vector<8x64xf32> to vector<8xf32>
    %54 = vector.shape_cast %53 : vector<8xf32> to vector<8x1xf32>
    %55 = arith.addf %52, %54 : vector<8x1xf32>
    %c0_19 = arith.constant 0 : index
    %c0_20 = arith.constant 0 : index
    %c0_21 = arith.constant 0 : index
    %56 = vector.load %arg7[%c0_19, %c0_20, %c0_21] : memref<1x8x1xf32, #tpu.memory_space<vmem>>, vector<1x8x1xf32>
    %57 = vector.shape_cast %56 : vector<1x8x1xf32> to vector<8x1xf32>
    %58 = vector.shape_cast %55 : vector<8x1xf32> to vector<1x8x1xf32>
    tpu.vector_store %arg7[%c0_19, %c0_20, %c0_21], %58 {strides = array<i32>} : memref<1x8x1xf32, #tpu.memory_space<vmem>>, vector<1x8x1xf32>,
    %c0_22 = arith.constant 0 : index
    %c0_23 = arith.constant 0 : index
    %c0_24 = arith.constant 0 : index
    %59 = vector.load %arg8[%c0_22, %c0_23, %c0_24] : memref<1x8x1xf32, #tpu.memory_space<vmem>>, vector<1x8x1xf32>
    %60 = vector.shape_cast %59 : vector<1x8x1xf32> to vector<8x1xf32>
    %61 = arith.mulf %47, %47 : vector<8x64xf32>
    %cst_25 = arith.constant dense<0.000000e+00> : vector<8xf32>
    %62 = vector.multi_reduction <add>, %61, %cst_25 [1] : vector<8x64xf32> to vector<8xf32>
    %63 = vector.shape_cast %62 : vector<8xf32> to vector<8x1xf32>
    %64 = arith.addf %60, %63 : vector<8x1xf32>
    %c0_26 = arith.constant 0 : index
    %c0_27 = arith.constant 0 : index
    %c0_28 = arith.constant 0 : index
    %65 = vector.load %arg8[%c0_26, %c0_27, %c0_28] : memref<1x8x1xf32, #tpu.memory_space<vmem>>, vector<1x8x1xf32>
    %66 = vector.shape_cast %65 : vector<1x8x1xf32> to vector<8x1xf32>
    %67 = vector.shape_cast %64 : vector<8x1xf32> to vector<1x8x1xf32>
    tpu.vector_store %arg8[%c0_26, %c0_27, %c0_28], %67 {strides = array<i32>} : memref<1x8x1xf32, #tpu.memory_space<vmem>>, vector<1x8x1xf32>,
    return
  }
  func.func @transform_0(%arg0: i32, %arg1: i32) -> (i32, i32, i32) {
    %c0_i32 = arith.constant 0 : i32
    %c0_i32_0 = arith.constant 0 : i32
    return %arg0, %c0_i32, %arg1 : i32, i32, i32
  }
  func.func @transform_1(%arg0: i32, %arg1: i32) -> (i32, i32) {
    %c0_i32 = arith.constant 0 : i32
    %c0_i32_0 = arith.constant 0 : i32
    %c0_i32_1 = arith.constant 0 : i32
    return %c0_i32, %c0_i32_0 : i32, i32
  }
  func.func @transform_2(%arg0: i32, %arg1: i32) -> (i32, i32) {
    %c0_i32 = arith.constant 0 : i32
    %c0_i32_0 = arith.constant 0 : i32
    %c0_i32_1 = arith.constant 0 : i32
    return %c0_i32, %c0_i32_0 : i32, i32
  }
  func.func @transform_3(%arg0: i32, %arg1: i32) -> (i32, i32) {
    %c0_i32 = arith.constant 0 : i32
    %c0_i32_0 = arith.constant 0 : i32
    %c0_i32_1 = arith.constant 0 : i32
    return %c0_i32, %c0_i32_0 : i32, i32
  }
  func.func @transform_4(%arg0: i32, %arg1: i32) -> (i32, i32, i32) {
    %c0_i32 = arith.constant 0 : i32
    %c0_i32_0 = arith.constant 0 : i32
    return %arg0, %c0_i32, %arg1 : i32, i32, i32
  }
  func.func @transform_5(%arg0: i32, %arg1: i32) -> (i32, i32, i32) {
    %c0_i32 = arith.constant 0 : i32
    %c0_i32_0 = arith.constant 0 : i32
    %c0_i32_1 = arith.constant 0 : i32
    return %arg0, %c0_i32, %c0_i32_0 : i32, i32, i32
  }
  func.func @transform_6(%arg0: i32, %arg1: i32) -> (i32, i32, i32) {
    %c0_i32 = arith.constant 0 : i32
    %c0_i32_0 = arith.constant 0 : i32
    %c0_i32_1 = arith.constant 0 : i32
    return %arg0, %c0_i32, %c0_i32_0 : i32, i32, i32
  }
}

module attributes {stable_mosaic.version = 11 : i64} {
  func.func @_conv1x1_stats_kernel(%arg0: i32, %arg1: i32, %arg2: memref<1x4x256xf32, #tpu.memory_space<vmem>>, %arg3: memref<8x4xf32, #tpu.memory_space<vmem>>, %arg4: memref<1x8x1xf32, #tpu.memory_space<vmem>>, %arg5: memref<1x8x1xf32, #tpu.memory_space<vmem>>, %arg6: memref<1x4x1xf32, #tpu.memory_space<vmem>>, %arg7: memref<1x4x1xf32, #tpu.memory_space<vmem>>) attributes {dimension_semantics = [#tpu.dimension_semantics<parallel>, #tpu.dimension_semantics<arbitrary>], iteration_bounds = array<i64: 2, 1>, scalar_prefetch = 0 : i64, scratch_operands = 0 : i64, tpu.core_type = #tpu.core_type<tc>, window_params = [{transform_indices = @transform_0, window_bounds = array<i64: 1, 4, 256>}, {pipeline_mode = #tpu.pipeline_mode<synchronous>, transform_indices = @transform_1, window_bounds = array<i64: 8, 4>}, {transform_indices = @transform_2, window_bounds = array<i64: 1, 8, 1>}, {transform_indices = @transform_3, window_bounds = array<i64: 1, 8, 1>}, {transform_indices = @transform_4, window_bounds = array<i64: 1, 4, 1>}, {transform_indices = @transform_5, window_bounds = array<i64: 1, 4, 1>}]} {
    %c0_i32 = arith.constant 0 : i32
    %0 = arith.cmpi eq, %arg1, %c0_i32 : i32
    %1 = arith.extui %0 : i1 to i32
    %c0_i32_0 = arith.constant 0 : i32
    %2 = arith.cmpi ne, %1, %c0_i32_0 : i32
    scf.if %2 {
      %cst_32 = arith.constant 0.000000e+00 : f32
      %63 = vector.broadcast %cst_32 : f32 to vector<8x1xf32>
      %c0_33 = arith.constant 0 : index
      %c0_34 = arith.constant 0 : index
      %c0_35 = arith.constant 0 : index
      %64 = vector.load %arg4[%c0_33, %c0_34, %c0_35] : memref<1x8x1xf32, #tpu.memory_space<vmem>>, vector<1x8x1xf32>
      %65 = vector.shape_cast %64 : vector<1x8x1xf32> to vector<8x1xf32>
      %66 = vector.shape_cast %63 : vector<8x1xf32> to vector<1x8x1xf32>
      tpu.vector_store %arg4[%c0_33, %c0_34, %c0_35], %66 {strides = array<i32>} : memref<1x8x1xf32, #tpu.memory_space<vmem>>, vector<1x8x1xf32>,
      %cst_36 = arith.constant 0.000000e+00 : f32
      %67 = vector.broadcast %cst_36 : f32 to vector<8x1xf32>
      %c0_37 = arith.constant 0 : index
      %c0_38 = arith.constant 0 : index
      %c0_39 = arith.constant 0 : index
      %68 = vector.load %arg5[%c0_37, %c0_38, %c0_39] : memref<1x8x1xf32, #tpu.memory_space<vmem>>, vector<1x8x1xf32>
      %69 = vector.shape_cast %68 : vector<1x8x1xf32> to vector<8x1xf32>
      %70 = vector.shape_cast %67 : vector<8x1xf32> to vector<1x8x1xf32>
      tpu.vector_store %arg5[%c0_37, %c0_38, %c0_39], %70 {strides = array<i32>} : memref<1x8x1xf32, #tpu.memory_space<vmem>>, vector<1x8x1xf32>,
      %cst_40 = arith.constant 0.000000e+00 : f32
      %71 = vector.broadcast %cst_40 : f32 to vector<4x1xf32>
      %c0_41 = arith.constant 0 : index
      %c0_42 = arith.constant 0 : index
      %c0_43 = arith.constant 0 : index
      %72 = vector.load %arg6[%c0_41, %c0_42, %c0_43] : memref<1x4x1xf32, #tpu.memory_space<vmem>>, vector<1x4x1xf32>
      %73 = vector.shape_cast %72 : vector<1x4x1xf32> to vector<4x1xf32>
      %74 = vector.shape_cast %71 : vector<4x1xf32> to vector<1x4x1xf32>
      tpu.vector_store %arg6[%c0_41, %c0_42, %c0_43], %74 {strides = array<i32>} : memref<1x4x1xf32, #tpu.memory_space<vmem>>, vector<1x4x1xf32>,
      %cst_44 = arith.constant 0.000000e+00 : f32
      %75 = vector.broadcast %cst_44 : f32 to vector<4x1xf32>
      %c0_45 = arith.constant 0 : index
      %c0_46 = arith.constant 0 : index
      %c0_47 = arith.constant 0 : index
      %76 = vector.load %arg7[%c0_45, %c0_46, %c0_47] : memref<1x4x1xf32, #tpu.memory_space<vmem>>, vector<1x4x1xf32>
      %77 = vector.shape_cast %76 : vector<1x4x1xf32> to vector<4x1xf32>
      %78 = vector.shape_cast %75 : vector<4x1xf32> to vector<1x4x1xf32>
      tpu.vector_store %arg7[%c0_45, %c0_46, %c0_47], %78 {strides = array<i32>} : memref<1x4x1xf32, #tpu.memory_space<vmem>>, vector<1x4x1xf32>,
    } else {
    }
    %c0 = arith.constant 0 : index
    %c0_1 = arith.constant 0 : index
    %c0_2 = arith.constant 0 : index
    %3 = vector.load %arg2[%c0, %c0_1, %c0_2] : memref<1x4x256xf32, #tpu.memory_space<vmem>>, vector<1x4x256xf32>
    %4 = vector.shape_cast %3 : vector<1x4x256xf32> to vector<4x256xf32>
    %c0_3 = arith.constant 0 : index
    %c0_4 = arith.constant 0 : index
    %5 = vector.load %arg3[%c0_3, %c0_4] : memref<8x4xf32, #tpu.memory_space<vmem>>, vector<8x4xf32>
    %6 = vector.extract_strided_slice %5 {offsets = [0, 0], sizes = [8, 1], strides = [1, 1]} : vector<8x4xf32> to vector<8x1xf32>
    %7 = vector.extract_strided_slice %4 {offsets = [0, 0], sizes = [1, 256], strides = [1, 1]} : vector<4x256xf32> to vector<1x256xf32>
    %8 = vector.broadcast %6 : vector<8x1xf32> to vector<8x256xf32>
    %9 = vector.broadcast %7 : vector<1x256xf32> to vector<8x256xf32>
    %10 = arith.mulf %8, %9 : vector<8x256xf32>
    %11 = vector.extract_strided_slice %5 {offsets = [0, 1], sizes = [8, 1], strides = [1, 1]} : vector<8x4xf32> to vector<8x1xf32>
    %12 = vector.extract_strided_slice %4 {offsets = [1, 0], sizes = [1, 256], strides = [1, 1]} : vector<4x256xf32> to vector<1x256xf32>
    %13 = vector.broadcast %11 : vector<8x1xf32> to vector<8x256xf32>
    %14 = vector.broadcast %12 : vector<1x256xf32> to vector<8x256xf32>
    %15 = arith.mulf %13, %14 : vector<8x256xf32>
    %16 = arith.addf %10, %15 : vector<8x256xf32>
    %17 = vector.extract_strided_slice %5 {offsets = [0, 2], sizes = [8, 1], strides = [1, 1]} : vector<8x4xf32> to vector<8x1xf32>
    %18 = vector.extract_strided_slice %4 {offsets = [2, 0], sizes = [1, 256], strides = [1, 1]} : vector<4x256xf32> to vector<1x256xf32>
    %19 = vector.broadcast %17 : vector<8x1xf32> to vector<8x256xf32>
    %20 = vector.broadcast %18 : vector<1x256xf32> to vector<8x256xf32>
    %21 = arith.mulf %19, %20 : vector<8x256xf32>
    %22 = arith.addf %16, %21 : vector<8x256xf32>
    %23 = vector.extract_strided_slice %5 {offsets = [0, 3], sizes = [8, 1], strides = [1, 1]} : vector<8x4xf32> to vector<8x1xf32>
    %24 = vector.extract_strided_slice %4 {offsets = [3, 0], sizes = [1, 256], strides = [1, 1]} : vector<4x256xf32> to vector<1x256xf32>
    %25 = vector.broadcast %23 : vector<8x1xf32> to vector<8x256xf32>
    %26 = vector.broadcast %24 : vector<1x256xf32> to vector<8x256xf32>
    %27 = arith.mulf %25, %26 : vector<8x256xf32>
    %28 = arith.addf %22, %27 : vector<8x256xf32>
    %c0_5 = arith.constant 0 : index
    %c0_6 = arith.constant 0 : index
    %c0_7 = arith.constant 0 : index
    %29 = vector.load %arg4[%c0_5, %c0_6, %c0_7] : memref<1x8x1xf32, #tpu.memory_space<vmem>>, vector<1x8x1xf32>
    %30 = vector.shape_cast %29 : vector<1x8x1xf32> to vector<8x1xf32>
    %cst = arith.constant dense<0.000000e+00> : vector<8xf32>
    %31 = vector.multi_reduction <add>, %28, %cst [1] : vector<8x256xf32> to vector<8xf32>
    %32 = vector.shape_cast %31 : vector<8xf32> to vector<8x1xf32>
    %33 = arith.addf %30, %32 : vector<8x1xf32>
    %c0_8 = arith.constant 0 : index
    %c0_9 = arith.constant 0 : index
    %c0_10 = arith.constant 0 : index
    %34 = vector.load %arg4[%c0_8, %c0_9, %c0_10] : memref<1x8x1xf32, #tpu.memory_space<vmem>>, vector<1x8x1xf32>
    %35 = vector.shape_cast %34 : vector<1x8x1xf32> to vector<8x1xf32>
    %36 = vector.shape_cast %33 : vector<8x1xf32> to vector<1x8x1xf32>
    tpu.vector_store %arg4[%c0_8, %c0_9, %c0_10], %36 {strides = array<i32>} : memref<1x8x1xf32, #tpu.memory_space<vmem>>, vector<1x8x1xf32>,
    %c0_11 = arith.constant 0 : index
    %c0_12 = arith.constant 0 : index
    %c0_13 = arith.constant 0 : index
    %37 = vector.load %arg5[%c0_11, %c0_12, %c0_13] : memref<1x8x1xf32, #tpu.memory_space<vmem>>, vector<1x8x1xf32>
    %38 = vector.shape_cast %37 : vector<1x8x1xf32> to vector<8x1xf32>
    %39 = arith.mulf %28, %28 : vector<8x256xf32>
    %cst_14 = arith.constant dense<0.000000e+00> : vector<8xf32>
    %40 = vector.multi_reduction <add>, %39, %cst_14 [1] : vector<8x256xf32> to vector<8xf32>
    %41 = vector.shape_cast %40 : vector<8xf32> to vector<8x1xf32>
    %42 = arith.addf %38, %41 : vector<8x1xf32>
    %c0_15 = arith.constant 0 : index
    %c0_16 = arith.constant 0 : index
    %c0_17 = arith.constant 0 : index
    %43 = vector.load %arg5[%c0_15, %c0_16, %c0_17] : memref<1x8x1xf32, #tpu.memory_space<vmem>>, vector<1x8x1xf32>
    %44 = vector.shape_cast %43 : vector<1x8x1xf32> to vector<8x1xf32>
    %45 = vector.shape_cast %42 : vector<8x1xf32> to vector<1x8x1xf32>
    tpu.vector_store %arg5[%c0_15, %c0_16, %c0_17], %45 {strides = array<i32>} : memref<1x8x1xf32, #tpu.memory_space<vmem>>, vector<1x8x1xf32>,
    %c0_18 = arith.constant 0 : index
    %c0_19 = arith.constant 0 : index
    %c0_20 = arith.constant 0 : index
    %46 = vector.load %arg6[%c0_18, %c0_19, %c0_20] : memref<1x4x1xf32, #tpu.memory_space<vmem>>, vector<1x4x1xf32>
    %47 = vector.shape_cast %46 : vector<1x4x1xf32> to vector<4x1xf32>
    %cst_21 = arith.constant dense<0.000000e+00> : vector<4xf32>
    %48 = vector.multi_reduction <add>, %4, %cst_21 [1] : vector<4x256xf32> to vector<4xf32>
    %49 = vector.shape_cast %48 : vector<4xf32> to vector<4x1xf32>
    %50 = arith.addf %47, %49 : vector<4x1xf32>
    %c0_22 = arith.constant 0 : index
    %c0_23 = arith.constant 0 : index
    %c0_24 = arith.constant 0 : index
    %51 = vector.load %arg6[%c0_22, %c0_23, %c0_24] : memref<1x4x1xf32, #tpu.memory_space<vmem>>, vector<1x4x1xf32>
    %52 = vector.shape_cast %51 : vector<1x4x1xf32> to vector<4x1xf32>
    %53 = vector.shape_cast %50 : vector<4x1xf32> to vector<1x4x1xf32>
    tpu.vector_store %arg6[%c0_22, %c0_23, %c0_24], %53 {strides = array<i32>} : memref<1x4x1xf32, #tpu.memory_space<vmem>>, vector<1x4x1xf32>,
    %c0_25 = arith.constant 0 : index
    %c0_26 = arith.constant 0 : index
    %c0_27 = arith.constant 0 : index
    %54 = vector.load %arg7[%c0_25, %c0_26, %c0_27] : memref<1x4x1xf32, #tpu.memory_space<vmem>>, vector<1x4x1xf32>
    %55 = vector.shape_cast %54 : vector<1x4x1xf32> to vector<4x1xf32>
    %56 = arith.mulf %4, %4 : vector<4x256xf32>
    %cst_28 = arith.constant dense<0.000000e+00> : vector<4xf32>
    %57 = vector.multi_reduction <add>, %56, %cst_28 [1] : vector<4x256xf32> to vector<4xf32>
    %58 = vector.shape_cast %57 : vector<4xf32> to vector<4x1xf32>
    %59 = arith.addf %55, %58 : vector<4x1xf32>
    %c0_29 = arith.constant 0 : index
    %c0_30 = arith.constant 0 : index
    %c0_31 = arith.constant 0 : index
    %60 = vector.load %arg7[%c0_29, %c0_30, %c0_31] : memref<1x4x1xf32, #tpu.memory_space<vmem>>, vector<1x4x1xf32>
    %61 = vector.shape_cast %60 : vector<1x4x1xf32> to vector<4x1xf32>
    %62 = vector.shape_cast %59 : vector<4x1xf32> to vector<1x4x1xf32>
    tpu.vector_store %arg7[%c0_29, %c0_30, %c0_31], %62 {strides = array<i32>} : memref<1x4x1xf32, #tpu.memory_space<vmem>>, vector<1x4x1xf32>,
    return
  }
  func.func @transform_0(%arg0: i32, %arg1: i32) -> (i32, i32, i32) {
    %c0_i32 = arith.constant 0 : i32
    %c0_i32_0 = arith.constant 0 : i32
    return %arg0, %c0_i32, %arg1 : i32, i32, i32
  }
  func.func @transform_1(%arg0: i32, %arg1: i32) -> (i32, i32) {
    %c0_i32 = arith.constant 0 : i32
    %c0_i32_0 = arith.constant 0 : i32
    %c0_i32_1 = arith.constant 0 : i32
    return %c0_i32, %c0_i32_0 : i32, i32
  }
  func.func @transform_2(%arg0: i32, %arg1: i32) -> (i32, i32, i32) {
    %c0_i32 = arith.constant 0 : i32
    %c0_i32_0 = arith.constant 0 : i32
    %c0_i32_1 = arith.constant 0 : i32
    return %arg0, %c0_i32, %c0_i32_0 : i32, i32, i32
  }
  func.func @transform_3(%arg0: i32, %arg1: i32) -> (i32, i32, i32) {
    %c0_i32 = arith.constant 0 : i32
    %c0_i32_0 = arith.constant 0 : i32
    %c0_i32_1 = arith.constant 0 : i32
    return %arg0, %c0_i32, %c0_i32_0 : i32, i32, i32
  }
  func.func @transform_4(%arg0: i32, %arg1: i32) -> (i32, i32, i32) {
    %c0_i32 = arith.constant 0 : i32
    %c0_i32_0 = arith.constant 0 : i32
    %c0_i32_1 = arith.constant 0 : i32
    return %arg0, %c0_i32, %c0_i32_0 : i32, i32, i32
  }
  func.func @transform_5(%arg0: i32, %arg1: i32) -> (i32, i32, i32) {
    %c0_i32 = arith.constant 0 : i32
    %c0_i32_0 = arith.constant 0 : i32
    %c0_i32_1 = arith.constant 0 : i32
    return %arg0, %c0_i32, %c0_i32_0 : i32, i32, i32
  }
}

module attributes {stable_mosaic.version = 11 : i64} {
  func.func @_conv1x1_bn_gelu_kernel(%arg0: i32, %arg1: i32, %arg2: memref<1x4x256xf32, #tpu.memory_space<vmem>>, %arg3: memref<8x4xf32, #tpu.memory_space<vmem>>, %arg4: memref<8x1xf32, #tpu.memory_space<vmem>>, %arg5: memref<8x1xf32, #tpu.memory_space<vmem>>, %arg6: memref<1x8x256xf32, #tpu.memory_space<vmem>>, %arg7: memref<1x8x1xf32, #tpu.memory_space<vmem>>, %arg8: memref<1x8x1xf32, #tpu.memory_space<vmem>>) attributes {dimension_semantics = [#tpu.dimension_semantics<parallel>, #tpu.dimension_semantics<arbitrary>], iteration_bounds = array<i64: 2, 1>, scalar_prefetch = 0 : i64, scratch_operands = 0 : i64, tpu.core_type = #tpu.core_type<tc>, window_params = [{transform_indices = @transform_0, window_bounds = array<i64: 1, 4, 256>}, {pipeline_mode = #tpu.pipeline_mode<synchronous>, transform_indices = @transform_1, window_bounds = array<i64: 8, 4>}, {pipeline_mode = #tpu.pipeline_mode<synchronous>, transform_indices = @transform_2, window_bounds = array<i64: 8, 1>}, {pipeline_mode = #tpu.pipeline_mode<synchronous>, transform_indices = @transform_3, window_bounds = array<i64: 8, 1>}, {transform_indices = @transform_4, window_bounds = array<i64: 1, 8, 256>}, {transform_indices = @transform_5, window_bounds = array<i64: 1, 8, 1>}, {transform_indices = @transform_6, window_bounds = array<i64: 1, 8, 1>}]} {
    %c0_i32 = arith.constant 0 : i32
    %0 = arith.cmpi eq, %arg1, %c0_i32 : i32
    %1 = arith.extui %0 : i1 to i32
    %c0_i32_0 = arith.constant 0 : i32
    %2 = arith.cmpi ne, %1, %c0_i32_0 : i32
    scf.if %2 {
      %cst_29 = arith.constant 0.000000e+00 : f32
      %68 = vector.broadcast %cst_29 : f32 to vector<8x1xf32>
      %c0_30 = arith.constant 0 : index
      %c0_31 = arith.constant 0 : index
      %c0_32 = arith.constant 0 : index
      %69 = vector.load %arg7[%c0_30, %c0_31, %c0_32] : memref<1x8x1xf32, #tpu.memory_space<vmem>>, vector<1x8x1xf32>
      %70 = vector.shape_cast %69 : vector<1x8x1xf32> to vector<8x1xf32>
      %71 = vector.shape_cast %68 : vector<8x1xf32> to vector<1x8x1xf32>
      tpu.vector_store %arg7[%c0_30, %c0_31, %c0_32], %71 {strides = array<i32>} : memref<1x8x1xf32, #tpu.memory_space<vmem>>, vector<1x8x1xf32>,
      %cst_33 = arith.constant 0.000000e+00 : f32
      %72 = vector.broadcast %cst_33 : f32 to vector<8x1xf32>
      %c0_34 = arith.constant 0 : index
      %c0_35 = arith.constant 0 : index
      %c0_36 = arith.constant 0 : index
      %73 = vector.load %arg8[%c0_34, %c0_35, %c0_36] : memref<1x8x1xf32, #tpu.memory_space<vmem>>, vector<1x8x1xf32>
      %74 = vector.shape_cast %73 : vector<1x8x1xf32> to vector<8x1xf32>
      %75 = vector.shape_cast %72 : vector<8x1xf32> to vector<1x8x1xf32>
      tpu.vector_store %arg8[%c0_34, %c0_35, %c0_36], %75 {strides = array<i32>} : memref<1x8x1xf32, #tpu.memory_space<vmem>>, vector<1x8x1xf32>,
    } else {
    }
    %c0 = arith.constant 0 : index
    %c0_1 = arith.constant 0 : index
    %3 = vector.load %arg3[%c0, %c0_1] : memref<8x4xf32, #tpu.memory_space<vmem>>, vector<8x4xf32>
    %c0_2 = arith.constant 0 : index
    %c0_3 = arith.constant 0 : index
    %c0_4 = arith.constant 0 : index
    %4 = vector.load %arg2[%c0_2, %c0_3, %c0_4] : memref<1x4x256xf32, #tpu.memory_space<vmem>>, vector<1x4x256xf32>
    %5 = vector.shape_cast %4 : vector<1x4x256xf32> to vector<4x256xf32>
    %6 = vector.extract_strided_slice %3 {offsets = [0, 0], sizes = [8, 1], strides = [1, 1]} : vector<8x4xf32> to vector<8x1xf32>
    %7 = vector.extract_strided_slice %5 {offsets = [0, 0], sizes = [1, 256], strides = [1, 1]} : vector<4x256xf32> to vector<1x256xf32>
    %8 = vector.broadcast %6 : vector<8x1xf32> to vector<8x256xf32>
    %9 = vector.broadcast %7 : vector<1x256xf32> to vector<8x256xf32>
    %10 = arith.mulf %8, %9 : vector<8x256xf32>
    %11 = vector.extract_strided_slice %3 {offsets = [0, 1], sizes = [8, 1], strides = [1, 1]} : vector<8x4xf32> to vector<8x1xf32>
    %12 = vector.extract_strided_slice %5 {offsets = [1, 0], sizes = [1, 256], strides = [1, 1]} : vector<4x256xf32> to vector<1x256xf32>
    %13 = vector.broadcast %11 : vector<8x1xf32> to vector<8x256xf32>
    %14 = vector.broadcast %12 : vector<1x256xf32> to vector<8x256xf32>
    %15 = arith.mulf %13, %14 : vector<8x256xf32>
    %16 = arith.addf %10, %15 : vector<8x256xf32>
    %17 = vector.extract_strided_slice %3 {offsets = [0, 2], sizes = [8, 1], strides = [1, 1]} : vector<8x4xf32> to vector<8x1xf32>
    %18 = vector.extract_strided_slice %5 {offsets = [2, 0], sizes = [1, 256], strides = [1, 1]} : vector<4x256xf32> to vector<1x256xf32>
    %19 = vector.broadcast %17 : vector<8x1xf32> to vector<8x256xf32>
    %20 = vector.broadcast %18 : vector<1x256xf32> to vector<8x256xf32>
    %21 = arith.mulf %19, %20 : vector<8x256xf32>
    %22 = arith.addf %16, %21 : vector<8x256xf32>
    %23 = vector.extract_strided_slice %3 {offsets = [0, 3], sizes = [8, 1], strides = [1, 1]} : vector<8x4xf32> to vector<8x1xf32>
    %24 = vector.extract_strided_slice %5 {offsets = [3, 0], sizes = [1, 256], strides = [1, 1]} : vector<4x256xf32> to vector<1x256xf32>
    %25 = vector.broadcast %23 : vector<8x1xf32> to vector<8x256xf32>
    %26 = vector.broadcast %24 : vector<1x256xf32> to vector<8x256xf32>
    %27 = arith.mulf %25, %26 : vector<8x256xf32>
    %28 = arith.addf %22, %27 : vector<8x256xf32>
    %c0_5 = arith.constant 0 : index
    %c0_6 = arith.constant 0 : index
    %29 = vector.load %arg4[%c0_5, %c0_6] : memref<8x1xf32, #tpu.memory_space<vmem>>, vector<8x1xf32>
    %30 = vector.broadcast %29 : vector<8x1xf32> to vector<8x256xf32>
    %31 = arith.mulf %28, %30 : vector<8x256xf32>
    %c0_7 = arith.constant 0 : index
    %c0_8 = arith.constant 0 : index
    %32 = vector.load %arg5[%c0_7, %c0_8] : memref<8x1xf32, #tpu.memory_space<vmem>>, vector<8x1xf32>
    %33 = vector.broadcast %32 : vector<8x1xf32> to vector<8x256xf32>
    %34 = arith.addf %31, %33 : vector<8x256xf32>
    %cst = arith.constant 5.000000e-01 : f32
    %35 = vector.broadcast %cst : f32 to vector<8x256xf32>
    %36 = arith.mulf %35, %34 : vector<8x256xf32>
    %cst_9 = arith.constant 4.471500e-02 : f32
    %37 = vector.broadcast %cst_9 : f32 to vector<8x256xf32>
    %38 = arith.mulf %37, %34 : vector<8x256xf32>
    %39 = arith.mulf %38, %34 : vector<8x256xf32>
    %40 = arith.mulf %39, %34 : vector<8x256xf32>
    %41 = arith.addf %34, %40 : vector<8x256xf32>
    %cst_10 = arith.constant 0.797884583 : f32
    %42 = vector.broadcast %cst_10 : f32 to vector<8x256xf32>
    %43 = arith.mulf %42, %41 : vector<8x256xf32>
    %44 = math.tanh %43 : vector<8x256xf32>
    %cst_11 = arith.constant 1.000000e+00 : f32
    %45 = vector.broadcast %cst_11 : f32 to vector<8x256xf32>
    %46 = arith.addf %45, %44 : vector<8x256xf32>
    %47 = arith.mulf %36, %46 : vector<8x256xf32>
    %c0_12 = arith.constant 0 : index
    %c0_13 = arith.constant 0 : index
    %c0_14 = arith.constant 0 : index
    %48 = vector.load %arg6[%c0_12, %c0_13, %c0_14] : memref<1x8x256xf32, #tpu.memory_space<vmem>>, vector<1x8x256xf32>
    %49 = vector.shape_cast %48 : vector<1x8x256xf32> to vector<8x256xf32>
    %50 = vector.shape_cast %47 : vector<8x256xf32> to vector<1x8x256xf32>
    tpu.vector_store %arg6[%c0_12, %c0_13, %c0_14], %50 {strides = array<i32>} : memref<1x8x256xf32, #tpu.memory_space<vmem>>, vector<1x8x256xf32>,
    %c0_15 = arith.constant 0 : index
    %c0_16 = arith.constant 0 : index
    %c0_17 = arith.constant 0 : index
    %51 = vector.load %arg7[%c0_15, %c0_16, %c0_17] : memref<1x8x1xf32, #tpu.memory_space<vmem>>, vector<1x8x1xf32>
    %52 = vector.shape_cast %51 : vector<1x8x1xf32> to vector<8x1xf32>
    %cst_18 = arith.constant dense<0.000000e+00> : vector<8xf32>
    %53 = vector.multi_reduction <add>, %47, %cst_18 [1] : vector<8x256xf32> to vector<8xf32>
    %54 = vector.shape_cast %53 : vector<8xf32> to vector<8x1xf32>
    %55 = arith.addf %52, %54 : vector<8x1xf32>
    %c0_19 = arith.constant 0 : index
    %c0_20 = arith.constant 0 : index
    %c0_21 = arith.constant 0 : index
    %56 = vector.load %arg7[%c0_19, %c0_20, %c0_21] : memref<1x8x1xf32, #tpu.memory_space<vmem>>, vector<1x8x1xf32>
    %57 = vector.shape_cast %56 : vector<1x8x1xf32> to vector<8x1xf32>
    %58 = vector.shape_cast %55 : vector<8x1xf32> to vector<1x8x1xf32>
    tpu.vector_store %arg7[%c0_19, %c0_20, %c0_21], %58 {strides = array<i32>} : memref<1x8x1xf32, #tpu.memory_space<vmem>>, vector<1x8x1xf32>,
    %c0_22 = arith.constant 0 : index
    %c0_23 = arith.constant 0 : index
    %c0_24 = arith.constant 0 : index
    %59 = vector.load %arg8[%c0_22, %c0_23, %c0_24] : memref<1x8x1xf32, #tpu.memory_space<vmem>>, vector<1x8x1xf32>
    %60 = vector.shape_cast %59 : vector<1x8x1xf32> to vector<8x1xf32>
    %61 = arith.mulf %47, %47 : vector<8x256xf32>
    %cst_25 = arith.constant dense<0.000000e+00> : vector<8xf32>
    %62 = vector.multi_reduction <add>, %61, %cst_25 [1] : vector<8x256xf32> to vector<8xf32>
    %63 = vector.shape_cast %62 : vector<8xf32> to vector<8x1xf32>
    %64 = arith.addf %60, %63 : vector<8x1xf32>
    %c0_26 = arith.constant 0 : index
    %c0_27 = arith.constant 0 : index
    %c0_28 = arith.constant 0 : index
    %65 = vector.load %arg8[%c0_26, %c0_27, %c0_28] : memref<1x8x1xf32, #tpu.memory_space<vmem>>, vector<1x8x1xf32>
    %66 = vector.shape_cast %65 : vector<1x8x1xf32> to vector<8x1xf32>
    %67 = vector.shape_cast %64 : vector<8x1xf32> to vector<1x8x1xf32>
    tpu.vector_store %arg8[%c0_26, %c0_27, %c0_28], %67 {strides = array<i32>} : memref<1x8x1xf32, #tpu.memory_space<vmem>>, vector<1x8x1xf32>,
    return
  }
  func.func @transform_0(%arg0: i32, %arg1: i32) -> (i32, i32, i32) {
    %c0_i32 = arith.constant 0 : i32
    %c0_i32_0 = arith.constant 0 : i32
    return %arg0, %c0_i32, %arg1 : i32, i32, i32
  }
  func.func @transform_1(%arg0: i32, %arg1: i32) -> (i32, i32) {
    %c0_i32 = arith.constant 0 : i32
    %c0_i32_0 = arith.constant 0 : i32
    %c0_i32_1 = arith.constant 0 : i32
    return %c0_i32, %c0_i32_0 : i32, i32
  }
  func.func @transform_2(%arg0: i32, %arg1: i32) -> (i32, i32) {
    %c0_i32 = arith.constant 0 : i32
    %c0_i32_0 = arith.constant 0 : i32
    %c0_i32_1 = arith.constant 0 : i32
    return %c0_i32, %c0_i32_0 : i32, i32
  }
  func.func @transform_3(%arg0: i32, %arg1: i32) -> (i32, i32) {
    %c0_i32 = arith.constant 0 : i32
    %c0_i32_0 = arith.constant 0 : i32
    %c0_i32_1 = arith.constant 0 : i32
    return %c0_i32, %c0_i32_0 : i32, i32
  }
  func.func @transform_4(%arg0: i32, %arg1: i32) -> (i32, i32, i32) {
    %c0_i32 = arith.constant 0 : i32
    %c0_i32_0 = arith.constant 0 : i32
    return %arg0, %c0_i32, %arg1 : i32, i32, i32
  }
  func.func @transform_5(%arg0: i32, %arg1: i32) -> (i32, i32, i32) {
    %c0_i32 = arith.constant 0 : i32
    %c0_i32_0 = arith.constant 0 : i32
    %c0_i32_1 = arith.constant 0 : i32
    return %arg0, %c0_i32, %c0_i32_0 : i32, i32, i32
  }
  func.func @transform_6(%arg0: i32, %arg1: i32) -> (i32, i32, i32) {
    %c0_i32 = arith.constant 0 : i32
    %c0_i32_0 = arith.constant 0 : i32
    %c0_i32_1 = arith.constant 0 : i32
    return %arg0, %c0_i32, %c0_i32_0 : i32, i32, i32
  }
}

module attributes {stable_mosaic.version = 11 : i64} {
  func.func @_conv3x3_stats_kernel(%arg0: i32, %arg1: memref<2x256xf32, #tpu.memory_space<vmem>>, %arg2: memref<1x8x256xf32, #tpu.memory_space<vmem>>, %arg3: memref<1x8x256xf32, #tpu.memory_space<vmem>>, %arg4: memref<8x72xf32, #tpu.memory_space<vmem>>, %arg5: memref<1x8x1xf32, #tpu.memory_space<vmem>>, %arg6: memref<1x8x1xf32, #tpu.memory_space<vmem>>, %arg7: memref<8x512xf32, #tpu.memory_space<vmem>>) attributes {dimension_semantics = [#tpu.dimension_semantics<parallel>], iteration_bounds = array<i64: 2>, scalar_prefetch = 0 : i64, scratch_operands = 1 : i64, tpu.core_type = #tpu.core_type<tc>, window_params = [{pipeline_mode = #tpu.pipeline_mode<synchronous>, transform_indices = @transform_0, window_bounds = array<i64: 2, 256>}, {transform_indices = @transform_1, window_bounds = array<i64: 1, 8, 256>}, {transform_indices = @transform_2, window_bounds = array<i64: 1, 8, 256>}, {pipeline_mode = #tpu.pipeline_mode<synchronous>, transform_indices = @transform_3, window_bounds = array<i64: 8, 72>}, {transform_indices = @transform_4, window_bounds = array<i64: 1, 8, 1>}, {transform_indices = @transform_5, window_bounds = array<i64: 1, 8, 1>}]} {
    %c0 = arith.constant 0 : index
    %c0_0 = arith.constant 0 : index
    %c0_1 = arith.constant 0 : index
    %0 = vector.load %arg2[%c0, %c0_0, %c0_1] : memref<1x8x256xf32, #tpu.memory_space<vmem>>, vector<1x8x256xf32>
    %1 = vector.shape_cast %0 : vector<1x8x256xf32> to vector<8x256xf32>
    %c0_2 = arith.constant 0 : index
    %c0_3 = arith.constant 0 : index
    %c0_4 = arith.constant 0 : index
    %2 = vector.load %arg3[%c0_2, %c0_3, %c0_4] : memref<1x8x256xf32, #tpu.memory_space<vmem>>, vector<1x8x256xf32>
    %3 = vector.shape_cast %2 : vector<1x8x256xf32> to vector<8x256xf32>
    %4 = arith.addf %1, %3 : vector<8x256xf32>
    %cst = arith.constant 0.000000e+00 : f32
    %5 = vector.broadcast %cst : f32 to vector<8x512xf32>
    %c0_5 = arith.constant 0 : index
    %c0_6 = arith.constant 0 : index
    %6 = vector.load %arg7[%c0_5, %c0_6] : memref<8x512xf32, #tpu.memory_space<vmem>>, vector<8x512xf32>
    tpu.vector_store %arg7[%c0_5, %c0_6], %5 {strides = array<i32>} : memref<8x512xf32, #tpu.memory_space<vmem>>, vector<8x512xf32>,
    %c0_7 = arith.constant 0 : index
    %c128 = arith.constant 128 : index
    %7 = vector.load %arg7[%c0_7, %c128] : memref<8x512xf32, #tpu.memory_space<vmem>>, vector<8x256xf32>
    tpu.vector_store %arg7[%c0_7, %c128], %4 {strides = array<i32>} : memref<8x512xf32, #tpu.memory_space<vmem>>, vector<8x256xf32>,
    %c0_8 = arith.constant 0 : index
    %c0_9 = arith.constant 0 : index
    %8 = vector.load %arg1[%c0_8, %c0_9] : memref<2x256xf32, #tpu.memory_space<vmem>>, vector<1x256xf32>
    %c1 = arith.constant 1 : index
    %c0_10 = arith.constant 0 : index
    %9 = vector.load %arg1[%c1, %c0_10] : memref<2x256xf32, #tpu.memory_space<vmem>>, vector<1x256xf32>
    %c0_11 = arith.constant 0 : index
    %c111 = arith.constant 111 : index
    %10 = vector.load %arg7[%c0_11, %c111] : memref<8x512xf32, #tpu.memory_space<vmem>>, vector<8x256xf32>
    %11 = vector.broadcast %8 : vector<1x256xf32> to vector<8x256xf32>
    %12 = arith.mulf %10, %11 : vector<8x256xf32>
    %c0_12 = arith.constant 0 : index
    %c112 = arith.constant 112 : index
    %13 = vector.load %arg7[%c0_12, %c112] : memref<8x512xf32, #tpu.memory_space<vmem>>, vector<8x256xf32>
    %c0_13 = arith.constant 0 : index
    %c113 = arith.constant 113 : index
    %14 = vector.load %arg7[%c0_13, %c113] : memref<8x512xf32, #tpu.memory_space<vmem>>, vector<8x256xf32>
    %15 = vector.broadcast %9 : vector<1x256xf32> to vector<8x256xf32>
    %16 = arith.mulf %14, %15 : vector<8x256xf32>
    %c0_14 = arith.constant 0 : index
    %c127 = arith.constant 127 : index
    %17 = vector.load %arg7[%c0_14, %c127] : memref<8x512xf32, #tpu.memory_space<vmem>>, vector<8x256xf32>
    %18 = vector.broadcast %8 : vector<1x256xf32> to vector<8x256xf32>
    %19 = arith.mulf %17, %18 : vector<8x256xf32>
    %c0_15 = arith.constant 0 : index
    %c128_16 = arith.constant 128 : index
    %20 = vector.load %arg7[%c0_15, %c128_16] : memref<8x512xf32, #tpu.memory_space<vmem>>, vector<8x256xf32>
    %c0_17 = arith.constant 0 : index
    %c129 = arith.constant 129 : index
    %21 = vector.load %arg7[%c0_17, %c129] : memref<8x512xf32, #tpu.memory_space<vmem>>, vector<8x256xf32>
    %22 = vector.broadcast %9 : vector<1x256xf32> to vector<8x256xf32>
    %23 = arith.mulf %21, %22 : vector<8x256xf32>
    %c0_18 = arith.constant 0 : index
    %c143 = arith.constant 143 : index
    %24 = vector.load %arg7[%c0_18, %c143] : memref<8x512xf32, #tpu.memory_space<vmem>>, vector<8x256xf32>
    %25 = vector.broadcast %8 : vector<1x256xf32> to vector<8x256xf32>
    %26 = arith.mulf %24, %25 : vector<8x256xf32>
    %c0_19 = arith.constant 0 : index
    %c144 = arith.constant 144 : index
    %27 = vector.load %arg7[%c0_19, %c144] : memref<8x512xf32, #tpu.memory_space<vmem>>, vector<8x256xf32>
    %c0_20 = arith.constant 0 : index
    %c145 = arith.constant 145 : index
    %28 = vector.load %arg7[%c0_20, %c145] : memref<8x512xf32, #tpu.memory_space<vmem>>, vector<8x256xf32>
    %29 = vector.broadcast %9 : vector<1x256xf32> to vector<8x256xf32>
    %30 = arith.mulf %28, %29 : vector<8x256xf32>
    %31 = tpu.concatenate %12, %13, %16, %19, %20, %23, %26, %27, %30 in 0 : vector<8x256xf32>, vector<8x256xf32>, vector<8x256xf32>, vector<8x256xf32>, vector<8x256xf32>, vector<8x256xf32>, vector<8x256xf32>, vector<8x256xf32>, vector<8x256xf32> -> vector<72x256xf32>
    %c0_21 = arith.constant 0 : index
    %c0_22 = arith.constant 0 : index
    %32 = vector.load %arg4[%c0_21, %c0_22] : memref<8x72xf32, #tpu.memory_space<vmem>>, vector<8x72xf32>
    %cst_23 = arith.constant dense<0.000000e+00> : vector<8x256xf32>
    %33 = tpu.matmul %32, %31, %cst_23 {dimension_numbers = #tpu.dot_dimension_numbers<[1], [0], [0], [1], [0, 0, 1, 1], [], []>} : vector<8x72xf32>, vector<72x256xf32>, vector<8x256xf32> -> vector<8x256xf32>
    %cst_24 = arith.constant dense<0.000000e+00> : vector<8xf32>
    %34 = vector.multi_reduction <add>, %33, %cst_24 [1] : vector<8x256xf32> to vector<8xf32>
    %35 = vector.shape_cast %34 : vector<8xf32> to vector<8x1xf32>
    %c0_25 = arith.constant 0 : index
    %c0_26 = arith.constant 0 : index
    %c0_27 = arith.constant 0 : index
    %36 = vector.load %arg5[%c0_25, %c0_26, %c0_27] : memref<1x8x1xf32, #tpu.memory_space<vmem>>, vector<1x8x1xf32>
    %37 = vector.shape_cast %36 : vector<1x8x1xf32> to vector<8x1xf32>
    %38 = vector.shape_cast %35 : vector<8x1xf32> to vector<1x8x1xf32>
    tpu.vector_store %arg5[%c0_25, %c0_26, %c0_27], %38 {strides = array<i32>} : memref<1x8x1xf32, #tpu.memory_space<vmem>>, vector<1x8x1xf32>,
    %39 = arith.mulf %33, %33 : vector<8x256xf32>
    %cst_28 = arith.constant dense<0.000000e+00> : vector<8xf32>
    %40 = vector.multi_reduction <add>, %39, %cst_28 [1] : vector<8x256xf32> to vector<8xf32>
    %41 = vector.shape_cast %40 : vector<8xf32> to vector<8x1xf32>
    %c0_29 = arith.constant 0 : index
    %c0_30 = arith.constant 0 : index
    %c0_31 = arith.constant 0 : index
    %42 = vector.load %arg6[%c0_29, %c0_30, %c0_31] : memref<1x8x1xf32, #tpu.memory_space<vmem>>, vector<1x8x1xf32>
    %43 = vector.shape_cast %42 : vector<1x8x1xf32> to vector<8x1xf32>
    %44 = vector.shape_cast %41 : vector<8x1xf32> to vector<1x8x1xf32>
    tpu.vector_store %arg6[%c0_29, %c0_30, %c0_31], %44 {strides = array<i32>} : memref<1x8x1xf32, #tpu.memory_space<vmem>>, vector<1x8x1xf32>,
    return
  }
  func.func @transform_0(%arg0: i32) -> (i32, i32) {
    %c0_i32 = arith.constant 0 : i32
    %c0_i32_0 = arith.constant 0 : i32
    %c0_i32_1 = arith.constant 0 : i32
    return %c0_i32, %c0_i32_0 : i32, i32
  }
  func.func @transform_1(%arg0: i32) -> (i32, i32, i32) {
    %c0_i32 = arith.constant 0 : i32
    %c0_i32_0 = arith.constant 0 : i32
    %c0_i32_1 = arith.constant 0 : i32
    return %arg0, %c0_i32, %c0_i32_0 : i32, i32, i32
  }
  func.func @transform_2(%arg0: i32) -> (i32, i32, i32) {
    %c0_i32 = arith.constant 0 : i32
    %c0_i32_0 = arith.constant 0 : i32
    %c0_i32_1 = arith.constant 0 : i32
    return %arg0, %c0_i32, %c0_i32_0 : i32, i32, i32
  }
  func.func @transform_3(%arg0: i32) -> (i32, i32) {
    %c0_i32 = arith.constant 0 : i32
    %c0_i32_0 = arith.constant 0 : i32
    %c0_i32_1 = arith.constant 0 : i32
    return %c0_i32, %c0_i32_0 : i32, i32
  }
  func.func @transform_4(%arg0: i32) -> (i32, i32, i32) {
    %c0_i32 = arith.constant 0 : i32
    %c0_i32_0 = arith.constant 0 : i32
    %c0_i32_1 = arith.constant 0 : i32
    return %arg0, %c0_i32, %c0_i32_0 : i32, i32, i32
  }
  func.func @transform_5(%arg0: i32) -> (i32, i32, i32) {
    %c0_i32 = arith.constant 0 : i32
    %c0_i32_0 = arith.constant 0 : i32
    %c0_i32_1 = arith.constant 0 : i32
    return %arg0, %c0_i32, %c0_i32_0 : i32, i32, i32
  }
}

module attributes {stable_mosaic.version = 11 : i64} {
  func.func @_conv3x3_bn_gelu_kernel(%arg0: i32, %arg1: memref<2x256xf32, #tpu.memory_space<vmem>>, %arg2: memref<1x8x256xf32, #tpu.memory_space<vmem>>, %arg3: memref<1x8x256xf32, #tpu.memory_space<vmem>>, %arg4: memref<8x72xf32, #tpu.memory_space<vmem>>, %arg5: memref<8x1xf32, #tpu.memory_space<vmem>>, %arg6: memref<8x1xf32, #tpu.memory_space<vmem>>, %arg7: memref<1x8x256xf32, #tpu.memory_space<vmem>>, %arg8: memref<1x8x1xf32, #tpu.memory_space<vmem>>, %arg9: memref<1x8x1xf32, #tpu.memory_space<vmem>>, %arg10: memref<8x512xf32, #tpu.memory_space<vmem>>) attributes {dimension_semantics = [#tpu.dimension_semantics<parallel>], iteration_bounds = array<i64: 2>, scalar_prefetch = 0 : i64, scratch_operands = 1 : i64, tpu.core_type = #tpu.core_type<tc>, window_params = [{pipeline_mode = #tpu.pipeline_mode<synchronous>, transform_indices = @transform_0, window_bounds = array<i64: 2, 256>}, {transform_indices = @transform_1, window_bounds = array<i64: 1, 8, 256>}, {transform_indices = @transform_2, window_bounds = array<i64: 1, 8, 256>}, {pipeline_mode = #tpu.pipeline_mode<synchronous>, transform_indices = @transform_3, window_bounds = array<i64: 8, 72>}, {pipeline_mode = #tpu.pipeline_mode<synchronous>, transform_indices = @transform_4, window_bounds = array<i64: 8, 1>}, {pipeline_mode = #tpu.pipeline_mode<synchronous>, transform_indices = @transform_5, window_bounds = array<i64: 8, 1>}, {transform_indices = @transform_6, window_bounds = array<i64: 1, 8, 256>}, {transform_indices = @transform_7, window_bounds = array<i64: 1, 8, 1>}, {transform_indices = @transform_8, window_bounds = array<i64: 1, 8, 1>}]} {
    %c0 = arith.constant 0 : index
    %c0_0 = arith.constant 0 : index
    %c0_1 = arith.constant 0 : index
    %0 = vector.load %arg2[%c0, %c0_0, %c0_1] : memref<1x8x256xf32, #tpu.memory_space<vmem>>, vector<1x8x256xf32>
    %1 = vector.shape_cast %0 : vector<1x8x256xf32> to vector<8x256xf32>
    %c0_2 = arith.constant 0 : index
    %c0_3 = arith.constant 0 : index
    %c0_4 = arith.constant 0 : index
    %2 = vector.load %arg3[%c0_2, %c0_3, %c0_4] : memref<1x8x256xf32, #tpu.memory_space<vmem>>, vector<1x8x256xf32>
    %3 = vector.shape_cast %2 : vector<1x8x256xf32> to vector<8x256xf32>
    %4 = arith.addf %1, %3 : vector<8x256xf32>
    %cst = arith.constant 0.000000e+00 : f32
    %5 = vector.broadcast %cst : f32 to vector<8x512xf32>
    %c0_5 = arith.constant 0 : index
    %c0_6 = arith.constant 0 : index
    %6 = vector.load %arg10[%c0_5, %c0_6] : memref<8x512xf32, #tpu.memory_space<vmem>>, vector<8x512xf32>
    tpu.vector_store %arg10[%c0_5, %c0_6], %5 {strides = array<i32>} : memref<8x512xf32, #tpu.memory_space<vmem>>, vector<8x512xf32>,
    %c0_7 = arith.constant 0 : index
    %c128 = arith.constant 128 : index
    %7 = vector.load %arg10[%c0_7, %c128] : memref<8x512xf32, #tpu.memory_space<vmem>>, vector<8x256xf32>
    tpu.vector_store %arg10[%c0_7, %c128], %4 {strides = array<i32>} : memref<8x512xf32, #tpu.memory_space<vmem>>, vector<8x256xf32>,
    %c0_8 = arith.constant 0 : index
    %c0_9 = arith.constant 0 : index
    %8 = vector.load %arg1[%c0_8, %c0_9] : memref<2x256xf32, #tpu.memory_space<vmem>>, vector<1x256xf32>
    %c1 = arith.constant 1 : index
    %c0_10 = arith.constant 0 : index
    %9 = vector.load %arg1[%c1, %c0_10] : memref<2x256xf32, #tpu.memory_space<vmem>>, vector<1x256xf32>
    %c0_11 = arith.constant 0 : index
    %c111 = arith.constant 111 : index
    %10 = vector.load %arg10[%c0_11, %c111] : memref<8x512xf32, #tpu.memory_space<vmem>>, vector<8x256xf32>
    %11 = vector.broadcast %8 : vector<1x256xf32> to vector<8x256xf32>
    %12 = arith.mulf %10, %11 : vector<8x256xf32>
    %c0_12 = arith.constant 0 : index
    %c112 = arith.constant 112 : index
    %13 = vector.load %arg10[%c0_12, %c112] : memref<8x512xf32, #tpu.memory_space<vmem>>, vector<8x256xf32>
    %c0_13 = arith.constant 0 : index
    %c113 = arith.constant 113 : index
    %14 = vector.load %arg10[%c0_13, %c113] : memref<8x512xf32, #tpu.memory_space<vmem>>, vector<8x256xf32>
    %15 = vector.broadcast %9 : vector<1x256xf32> to vector<8x256xf32>
    %16 = arith.mulf %14, %15 : vector<8x256xf32>
    %c0_14 = arith.constant 0 : index
    %c127 = arith.constant 127 : index
    %17 = vector.load %arg10[%c0_14, %c127] : memref<8x512xf32, #tpu.memory_space<vmem>>, vector<8x256xf32>
    %18 = vector.broadcast %8 : vector<1x256xf32> to vector<8x256xf32>
    %19 = arith.mulf %17, %18 : vector<8x256xf32>
    %c0_15 = arith.constant 0 : index
    %c128_16 = arith.constant 128 : index
    %20 = vector.load %arg10[%c0_15, %c128_16] : memref<8x512xf32, #tpu.memory_space<vmem>>, vector<8x256xf32>
    %c0_17 = arith.constant 0 : index
    %c129 = arith.constant 129 : index
    %21 = vector.load %arg10[%c0_17, %c129] : memref<8x512xf32, #tpu.memory_space<vmem>>, vector<8x256xf32>
    %22 = vector.broadcast %9 : vector<1x256xf32> to vector<8x256xf32>
    %23 = arith.mulf %21, %22 : vector<8x256xf32>
    %c0_18 = arith.constant 0 : index
    %c143 = arith.constant 143 : index
    %24 = vector.load %arg10[%c0_18, %c143] : memref<8x512xf32, #tpu.memory_space<vmem>>, vector<8x256xf32>
    %25 = vector.broadcast %8 : vector<1x256xf32> to vector<8x256xf32>
    %26 = arith.mulf %24, %25 : vector<8x256xf32>
    %c0_19 = arith.constant 0 : index
    %c144 = arith.constant 144 : index
    %27 = vector.load %arg10[%c0_19, %c144] : memref<8x512xf32, #tpu.memory_space<vmem>>, vector<8x256xf32>
    %c0_20 = arith.constant 0 : index
    %c145 = arith.constant 145 : index
    %28 = vector.load %arg10[%c0_20, %c145] : memref<8x512xf32, #tpu.memory_space<vmem>>, vector<8x256xf32>
    %29 = vector.broadcast %9 : vector<1x256xf32> to vector<8x256xf32>
    %30 = arith.mulf %28, %29 : vector<8x256xf32>
    %31 = tpu.concatenate %12, %13, %16, %19, %20, %23, %26, %27, %30 in 0 : vector<8x256xf32>, vector<8x256xf32>, vector<8x256xf32>, vector<8x256xf32>, vector<8x256xf32>, vector<8x256xf32>, vector<8x256xf32>, vector<8x256xf32>, vector<8x256xf32> -> vector<72x256xf32>
    %c0_21 = arith.constant 0 : index
    %c0_22 = arith.constant 0 : index
    %32 = vector.load %arg4[%c0_21, %c0_22] : memref<8x72xf32, #tpu.memory_space<vmem>>, vector<8x72xf32>
    %cst_23 = arith.constant dense<0.000000e+00> : vector<8x256xf32>
    %33 = tpu.matmul %32, %31, %cst_23 {dimension_numbers = #tpu.dot_dimension_numbers<[1], [0], [0], [1], [0, 0, 1, 1], [], []>} : vector<8x72xf32>, vector<72x256xf32>, vector<8x256xf32> -> vector<8x256xf32>
    %c0_24 = arith.constant 0 : index
    %c0_25 = arith.constant 0 : index
    %34 = vector.load %arg5[%c0_24, %c0_25] : memref<8x1xf32, #tpu.memory_space<vmem>>, vector<8x1xf32>
    %35 = vector.broadcast %34 : vector<8x1xf32> to vector<8x256xf32>
    %36 = arith.mulf %33, %35 : vector<8x256xf32>
    %c0_26 = arith.constant 0 : index
    %c0_27 = arith.constant 0 : index
    %37 = vector.load %arg6[%c0_26, %c0_27] : memref<8x1xf32, #tpu.memory_space<vmem>>, vector<8x1xf32>
    %38 = vector.broadcast %37 : vector<8x1xf32> to vector<8x256xf32>
    %39 = arith.addf %36, %38 : vector<8x256xf32>
    %cst_28 = arith.constant 5.000000e-01 : f32
    %40 = vector.broadcast %cst_28 : f32 to vector<8x256xf32>
    %41 = arith.mulf %40, %39 : vector<8x256xf32>
    %cst_29 = arith.constant 4.471500e-02 : f32
    %42 = vector.broadcast %cst_29 : f32 to vector<8x256xf32>
    %43 = arith.mulf %42, %39 : vector<8x256xf32>
    %44 = arith.mulf %43, %39 : vector<8x256xf32>
    %45 = arith.mulf %44, %39 : vector<8x256xf32>
    %46 = arith.addf %39, %45 : vector<8x256xf32>
    %cst_30 = arith.constant 0.797884583 : f32
    %47 = vector.broadcast %cst_30 : f32 to vector<8x256xf32>
    %48 = arith.mulf %47, %46 : vector<8x256xf32>
    %49 = math.tanh %48 : vector<8x256xf32>
    %cst_31 = arith.constant 1.000000e+00 : f32
    %50 = vector.broadcast %cst_31 : f32 to vector<8x256xf32>
    %51 = arith.addf %50, %49 : vector<8x256xf32>
    %52 = arith.mulf %41, %51 : vector<8x256xf32>
    %c0_32 = arith.constant 0 : index
    %c0_33 = arith.constant 0 : index
    %c0_34 = arith.constant 0 : index
    %53 = vector.load %arg7[%c0_32, %c0_33, %c0_34] : memref<1x8x256xf32, #tpu.memory_space<vmem>>, vector<1x8x256xf32>
    %54 = vector.shape_cast %53 : vector<1x8x256xf32> to vector<8x256xf32>
    %55 = vector.shape_cast %52 : vector<8x256xf32> to vector<1x8x256xf32>
    tpu.vector_store %arg7[%c0_32, %c0_33, %c0_34], %55 {strides = array<i32>} : memref<1x8x256xf32, #tpu.memory_space<vmem>>, vector<1x8x256xf32>,
    %cst_35 = arith.constant dense<0.000000e+00> : vector<8xf32>
    %56 = vector.multi_reduction <add>, %52, %cst_35 [1] : vector<8x256xf32> to vector<8xf32>
    %57 = vector.shape_cast %56 : vector<8xf32> to vector<8x1xf32>
    %c0_36 = arith.constant 0 : index
    %c0_37 = arith.constant 0 : index
    %c0_38 = arith.constant 0 : index
    %58 = vector.load %arg8[%c0_36, %c0_37, %c0_38] : memref<1x8x1xf32, #tpu.memory_space<vmem>>, vector<1x8x1xf32>
    %59 = vector.shape_cast %58 : vector<1x8x1xf32> to vector<8x1xf32>
    %60 = vector.shape_cast %57 : vector<8x1xf32> to vector<1x8x1xf32>
    tpu.vector_store %arg8[%c0_36, %c0_37, %c0_38], %60 {strides = array<i32>} : memref<1x8x1xf32, #tpu.memory_space<vmem>>, vector<1x8x1xf32>,
    %61 = arith.mulf %52, %52 : vector<8x256xf32>
    %cst_39 = arith.constant dense<0.000000e+00> : vector<8xf32>
    %62 = vector.multi_reduction <add>, %61, %cst_39 [1] : vector<8x256xf32> to vector<8xf32>
    %63 = vector.shape_cast %62 : vector<8xf32> to vector<8x1xf32>
    %c0_40 = arith.constant 0 : index
    %c0_41 = arith.constant 0 : index
    %c0_42 = arith.constant 0 : index
    %64 = vector.load %arg9[%c0_40, %c0_41, %c0_42] : memref<1x8x1xf32, #tpu.memory_space<vmem>>, vector<1x8x1xf32>
    %65 = vector.shape_cast %64 : vector<1x8x1xf32> to vector<8x1xf32>
    %66 = vector.shape_cast %63 : vector<8x1xf32> to vector<1x8x1xf32>
    tpu.vector_store %arg9[%c0_40, %c0_41, %c0_42], %66 {strides = array<i32>} : memref<1x8x1xf32, #tpu.memory_space<vmem>>, vector<1x8x1xf32>,
    return
  }
  func.func @transform_0(%arg0: i32) -> (i32, i32) {
    %c0_i32 = arith.constant 0 : i32
    %c0_i32_0 = arith.constant 0 : i32
    %c0_i32_1 = arith.constant 0 : i32
    return %c0_i32, %c0_i32_0 : i32, i32
  }
  func.func @transform_1(%arg0: i32) -> (i32, i32, i32) {
    %c0_i32 = arith.constant 0 : i32
    %c0_i32_0 = arith.constant 0 : i32
    %c0_i32_1 = arith.constant 0 : i32
    return %arg0, %c0_i32, %c0_i32_0 : i32, i32, i32
  }
  func.func @transform_2(%arg0: i32) -> (i32, i32, i32) {
    %c0_i32 = arith.constant 0 : i32
    %c0_i32_0 = arith.constant 0 : i32
    %c0_i32_1 = arith.constant 0 : i32
    return %arg0, %c0_i32, %c0_i32_0 : i32, i32, i32
  }
  func.func @transform_3(%arg0: i32) -> (i32, i32) {
    %c0_i32 = arith.constant 0 : i32
    %c0_i32_0 = arith.constant 0 : i32
    %c0_i32_1 = arith.constant 0 : i32
    return %c0_i32, %c0_i32_0 : i32, i32
  }
  func.func @transform_4(%arg0: i32) -> (i32, i32) {
    %c0_i32 = arith.constant 0 : i32
    %c0_i32_0 = arith.constant 0 : i32
    %c0_i32_1 = arith.constant 0 : i32
    return %c0_i32, %c0_i32_0 : i32, i32
  }
  func.func @transform_5(%arg0: i32) -> (i32, i32) {
    %c0_i32 = arith.constant 0 : i32
    %c0_i32_0 = arith.constant 0 : i32
    %c0_i32_1 = arith.constant 0 : i32
    return %c0_i32, %c0_i32_0 : i32, i32
  }
  func.func @transform_6(%arg0: i32) -> (i32, i32, i32) {
    %c0_i32 = arith.constant 0 : i32
    %c0_i32_0 = arith.constant 0 : i32
    %c0_i32_1 = arith.constant 0 : i32
    return %arg0, %c0_i32, %c0_i32_0 : i32, i32, i32
  }
  func.func @transform_7(%arg0: i32) -> (i32, i32, i32) {
    %c0_i32 = arith.constant 0 : i32
    %c0_i32_0 = arith.constant 0 : i32
    %c0_i32_1 = arith.constant 0 : i32
    return %arg0, %c0_i32, %c0_i32_0 : i32, i32, i32
  }
  func.func @transform_8(%arg0: i32) -> (i32, i32, i32) {
    %c0_i32 = arith.constant 0 : i32
    %c0_i32_0 = arith.constant 0 : i32
    %c0_i32_1 = arith.constant 0 : i32
    return %arg0, %c0_i32, %c0_i32_0 : i32, i32, i32
  }
}

module attributes {stable_mosaic.version = 11 : i64} {
  func.func @_conv1x1_stats_kernel(%arg0: i32, %arg1: i32, %arg2: memref<1x4x16xf32, #tpu.memory_space<vmem>>, %arg3: memref<8x4xf32, #tpu.memory_space<vmem>>, %arg4: memref<1x8x1xf32, #tpu.memory_space<vmem>>, %arg5: memref<1x8x1xf32, #tpu.memory_space<vmem>>, %arg6: memref<1x4x1xf32, #tpu.memory_space<vmem>>, %arg7: memref<1x4x1xf32, #tpu.memory_space<vmem>>) attributes {dimension_semantics = [#tpu.dimension_semantics<parallel>, #tpu.dimension_semantics<arbitrary>], iteration_bounds = array<i64: 2, 1>, scalar_prefetch = 0 : i64, scratch_operands = 0 : i64, tpu.core_type = #tpu.core_type<tc>, window_params = [{transform_indices = @transform_0, window_bounds = array<i64: 1, 4, 16>}, {pipeline_mode = #tpu.pipeline_mode<synchronous>, transform_indices = @transform_1, window_bounds = array<i64: 8, 4>}, {transform_indices = @transform_2, window_bounds = array<i64: 1, 8, 1>}, {transform_indices = @transform_3, window_bounds = array<i64: 1, 8, 1>}, {transform_indices = @transform_4, window_bounds = array<i64: 1, 4, 1>}, {transform_indices = @transform_5, window_bounds = array<i64: 1, 4, 1>}]} {
    %c0_i32 = arith.constant 0 : i32
    %0 = arith.cmpi eq, %arg1, %c0_i32 : i32
    %1 = arith.extui %0 : i1 to i32
    %c0_i32_0 = arith.constant 0 : i32
    %2 = arith.cmpi ne, %1, %c0_i32_0 : i32
    scf.if %2 {
      %cst_32 = arith.constant 0.000000e+00 : f32
      %63 = vector.broadcast %cst_32 : f32 to vector<8x1xf32>
      %c0_33 = arith.constant 0 : index
      %c0_34 = arith.constant 0 : index
      %c0_35 = arith.constant 0 : index
      %64 = vector.load %arg4[%c0_33, %c0_34, %c0_35] : memref<1x8x1xf32, #tpu.memory_space<vmem>>, vector<1x8x1xf32>
      %65 = vector.shape_cast %64 : vector<1x8x1xf32> to vector<8x1xf32>
      %66 = vector.shape_cast %63 : vector<8x1xf32> to vector<1x8x1xf32>
      tpu.vector_store %arg4[%c0_33, %c0_34, %c0_35], %66 {strides = array<i32>} : memref<1x8x1xf32, #tpu.memory_space<vmem>>, vector<1x8x1xf32>,
      %cst_36 = arith.constant 0.000000e+00 : f32
      %67 = vector.broadcast %cst_36 : f32 to vector<8x1xf32>
      %c0_37 = arith.constant 0 : index
      %c0_38 = arith.constant 0 : index
      %c0_39 = arith.constant 0 : index
      %68 = vector.load %arg5[%c0_37, %c0_38, %c0_39] : memref<1x8x1xf32, #tpu.memory_space<vmem>>, vector<1x8x1xf32>
      %69 = vector.shape_cast %68 : vector<1x8x1xf32> to vector<8x1xf32>
      %70 = vector.shape_cast %67 : vector<8x1xf32> to vector<1x8x1xf32>
      tpu.vector_store %arg5[%c0_37, %c0_38, %c0_39], %70 {strides = array<i32>} : memref<1x8x1xf32, #tpu.memory_space<vmem>>, vector<1x8x1xf32>,
      %cst_40 = arith.constant 0.000000e+00 : f32
      %71 = vector.broadcast %cst_40 : f32 to vector<4x1xf32>
      %c0_41 = arith.constant 0 : index
      %c0_42 = arith.constant 0 : index
      %c0_43 = arith.constant 0 : index
      %72 = vector.load %arg6[%c0_41, %c0_42, %c0_43] : memref<1x4x1xf32, #tpu.memory_space<vmem>>, vector<1x4x1xf32>
      %73 = vector.shape_cast %72 : vector<1x4x1xf32> to vector<4x1xf32>
      %74 = vector.shape_cast %71 : vector<4x1xf32> to vector<1x4x1xf32>
      tpu.vector_store %arg6[%c0_41, %c0_42, %c0_43], %74 {strides = array<i32>} : memref<1x4x1xf32, #tpu.memory_space<vmem>>, vector<1x4x1xf32>,
      %cst_44 = arith.constant 0.000000e+00 : f32
      %75 = vector.broadcast %cst_44 : f32 to vector<4x1xf32>
      %c0_45 = arith.constant 0 : index
      %c0_46 = arith.constant 0 : index
      %c0_47 = arith.constant 0 : index
      %76 = vector.load %arg7[%c0_45, %c0_46, %c0_47] : memref<1x4x1xf32, #tpu.memory_space<vmem>>, vector<1x4x1xf32>
      %77 = vector.shape_cast %76 : vector<1x4x1xf32> to vector<4x1xf32>
      %78 = vector.shape_cast %75 : vector<4x1xf32> to vector<1x4x1xf32>
      tpu.vector_store %arg7[%c0_45, %c0_46, %c0_47], %78 {strides = array<i32>} : memref<1x4x1xf32, #tpu.memory_space<vmem>>, vector<1x4x1xf32>,
    } else {
    }
    %c0 = arith.constant 0 : index
    %c0_1 = arith.constant 0 : index
    %c0_2 = arith.constant 0 : index
    %3 = vector.load %arg2[%c0, %c0_1, %c0_2] : memref<1x4x16xf32, #tpu.memory_space<vmem>>, vector<1x4x16xf32>
    %4 = vector.shape_cast %3 : vector<1x4x16xf32> to vector<4x16xf32>
    %c0_3 = arith.constant 0 : index
    %c0_4 = arith.constant 0 : index
    %5 = vector.load %arg3[%c0_3, %c0_4] : memref<8x4xf32, #tpu.memory_space<vmem>>, vector<8x4xf32>
    %6 = vector.extract_strided_slice %5 {offsets = [0, 0], sizes = [8, 1], strides = [1, 1]} : vector<8x4xf32> to vector<8x1xf32>
    %7 = vector.extract_strided_slice %4 {offsets = [0, 0], sizes = [1, 16], strides = [1, 1]} : vector<4x16xf32> to vector<1x16xf32>
    %8 = vector.broadcast %6 : vector<8x1xf32> to vector<8x16xf32>
    %9 = vector.broadcast %7 : vector<1x16xf32> to vector<8x16xf32>
    %10 = arith.mulf %8, %9 : vector<8x16xf32>
    %11 = vector.extract_strided_slice %5 {offsets = [0, 1], sizes = [8, 1], strides = [1, 1]} : vector<8x4xf32> to vector<8x1xf32>
    %12 = vector.extract_strided_slice %4 {offsets = [1, 0], sizes = [1, 16], strides = [1, 1]} : vector<4x16xf32> to vector<1x16xf32>
    %13 = vector.broadcast %11 : vector<8x1xf32> to vector<8x16xf32>
    %14 = vector.broadcast %12 : vector<1x16xf32> to vector<8x16xf32>
    %15 = arith.mulf %13, %14 : vector<8x16xf32>
    %16 = arith.addf %10, %15 : vector<8x16xf32>
    %17 = vector.extract_strided_slice %5 {offsets = [0, 2], sizes = [8, 1], strides = [1, 1]} : vector<8x4xf32> to vector<8x1xf32>
    %18 = vector.extract_strided_slice %4 {offsets = [2, 0], sizes = [1, 16], strides = [1, 1]} : vector<4x16xf32> to vector<1x16xf32>
    %19 = vector.broadcast %17 : vector<8x1xf32> to vector<8x16xf32>
    %20 = vector.broadcast %18 : vector<1x16xf32> to vector<8x16xf32>
    %21 = arith.mulf %19, %20 : vector<8x16xf32>
    %22 = arith.addf %16, %21 : vector<8x16xf32>
    %23 = vector.extract_strided_slice %5 {offsets = [0, 3], sizes = [8, 1], strides = [1, 1]} : vector<8x4xf32> to vector<8x1xf32>
    %24 = vector.extract_strided_slice %4 {offsets = [3, 0], sizes = [1, 16], strides = [1, 1]} : vector<4x16xf32> to vector<1x16xf32>
    %25 = vector.broadcast %23 : vector<8x1xf32> to vector<8x16xf32>
    %26 = vector.broadcast %24 : vector<1x16xf32> to vector<8x16xf32>
    %27 = arith.mulf %25, %26 : vector<8x16xf32>
    %28 = arith.addf %22, %27 : vector<8x16xf32>
    %c0_5 = arith.constant 0 : index
    %c0_6 = arith.constant 0 : index
    %c0_7 = arith.constant 0 : index
    %29 = vector.load %arg4[%c0_5, %c0_6, %c0_7] : memref<1x8x1xf32, #tpu.memory_space<vmem>>, vector<1x8x1xf32>
    %30 = vector.shape_cast %29 : vector<1x8x1xf32> to vector<8x1xf32>
    %cst = arith.constant dense<0.000000e+00> : vector<8xf32>
    %31 = vector.multi_reduction <add>, %28, %cst [1] : vector<8x16xf32> to vector<8xf32>
    %32 = vector.shape_cast %31 : vector<8xf32> to vector<8x1xf32>
    %33 = arith.addf %30, %32 : vector<8x1xf32>
    %c0_8 = arith.constant 0 : index
    %c0_9 = arith.constant 0 : index
    %c0_10 = arith.constant 0 : index
    %34 = vector.load %arg4[%c0_8, %c0_9, %c0_10] : memref<1x8x1xf32, #tpu.memory_space<vmem>>, vector<1x8x1xf32>
    %35 = vector.shape_cast %34 : vector<1x8x1xf32> to vector<8x1xf32>
    %36 = vector.shape_cast %33 : vector<8x1xf32> to vector<1x8x1xf32>
    tpu.vector_store %arg4[%c0_8, %c0_9, %c0_10], %36 {strides = array<i32>} : memref<1x8x1xf32, #tpu.memory_space<vmem>>, vector<1x8x1xf32>,
    %c0_11 = arith.constant 0 : index
    %c0_12 = arith.constant 0 : index
    %c0_13 = arith.constant 0 : index
    %37 = vector.load %arg5[%c0_11, %c0_12, %c0_13] : memref<1x8x1xf32, #tpu.memory_space<vmem>>, vector<1x8x1xf32>
    %38 = vector.shape_cast %37 : vector<1x8x1xf32> to vector<8x1xf32>
    %39 = arith.mulf %28, %28 : vector<8x16xf32>
    %cst_14 = arith.constant dense<0.000000e+00> : vector<8xf32>
    %40 = vector.multi_reduction <add>, %39, %cst_14 [1] : vector<8x16xf32> to vector<8xf32>
    %41 = vector.shape_cast %40 : vector<8xf32> to vector<8x1xf32>
    %42 = arith.addf %38, %41 : vector<8x1xf32>
    %c0_15 = arith.constant 0 : index
    %c0_16 = arith.constant 0 : index
    %c0_17 = arith.constant 0 : index
    %43 = vector.load %arg5[%c0_15, %c0_16, %c0_17] : memref<1x8x1xf32, #tpu.memory_space<vmem>>, vector<1x8x1xf32>
    %44 = vector.shape_cast %43 : vector<1x8x1xf32> to vector<8x1xf32>
    %45 = vector.shape_cast %42 : vector<8x1xf32> to vector<1x8x1xf32>
    tpu.vector_store %arg5[%c0_15, %c0_16, %c0_17], %45 {strides = array<i32>} : memref<1x8x1xf32, #tpu.memory_space<vmem>>, vector<1x8x1xf32>,
    %c0_18 = arith.constant 0 : index
    %c0_19 = arith.constant 0 : index
    %c0_20 = arith.constant 0 : index
    %46 = vector.load %arg6[%c0_18, %c0_19, %c0_20] : memref<1x4x1xf32, #tpu.memory_space<vmem>>, vector<1x4x1xf32>
    %47 = vector.shape_cast %46 : vector<1x4x1xf32> to vector<4x1xf32>
    %cst_21 = arith.constant dense<0.000000e+00> : vector<4xf32>
    %48 = vector.multi_reduction <add>, %4, %cst_21 [1] : vector<4x16xf32> to vector<4xf32>
    %49 = vector.shape_cast %48 : vector<4xf32> to vector<4x1xf32>
    %50 = arith.addf %47, %49 : vector<4x1xf32>
    %c0_22 = arith.constant 0 : index
    %c0_23 = arith.constant 0 : index
    %c0_24 = arith.constant 0 : index
    %51 = vector.load %arg6[%c0_22, %c0_23, %c0_24] : memref<1x4x1xf32, #tpu.memory_space<vmem>>, vector<1x4x1xf32>
    %52 = vector.shape_cast %51 : vector<1x4x1xf32> to vector<4x1xf32>
    %53 = vector.shape_cast %50 : vector<4x1xf32> to vector<1x4x1xf32>
    tpu.vector_store %arg6[%c0_22, %c0_23, %c0_24], %53 {strides = array<i32>} : memref<1x4x1xf32, #tpu.memory_space<vmem>>, vector<1x4x1xf32>,
    %c0_25 = arith.constant 0 : index
    %c0_26 = arith.constant 0 : index
    %c0_27 = arith.constant 0 : index
    %54 = vector.load %arg7[%c0_25, %c0_26, %c0_27] : memref<1x4x1xf32, #tpu.memory_space<vmem>>, vector<1x4x1xf32>
    %55 = vector.shape_cast %54 : vector<1x4x1xf32> to vector<4x1xf32>
    %56 = arith.mulf %4, %4 : vector<4x16xf32>
    %cst_28 = arith.constant dense<0.000000e+00> : vector<4xf32>
    %57 = vector.multi_reduction <add>, %56, %cst_28 [1] : vector<4x16xf32> to vector<4xf32>
    %58 = vector.shape_cast %57 : vector<4xf32> to vector<4x1xf32>
    %59 = arith.addf %55, %58 : vector<4x1xf32>
    %c0_29 = arith.constant 0 : index
    %c0_30 = arith.constant 0 : index
    %c0_31 = arith.constant 0 : index
    %60 = vector.load %arg7[%c0_29, %c0_30, %c0_31] : memref<1x4x1xf32, #tpu.memory_space<vmem>>, vector<1x4x1xf32>
    %61 = vector.shape_cast %60 : vector<1x4x1xf32> to vector<4x1xf32>
    %62 = vector.shape_cast %59 : vector<4x1xf32> to vector<1x4x1xf32>
    tpu.vector_store %arg7[%c0_29, %c0_30, %c0_31], %62 {strides = array<i32>} : memref<1x4x1xf32, #tpu.memory_space<vmem>>, vector<1x4x1xf32>,
    return
  }
  func.func @transform_0(%arg0: i32, %arg1: i32) -> (i32, i32, i32) {
    %c0_i32 = arith.constant 0 : i32
    %c0_i32_0 = arith.constant 0 : i32
    return %arg0, %c0_i32, %arg1 : i32, i32, i32
  }
  func.func @transform_1(%arg0: i32, %arg1: i32) -> (i32, i32) {
    %c0_i32 = arith.constant 0 : i32
    %c0_i32_0 = arith.constant 0 : i32
    %c0_i32_1 = arith.constant 0 : i32
    return %c0_i32, %c0_i32_0 : i32, i32
  }
  func.func @transform_2(%arg0: i32, %arg1: i32) -> (i32, i32, i32) {
    %c0_i32 = arith.constant 0 : i32
    %c0_i32_0 = arith.constant 0 : i32
    %c0_i32_1 = arith.constant 0 : i32
    return %arg0, %c0_i32, %c0_i32_0 : i32, i32, i32
  }
  func.func @transform_3(%arg0: i32, %arg1: i32) -> (i32, i32, i32) {
    %c0_i32 = arith.constant 0 : i32
    %c0_i32_0 = arith.constant 0 : i32
    %c0_i32_1 = arith.constant 0 : i32
    return %arg0, %c0_i32, %c0_i32_0 : i32, i32, i32
  }
  func.func @transform_4(%arg0: i32, %arg1: i32) -> (i32, i32, i32) {
    %c0_i32 = arith.constant 0 : i32
    %c0_i32_0 = arith.constant 0 : i32
    %c0_i32_1 = arith.constant 0 : i32
    return %arg0, %c0_i32, %c0_i32_0 : i32, i32, i32
  }
  func.func @transform_5(%arg0: i32, %arg1: i32) -> (i32, i32, i32) {
    %c0_i32 = arith.constant 0 : i32
    %c0_i32_0 = arith.constant 0 : i32
    %c0_i32_1 = arith.constant 0 : i32
    return %arg0, %c0_i32, %c0_i32_0 : i32, i32, i32
  }
}

module attributes {stable_mosaic.version = 11 : i64} {
  func.func @_conv1x1_bn_gelu_kernel(%arg0: i32, %arg1: i32, %arg2: memref<1x4x16xf32, #tpu.memory_space<vmem>>, %arg3: memref<8x4xf32, #tpu.memory_space<vmem>>, %arg4: memref<8x1xf32, #tpu.memory_space<vmem>>, %arg5: memref<8x1xf32, #tpu.memory_space<vmem>>, %arg6: memref<1x8x16xf32, #tpu.memory_space<vmem>>, %arg7: memref<1x8x1xf32, #tpu.memory_space<vmem>>, %arg8: memref<1x8x1xf32, #tpu.memory_space<vmem>>) attributes {dimension_semantics = [#tpu.dimension_semantics<parallel>, #tpu.dimension_semantics<arbitrary>], iteration_bounds = array<i64: 2, 1>, scalar_prefetch = 0 : i64, scratch_operands = 0 : i64, tpu.core_type = #tpu.core_type<tc>, window_params = [{transform_indices = @transform_0, window_bounds = array<i64: 1, 4, 16>}, {pipeline_mode = #tpu.pipeline_mode<synchronous>, transform_indices = @transform_1, window_bounds = array<i64: 8, 4>}, {pipeline_mode = #tpu.pipeline_mode<synchronous>, transform_indices = @transform_2, window_bounds = array<i64: 8, 1>}, {pipeline_mode = #tpu.pipeline_mode<synchronous>, transform_indices = @transform_3, window_bounds = array<i64: 8, 1>}, {transform_indices = @transform_4, window_bounds = array<i64: 1, 8, 16>}, {transform_indices = @transform_5, window_bounds = array<i64: 1, 8, 1>}, {transform_indices = @transform_6, window_bounds = array<i64: 1, 8, 1>}]} {
    %c0_i32 = arith.constant 0 : i32
    %0 = arith.cmpi eq, %arg1, %c0_i32 : i32
    %1 = arith.extui %0 : i1 to i32
    %c0_i32_0 = arith.constant 0 : i32
    %2 = arith.cmpi ne, %1, %c0_i32_0 : i32
    scf.if %2 {
      %cst_29 = arith.constant 0.000000e+00 : f32
      %68 = vector.broadcast %cst_29 : f32 to vector<8x1xf32>
      %c0_30 = arith.constant 0 : index
      %c0_31 = arith.constant 0 : index
      %c0_32 = arith.constant 0 : index
      %69 = vector.load %arg7[%c0_30, %c0_31, %c0_32] : memref<1x8x1xf32, #tpu.memory_space<vmem>>, vector<1x8x1xf32>
      %70 = vector.shape_cast %69 : vector<1x8x1xf32> to vector<8x1xf32>
      %71 = vector.shape_cast %68 : vector<8x1xf32> to vector<1x8x1xf32>
      tpu.vector_store %arg7[%c0_30, %c0_31, %c0_32], %71 {strides = array<i32>} : memref<1x8x1xf32, #tpu.memory_space<vmem>>, vector<1x8x1xf32>,
      %cst_33 = arith.constant 0.000000e+00 : f32
      %72 = vector.broadcast %cst_33 : f32 to vector<8x1xf32>
      %c0_34 = arith.constant 0 : index
      %c0_35 = arith.constant 0 : index
      %c0_36 = arith.constant 0 : index
      %73 = vector.load %arg8[%c0_34, %c0_35, %c0_36] : memref<1x8x1xf32, #tpu.memory_space<vmem>>, vector<1x8x1xf32>
      %74 = vector.shape_cast %73 : vector<1x8x1xf32> to vector<8x1xf32>
      %75 = vector.shape_cast %72 : vector<8x1xf32> to vector<1x8x1xf32>
      tpu.vector_store %arg8[%c0_34, %c0_35, %c0_36], %75 {strides = array<i32>} : memref<1x8x1xf32, #tpu.memory_space<vmem>>, vector<1x8x1xf32>,
    } else {
    }
    %c0 = arith.constant 0 : index
    %c0_1 = arith.constant 0 : index
    %3 = vector.load %arg3[%c0, %c0_1] : memref<8x4xf32, #tpu.memory_space<vmem>>, vector<8x4xf32>
    %c0_2 = arith.constant 0 : index
    %c0_3 = arith.constant 0 : index
    %c0_4 = arith.constant 0 : index
    %4 = vector.load %arg2[%c0_2, %c0_3, %c0_4] : memref<1x4x16xf32, #tpu.memory_space<vmem>>, vector<1x4x16xf32>
    %5 = vector.shape_cast %4 : vector<1x4x16xf32> to vector<4x16xf32>
    %6 = vector.extract_strided_slice %3 {offsets = [0, 0], sizes = [8, 1], strides = [1, 1]} : vector<8x4xf32> to vector<8x1xf32>
    %7 = vector.extract_strided_slice %5 {offsets = [0, 0], sizes = [1, 16], strides = [1, 1]} : vector<4x16xf32> to vector<1x16xf32>
    %8 = vector.broadcast %6 : vector<8x1xf32> to vector<8x16xf32>
    %9 = vector.broadcast %7 : vector<1x16xf32> to vector<8x16xf32>
    %10 = arith.mulf %8, %9 : vector<8x16xf32>
    %11 = vector.extract_strided_slice %3 {offsets = [0, 1], sizes = [8, 1], strides = [1, 1]} : vector<8x4xf32> to vector<8x1xf32>
    %12 = vector.extract_strided_slice %5 {offsets = [1, 0], sizes = [1, 16], strides = [1, 1]} : vector<4x16xf32> to vector<1x16xf32>
    %13 = vector.broadcast %11 : vector<8x1xf32> to vector<8x16xf32>
    %14 = vector.broadcast %12 : vector<1x16xf32> to vector<8x16xf32>
    %15 = arith.mulf %13, %14 : vector<8x16xf32>
    %16 = arith.addf %10, %15 : vector<8x16xf32>
    %17 = vector.extract_strided_slice %3 {offsets = [0, 2], sizes = [8, 1], strides = [1, 1]} : vector<8x4xf32> to vector<8x1xf32>
    %18 = vector.extract_strided_slice %5 {offsets = [2, 0], sizes = [1, 16], strides = [1, 1]} : vector<4x16xf32> to vector<1x16xf32>
    %19 = vector.broadcast %17 : vector<8x1xf32> to vector<8x16xf32>
    %20 = vector.broadcast %18 : vector<1x16xf32> to vector<8x16xf32>
    %21 = arith.mulf %19, %20 : vector<8x16xf32>
    %22 = arith.addf %16, %21 : vector<8x16xf32>
    %23 = vector.extract_strided_slice %3 {offsets = [0, 3], sizes = [8, 1], strides = [1, 1]} : vector<8x4xf32> to vector<8x1xf32>
    %24 = vector.extract_strided_slice %5 {offsets = [3, 0], sizes = [1, 16], strides = [1, 1]} : vector<4x16xf32> to vector<1x16xf32>
    %25 = vector.broadcast %23 : vector<8x1xf32> to vector<8x16xf32>
    %26 = vector.broadcast %24 : vector<1x16xf32> to vector<8x16xf32>
    %27 = arith.mulf %25, %26 : vector<8x16xf32>
    %28 = arith.addf %22, %27 : vector<8x16xf32>
    %c0_5 = arith.constant 0 : index
    %c0_6 = arith.constant 0 : index
    %29 = vector.load %arg4[%c0_5, %c0_6] : memref<8x1xf32, #tpu.memory_space<vmem>>, vector<8x1xf32>
    %30 = vector.broadcast %29 : vector<8x1xf32> to vector<8x16xf32>
    %31 = arith.mulf %28, %30 : vector<8x16xf32>
    %c0_7 = arith.constant 0 : index
    %c0_8 = arith.constant 0 : index
    %32 = vector.load %arg5[%c0_7, %c0_8] : memref<8x1xf32, #tpu.memory_space<vmem>>, vector<8x1xf32>
    %33 = vector.broadcast %32 : vector<8x1xf32> to vector<8x16xf32>
    %34 = arith.addf %31, %33 : vector<8x16xf32>
    %cst = arith.constant 5.000000e-01 : f32
    %35 = vector.broadcast %cst : f32 to vector<8x16xf32>
    %36 = arith.mulf %35, %34 : vector<8x16xf32>
    %cst_9 = arith.constant 4.471500e-02 : f32
    %37 = vector.broadcast %cst_9 : f32 to vector<8x16xf32>
    %38 = arith.mulf %37, %34 : vector<8x16xf32>
    %39 = arith.mulf %38, %34 : vector<8x16xf32>
    %40 = arith.mulf %39, %34 : vector<8x16xf32>
    %41 = arith.addf %34, %40 : vector<8x16xf32>
    %cst_10 = arith.constant 0.797884583 : f32
    %42 = vector.broadcast %cst_10 : f32 to vector<8x16xf32>
    %43 = arith.mulf %42, %41 : vector<8x16xf32>
    %44 = math.tanh %43 : vector<8x16xf32>
    %cst_11 = arith.constant 1.000000e+00 : f32
    %45 = vector.broadcast %cst_11 : f32 to vector<8x16xf32>
    %46 = arith.addf %45, %44 : vector<8x16xf32>
    %47 = arith.mulf %36, %46 : vector<8x16xf32>
    %c0_12 = arith.constant 0 : index
    %c0_13 = arith.constant 0 : index
    %c0_14 = arith.constant 0 : index
    %48 = vector.load %arg6[%c0_12, %c0_13, %c0_14] : memref<1x8x16xf32, #tpu.memory_space<vmem>>, vector<1x8x16xf32>
    %49 = vector.shape_cast %48 : vector<1x8x16xf32> to vector<8x16xf32>
    %50 = vector.shape_cast %47 : vector<8x16xf32> to vector<1x8x16xf32>
    tpu.vector_store %arg6[%c0_12, %c0_13, %c0_14], %50 {strides = array<i32>} : memref<1x8x16xf32, #tpu.memory_space<vmem>>, vector<1x8x16xf32>,
    %c0_15 = arith.constant 0 : index
    %c0_16 = arith.constant 0 : index
    %c0_17 = arith.constant 0 : index
    %51 = vector.load %arg7[%c0_15, %c0_16, %c0_17] : memref<1x8x1xf32, #tpu.memory_space<vmem>>, vector<1x8x1xf32>
    %52 = vector.shape_cast %51 : vector<1x8x1xf32> to vector<8x1xf32>
    %cst_18 = arith.constant dense<0.000000e+00> : vector<8xf32>
    %53 = vector.multi_reduction <add>, %47, %cst_18 [1] : vector<8x16xf32> to vector<8xf32>
    %54 = vector.shape_cast %53 : vector<8xf32> to vector<8x1xf32>
    %55 = arith.addf %52, %54 : vector<8x1xf32>
    %c0_19 = arith.constant 0 : index
    %c0_20 = arith.constant 0 : index
    %c0_21 = arith.constant 0 : index
    %56 = vector.load %arg7[%c0_19, %c0_20, %c0_21] : memref<1x8x1xf32, #tpu.memory_space<vmem>>, vector<1x8x1xf32>
    %57 = vector.shape_cast %56 : vector<1x8x1xf32> to vector<8x1xf32>
    %58 = vector.shape_cast %55 : vector<8x1xf32> to vector<1x8x1xf32>
    tpu.vector_store %arg7[%c0_19, %c0_20, %c0_21], %58 {strides = array<i32>} : memref<1x8x1xf32, #tpu.memory_space<vmem>>, vector<1x8x1xf32>,
    %c0_22 = arith.constant 0 : index
    %c0_23 = arith.constant 0 : index
    %c0_24 = arith.constant 0 : index
    %59 = vector.load %arg8[%c0_22, %c0_23, %c0_24] : memref<1x8x1xf32, #tpu.memory_space<vmem>>, vector<1x8x1xf32>
    %60 = vector.shape_cast %59 : vector<1x8x1xf32> to vector<8x1xf32>
    %61 = arith.mulf %47, %47 : vector<8x16xf32>
    %cst_25 = arith.constant dense<0.000000e+00> : vector<8xf32>
    %62 = vector.multi_reduction <add>, %61, %cst_25 [1] : vector<8x16xf32> to vector<8xf32>
    %63 = vector.shape_cast %62 : vector<8xf32> to vector<8x1xf32>
    %64 = arith.addf %60, %63 : vector<8x1xf32>
    %c0_26 = arith.constant 0 : index
    %c0_27 = arith.constant 0 : index
    %c0_28 = arith.constant 0 : index
    %65 = vector.load %arg8[%c0_26, %c0_27, %c0_28] : memref<1x8x1xf32, #tpu.memory_space<vmem>>, vector<1x8x1xf32>
    %66 = vector.shape_cast %65 : vector<1x8x1xf32> to vector<8x1xf32>
    %67 = vector.shape_cast %64 : vector<8x1xf32> to vector<1x8x1xf32>
    tpu.vector_store %arg8[%c0_26, %c0_27, %c0_28], %67 {strides = array<i32>} : memref<1x8x1xf32, #tpu.memory_space<vmem>>, vector<1x8x1xf32>,
    return
  }
  func.func @transform_0(%arg0: i32, %arg1: i32) -> (i32, i32, i32) {
    %c0_i32 = arith.constant 0 : i32
    %c0_i32_0 = arith.constant 0 : i32
    return %arg0, %c0_i32, %arg1 : i32, i32, i32
  }
  func.func @transform_1(%arg0: i32, %arg1: i32) -> (i32, i32) {
    %c0_i32 = arith.constant 0 : i32
    %c0_i32_0 = arith.constant 0 : i32
    %c0_i32_1 = arith.constant 0 : i32
    return %c0_i32, %c0_i32_0 : i32, i32
  }
  func.func @transform_2(%arg0: i32, %arg1: i32) -> (i32, i32) {
    %c0_i32 = arith.constant 0 : i32
    %c0_i32_0 = arith.constant 0 : i32
    %c0_i32_1 = arith.constant 0 : i32
    return %c0_i32, %c0_i32_0 : i32, i32
  }
  func.func @transform_3(%arg0: i32, %arg1: i32) -> (i32, i32) {
    %c0_i32 = arith.constant 0 : i32
    %c0_i32_0 = arith.constant 0 : i32
    %c0_i32_1 = arith.constant 0 : i32
    return %c0_i32, %c0_i32_0 : i32, i32
  }
  func.func @transform_4(%arg0: i32, %arg1: i32) -> (i32, i32, i32) {
    %c0_i32 = arith.constant 0 : i32
    %c0_i32_0 = arith.constant 0 : i32
    return %arg0, %c0_i32, %arg1 : i32, i32, i32
  }
  func.func @transform_5(%arg0: i32, %arg1: i32) -> (i32, i32, i32) {
    %c0_i32 = arith.constant 0 : i32
    %c0_i32_0 = arith.constant 0 : i32
    %c0_i32_1 = arith.constant 0 : i32
    return %arg0, %c0_i32, %c0_i32_0 : i32, i32, i32
  }
  func.func @transform_6(%arg0: i32, %arg1: i32) -> (i32, i32, i32) {
    %c0_i32 = arith.constant 0 : i32
    %c0_i32_0 = arith.constant 0 : i32
    %c0_i32_1 = arith.constant 0 : i32
    return %arg0, %c0_i32, %c0_i32_0 : i32, i32, i32
  }
}

module attributes {stable_mosaic.version = 11 : i64} {
  func.func @_conv1x1_bn_gelu_kernel(%arg0: i32, %arg1: i32, %arg2: memref<1x4x4xf32, #tpu.memory_space<vmem>>, %arg3: memref<8x4xf32, #tpu.memory_space<vmem>>, %arg4: memref<8x1xf32, #tpu.memory_space<vmem>>, %arg5: memref<8x1xf32, #tpu.memory_space<vmem>>, %arg6: memref<1x8x4xf32, #tpu.memory_space<vmem>>, %arg7: memref<1x8x1xf32, #tpu.memory_space<vmem>>, %arg8: memref<1x8x1xf32, #tpu.memory_space<vmem>>) attributes {dimension_semantics = [#tpu.dimension_semantics<parallel>, #tpu.dimension_semantics<arbitrary>], iteration_bounds = array<i64: 2, 1>, scalar_prefetch = 0 : i64, scratch_operands = 0 : i64, tpu.core_type = #tpu.core_type<tc>, window_params = [{transform_indices = @transform_0, window_bounds = array<i64: 1, 4, 4>}, {pipeline_mode = #tpu.pipeline_mode<synchronous>, transform_indices = @transform_1, window_bounds = array<i64: 8, 4>}, {pipeline_mode = #tpu.pipeline_mode<synchronous>, transform_indices = @transform_2, window_bounds = array<i64: 8, 1>}, {pipeline_mode = #tpu.pipeline_mode<synchronous>, transform_indices = @transform_3, window_bounds = array<i64: 8, 1>}, {transform_indices = @transform_4, window_bounds = array<i64: 1, 8, 4>}, {transform_indices = @transform_5, window_bounds = array<i64: 1, 8, 1>}, {transform_indices = @transform_6, window_bounds = array<i64: 1, 8, 1>}]} {
    %c0_i32 = arith.constant 0 : i32
    %0 = arith.cmpi eq, %arg1, %c0_i32 : i32
    %1 = arith.extui %0 : i1 to i32
    %c0_i32_0 = arith.constant 0 : i32
    %2 = arith.cmpi ne, %1, %c0_i32_0 : i32
    scf.if %2 {
      %cst_29 = arith.constant 0.000000e+00 : f32
      %68 = vector.broadcast %cst_29 : f32 to vector<8x1xf32>
      %c0_30 = arith.constant 0 : index
      %c0_31 = arith.constant 0 : index
      %c0_32 = arith.constant 0 : index
      %69 = vector.load %arg7[%c0_30, %c0_31, %c0_32] : memref<1x8x1xf32, #tpu.memory_space<vmem>>, vector<1x8x1xf32>
      %70 = vector.shape_cast %69 : vector<1x8x1xf32> to vector<8x1xf32>
      %71 = vector.shape_cast %68 : vector<8x1xf32> to vector<1x8x1xf32>
      tpu.vector_store %arg7[%c0_30, %c0_31, %c0_32], %71 {strides = array<i32>} : memref<1x8x1xf32, #tpu.memory_space<vmem>>, vector<1x8x1xf32>,
      %cst_33 = arith.constant 0.000000e+00 : f32
      %72 = vector.broadcast %cst_33 : f32 to vector<8x1xf32>
      %c0_34 = arith.constant 0 : index
      %c0_35 = arith.constant 0 : index
      %c0_36 = arith.constant 0 : index
      %73 = vector.load %arg8[%c0_34, %c0_35, %c0_36] : memref<1x8x1xf32, #tpu.memory_space<vmem>>, vector<1x8x1xf32>
      %74 = vector.shape_cast %73 : vector<1x8x1xf32> to vector<8x1xf32>
      %75 = vector.shape_cast %72 : vector<8x1xf32> to vector<1x8x1xf32>
      tpu.vector_store %arg8[%c0_34, %c0_35, %c0_36], %75 {strides = array<i32>} : memref<1x8x1xf32, #tpu.memory_space<vmem>>, vector<1x8x1xf32>,
    } else {
    }
    %c0 = arith.constant 0 : index
    %c0_1 = arith.constant 0 : index
    %3 = vector.load %arg3[%c0, %c0_1] : memref<8x4xf32, #tpu.memory_space<vmem>>, vector<8x4xf32>
    %c0_2 = arith.constant 0 : index
    %c0_3 = arith.constant 0 : index
    %c0_4 = arith.constant 0 : index
    %4 = vector.load %arg2[%c0_2, %c0_3, %c0_4] : memref<1x4x4xf32, #tpu.memory_space<vmem>>, vector<1x4x4xf32>
    %5 = vector.shape_cast %4 : vector<1x4x4xf32> to vector<4x4xf32>
    %6 = vector.extract_strided_slice %3 {offsets = [0, 0], sizes = [8, 1], strides = [1, 1]} : vector<8x4xf32> to vector<8x1xf32>
    %7 = vector.extract_strided_slice %5 {offsets = [0, 0], sizes = [1, 4], strides = [1, 1]} : vector<4x4xf32> to vector<1x4xf32>
    %8 = vector.broadcast %6 : vector<8x1xf32> to vector<8x4xf32>
    %9 = vector.broadcast %7 : vector<1x4xf32> to vector<8x4xf32>
    %10 = arith.mulf %8, %9 : vector<8x4xf32>
    %11 = vector.extract_strided_slice %3 {offsets = [0, 1], sizes = [8, 1], strides = [1, 1]} : vector<8x4xf32> to vector<8x1xf32>
    %12 = vector.extract_strided_slice %5 {offsets = [1, 0], sizes = [1, 4], strides = [1, 1]} : vector<4x4xf32> to vector<1x4xf32>
    %13 = vector.broadcast %11 : vector<8x1xf32> to vector<8x4xf32>
    %14 = vector.broadcast %12 : vector<1x4xf32> to vector<8x4xf32>
    %15 = arith.mulf %13, %14 : vector<8x4xf32>
    %16 = arith.addf %10, %15 : vector<8x4xf32>
    %17 = vector.extract_strided_slice %3 {offsets = [0, 2], sizes = [8, 1], strides = [1, 1]} : vector<8x4xf32> to vector<8x1xf32>
    %18 = vector.extract_strided_slice %5 {offsets = [2, 0], sizes = [1, 4], strides = [1, 1]} : vector<4x4xf32> to vector<1x4xf32>
    %19 = vector.broadcast %17 : vector<8x1xf32> to vector<8x4xf32>
    %20 = vector.broadcast %18 : vector<1x4xf32> to vector<8x4xf32>
    %21 = arith.mulf %19, %20 : vector<8x4xf32>
    %22 = arith.addf %16, %21 : vector<8x4xf32>
    %23 = vector.extract_strided_slice %3 {offsets = [0, 3], sizes = [8, 1], strides = [1, 1]} : vector<8x4xf32> to vector<8x1xf32>
    %24 = vector.extract_strided_slice %5 {offsets = [3, 0], sizes = [1, 4], strides = [1, 1]} : vector<4x4xf32> to vector<1x4xf32>
    %25 = vector.broadcast %23 : vector<8x1xf32> to vector<8x4xf32>
    %26 = vector.broadcast %24 : vector<1x4xf32> to vector<8x4xf32>
    %27 = arith.mulf %25, %26 : vector<8x4xf32>
    %28 = arith.addf %22, %27 : vector<8x4xf32>
    %c0_5 = arith.constant 0 : index
    %c0_6 = arith.constant 0 : index
    %29 = vector.load %arg4[%c0_5, %c0_6] : memref<8x1xf32, #tpu.memory_space<vmem>>, vector<8x1xf32>
    %30 = vector.broadcast %29 : vector<8x1xf32> to vector<8x4xf32>
    %31 = arith.mulf %28, %30 : vector<8x4xf32>
    %c0_7 = arith.constant 0 : index
    %c0_8 = arith.constant 0 : index
    %32 = vector.load %arg5[%c0_7, %c0_8] : memref<8x1xf32, #tpu.memory_space<vmem>>, vector<8x1xf32>
    %33 = vector.broadcast %32 : vector<8x1xf32> to vector<8x4xf32>
    %34 = arith.addf %31, %33 : vector<8x4xf32>
    %cst = arith.constant 5.000000e-01 : f32
    %35 = vector.broadcast %cst : f32 to vector<8x4xf32>
    %36 = arith.mulf %35, %34 : vector<8x4xf32>
    %cst_9 = arith.constant 4.471500e-02 : f32
    %37 = vector.broadcast %cst_9 : f32 to vector<8x4xf32>
    %38 = arith.mulf %37, %34 : vector<8x4xf32>
    %39 = arith.mulf %38, %34 : vector<8x4xf32>
    %40 = arith.mulf %39, %34 : vector<8x4xf32>
    %41 = arith.addf %34, %40 : vector<8x4xf32>
    %cst_10 = arith.constant 0.797884583 : f32
    %42 = vector.broadcast %cst_10 : f32 to vector<8x4xf32>
    %43 = arith.mulf %42, %41 : vector<8x4xf32>
    %44 = math.tanh %43 : vector<8x4xf32>
    %cst_11 = arith.constant 1.000000e+00 : f32
    %45 = vector.broadcast %cst_11 : f32 to vector<8x4xf32>
    %46 = arith.addf %45, %44 : vector<8x4xf32>
    %47 = arith.mulf %36, %46 : vector<8x4xf32>
    %c0_12 = arith.constant 0 : index
    %c0_13 = arith.constant 0 : index
    %c0_14 = arith.constant 0 : index
    %48 = vector.load %arg6[%c0_12, %c0_13, %c0_14] : memref<1x8x4xf32, #tpu.memory_space<vmem>>, vector<1x8x4xf32>
    %49 = vector.shape_cast %48 : vector<1x8x4xf32> to vector<8x4xf32>
    %50 = vector.shape_cast %47 : vector<8x4xf32> to vector<1x8x4xf32>
    tpu.vector_store %arg6[%c0_12, %c0_13, %c0_14], %50 {strides = array<i32>} : memref<1x8x4xf32, #tpu.memory_space<vmem>>, vector<1x8x4xf32>,
    %c0_15 = arith.constant 0 : index
    %c0_16 = arith.constant 0 : index
    %c0_17 = arith.constant 0 : index
    %51 = vector.load %arg7[%c0_15, %c0_16, %c0_17] : memref<1x8x1xf32, #tpu.memory_space<vmem>>, vector<1x8x1xf32>
    %52 = vector.shape_cast %51 : vector<1x8x1xf32> to vector<8x1xf32>
    %cst_18 = arith.constant dense<0.000000e+00> : vector<8xf32>
    %53 = vector.multi_reduction <add>, %47, %cst_18 [1] : vector<8x4xf32> to vector<8xf32>
    %54 = vector.shape_cast %53 : vector<8xf32> to vector<8x1xf32>
    %55 = arith.addf %52, %54 : vector<8x1xf32>
    %c0_19 = arith.constant 0 : index
    %c0_20 = arith.constant 0 : index
    %c0_21 = arith.constant 0 : index
    %56 = vector.load %arg7[%c0_19, %c0_20, %c0_21] : memref<1x8x1xf32, #tpu.memory_space<vmem>>, vector<1x8x1xf32>
    %57 = vector.shape_cast %56 : vector<1x8x1xf32> to vector<8x1xf32>
    %58 = vector.shape_cast %55 : vector<8x1xf32> to vector<1x8x1xf32>
    tpu.vector_store %arg7[%c0_19, %c0_20, %c0_21], %58 {strides = array<i32>} : memref<1x8x1xf32, #tpu.memory_space<vmem>>, vector<1x8x1xf32>,
    %c0_22 = arith.constant 0 : index
    %c0_23 = arith.constant 0 : index
    %c0_24 = arith.constant 0 : index
    %59 = vector.load %arg8[%c0_22, %c0_23, %c0_24] : memref<1x8x1xf32, #tpu.memory_space<vmem>>, vector<1x8x1xf32>
    %60 = vector.shape_cast %59 : vector<1x8x1xf32> to vector<8x1xf32>
    %61 = arith.mulf %47, %47 : vector<8x4xf32>
    %cst_25 = arith.constant dense<0.000000e+00> : vector<8xf32>
    %62 = vector.multi_reduction <add>, %61, %cst_25 [1] : vector<8x4xf32> to vector<8xf32>
    %63 = vector.shape_cast %62 : vector<8xf32> to vector<8x1xf32>
    %64 = arith.addf %60, %63 : vector<8x1xf32>
    %c0_26 = arith.constant 0 : index
    %c0_27 = arith.constant 0 : index
    %c0_28 = arith.constant 0 : index
    %65 = vector.load %arg8[%c0_26, %c0_27, %c0_28] : memref<1x8x1xf32, #tpu.memory_space<vmem>>, vector<1x8x1xf32>
    %66 = vector.shape_cast %65 : vector<1x8x1xf32> to vector<8x1xf32>
    %67 = vector.shape_cast %64 : vector<8x1xf32> to vector<1x8x1xf32>
    tpu.vector_store %arg8[%c0_26, %c0_27, %c0_28], %67 {strides = array<i32>} : memref<1x8x1xf32, #tpu.memory_space<vmem>>, vector<1x8x1xf32>,
    return
  }
  func.func @transform_0(%arg0: i32, %arg1: i32) -> (i32, i32, i32) {
    %c0_i32 = arith.constant 0 : i32
    %c0_i32_0 = arith.constant 0 : i32
    return %arg0, %c0_i32, %arg1 : i32, i32, i32
  }
  func.func @transform_1(%arg0: i32, %arg1: i32) -> (i32, i32) {
    %c0_i32 = arith.constant 0 : i32
    %c0_i32_0 = arith.constant 0 : i32
    %c0_i32_1 = arith.constant 0 : i32
    return %c0_i32, %c0_i32_0 : i32, i32
  }
  func.func @transform_2(%arg0: i32, %arg1: i32) -> (i32, i32) {
    %c0_i32 = arith.constant 0 : i32
    %c0_i32_0 = arith.constant 0 : i32
    %c0_i32_1 = arith.constant 0 : i32
    return %c0_i32, %c0_i32_0 : i32, i32
  }
  func.func @transform_3(%arg0: i32, %arg1: i32) -> (i32, i32) {
    %c0_i32 = arith.constant 0 : i32
    %c0_i32_0 = arith.constant 0 : i32
    %c0_i32_1 = arith.constant 0 : i32
    return %c0_i32, %c0_i32_0 : i32, i32
  }
  func.func @transform_4(%arg0: i32, %arg1: i32) -> (i32, i32, i32) {
    %c0_i32 = arith.constant 0 : i32
    %c0_i32_0 = arith.constant 0 : i32
    return %arg0, %c0_i32, %arg1 : i32, i32, i32
  }
  func.func @transform_5(%arg0: i32, %arg1: i32) -> (i32, i32, i32) {
    %c0_i32 = arith.constant 0 : i32
    %c0_i32_0 = arith.constant 0 : i32
    %c0_i32_1 = arith.constant 0 : i32
    return %arg0, %c0_i32, %c0_i32_0 : i32, i32, i32
  }
  func.func @transform_6(%arg0: i32, %arg1: i32) -> (i32, i32, i32) {
    %c0_i32 = arith.constant 0 : i32
    %c0_i32_0 = arith.constant 0 : i32
    %c0_i32_1 = arith.constant 0 : i32
    return %arg0, %c0_i32, %c0_i32_0 : i32, i32, i32
  }
}

module attributes {stable_mosaic.version = 11 : i64} {
  func.func @_conv1x1_stats_kernel(%arg0: i32, %arg1: i32, %arg2: memref<1x4x4xf32, #tpu.memory_space<vmem>>, %arg3: memref<8x4xf32, #tpu.memory_space<vmem>>, %arg4: memref<1x8x1xf32, #tpu.memory_space<vmem>>, %arg5: memref<1x8x1xf32, #tpu.memory_space<vmem>>, %arg6: memref<1x4x1xf32, #tpu.memory_space<vmem>>, %arg7: memref<1x4x1xf32, #tpu.memory_space<vmem>>) attributes {dimension_semantics = [#tpu.dimension_semantics<parallel>, #tpu.dimension_semantics<arbitrary>], iteration_bounds = array<i64: 2, 1>, scalar_prefetch = 0 : i64, scratch_operands = 0 : i64, tpu.core_type = #tpu.core_type<tc>, window_params = [{transform_indices = @transform_0, window_bounds = array<i64: 1, 4, 4>}, {pipeline_mode = #tpu.pipeline_mode<synchronous>, transform_indices = @transform_1, window_bounds = array<i64: 8, 4>}, {transform_indices = @transform_2, window_bounds = array<i64: 1, 8, 1>}, {transform_indices = @transform_3, window_bounds = array<i64: 1, 8, 1>}, {transform_indices = @transform_4, window_bounds = array<i64: 1, 4, 1>}, {transform_indices = @transform_5, window_bounds = array<i64: 1, 4, 1>}]} {
    %c0_i32 = arith.constant 0 : i32
    %0 = arith.cmpi eq, %arg1, %c0_i32 : i32
    %1 = arith.extui %0 : i1 to i32
    %c0_i32_0 = arith.constant 0 : i32
    %2 = arith.cmpi ne, %1, %c0_i32_0 : i32
    scf.if %2 {
      %cst_32 = arith.constant 0.000000e+00 : f32
      %63 = vector.broadcast %cst_32 : f32 to vector<8x1xf32>
      %c0_33 = arith.constant 0 : index
      %c0_34 = arith.constant 0 : index
      %c0_35 = arith.constant 0 : index
      %64 = vector.load %arg4[%c0_33, %c0_34, %c0_35] : memref<1x8x1xf32, #tpu.memory_space<vmem>>, vector<1x8x1xf32>
      %65 = vector.shape_cast %64 : vector<1x8x1xf32> to vector<8x1xf32>
      %66 = vector.shape_cast %63 : vector<8x1xf32> to vector<1x8x1xf32>
      tpu.vector_store %arg4[%c0_33, %c0_34, %c0_35], %66 {strides = array<i32>} : memref<1x8x1xf32, #tpu.memory_space<vmem>>, vector<1x8x1xf32>,
      %cst_36 = arith.constant 0.000000e+00 : f32
      %67 = vector.broadcast %cst_36 : f32 to vector<8x1xf32>
      %c0_37 = arith.constant 0 : index
      %c0_38 = arith.constant 0 : index
      %c0_39 = arith.constant 0 : index
      %68 = vector.load %arg5[%c0_37, %c0_38, %c0_39] : memref<1x8x1xf32, #tpu.memory_space<vmem>>, vector<1x8x1xf32>
      %69 = vector.shape_cast %68 : vector<1x8x1xf32> to vector<8x1xf32>
      %70 = vector.shape_cast %67 : vector<8x1xf32> to vector<1x8x1xf32>
      tpu.vector_store %arg5[%c0_37, %c0_38, %c0_39], %70 {strides = array<i32>} : memref<1x8x1xf32, #tpu.memory_space<vmem>>, vector<1x8x1xf32>,
      %cst_40 = arith.constant 0.000000e+00 : f32
      %71 = vector.broadcast %cst_40 : f32 to vector<4x1xf32>
      %c0_41 = arith.constant 0 : index
      %c0_42 = arith.constant 0 : index
      %c0_43 = arith.constant 0 : index
      %72 = vector.load %arg6[%c0_41, %c0_42, %c0_43] : memref<1x4x1xf32, #tpu.memory_space<vmem>>, vector<1x4x1xf32>
      %73 = vector.shape_cast %72 : vector<1x4x1xf32> to vector<4x1xf32>
      %74 = vector.shape_cast %71 : vector<4x1xf32> to vector<1x4x1xf32>
      tpu.vector_store %arg6[%c0_41, %c0_42, %c0_43], %74 {strides = array<i32>} : memref<1x4x1xf32, #tpu.memory_space<vmem>>, vector<1x4x1xf32>,
      %cst_44 = arith.constant 0.000000e+00 : f32
      %75 = vector.broadcast %cst_44 : f32 to vector<4x1xf32>
      %c0_45 = arith.constant 0 : index
      %c0_46 = arith.constant 0 : index
      %c0_47 = arith.constant 0 : index
      %76 = vector.load %arg7[%c0_45, %c0_46, %c0_47] : memref<1x4x1xf32, #tpu.memory_space<vmem>>, vector<1x4x1xf32>
      %77 = vector.shape_cast %76 : vector<1x4x1xf32> to vector<4x1xf32>
      %78 = vector.shape_cast %75 : vector<4x1xf32> to vector<1x4x1xf32>
      tpu.vector_store %arg7[%c0_45, %c0_46, %c0_47], %78 {strides = array<i32>} : memref<1x4x1xf32, #tpu.memory_space<vmem>>, vector<1x4x1xf32>,
    } else {
    }
    %c0 = arith.constant 0 : index
    %c0_1 = arith.constant 0 : index
    %c0_2 = arith.constant 0 : index
    %3 = vector.load %arg2[%c0, %c0_1, %c0_2] : memref<1x4x4xf32, #tpu.memory_space<vmem>>, vector<1x4x4xf32>
    %4 = vector.shape_cast %3 : vector<1x4x4xf32> to vector<4x4xf32>
    %c0_3 = arith.constant 0 : index
    %c0_4 = arith.constant 0 : index
    %5 = vector.load %arg3[%c0_3, %c0_4] : memref<8x4xf32, #tpu.memory_space<vmem>>, vector<8x4xf32>
    %6 = vector.extract_strided_slice %5 {offsets = [0, 0], sizes = [8, 1], strides = [1, 1]} : vector<8x4xf32> to vector<8x1xf32>
    %7 = vector.extract_strided_slice %4 {offsets = [0, 0], sizes = [1, 4], strides = [1, 1]} : vector<4x4xf32> to vector<1x4xf32>
    %8 = vector.broadcast %6 : vector<8x1xf32> to vector<8x4xf32>
    %9 = vector.broadcast %7 : vector<1x4xf32> to vector<8x4xf32>
    %10 = arith.mulf %8, %9 : vector<8x4xf32>
    %11 = vector.extract_strided_slice %5 {offsets = [0, 1], sizes = [8, 1], strides = [1, 1]} : vector<8x4xf32> to vector<8x1xf32>
    %12 = vector.extract_strided_slice %4 {offsets = [1, 0], sizes = [1, 4], strides = [1, 1]} : vector<4x4xf32> to vector<1x4xf32>
    %13 = vector.broadcast %11 : vector<8x1xf32> to vector<8x4xf32>
    %14 = vector.broadcast %12 : vector<1x4xf32> to vector<8x4xf32>
    %15 = arith.mulf %13, %14 : vector<8x4xf32>
    %16 = arith.addf %10, %15 : vector<8x4xf32>
    %17 = vector.extract_strided_slice %5 {offsets = [0, 2], sizes = [8, 1], strides = [1, 1]} : vector<8x4xf32> to vector<8x1xf32>
    %18 = vector.extract_strided_slice %4 {offsets = [2, 0], sizes = [1, 4], strides = [1, 1]} : vector<4x4xf32> to vector<1x4xf32>
    %19 = vector.broadcast %17 : vector<8x1xf32> to vector<8x4xf32>
    %20 = vector.broadcast %18 : vector<1x4xf32> to vector<8x4xf32>
    %21 = arith.mulf %19, %20 : vector<8x4xf32>
    %22 = arith.addf %16, %21 : vector<8x4xf32>
    %23 = vector.extract_strided_slice %5 {offsets = [0, 3], sizes = [8, 1], strides = [1, 1]} : vector<8x4xf32> to vector<8x1xf32>
    %24 = vector.extract_strided_slice %4 {offsets = [3, 0], sizes = [1, 4], strides = [1, 1]} : vector<4x4xf32> to vector<1x4xf32>
    %25 = vector.broadcast %23 : vector<8x1xf32> to vector<8x4xf32>
    %26 = vector.broadcast %24 : vector<1x4xf32> to vector<8x4xf32>
    %27 = arith.mulf %25, %26 : vector<8x4xf32>
    %28 = arith.addf %22, %27 : vector<8x4xf32>
    %c0_5 = arith.constant 0 : index
    %c0_6 = arith.constant 0 : index
    %c0_7 = arith.constant 0 : index
    %29 = vector.load %arg4[%c0_5, %c0_6, %c0_7] : memref<1x8x1xf32, #tpu.memory_space<vmem>>, vector<1x8x1xf32>
    %30 = vector.shape_cast %29 : vector<1x8x1xf32> to vector<8x1xf32>
    %cst = arith.constant dense<0.000000e+00> : vector<8xf32>
    %31 = vector.multi_reduction <add>, %28, %cst [1] : vector<8x4xf32> to vector<8xf32>
    %32 = vector.shape_cast %31 : vector<8xf32> to vector<8x1xf32>
    %33 = arith.addf %30, %32 : vector<8x1xf32>
    %c0_8 = arith.constant 0 : index
    %c0_9 = arith.constant 0 : index
    %c0_10 = arith.constant 0 : index
    %34 = vector.load %arg4[%c0_8, %c0_9, %c0_10] : memref<1x8x1xf32, #tpu.memory_space<vmem>>, vector<1x8x1xf32>
    %35 = vector.shape_cast %34 : vector<1x8x1xf32> to vector<8x1xf32>
    %36 = vector.shape_cast %33 : vector<8x1xf32> to vector<1x8x1xf32>
    tpu.vector_store %arg4[%c0_8, %c0_9, %c0_10], %36 {strides = array<i32>} : memref<1x8x1xf32, #tpu.memory_space<vmem>>, vector<1x8x1xf32>,
    %c0_11 = arith.constant 0 : index
    %c0_12 = arith.constant 0 : index
    %c0_13 = arith.constant 0 : index
    %37 = vector.load %arg5[%c0_11, %c0_12, %c0_13] : memref<1x8x1xf32, #tpu.memory_space<vmem>>, vector<1x8x1xf32>
    %38 = vector.shape_cast %37 : vector<1x8x1xf32> to vector<8x1xf32>
    %39 = arith.mulf %28, %28 : vector<8x4xf32>
    %cst_14 = arith.constant dense<0.000000e+00> : vector<8xf32>
    %40 = vector.multi_reduction <add>, %39, %cst_14 [1] : vector<8x4xf32> to vector<8xf32>
    %41 = vector.shape_cast %40 : vector<8xf32> to vector<8x1xf32>
    %42 = arith.addf %38, %41 : vector<8x1xf32>
    %c0_15 = arith.constant 0 : index
    %c0_16 = arith.constant 0 : index
    %c0_17 = arith.constant 0 : index
    %43 = vector.load %arg5[%c0_15, %c0_16, %c0_17] : memref<1x8x1xf32, #tpu.memory_space<vmem>>, vector<1x8x1xf32>
    %44 = vector.shape_cast %43 : vector<1x8x1xf32> to vector<8x1xf32>
    %45 = vector.shape_cast %42 : vector<8x1xf32> to vector<1x8x1xf32>
    tpu.vector_store %arg5[%c0_15, %c0_16, %c0_17], %45 {strides = array<i32>} : memref<1x8x1xf32, #tpu.memory_space<vmem>>, vector<1x8x1xf32>,
    %c0_18 = arith.constant 0 : index
    %c0_19 = arith.constant 0 : index
    %c0_20 = arith.constant 0 : index
    %46 = vector.load %arg6[%c0_18, %c0_19, %c0_20] : memref<1x4x1xf32, #tpu.memory_space<vmem>>, vector<1x4x1xf32>
    %47 = vector.shape_cast %46 : vector<1x4x1xf32> to vector<4x1xf32>
    %cst_21 = arith.constant dense<0.000000e+00> : vector<4xf32>
    %48 = vector.multi_reduction <add>, %4, %cst_21 [1] : vector<4x4xf32> to vector<4xf32>
    %49 = vector.shape_cast %48 : vector<4xf32> to vector<4x1xf32>
    %50 = arith.addf %47, %49 : vector<4x1xf32>
    %c0_22 = arith.constant 0 : index
    %c0_23 = arith.constant 0 : index
    %c0_24 = arith.constant 0 : index
    %51 = vector.load %arg6[%c0_22, %c0_23, %c0_24] : memref<1x4x1xf32, #tpu.memory_space<vmem>>, vector<1x4x1xf32>
    %52 = vector.shape_cast %51 : vector<1x4x1xf32> to vector<4x1xf32>
    %53 = vector.shape_cast %50 : vector<4x1xf32> to vector<1x4x1xf32>
    tpu.vector_store %arg6[%c0_22, %c0_23, %c0_24], %53 {strides = array<i32>} : memref<1x4x1xf32, #tpu.memory_space<vmem>>, vector<1x4x1xf32>,
    %c0_25 = arith.constant 0 : index
    %c0_26 = arith.constant 0 : index
    %c0_27 = arith.constant 0 : index
    %54 = vector.load %arg7[%c0_25, %c0_26, %c0_27] : memref<1x4x1xf32, #tpu.memory_space<vmem>>, vector<1x4x1xf32>
    %55 = vector.shape_cast %54 : vector<1x4x1xf32> to vector<4x1xf32>
    %56 = arith.mulf %4, %4 : vector<4x4xf32>
    %cst_28 = arith.constant dense<0.000000e+00> : vector<4xf32>
    %57 = vector.multi_reduction <add>, %56, %cst_28 [1] : vector<4x4xf32> to vector<4xf32>
    %58 = vector.shape_cast %57 : vector<4xf32> to vector<4x1xf32>
    %59 = arith.addf %55, %58 : vector<4x1xf32>
    %c0_29 = arith.constant 0 : index
    %c0_30 = arith.constant 0 : index
    %c0_31 = arith.constant 0 : index
    %60 = vector.load %arg7[%c0_29, %c0_30, %c0_31] : memref<1x4x1xf32, #tpu.memory_space<vmem>>, vector<1x4x1xf32>
    %61 = vector.shape_cast %60 : vector<1x4x1xf32> to vector<4x1xf32>
    %62 = vector.shape_cast %59 : vector<4x1xf32> to vector<1x4x1xf32>
    tpu.vector_store %arg7[%c0_29, %c0_30, %c0_31], %62 {strides = array<i32>} : memref<1x4x1xf32, #tpu.memory_space<vmem>>, vector<1x4x1xf32>,
    return
  }
  func.func @transform_0(%arg0: i32, %arg1: i32) -> (i32, i32, i32) {
    %c0_i32 = arith.constant 0 : i32
    %c0_i32_0 = arith.constant 0 : i32
    return %arg0, %c0_i32, %arg1 : i32, i32, i32
  }
  func.func @transform_1(%arg0: i32, %arg1: i32) -> (i32, i32) {
    %c0_i32 = arith.constant 0 : i32
    %c0_i32_0 = arith.constant 0 : i32
    %c0_i32_1 = arith.constant 0 : i32
    return %c0_i32, %c0_i32_0 : i32, i32
  }
  func.func @transform_2(%arg0: i32, %arg1: i32) -> (i32, i32, i32) {
    %c0_i32 = arith.constant 0 : i32
    %c0_i32_0 = arith.constant 0 : i32
    %c0_i32_1 = arith.constant 0 : i32
    return %arg0, %c0_i32, %c0_i32_0 : i32, i32, i32
  }
  func.func @transform_3(%arg0: i32, %arg1: i32) -> (i32, i32, i32) {
    %c0_i32 = arith.constant 0 : i32
    %c0_i32_0 = arith.constant 0 : i32
    %c0_i32_1 = arith.constant 0 : i32
    return %arg0, %c0_i32, %c0_i32_0 : i32, i32, i32
  }
  func.func @transform_4(%arg0: i32, %arg1: i32) -> (i32, i32, i32) {
    %c0_i32 = arith.constant 0 : i32
    %c0_i32_0 = arith.constant 0 : i32
    %c0_i32_1 = arith.constant 0 : i32
    return %arg0, %c0_i32, %c0_i32_0 : i32, i32, i32
  }
  func.func @transform_5(%arg0: i32, %arg1: i32) -> (i32, i32, i32) {
    %c0_i32 = arith.constant 0 : i32
    %c0_i32_0 = arith.constant 0 : i32
    %c0_i32_1 = arith.constant 0 : i32
    return %arg0, %c0_i32, %c0_i32_0 : i32, i32, i32
  }
}

module attributes {stable_mosaic.version = 11 : i64} {
  func.func @_conv3x3_stats_kernel(%arg0: i32, %arg1: memref<2x256xf32, #tpu.memory_space<vmem>>, %arg2: memref<1x8x1xf32, #tpu.memory_space<vmem>>, %arg3: memref<1x8x256xf32, #tpu.memory_space<vmem>>, %arg4: memref<8x72xf32, #tpu.memory_space<vmem>>, %arg5: memref<1x8x1xf32, #tpu.memory_space<vmem>>, %arg6: memref<1x8x1xf32, #tpu.memory_space<vmem>>, %arg7: memref<8x512xf32, #tpu.memory_space<vmem>>) attributes {dimension_semantics = [#tpu.dimension_semantics<parallel>], iteration_bounds = array<i64: 2>, scalar_prefetch = 0 : i64, scratch_operands = 1 : i64, tpu.core_type = #tpu.core_type<tc>, window_params = [{pipeline_mode = #tpu.pipeline_mode<synchronous>, transform_indices = @transform_0, window_bounds = array<i64: 2, 256>}, {transform_indices = @transform_1, window_bounds = array<i64: 1, 8, 1>}, {transform_indices = @transform_2, window_bounds = array<i64: 1, 8, 256>}, {pipeline_mode = #tpu.pipeline_mode<synchronous>, transform_indices = @transform_3, window_bounds = array<i64: 8, 72>}, {transform_indices = @transform_4, window_bounds = array<i64: 1, 8, 1>}, {transform_indices = @transform_5, window_bounds = array<i64: 1, 8, 1>}]} {
    %c0 = arith.constant 0 : index
    %c0_0 = arith.constant 0 : index
    %c0_1 = arith.constant 0 : index
    %0 = vector.load %arg2[%c0, %c0_0, %c0_1] : memref<1x8x1xf32, #tpu.memory_space<vmem>>, vector<1x8x1xf32>
    %1 = vector.shape_cast %0 : vector<1x8x1xf32> to vector<8x1xf32>
    %c0_2 = arith.constant 0 : index
    %c0_3 = arith.constant 0 : index
    %c0_4 = arith.constant 0 : index
    %2 = vector.load %arg3[%c0_2, %c0_3, %c0_4] : memref<1x8x256xf32, #tpu.memory_space<vmem>>, vector<1x8x256xf32>
    %3 = vector.shape_cast %2 : vector<1x8x256xf32> to vector<8x256xf32>
    %4 = vector.broadcast %1 : vector<8x1xf32> to vector<8x256xf32>
    %5 = arith.addf %4, %3 : vector<8x256xf32>
    %cst = arith.constant 0.000000e+00 : f32
    %6 = vector.broadcast %cst : f32 to vector<8x512xf32>
    %c0_5 = arith.constant 0 : index
    %c0_6 = arith.constant 0 : index
    %7 = vector.load %arg7[%c0_5, %c0_6] : memref<8x512xf32, #tpu.memory_space<vmem>>, vector<8x512xf32>
    tpu.vector_store %arg7[%c0_5, %c0_6], %6 {strides = array<i32>} : memref<8x512xf32, #tpu.memory_space<vmem>>, vector<8x512xf32>,
    %c0_7 = arith.constant 0 : index
    %c128 = arith.constant 128 : index
    %8 = vector.load %arg7[%c0_7, %c128] : memref<8x512xf32, #tpu.memory_space<vmem>>, vector<8x256xf32>
    tpu.vector_store %arg7[%c0_7, %c128], %5 {strides = array<i32>} : memref<8x512xf32, #tpu.memory_space<vmem>>, vector<8x256xf32>,
    %c0_8 = arith.constant 0 : index
    %c0_9 = arith.constant 0 : index
    %9 = vector.load %arg1[%c0_8, %c0_9] : memref<2x256xf32, #tpu.memory_space<vmem>>, vector<1x256xf32>
    %c1 = arith.constant 1 : index
    %c0_10 = arith.constant 0 : index
    %10 = vector.load %arg1[%c1, %c0_10] : memref<2x256xf32, #tpu.memory_space<vmem>>, vector<1x256xf32>
    %c0_11 = arith.constant 0 : index
    %c111 = arith.constant 111 : index
    %11 = vector.load %arg7[%c0_11, %c111] : memref<8x512xf32, #tpu.memory_space<vmem>>, vector<8x256xf32>
    %12 = vector.broadcast %9 : vector<1x256xf32> to vector<8x256xf32>
    %13 = arith.mulf %11, %12 : vector<8x256xf32>
    %c0_12 = arith.constant 0 : index
    %c112 = arith.constant 112 : index
    %14 = vector.load %arg7[%c0_12, %c112] : memref<8x512xf32, #tpu.memory_space<vmem>>, vector<8x256xf32>
    %c0_13 = arith.constant 0 : index
    %c113 = arith.constant 113 : index
    %15 = vector.load %arg7[%c0_13, %c113] : memref<8x512xf32, #tpu.memory_space<vmem>>, vector<8x256xf32>
    %16 = vector.broadcast %10 : vector<1x256xf32> to vector<8x256xf32>
    %17 = arith.mulf %15, %16 : vector<8x256xf32>
    %c0_14 = arith.constant 0 : index
    %c127 = arith.constant 127 : index
    %18 = vector.load %arg7[%c0_14, %c127] : memref<8x512xf32, #tpu.memory_space<vmem>>, vector<8x256xf32>
    %19 = vector.broadcast %9 : vector<1x256xf32> to vector<8x256xf32>
    %20 = arith.mulf %18, %19 : vector<8x256xf32>
    %c0_15 = arith.constant 0 : index
    %c128_16 = arith.constant 128 : index
    %21 = vector.load %arg7[%c0_15, %c128_16] : memref<8x512xf32, #tpu.memory_space<vmem>>, vector<8x256xf32>
    %c0_17 = arith.constant 0 : index
    %c129 = arith.constant 129 : index
    %22 = vector.load %arg7[%c0_17, %c129] : memref<8x512xf32, #tpu.memory_space<vmem>>, vector<8x256xf32>
    %23 = vector.broadcast %10 : vector<1x256xf32> to vector<8x256xf32>
    %24 = arith.mulf %22, %23 : vector<8x256xf32>
    %c0_18 = arith.constant 0 : index
    %c143 = arith.constant 143 : index
    %25 = vector.load %arg7[%c0_18, %c143] : memref<8x512xf32, #tpu.memory_space<vmem>>, vector<8x256xf32>
    %26 = vector.broadcast %9 : vector<1x256xf32> to vector<8x256xf32>
    %27 = arith.mulf %25, %26 : vector<8x256xf32>
    %c0_19 = arith.constant 0 : index
    %c144 = arith.constant 144 : index
    %28 = vector.load %arg7[%c0_19, %c144] : memref<8x512xf32, #tpu.memory_space<vmem>>, vector<8x256xf32>
    %c0_20 = arith.constant 0 : index
    %c145 = arith.constant 145 : index
    %29 = vector.load %arg7[%c0_20, %c145] : memref<8x512xf32, #tpu.memory_space<vmem>>, vector<8x256xf32>
    %30 = vector.broadcast %10 : vector<1x256xf32> to vector<8x256xf32>
    %31 = arith.mulf %29, %30 : vector<8x256xf32>
    %32 = tpu.concatenate %13, %14, %17, %20, %21, %24, %27, %28, %31 in 0 : vector<8x256xf32>, vector<8x256xf32>, vector<8x256xf32>, vector<8x256xf32>, vector<8x256xf32>, vector<8x256xf32>, vector<8x256xf32>, vector<8x256xf32>, vector<8x256xf32> -> vector<72x256xf32>
    %c0_21 = arith.constant 0 : index
    %c0_22 = arith.constant 0 : index
    %33 = vector.load %arg4[%c0_21, %c0_22] : memref<8x72xf32, #tpu.memory_space<vmem>>, vector<8x72xf32>
    %cst_23 = arith.constant dense<0.000000e+00> : vector<8x256xf32>
    %34 = tpu.matmul %33, %32, %cst_23 {dimension_numbers = #tpu.dot_dimension_numbers<[1], [0], [0], [1], [0, 0, 1, 1], [], []>} : vector<8x72xf32>, vector<72x256xf32>, vector<8x256xf32> -> vector<8x256xf32>
    %cst_24 = arith.constant dense<0.000000e+00> : vector<8xf32>
    %35 = vector.multi_reduction <add>, %34, %cst_24 [1] : vector<8x256xf32> to vector<8xf32>
    %36 = vector.shape_cast %35 : vector<8xf32> to vector<8x1xf32>
    %c0_25 = arith.constant 0 : index
    %c0_26 = arith.constant 0 : index
    %c0_27 = arith.constant 0 : index
    %37 = vector.load %arg5[%c0_25, %c0_26, %c0_27] : memref<1x8x1xf32, #tpu.memory_space<vmem>>, vector<1x8x1xf32>
    %38 = vector.shape_cast %37 : vector<1x8x1xf32> to vector<8x1xf32>
    %39 = vector.shape_cast %36 : vector<8x1xf32> to vector<1x8x1xf32>
    tpu.vector_store %arg5[%c0_25, %c0_26, %c0_27], %39 {strides = array<i32>} : memref<1x8x1xf32, #tpu.memory_space<vmem>>, vector<1x8x1xf32>,
    %40 = arith.mulf %34, %34 : vector<8x256xf32>
    %cst_28 = arith.constant dense<0.000000e+00> : vector<8xf32>
    %41 = vector.multi_reduction <add>, %40, %cst_28 [1] : vector<8x256xf32> to vector<8xf32>
    %42 = vector.shape_cast %41 : vector<8xf32> to vector<8x1xf32>
    %c0_29 = arith.constant 0 : index
    %c0_30 = arith.constant 0 : index
    %c0_31 = arith.constant 0 : index
    %43 = vector.load %arg6[%c0_29, %c0_30, %c0_31] : memref<1x8x1xf32, #tpu.memory_space<vmem>>, vector<1x8x1xf32>
    %44 = vector.shape_cast %43 : vector<1x8x1xf32> to vector<8x1xf32>
    %45 = vector.shape_cast %42 : vector<8x1xf32> to vector<1x8x1xf32>
    tpu.vector_store %arg6[%c0_29, %c0_30, %c0_31], %45 {strides = array<i32>} : memref<1x8x1xf32, #tpu.memory_space<vmem>>, vector<1x8x1xf32>,
    return
  }
  func.func @transform_0(%arg0: i32) -> (i32, i32) {
    %c0_i32 = arith.constant 0 : i32
    %c0_i32_0 = arith.constant 0 : i32
    %c0_i32_1 = arith.constant 0 : i32
    return %c0_i32, %c0_i32_0 : i32, i32
  }
  func.func @transform_1(%arg0: i32) -> (i32, i32, i32) {
    %c0_i32 = arith.constant 0 : i32
    %c0_i32_0 = arith.constant 0 : i32
    %c0_i32_1 = arith.constant 0 : i32
    return %arg0, %c0_i32, %c0_i32_0 : i32, i32, i32
  }
  func.func @transform_2(%arg0: i32) -> (i32, i32, i32) {
    %c0_i32 = arith.constant 0 : i32
    %c0_i32_0 = arith.constant 0 : i32
    %c0_i32_1 = arith.constant 0 : i32
    return %arg0, %c0_i32, %c0_i32_0 : i32, i32, i32
  }
  func.func @transform_3(%arg0: i32) -> (i32, i32) {
    %c0_i32 = arith.constant 0 : i32
    %c0_i32_0 = arith.constant 0 : i32
    %c0_i32_1 = arith.constant 0 : i32
    return %c0_i32, %c0_i32_0 : i32, i32
  }
  func.func @transform_4(%arg0: i32) -> (i32, i32, i32) {
    %c0_i32 = arith.constant 0 : i32
    %c0_i32_0 = arith.constant 0 : i32
    %c0_i32_1 = arith.constant 0 : i32
    return %arg0, %c0_i32, %c0_i32_0 : i32, i32, i32
  }
  func.func @transform_5(%arg0: i32) -> (i32, i32, i32) {
    %c0_i32 = arith.constant 0 : i32
    %c0_i32_0 = arith.constant 0 : i32
    %c0_i32_1 = arith.constant 0 : i32
    return %arg0, %c0_i32, %c0_i32_0 : i32, i32, i32
  }
}

module attributes {stable_mosaic.version = 11 : i64} {
  func.func @_conv3x3_bn_gelu_kernel(%arg0: i32, %arg1: memref<2x256xf32, #tpu.memory_space<vmem>>, %arg2: memref<1x8x1xf32, #tpu.memory_space<vmem>>, %arg3: memref<1x8x256xf32, #tpu.memory_space<vmem>>, %arg4: memref<8x72xf32, #tpu.memory_space<vmem>>, %arg5: memref<8x1xf32, #tpu.memory_space<vmem>>, %arg6: memref<8x1xf32, #tpu.memory_space<vmem>>, %arg7: memref<1x8x256xf32, #tpu.memory_space<vmem>>, %arg8: memref<1x8x1xf32, #tpu.memory_space<vmem>>, %arg9: memref<1x8x1xf32, #tpu.memory_space<vmem>>, %arg10: memref<8x512xf32, #tpu.memory_space<vmem>>) attributes {dimension_semantics = [#tpu.dimension_semantics<parallel>], iteration_bounds = array<i64: 2>, scalar_prefetch = 0 : i64, scratch_operands = 1 : i64, tpu.core_type = #tpu.core_type<tc>, window_params = [{pipeline_mode = #tpu.pipeline_mode<synchronous>, transform_indices = @transform_0, window_bounds = array<i64: 2, 256>}, {transform_indices = @transform_1, window_bounds = array<i64: 1, 8, 1>}, {transform_indices = @transform_2, window_bounds = array<i64: 1, 8, 256>}, {pipeline_mode = #tpu.pipeline_mode<synchronous>, transform_indices = @transform_3, window_bounds = array<i64: 8, 72>}, {pipeline_mode = #tpu.pipeline_mode<synchronous>, transform_indices = @transform_4, window_bounds = array<i64: 8, 1>}, {pipeline_mode = #tpu.pipeline_mode<synchronous>, transform_indices = @transform_5, window_bounds = array<i64: 8, 1>}, {transform_indices = @transform_6, window_bounds = array<i64: 1, 8, 256>}, {transform_indices = @transform_7, window_bounds = array<i64: 1, 8, 1>}, {transform_indices = @transform_8, window_bounds = array<i64: 1, 8, 1>}]} {
    %c0 = arith.constant 0 : index
    %c0_0 = arith.constant 0 : index
    %c0_1 = arith.constant 0 : index
    %0 = vector.load %arg2[%c0, %c0_0, %c0_1] : memref<1x8x1xf32, #tpu.memory_space<vmem>>, vector<1x8x1xf32>
    %1 = vector.shape_cast %0 : vector<1x8x1xf32> to vector<8x1xf32>
    %c0_2 = arith.constant 0 : index
    %c0_3 = arith.constant 0 : index
    %c0_4 = arith.constant 0 : index
    %2 = vector.load %arg3[%c0_2, %c0_3, %c0_4] : memref<1x8x256xf32, #tpu.memory_space<vmem>>, vector<1x8x256xf32>
    %3 = vector.shape_cast %2 : vector<1x8x256xf32> to vector<8x256xf32>
    %4 = vector.broadcast %1 : vector<8x1xf32> to vector<8x256xf32>
    %5 = arith.addf %4, %3 : vector<8x256xf32>
    %cst = arith.constant 0.000000e+00 : f32
    %6 = vector.broadcast %cst : f32 to vector<8x512xf32>
    %c0_5 = arith.constant 0 : index
    %c0_6 = arith.constant 0 : index
    %7 = vector.load %arg10[%c0_5, %c0_6] : memref<8x512xf32, #tpu.memory_space<vmem>>, vector<8x512xf32>
    tpu.vector_store %arg10[%c0_5, %c0_6], %6 {strides = array<i32>} : memref<8x512xf32, #tpu.memory_space<vmem>>, vector<8x512xf32>,
    %c0_7 = arith.constant 0 : index
    %c128 = arith.constant 128 : index
    %8 = vector.load %arg10[%c0_7, %c128] : memref<8x512xf32, #tpu.memory_space<vmem>>, vector<8x256xf32>
    tpu.vector_store %arg10[%c0_7, %c128], %5 {strides = array<i32>} : memref<8x512xf32, #tpu.memory_space<vmem>>, vector<8x256xf32>,
    %c0_8 = arith.constant 0 : index
    %c0_9 = arith.constant 0 : index
    %9 = vector.load %arg1[%c0_8, %c0_9] : memref<2x256xf32, #tpu.memory_space<vmem>>, vector<1x256xf32>
    %c1 = arith.constant 1 : index
    %c0_10 = arith.constant 0 : index
    %10 = vector.load %arg1[%c1, %c0_10] : memref<2x256xf32, #tpu.memory_space<vmem>>, vector<1x256xf32>
    %c0_11 = arith.constant 0 : index
    %c111 = arith.constant 111 : index
    %11 = vector.load %arg10[%c0_11, %c111] : memref<8x512xf32, #tpu.memory_space<vmem>>, vector<8x256xf32>
    %12 = vector.broadcast %9 : vector<1x256xf32> to vector<8x256xf32>
    %13 = arith.mulf %11, %12 : vector<8x256xf32>
    %c0_12 = arith.constant 0 : index
    %c112 = arith.constant 112 : index
    %14 = vector.load %arg10[%c0_12, %c112] : memref<8x512xf32, #tpu.memory_space<vmem>>, vector<8x256xf32>
    %c0_13 = arith.constant 0 : index
    %c113 = arith.constant 113 : index
    %15 = vector.load %arg10[%c0_13, %c113] : memref<8x512xf32, #tpu.memory_space<vmem>>, vector<8x256xf32>
    %16 = vector.broadcast %10 : vector<1x256xf32> to vector<8x256xf32>
    %17 = arith.mulf %15, %16 : vector<8x256xf32>
    %c0_14 = arith.constant 0 : index
    %c127 = arith.constant 127 : index
    %18 = vector.load %arg10[%c0_14, %c127] : memref<8x512xf32, #tpu.memory_space<vmem>>, vector<8x256xf32>
    %19 = vector.broadcast %9 : vector<1x256xf32> to vector<8x256xf32>
    %20 = arith.mulf %18, %19 : vector<8x256xf32>
    %c0_15 = arith.constant 0 : index
    %c128_16 = arith.constant 128 : index
    %21 = vector.load %arg10[%c0_15, %c128_16] : memref<8x512xf32, #tpu.memory_space<vmem>>, vector<8x256xf32>
    %c0_17 = arith.constant 0 : index
    %c129 = arith.constant 129 : index
    %22 = vector.load %arg10[%c0_17, %c129] : memref<8x512xf32, #tpu.memory_space<vmem>>, vector<8x256xf32>
    %23 = vector.broadcast %10 : vector<1x256xf32> to vector<8x256xf32>
    %24 = arith.mulf %22, %23 : vector<8x256xf32>
    %c0_18 = arith.constant 0 : index
    %c143 = arith.constant 143 : index
    %25 = vector.load %arg10[%c0_18, %c143] : memref<8x512xf32, #tpu.memory_space<vmem>>, vector<8x256xf32>
    %26 = vector.broadcast %9 : vector<1x256xf32> to vector<8x256xf32>
    %27 = arith.mulf %25, %26 : vector<8x256xf32>
    %c0_19 = arith.constant 0 : index
    %c144 = arith.constant 144 : index
    %28 = vector.load %arg10[%c0_19, %c144] : memref<8x512xf32, #tpu.memory_space<vmem>>, vector<8x256xf32>
    %c0_20 = arith.constant 0 : index
    %c145 = arith.constant 145 : index
    %29 = vector.load %arg10[%c0_20, %c145] : memref<8x512xf32, #tpu.memory_space<vmem>>, vector<8x256xf32>
    %30 = vector.broadcast %10 : vector<1x256xf32> to vector<8x256xf32>
    %31 = arith.mulf %29, %30 : vector<8x256xf32>
    %32 = tpu.concatenate %13, %14, %17, %20, %21, %24, %27, %28, %31 in 0 : vector<8x256xf32>, vector<8x256xf32>, vector<8x256xf32>, vector<8x256xf32>, vector<8x256xf32>, vector<8x256xf32>, vector<8x256xf32>, vector<8x256xf32>, vector<8x256xf32> -> vector<72x256xf32>
    %c0_21 = arith.constant 0 : index
    %c0_22 = arith.constant 0 : index
    %33 = vector.load %arg4[%c0_21, %c0_22] : memref<8x72xf32, #tpu.memory_space<vmem>>, vector<8x72xf32>
    %cst_23 = arith.constant dense<0.000000e+00> : vector<8x256xf32>
    %34 = tpu.matmul %33, %32, %cst_23 {dimension_numbers = #tpu.dot_dimension_numbers<[1], [0], [0], [1], [0, 0, 1, 1], [], []>} : vector<8x72xf32>, vector<72x256xf32>, vector<8x256xf32> -> vector<8x256xf32>
    %c0_24 = arith.constant 0 : index
    %c0_25 = arith.constant 0 : index
    %35 = vector.load %arg5[%c0_24, %c0_25] : memref<8x1xf32, #tpu.memory_space<vmem>>, vector<8x1xf32>
    %36 = vector.broadcast %35 : vector<8x1xf32> to vector<8x256xf32>
    %37 = arith.mulf %34, %36 : vector<8x256xf32>
    %c0_26 = arith.constant 0 : index
    %c0_27 = arith.constant 0 : index
    %38 = vector.load %arg6[%c0_26, %c0_27] : memref<8x1xf32, #tpu.memory_space<vmem>>, vector<8x1xf32>
    %39 = vector.broadcast %38 : vector<8x1xf32> to vector<8x256xf32>
    %40 = arith.addf %37, %39 : vector<8x256xf32>
    %cst_28 = arith.constant 5.000000e-01 : f32
    %41 = vector.broadcast %cst_28 : f32 to vector<8x256xf32>
    %42 = arith.mulf %41, %40 : vector<8x256xf32>
    %cst_29 = arith.constant 4.471500e-02 : f32
    %43 = vector.broadcast %cst_29 : f32 to vector<8x256xf32>
    %44 = arith.mulf %43, %40 : vector<8x256xf32>
    %45 = arith.mulf %44, %40 : vector<8x256xf32>
    %46 = arith.mulf %45, %40 : vector<8x256xf32>
    %47 = arith.addf %40, %46 : vector<8x256xf32>
    %cst_30 = arith.constant 0.797884583 : f32
    %48 = vector.broadcast %cst_30 : f32 to vector<8x256xf32>
    %49 = arith.mulf %48, %47 : vector<8x256xf32>
    %50 = math.tanh %49 : vector<8x256xf32>
    %cst_31 = arith.constant 1.000000e+00 : f32
    %51 = vector.broadcast %cst_31 : f32 to vector<8x256xf32>
    %52 = arith.addf %51, %50 : vector<8x256xf32>
    %53 = arith.mulf %42, %52 : vector<8x256xf32>
    %c0_32 = arith.constant 0 : index
    %c0_33 = arith.constant 0 : index
    %c0_34 = arith.constant 0 : index
    %54 = vector.load %arg7[%c0_32, %c0_33, %c0_34] : memref<1x8x256xf32, #tpu.memory_space<vmem>>, vector<1x8x256xf32>
    %55 = vector.shape_cast %54 : vector<1x8x256xf32> to vector<8x256xf32>
    %56 = vector.shape_cast %53 : vector<8x256xf32> to vector<1x8x256xf32>
    tpu.vector_store %arg7[%c0_32, %c0_33, %c0_34], %56 {strides = array<i32>} : memref<1x8x256xf32, #tpu.memory_space<vmem>>, vector<1x8x256xf32>,
    %cst_35 = arith.constant dense<0.000000e+00> : vector<8xf32>
    %57 = vector.multi_reduction <add>, %53, %cst_35 [1] : vector<8x256xf32> to vector<8xf32>
    %58 = vector.shape_cast %57 : vector<8xf32> to vector<8x1xf32>
    %c0_36 = arith.constant 0 : index
    %c0_37 = arith.constant 0 : index
    %c0_38 = arith.constant 0 : index
    %59 = vector.load %arg8[%c0_36, %c0_37, %c0_38] : memref<1x8x1xf32, #tpu.memory_space<vmem>>, vector<1x8x1xf32>
    %60 = vector.shape_cast %59 : vector<1x8x1xf32> to vector<8x1xf32>
    %61 = vector.shape_cast %58 : vector<8x1xf32> to vector<1x8x1xf32>
    tpu.vector_store %arg8[%c0_36, %c0_37, %c0_38], %61 {strides = array<i32>} : memref<1x8x1xf32, #tpu.memory_space<vmem>>, vector<1x8x1xf32>,
    %62 = arith.mulf %53, %53 : vector<8x256xf32>
    %cst_39 = arith.constant dense<0.000000e+00> : vector<8xf32>
    %63 = vector.multi_reduction <add>, %62, %cst_39 [1] : vector<8x256xf32> to vector<8xf32>
    %64 = vector.shape_cast %63 : vector<8xf32> to vector<8x1xf32>
    %c0_40 = arith.constant 0 : index
    %c0_41 = arith.constant 0 : index
    %c0_42 = arith.constant 0 : index
    %65 = vector.load %arg9[%c0_40, %c0_41, %c0_42] : memref<1x8x1xf32, #tpu.memory_space<vmem>>, vector<1x8x1xf32>
    %66 = vector.shape_cast %65 : vector<1x8x1xf32> to vector<8x1xf32>
    %67 = vector.shape_cast %64 : vector<8x1xf32> to vector<1x8x1xf32>
    tpu.vector_store %arg9[%c0_40, %c0_41, %c0_42], %67 {strides = array<i32>} : memref<1x8x1xf32, #tpu.memory_space<vmem>>, vector<1x8x1xf32>,
    return
  }
  func.func @transform_0(%arg0: i32) -> (i32, i32) {
    %c0_i32 = arith.constant 0 : i32
    %c0_i32_0 = arith.constant 0 : i32
    %c0_i32_1 = arith.constant 0 : i32
    return %c0_i32, %c0_i32_0 : i32, i32
  }
  func.func @transform_1(%arg0: i32) -> (i32, i32, i32) {
    %c0_i32 = arith.constant 0 : i32
    %c0_i32_0 = arith.constant 0 : i32
    %c0_i32_1 = arith.constant 0 : i32
    return %arg0, %c0_i32, %c0_i32_0 : i32, i32, i32
  }
  func.func @transform_2(%arg0: i32) -> (i32, i32, i32) {
    %c0_i32 = arith.constant 0 : i32
    %c0_i32_0 = arith.constant 0 : i32
    %c0_i32_1 = arith.constant 0 : i32
    return %arg0, %c0_i32, %c0_i32_0 : i32, i32, i32
  }
  func.func @transform_3(%arg0: i32) -> (i32, i32) {
    %c0_i32 = arith.constant 0 : i32
    %c0_i32_0 = arith.constant 0 : i32
    %c0_i32_1 = arith.constant 0 : i32
    return %c0_i32, %c0_i32_0 : i32, i32
  }
  func.func @transform_4(%arg0: i32) -> (i32, i32) {
    %c0_i32 = arith.constant 0 : i32
    %c0_i32_0 = arith.constant 0 : i32
    %c0_i32_1 = arith.constant 0 : i32
    return %c0_i32, %c0_i32_0 : i32, i32
  }
  func.func @transform_5(%arg0: i32) -> (i32, i32) {
    %c0_i32 = arith.constant 0 : i32
    %c0_i32_0 = arith.constant 0 : i32
    %c0_i32_1 = arith.constant 0 : i32
    return %c0_i32, %c0_i32_0 : i32, i32
  }
  func.func @transform_6(%arg0: i32) -> (i32, i32, i32) {
    %c0_i32 = arith.constant 0 : i32
    %c0_i32_0 = arith.constant 0 : i32
    %c0_i32_1 = arith.constant 0 : i32
    return %arg0, %c0_i32, %c0_i32_0 : i32, i32, i32
  }
  func.func @transform_7(%arg0: i32) -> (i32, i32, i32) {
    %c0_i32 = arith.constant 0 : i32
    %c0_i32_0 = arith.constant 0 : i32
    %c0_i32_1 = arith.constant 0 : i32
    return %arg0, %c0_i32, %c0_i32_0 : i32, i32, i32
  }
  func.func @transform_8(%arg0: i32) -> (i32, i32, i32) {
    %c0_i32 = arith.constant 0 : i32
    %c0_i32_0 = arith.constant 0 : i32
    %c0_i32_1 = arith.constant 0 : i32
    return %arg0, %c0_i32, %c0_i32_0 : i32, i32, i32
  }
}

module attributes {stable_mosaic.version = 11 : i64} {
  func.func @_bn_gelu_matmul_kernel(%arg0: i32, %arg1: i32, %arg2: memref<1x8x256xf32, #tpu.memory_space<vmem>>, %arg3: memref<1x8x256xf32, #tpu.memory_space<vmem>>, %arg4: memref<1x8x256xf32, #tpu.memory_space<vmem>>, %arg5: memref<1x8x256xf32, #tpu.memory_space<vmem>>, %arg6: memref<1x8x256xf32, #tpu.memory_space<vmem>>, %arg7: memref<40x1xf32, #tpu.memory_space<vmem>>, %arg8: memref<40x1xf32, #tpu.memory_space<vmem>>, %arg9: memref<16x40xf32, #tpu.memory_space<vmem>>, %arg10: memref<1x16x256xf32, #tpu.memory_space<vmem>>, %arg11: memref<1x16x1xf32, #tpu.memory_space<vmem>>) attributes {dimension_semantics = [#tpu.dimension_semantics<parallel>, #tpu.dimension_semantics<arbitrary>], iteration_bounds = array<i64: 2, 1>, scalar_prefetch = 0 : i64, scratch_operands = 0 : i64, tpu.core_type = #tpu.core_type<tc>, window_params = [{transform_indices = @transform_0, window_bounds = array<i64: 1, 8, 256>}, {transform_indices = @transform_1, window_bounds = array<i64: 1, 8, 256>}, {transform_indices = @transform_2, window_bounds = array<i64: 1, 8, 256>}, {transform_indices = @transform_3, window_bounds = array<i64: 1, 8, 256>}, {transform_indices = @transform_4, window_bounds = array<i64: 1, 8, 256>}, {pipeline_mode = #tpu.pipeline_mode<synchronous>, transform_indices = @transform_5, window_bounds = array<i64: 40, 1>}, {pipeline_mode = #tpu.pipeline_mode<synchronous>, transform_indices = @transform_6, window_bounds = array<i64: 40, 1>}, {pipeline_mode = #tpu.pipeline_mode<synchronous>, transform_indices = @transform_7, window_bounds = array<i64: 16, 40>}, {transform_indices = @transform_8, window_bounds = array<i64: 1, 16, 256>}, {transform_indices = @transform_9, window_bounds = array<i64: 1, 16, 1>}]} {
    %c0_i32 = arith.constant 0 : i32
    %0 = arith.cmpi eq, %arg1, %c0_i32 : i32
    %1 = arith.extui %0 : i1 to i32
    %c0_i32_0 = arith.constant 0 : i32
    %2 = arith.cmpi ne, %1, %c0_i32_0 : i32
    scf.if %2 {
      %cst_35 = arith.constant 0.000000e+00 : f32
      %46 = vector.broadcast %cst_35 : f32 to vector<16x1xf32>
      %c0_36 = arith.constant 0 : index
      %c0_37 = arith.constant 0 : index
      %c0_38 = arith.constant 0 : index
      %47 = vector.load %arg11[%c0_36, %c0_37, %c0_38] : memref<1x16x1xf32, #tpu.memory_space<vmem>>, vector<1x16x1xf32>
      %48 = vector.shape_cast %47 : vector<1x16x1xf32> to vector<16x1xf32>
      %49 = vector.shape_cast %46 : vector<16x1xf32> to vector<1x16x1xf32>
      tpu.vector_store %arg11[%c0_36, %c0_37, %c0_38], %49 {strides = array<i32>} : memref<1x16x1xf32, #tpu.memory_space<vmem>>, vector<1x16x1xf32>,
    } else {
    }
    %c0 = arith.constant 0 : index
    %c0_1 = arith.constant 0 : index
    %c0_2 = arith.constant 0 : index
    %3 = vector.load %arg2[%c0, %c0_1, %c0_2] : memref<1x8x256xf32, #tpu.memory_space<vmem>>, vector<1x8x256xf32>
    %4 = vector.shape_cast %3 : vector<1x8x256xf32> to vector<8x256xf32>
    %c0_3 = arith.constant 0 : index
    %c0_4 = arith.constant 0 : index
    %c0_5 = arith.constant 0 : index
    %5 = vector.load %arg3[%c0_3, %c0_4, %c0_5] : memref<1x8x256xf32, #tpu.memory_space<vmem>>, vector<1x8x256xf32>
    %6 = vector.shape_cast %5 : vector<1x8x256xf32> to vector<8x256xf32>
    %c0_6 = arith.constant 0 : index
    %c0_7 = arith.constant 0 : index
    %c0_8 = arith.constant 0 : index
    %7 = vector.load %arg4[%c0_6, %c0_7, %c0_8] : memref<1x8x256xf32, #tpu.memory_space<vmem>>, vector<1x8x256xf32>
    %8 = vector.shape_cast %7 : vector<1x8x256xf32> to vector<8x256xf32>
    %c0_9 = arith.constant 0 : index
    %c0_10 = arith.constant 0 : index
    %c0_11 = arith.constant 0 : index
    %9 = vector.load %arg5[%c0_9, %c0_10, %c0_11] : memref<1x8x256xf32, #tpu.memory_space<vmem>>, vector<1x8x256xf32>
    %10 = vector.shape_cast %9 : vector<1x8x256xf32> to vector<8x256xf32>
    %c0_12 = arith.constant 0 : index
    %c0_13 = arith.constant 0 : index
    %c0_14 = arith.constant 0 : index
    %11 = vector.load %arg6[%c0_12, %c0_13, %c0_14] : memref<1x8x256xf32, #tpu.memory_space<vmem>>, vector<1x8x256xf32>
    %12 = vector.shape_cast %11 : vector<1x8x256xf32> to vector<8x256xf32>
    %13 = tpu.concatenate %4, %6, %8, %10, %12 in 0 : vector<8x256xf32>, vector<8x256xf32>, vector<8x256xf32>, vector<8x256xf32>, vector<8x256xf32> -> vector<40x256xf32>
    %c0_15 = arith.constant 0 : index
    %c0_16 = arith.constant 0 : index
    %14 = vector.load %arg7[%c0_15, %c0_16] : memref<40x1xf32, #tpu.memory_space<vmem>>, vector<40x1xf32>
    %15 = vector.broadcast %14 : vector<40x1xf32> to vector<40x256xf32>
    %16 = arith.mulf %13, %15 : vector<40x256xf32>
    %c0_17 = arith.constant 0 : index
    %c0_18 = arith.constant 0 : index
    %17 = vector.load %arg8[%c0_17, %c0_18] : memref<40x1xf32, #tpu.memory_space<vmem>>, vector<40x1xf32>
    %18 = vector.broadcast %17 : vector<40x1xf32> to vector<40x256xf32>
    %19 = arith.addf %16, %18 : vector<40x256xf32>
    %cst = arith.constant 5.000000e-01 : f32
    %20 = vector.broadcast %cst : f32 to vector<40x256xf32>
    %21 = arith.mulf %20, %19 : vector<40x256xf32>
    %cst_19 = arith.constant 4.471500e-02 : f32
    %22 = vector.broadcast %cst_19 : f32 to vector<40x256xf32>
    %23 = arith.mulf %22, %19 : vector<40x256xf32>
    %24 = arith.mulf %23, %19 : vector<40x256xf32>
    %25 = arith.mulf %24, %19 : vector<40x256xf32>
    %26 = arith.addf %19, %25 : vector<40x256xf32>
    %cst_20 = arith.constant 0.797884583 : f32
    %27 = vector.broadcast %cst_20 : f32 to vector<40x256xf32>
    %28 = arith.mulf %27, %26 : vector<40x256xf32>
    %29 = math.tanh %28 : vector<40x256xf32>
    %cst_21 = arith.constant 1.000000e+00 : f32
    %30 = vector.broadcast %cst_21 : f32 to vector<40x256xf32>
    %31 = arith.addf %30, %29 : vector<40x256xf32>
    %32 = arith.mulf %21, %31 : vector<40x256xf32>
    %c0_22 = arith.constant 0 : index
    %c0_23 = arith.constant 0 : index
    %33 = vector.load %arg9[%c0_22, %c0_23] : memref<16x40xf32, #tpu.memory_space<vmem>>, vector<16x40xf32>
    %cst_24 = arith.constant dense<0.000000e+00> : vector<16x256xf32>
    %34 = tpu.matmul %33, %32, %cst_24 {dimension_numbers = #tpu.dot_dimension_numbers<[1], [0], [0], [1], [0, 0, 1, 1], [], []>} : vector<16x40xf32>, vector<40x256xf32>, vector<16x256xf32> -> vector<16x256xf32>
    %c0_25 = arith.constant 0 : index
    %c0_26 = arith.constant 0 : index
    %c0_27 = arith.constant 0 : index
    %35 = vector.load %arg10[%c0_25, %c0_26, %c0_27] : memref<1x16x256xf32, #tpu.memory_space<vmem>>, vector<1x16x256xf32>
    %36 = vector.shape_cast %35 : vector<1x16x256xf32> to vector<16x256xf32>
    %37 = vector.shape_cast %34 : vector<16x256xf32> to vector<1x16x256xf32>
    tpu.vector_store %arg10[%c0_25, %c0_26, %c0_27], %37 {strides = array<i32>} : memref<1x16x256xf32, #tpu.memory_space<vmem>>, vector<1x16x256xf32>,
    %c0_28 = arith.constant 0 : index
    %c0_29 = arith.constant 0 : index
    %c0_30 = arith.constant 0 : index
    %38 = vector.load %arg11[%c0_28, %c0_29, %c0_30] : memref<1x16x1xf32, #tpu.memory_space<vmem>>, vector<1x16x1xf32>
    %39 = vector.shape_cast %38 : vector<1x16x1xf32> to vector<16x1xf32>
    %cst_31 = arith.constant dense<0.000000e+00> : vector<16xf32>
    %40 = vector.multi_reduction <add>, %34, %cst_31 [1] : vector<16x256xf32> to vector<16xf32>
    %41 = vector.shape_cast %40 : vector<16xf32> to vector<16x1xf32>
    %42 = arith.addf %39, %41 : vector<16x1xf32>
    %c0_32 = arith.constant 0 : index
    %c0_33 = arith.constant 0 : index
    %c0_34 = arith.constant 0 : index
    %43 = vector.load %arg11[%c0_32, %c0_33, %c0_34] : memref<1x16x1xf32, #tpu.memory_space<vmem>>, vector<1x16x1xf32>
    %44 = vector.shape_cast %43 : vector<1x16x1xf32> to vector<16x1xf32>
    %45 = vector.shape_cast %42 : vector<16x1xf32> to vector<1x16x1xf32>
    tpu.vector_store %arg11[%c0_32, %c0_33, %c0_34], %45 {strides = array<i32>} : memref<1x16x1xf32, #tpu.memory_space<vmem>>, vector<1x16x1xf32>,
    return
  }
  func.func @transform_0(%arg0: i32, %arg1: i32) -> (i32, i32, i32) {
    %c0_i32 = arith.constant 0 : i32
    %c0_i32_0 = arith.constant 0 : i32
    return %arg0, %c0_i32, %arg1 : i32, i32, i32
  }
  func.func @transform_1(%arg0: i32, %arg1: i32) -> (i32, i32, i32) {
    %c0_i32 = arith.constant 0 : i32
    %c0_i32_0 = arith.constant 0 : i32
    return %arg0, %c0_i32, %arg1 : i32, i32, i32
  }
  func.func @transform_2(%arg0: i32, %arg1: i32) -> (i32, i32, i32) {
    %c0_i32 = arith.constant 0 : i32
    %c0_i32_0 = arith.constant 0 : i32
    return %arg0, %c0_i32, %arg1 : i32, i32, i32
  }
  func.func @transform_3(%arg0: i32, %arg1: i32) -> (i32, i32, i32) {
    %c0_i32 = arith.constant 0 : i32
    %c0_i32_0 = arith.constant 0 : i32
    return %arg0, %c0_i32, %arg1 : i32, i32, i32
  }
  func.func @transform_4(%arg0: i32, %arg1: i32) -> (i32, i32, i32) {
    %c0_i32 = arith.constant 0 : i32
    %c0_i32_0 = arith.constant 0 : i32
    return %arg0, %c0_i32, %arg1 : i32, i32, i32
  }
  func.func @transform_5(%arg0: i32, %arg1: i32) -> (i32, i32) {
    %c0_i32 = arith.constant 0 : i32
    %c0_i32_0 = arith.constant 0 : i32
    %c0_i32_1 = arith.constant 0 : i32
    return %c0_i32, %c0_i32_0 : i32, i32
  }
  func.func @transform_6(%arg0: i32, %arg1: i32) -> (i32, i32) {
    %c0_i32 = arith.constant 0 : i32
    %c0_i32_0 = arith.constant 0 : i32
    %c0_i32_1 = arith.constant 0 : i32
    return %c0_i32, %c0_i32_0 : i32, i32
  }
  func.func @transform_7(%arg0: i32, %arg1: i32) -> (i32, i32) {
    %c0_i32 = arith.constant 0 : i32
    %c0_i32_0 = arith.constant 0 : i32
    %c0_i32_1 = arith.constant 0 : i32
    return %c0_i32, %c0_i32_0 : i32, i32
  }
  func.func @transform_8(%arg0: i32, %arg1: i32) -> (i32, i32, i32) {
    %c0_i32 = arith.constant 0 : i32
    %c0_i32_0 = arith.constant 0 : i32
    return %arg0, %c0_i32, %arg1 : i32, i32, i32
  }
  func.func @transform_9(%arg0: i32, %arg1: i32) -> (i32, i32, i32) {
    %c0_i32 = arith.constant 0 : i32
    %c0_i32_0 = arith.constant 0 : i32
    %c0_i32_1 = arith.constant 0 : i32
    return %arg0, %c0_i32, %c0_i32_0 : i32, i32, i32
  }
}

module attributes {stable_mosaic.version = 11 : i64} {
  func.func @_bn_gelu_matmul_kernel(%arg0: i32, %arg1: i32, %arg2: memref<1x4x256xf32, #tpu.memory_space<vmem>>, %arg3: memref<4x1xf32, #tpu.memory_space<vmem>>, %arg4: memref<4x1xf32, #tpu.memory_space<vmem>>, %arg5: memref<16x4xf32, #tpu.memory_space<vmem>>, %arg6: memref<1x16x256xf32, #tpu.memory_space<vmem>>, %arg7: memref<1x16x1xf32, #tpu.memory_space<vmem>>) attributes {dimension_semantics = [#tpu.dimension_semantics<parallel>, #tpu.dimension_semantics<arbitrary>], iteration_bounds = array<i64: 2, 1>, scalar_prefetch = 0 : i64, scratch_operands = 0 : i64, tpu.core_type = #tpu.core_type<tc>, window_params = [{transform_indices = @transform_0, window_bounds = array<i64: 1, 4, 256>}, {pipeline_mode = #tpu.pipeline_mode<synchronous>, transform_indices = @transform_1, window_bounds = array<i64: 4, 1>}, {pipeline_mode = #tpu.pipeline_mode<synchronous>, transform_indices = @transform_2, window_bounds = array<i64: 4, 1>}, {pipeline_mode = #tpu.pipeline_mode<synchronous>, transform_indices = @transform_3, window_bounds = array<i64: 16, 4>}, {transform_indices = @transform_4, window_bounds = array<i64: 1, 16, 256>}, {transform_indices = @transform_5, window_bounds = array<i64: 1, 16, 1>}]} {
    %c0_i32 = arith.constant 0 : i32
    %0 = arith.cmpi eq, %arg1, %c0_i32 : i32
    %1 = arith.extui %0 : i1 to i32
    %c0_i32_0 = arith.constant 0 : i32
    %2 = arith.cmpi ne, %1, %c0_i32_0 : i32
    scf.if %2 {
      %cst_22 = arith.constant 0.000000e+00 : f32
      %59 = vector.broadcast %cst_22 : f32 to vector<16x1xf32>
      %c0_23 = arith.constant 0 : index
      %c0_24 = arith.constant 0 : index
      %c0_25 = arith.constant 0 : index
      %60 = vector.load %arg7[%c0_23, %c0_24, %c0_25] : memref<1x16x1xf32, #tpu.memory_space<vmem>>, vector<1x16x1xf32>
      %61 = vector.shape_cast %60 : vector<1x16x1xf32> to vector<16x1xf32>
      %62 = vector.shape_cast %59 : vector<16x1xf32> to vector<1x16x1xf32>
      tpu.vector_store %arg7[%c0_23, %c0_24, %c0_25], %62 {strides = array<i32>} : memref<1x16x1xf32, #tpu.memory_space<vmem>>, vector<1x16x1xf32>,
    } else {
    }
    %c0 = arith.constant 0 : index
    %c0_1 = arith.constant 0 : index
    %c0_2 = arith.constant 0 : index
    %3 = vector.load %arg2[%c0, %c0_1, %c0_2] : memref<1x4x256xf32, #tpu.memory_space<vmem>>, vector<1x4x256xf32>
    %4 = vector.shape_cast %3 : vector<1x4x256xf32> to vector<4x256xf32>
    %c0_3 = arith.constant 0 : index
    %c0_4 = arith.constant 0 : index
    %5 = vector.load %arg3[%c0_3, %c0_4] : memref<4x1xf32, #tpu.memory_space<vmem>>, vector<4x1xf32>
    %6 = vector.broadcast %5 : vector<4x1xf32> to vector<4x256xf32>
    %7 = arith.mulf %4, %6 : vector<4x256xf32>
    %c0_5 = arith.constant 0 : index
    %c0_6 = arith.constant 0 : index
    %8 = vector.load %arg4[%c0_5, %c0_6] : memref<4x1xf32, #tpu.memory_space<vmem>>, vector<4x1xf32>
    %9 = vector.broadcast %8 : vector<4x1xf32> to vector<4x256xf32>
    %10 = arith.addf %7, %9 : vector<4x256xf32>
    %cst = arith.constant 5.000000e-01 : f32
    %11 = vector.broadcast %cst : f32 to vector<4x256xf32>
    %12 = arith.mulf %11, %10 : vector<4x256xf32>
    %cst_7 = arith.constant 4.471500e-02 : f32
    %13 = vector.broadcast %cst_7 : f32 to vector<4x256xf32>
    %14 = arith.mulf %13, %10 : vector<4x256xf32>
    %15 = arith.mulf %14, %10 : vector<4x256xf32>
    %16 = arith.mulf %15, %10 : vector<4x256xf32>
    %17 = arith.addf %10, %16 : vector<4x256xf32>
    %cst_8 = arith.constant 0.797884583 : f32
    %18 = vector.broadcast %cst_8 : f32 to vector<4x256xf32>
    %19 = arith.mulf %18, %17 : vector<4x256xf32>
    %20 = math.tanh %19 : vector<4x256xf32>
    %cst_9 = arith.constant 1.000000e+00 : f32
    %21 = vector.broadcast %cst_9 : f32 to vector<4x256xf32>
    %22 = arith.addf %21, %20 : vector<4x256xf32>
    %23 = arith.mulf %12, %22 : vector<4x256xf32>
    %c0_10 = arith.constant 0 : index
    %c0_11 = arith.constant 0 : index
    %24 = vector.load %arg5[%c0_10, %c0_11] : memref<16x4xf32, #tpu.memory_space<vmem>>, vector<16x4xf32>
    %25 = vector.extract_strided_slice %24 {offsets = [0, 0], sizes = [16, 1], strides = [1, 1]} : vector<16x4xf32> to vector<16x1xf32>
    %26 = vector.extract_strided_slice %23 {offsets = [0, 0], sizes = [1, 256], strides = [1, 1]} : vector<4x256xf32> to vector<1x256xf32>
    %27 = vector.broadcast %25 : vector<16x1xf32> to vector<16x256xf32>
    %28 = vector.broadcast %26 : vector<1x256xf32> to vector<16x256xf32>
    %29 = arith.mulf %27, %28 : vector<16x256xf32>
    %30 = vector.extract_strided_slice %24 {offsets = [0, 1], sizes = [16, 1], strides = [1, 1]} : vector<16x4xf32> to vector<16x1xf32>
    %31 = vector.extract_strided_slice %23 {offsets = [1, 0], sizes = [1, 256], strides = [1, 1]} : vector<4x256xf32> to vector<1x256xf32>
    %32 = vector.broadcast %30 : vector<16x1xf32> to vector<16x256xf32>
    %33 = vector.broadcast %31 : vector<1x256xf32> to vector<16x256xf32>
    %34 = arith.mulf %32, %33 : vector<16x256xf32>
    %35 = arith.addf %29, %34 : vector<16x256xf32>
    %36 = vector.extract_strided_slice %24 {offsets = [0, 2], sizes = [16, 1], strides = [1, 1]} : vector<16x4xf32> to vector<16x1xf32>
    %37 = vector.extract_strided_slice %23 {offsets = [2, 0], sizes = [1, 256], strides = [1, 1]} : vector<4x256xf32> to vector<1x256xf32>
    %38 = vector.broadcast %36 : vector<16x1xf32> to vector<16x256xf32>
    %39 = vector.broadcast %37 : vector<1x256xf32> to vector<16x256xf32>
    %40 = arith.mulf %38, %39 : vector<16x256xf32>
    %41 = arith.addf %35, %40 : vector<16x256xf32>
    %42 = vector.extract_strided_slice %24 {offsets = [0, 3], sizes = [16, 1], strides = [1, 1]} : vector<16x4xf32> to vector<16x1xf32>
    %43 = vector.extract_strided_slice %23 {offsets = [3, 0], sizes = [1, 256], strides = [1, 1]} : vector<4x256xf32> to vector<1x256xf32>
    %44 = vector.broadcast %42 : vector<16x1xf32> to vector<16x256xf32>
    %45 = vector.broadcast %43 : vector<1x256xf32> to vector<16x256xf32>
    %46 = arith.mulf %44, %45 : vector<16x256xf32>
    %47 = arith.addf %41, %46 : vector<16x256xf32>
    %c0_12 = arith.constant 0 : index
    %c0_13 = arith.constant 0 : index
    %c0_14 = arith.constant 0 : index
    %48 = vector.load %arg6[%c0_12, %c0_13, %c0_14] : memref<1x16x256xf32, #tpu.memory_space<vmem>>, vector<1x16x256xf32>
    %49 = vector.shape_cast %48 : vector<1x16x256xf32> to vector<16x256xf32>
    %50 = vector.shape_cast %47 : vector<16x256xf32> to vector<1x16x256xf32>
    tpu.vector_store %arg6[%c0_12, %c0_13, %c0_14], %50 {strides = array<i32>} : memref<1x16x256xf32, #tpu.memory_space<vmem>>, vector<1x16x256xf32>,
    %c0_15 = arith.constant 0 : index
    %c0_16 = arith.constant 0 : index
    %c0_17 = arith.constant 0 : index
    %51 = vector.load %arg7[%c0_15, %c0_16, %c0_17] : memref<1x16x1xf32, #tpu.memory_space<vmem>>, vector<1x16x1xf32>
    %52 = vector.shape_cast %51 : vector<1x16x1xf32> to vector<16x1xf32>
    %cst_18 = arith.constant dense<0.000000e+00> : vector<16xf32>
    %53 = vector.multi_reduction <add>, %47, %cst_18 [1] : vector<16x256xf32> to vector<16xf32>
    %54 = vector.shape_cast %53 : vector<16xf32> to vector<16x1xf32>
    %55 = arith.addf %52, %54 : vector<16x1xf32>
    %c0_19 = arith.constant 0 : index
    %c0_20 = arith.constant 0 : index
    %c0_21 = arith.constant 0 : index
    %56 = vector.load %arg7[%c0_19, %c0_20, %c0_21] : memref<1x16x1xf32, #tpu.memory_space<vmem>>, vector<1x16x1xf32>
    %57 = vector.shape_cast %56 : vector<1x16x1xf32> to vector<16x1xf32>
    %58 = vector.shape_cast %55 : vector<16x1xf32> to vector<1x16x1xf32>
    tpu.vector_store %arg7[%c0_19, %c0_20, %c0_21], %58 {strides = array<i32>} : memref<1x16x1xf32, #tpu.memory_space<vmem>>, vector<1x16x1xf32>,
    return
  }
  func.func @transform_0(%arg0: i32, %arg1: i32) -> (i32, i32, i32) {
    %c0_i32 = arith.constant 0 : i32
    %c0_i32_0 = arith.constant 0 : i32
    return %arg0, %c0_i32, %arg1 : i32, i32, i32
  }
  func.func @transform_1(%arg0: i32, %arg1: i32) -> (i32, i32) {
    %c0_i32 = arith.constant 0 : i32
    %c0_i32_0 = arith.constant 0 : i32
    %c0_i32_1 = arith.constant 0 : i32
    return %c0_i32, %c0_i32_0 : i32, i32
  }
  func.func @transform_2(%arg0: i32, %arg1: i32) -> (i32, i32) {
    %c0_i32 = arith.constant 0 : i32
    %c0_i32_0 = arith.constant 0 : i32
    %c0_i32_1 = arith.constant 0 : i32
    return %c0_i32, %c0_i32_0 : i32, i32
  }
  func.func @transform_3(%arg0: i32, %arg1: i32) -> (i32, i32) {
    %c0_i32 = arith.constant 0 : i32
    %c0_i32_0 = arith.constant 0 : i32
    %c0_i32_1 = arith.constant 0 : i32
    return %c0_i32, %c0_i32_0 : i32, i32
  }
  func.func @transform_4(%arg0: i32, %arg1: i32) -> (i32, i32, i32) {
    %c0_i32 = arith.constant 0 : i32
    %c0_i32_0 = arith.constant 0 : i32
    return %arg0, %c0_i32, %arg1 : i32, i32, i32
  }
  func.func @transform_5(%arg0: i32, %arg1: i32) -> (i32, i32, i32) {
    %c0_i32 = arith.constant 0 : i32
    %c0_i32_0 = arith.constant 0 : i32
    %c0_i32_1 = arith.constant 0 : i32
    return %arg0, %c0_i32, %c0_i32_0 : i32, i32, i32
  }
}

module attributes {stable_mosaic.version = 11 : i64} {
  func.func @_attn_combine_kernel(%arg0: i32, %arg1: i32, %arg2: memref<1x16x256xf32, #tpu.memory_space<vmem>>, %arg3: memref<1x16x256xf32, #tpu.memory_space<vmem>>, %arg4: memref<1x16x1xf32, #tpu.memory_space<vmem>>, %arg5: memref<1x16x1xf32, #tpu.memory_space<vmem>>, %arg6: memref<1x16x256xf32, #tpu.memory_space<vmem>>) attributes {dimension_semantics = [#tpu.dimension_semantics<parallel>, #tpu.dimension_semantics<parallel>], iteration_bounds = array<i64: 2, 1>, scalar_prefetch = 0 : i64, scratch_operands = 0 : i64, tpu.core_type = #tpu.core_type<tc>, window_params = [{transform_indices = @transform_0, window_bounds = array<i64: 1, 16, 256>}, {transform_indices = @transform_1, window_bounds = array<i64: 1, 16, 256>}, {transform_indices = @transform_2, window_bounds = array<i64: 1, 16, 1>}, {transform_indices = @transform_3, window_bounds = array<i64: 1, 16, 1>}, {transform_indices = @transform_4, window_bounds = array<i64: 1, 16, 256>}]} {
    %c0 = arith.constant 0 : index
    %c0_0 = arith.constant 0 : index
    %c0_1 = arith.constant 0 : index
    %0 = vector.load %arg2[%c0, %c0_0, %c0_1] : memref<1x16x256xf32, #tpu.memory_space<vmem>>, vector<1x16x256xf32>
    %1 = vector.shape_cast %0 : vector<1x16x256xf32> to vector<16x256xf32>
    %c0_2 = arith.constant 0 : index
    %c0_3 = arith.constant 0 : index
    %c0_4 = arith.constant 0 : index
    %2 = vector.load %arg4[%c0_2, %c0_3, %c0_4] : memref<1x16x1xf32, #tpu.memory_space<vmem>>, vector<1x16x1xf32>
    %3 = vector.shape_cast %2 : vector<1x16x1xf32> to vector<16x1xf32>
    %4 = vector.broadcast %3 : vector<16x1xf32> to vector<16x256xf32>
    %5 = arith.mulf %1, %4 : vector<16x256xf32>
    %c0_5 = arith.constant 0 : index
    %c0_6 = arith.constant 0 : index
    %c0_7 = arith.constant 0 : index
    %6 = vector.load %arg3[%c0_5, %c0_6, %c0_7] : memref<1x16x256xf32, #tpu.memory_space<vmem>>, vector<1x16x256xf32>
    %7 = vector.shape_cast %6 : vector<1x16x256xf32> to vector<16x256xf32>
    %c0_8 = arith.constant 0 : index
    %c0_9 = arith.constant 0 : index
    %c0_10 = arith.constant 0 : index
    %8 = vector.load %arg5[%c0_8, %c0_9, %c0_10] : memref<1x16x1xf32, #tpu.memory_space<vmem>>, vector<1x16x1xf32>
    %9 = vector.shape_cast %8 : vector<1x16x1xf32> to vector<16x1xf32>
    %10 = vector.broadcast %9 : vector<16x1xf32> to vector<16x256xf32>
    %11 = arith.mulf %7, %10 : vector<16x256xf32>
    %12 = arith.addf %5, %11 : vector<16x256xf32>
    %c0_11 = arith.constant 0 : index
    %c0_12 = arith.constant 0 : index
    %c0_13 = arith.constant 0 : index
    %13 = vector.load %arg6[%c0_11, %c0_12, %c0_13] : memref<1x16x256xf32, #tpu.memory_space<vmem>>, vector<1x16x256xf32>
    %14 = vector.shape_cast %13 : vector<1x16x256xf32> to vector<16x256xf32>
    %15 = vector.shape_cast %12 : vector<16x256xf32> to vector<1x16x256xf32>
    tpu.vector_store %arg6[%c0_11, %c0_12, %c0_13], %15 {strides = array<i32>} : memref<1x16x256xf32, #tpu.memory_space<vmem>>, vector<1x16x256xf32>,
    return
  }
  func.func @transform_0(%arg0: i32, %arg1: i32) -> (i32, i32, i32) {
    %c0_i32 = arith.constant 0 : i32
    %c0_i32_0 = arith.constant 0 : i32
    return %arg0, %c0_i32, %arg1 : i32, i32, i32
  }
  func.func @transform_1(%arg0: i32, %arg1: i32) -> (i32, i32, i32) {
    %c0_i32 = arith.constant 0 : i32
    %c0_i32_0 = arith.constant 0 : i32
    return %arg0, %c0_i32, %arg1 : i32, i32, i32
  }
  func.func @transform_2(%arg0: i32, %arg1: i32) -> (i32, i32, i32) {
    %c0_i32 = arith.constant 0 : i32
    %c0_i32_0 = arith.constant 0 : i32
    %c0_i32_1 = arith.constant 0 : i32
    return %arg0, %c0_i32, %c0_i32_0 : i32, i32, i32
  }
  func.func @transform_3(%arg0: i32, %arg1: i32) -> (i32, i32, i32) {
    %c0_i32 = arith.constant 0 : i32
    %c0_i32_0 = arith.constant 0 : i32
    %c0_i32_1 = arith.constant 0 : i32
    return %arg0, %c0_i32, %c0_i32_0 : i32, i32, i32
  }
  func.func @transform_4(%arg0: i32, %arg1: i32) -> (i32, i32, i32) {
    %c0_i32 = arith.constant 0 : i32
    %c0_i32_0 = arith.constant 0 : i32
    return %arg0, %c0_i32, %arg1 : i32, i32, i32
  }
}

</mosaic_0001>

<bundles_post_ra>
// kernel: msse_forward.22
= control target key start
LH: loop header
LB: loop body
LE: loop exit
PB: predicated region body
PF: predicated region fallthrough
CT: control target
= control target key end

     0   :  { %s969_s0 = inlined_call_operand.vmem [shape: f32[2,4,64], index: 0, kind: input, shape index: {}]   ;;  %s970_s1 = inlined_call_operand.vmem [shape: f32[8,4], index: 1, kind: input, shape index: {}]   ;;  %s971_s2 = inlined_call_operand.vmem [shape: f32[8,1], index: 2, kind: input, shape index: {}]   ;;  %s972_s3 = inlined_call_operand.vmem [shape: f32[8,1], index: 3, kind: input, shape index: {}]   ;;  %s973_s4 = inlined_call_operand.vmem [shape: f32[2,8,64], index: 4, kind: output, shape index: {0}]   ;;  %s974_s5 = inlined_call_operand.hbm [shape: f32[2,8,1], index: 5, kind: output, shape index: {1}]   ;;  %s975_s6 = inlined_call_operand.hbm [shape: f32[2,8,1], index: 6, kind: output, shape index: {2}]  }
   0x1   :  { %976 = sst [smem:[#allocation8_spill]] %s969_s0 }
   0x2   :  { %12 = vsyncpa [#allocation3], 0 }
   0x3   :  { %14 = vsyncpa [#allocation3 + $0x1], 0 }
   0x4   :  { %15 = vsyncpa [#allocation5], 0 }
   0x5   :  { %17 = vsyncpa [#allocation5 + $0x1], 0  ;;  %s800_s21 = smov 0   ;;  %s802_s22 = smov 0  }
   0x6   :  { %s804_s23 = smov 0   ;;  %s806_s24 = smov 0  }
   0x7   :  { %s808_s25 = smov 0   ;;  %s810_s26 = smov 0  }
   0x8 LB: > { %s562_s27 = sadd.s32 4294967295, %s756_s26   ;;  %s563_s28 = sadd.s32 4294967294, %s756_s26   ;;  %s756_s26 = sphi %s810_s26, %s23_s26   ;;  %s752_s25 = sphi %s808_s25, %s984_s25   ;;  %s748_s24 = sphi %s806_s24, %s983_s24   ;;  %s744_s23 = sphi %s804_s23, %s982_s23   ;;  %s740_s22 = sphi %s802_s22, %s981_s22   ;;  %s736_s21 = sphi %s800_s21, %s980_s21  }
   0x9   : > { %s35_s29 = sadd.s32 1, %s752_s25  ;;  %s161_s30 = sadd.s32 1, %s744_s23 }
   0xa   : > { %p37_p0 = scmp.ge.s32.totalorder %s35_s29, 2  ;;  %p171_p1 = scmp.ne.s32.totalorder %s744_s23, %s740_s22 }
   0xb   : > { %p172_p2 = scmp.eq.s32.totalorder %s562_s27, 1  ;;  %p177_p3 = scmp.ne.s32.totalorder %s740_s22, %s736_s21 }
   0xc   : > { %s986_s29 = smov (%p37_p0, %s35_s29), 0  ;;  %p178_p5 = scmp.eq.s32.totalorder %s563_s28, 1 }
   0xd   : > { %p840_p4 = por %p172_p2, %p171_p1  ;;  %s158_s8 = ssub.s32 %s752_s25, %s986_s29 }
   0xe   : > { %p566_p6 = scmp.ge.s32.totalorder %s756_s26, 1  ;;  %p159_p7 = scmp.eq.s32.totalorder %s158_s8, 0 }
   0xf   : > { %p847_p8 = por %p178_p5, %p177_p3  ;;  %p241_p9 = scmp.lt.s32.totalorder %s756_s26, 3 }
  0x10   : > { %s853_s10 = scalar_select %p159_p7, %s744_s23, %s161_s30  }
  0x11   : > { %p242_p10 = pnand %p566_p6, %p241_p9 }
  0x12   : > { %p285_p11 = scmp.lt.s32.totalorder (!%p242_p10), %s748_s24, 1  ;;  %s979_s0 = sld [smem:[#allocation8_spill]] (!%p242_p10) }
  0x13   : > { %245 = sbr.rel (%p242_p10) target bundleno = 371 (0x173), region = 36  ;;  %s877_s12 = sand.u32 (!%p242_p10), 1, %s740_s22  }
  0x14   : > { %s567_s13 = sshll.u32 (!%p242_p10), %s877_s12, 3  ;;  %s573_s16 = sshll.u32 (!%p242_p10), %s748_s24, 7 }
  0x15   : > { %s277_s14 = scalar_lea.vmem (!%p242_p10), [#allocation2], %s567_s13  ;;  %s881_s15 = scalar_lea.vmem (!%p242_p10), [#allocation4], %s567_s13 }
  0x16   : > { %s899_s30 = scalar_lea.hbm (!%p242_p10), %s975_s6, %s573_s16  ;;  %s395_s8 = scalar_lea.sflag (!%p242_p10), [#allocation3], %s877_s12 }
  0x17   : > { %s763_s13 = smov (!%p242_p10), [#allocation2]  }
  0x18   : > { %v306_v0 = vld [vmem:[%s970_s1] sm:$0xff]  ;;  %v758_v1 = vmov 0   ;;  %v759_v2 = vmov 2   ;;  %v760_v3 = vmov 1   ;;  %v761_v4 = vmov 3   ;;  %s866_s17 = scalar_select %p285_p11, %s748_s24, 1 }
  0x19   : > { %642 = vset.pattern.permute.xlu0 %v758_v1  ;;  %644 = vset.pattern.permute.xlu1 %v759_v2  ;;  %v348_v5 = vld [vmem:[%s971_s2] sm:$0xff]  ;;  %v313_v7 = vlaneseq  ;;  %vm371_vm0 = vcmask 523264   ;;  %vm303_vm1 = vcmask 7168   ;;  %v762_v45 = vmov 0.0   ;;  %s654_s19 = sshll.u32 %s763_s13, 4  ;;  %s655_s19 = int_to_ptr.vmem [resolvable:$false] %s654_s19 }
  0x1a   : > { %310 = vperm.xlu0 %642, %v306_v0   ;;  %329 = vperm.xlu1 %644, %v306_v0   ;;  %v355_v6 = vld [vmem:[%s972_s3] sm:$0xff]  ;;  %s569_s18 = sshll.u32 %s866_s17, 2  ;;  %s570_s28 = sshll.u32 %s866_s17, 3  ;;  %304 = vst.msk [vmem:[%s277_s14] sm:$0xff] %vm303_vm1, %v762_v45  ;;  %305 = vst.msk [vmem:[%s881_s15] sm:$0xff] %vm303_vm1, %v762_v45 }
  0x1b   : > { %v314_v8 = vshrl.u32 %v313_v7, 7  ;;  %s291_s27 = scalar_lea.vmem %s979_s0, %s569_s18  ;;  %s298_s11 = scalar_lea.vmem %s973_s4, %s570_s28 }
  0x1c   : > { %v307_v11 = vld [vmem:[%s291_s27] sm:$0xf]  ;;  %s416_s17 = sshll.u32 %s277_s14, 4  ;;  %s429_s18 = sshll.u32 %s881_s15, 4  ;;  %s893_s17 = int_to_ptr.vmem [resolvable:$true] %s416_s17  ;;  %s901_s18 = int_to_ptr.vmem [resolvable:$true] %s429_s18 }
  0x1d   : > { %v315_v9 = vsub.s32 0, %v314_v8  ;;  %v324_v10 = vsub.s32 1, %v314_v8  ;;  %v334_v13 = vsub.s32 2, %v314_v8  ;;  %v344_v15 = vsub.s32 3, %v314_v8  ;;  %s891_s27 = scalar_lea.hbm %s974_s5, %s573_s16  ;;  %s656_s20 = scalar_lea.vmem %s655_s19, 256 }
  0x1e   : > { %643 = vset.pattern.permute.xlu0 %v760_v3  ;;  %645 = vset.pattern.permute.xlu1 %v761_v4  ;;  %p657_p1 = scmp.lt.s32.totalorder %s893_s17, %s655_s19 }
  0x1f   : > { %319 = vperm.xlu0 %643, %v306_v0   ;;  %339 = vperm.xlu1 %645, %v306_v0   ;;  %v316_v16 = vrot.slane %v307_v11, %v315_v9  ;;  %v325_v17 = vrot.slane %v307_v11, %v324_v10  ;;  %v335_v18 = vrot.slane %v307_v11, %v334_v13 }
  0x20   : > { %v345_v19 = vrot.slane %v307_v11, %v344_v15 }
  0x21   : > { %v373_v46 = vld [vmem:[%s277_s14] sm:$0xff]  ;;  %v380_v48 = vld [vmem:[%s881_s15] sm:$0xff] }
  0x23   : > { %646 = vset.pattern.permute.xlu1 %v758_v1  ;;  %647 = vset.pattern.permute.xlu0 %v758_v1 }
  0x24   : > { %351 = vperm.xlu1 %646, %v348_v5   ;;  %358 = vperm.xlu0 %647, %v355_v6  }
  0x95   : > { %v311_v12 = vpop.permute.xlu0 %310  ;;  %v330_v14 = vpop.permute.xlu1 %329 }
  0x96   : > { %v317_v22 = vmul.f32 %v316_v16, %v311_v12  ;;  %v336_v24 = vmul.f32 %v335_v18, %v330_v14 }
  0x9a   : > { %v320_v20 = vpop.permute.xlu0 %319  ;;  %v340_v21 = vpop.permute.xlu1 %339 }
  0x9b   : > { %v326_v23 = vmul.f32 %v325_v17, %v320_v20  ;;  %v346_v26 = vmul.f32 %v345_v19, %v340_v21 }
  0x9d   : > { %v327_v25 = vadd.f32 %v326_v23, %v317_v22 }
  0x9f   : > { %v337_v27 = vadd.f32 %v336_v24, %v327_v25  ;;  %v352_v28 = vpop.permute.xlu1 %351  ;;  %v359_v30 = vpop.permute.xlu0 %358 }
  0xa1   : > { %v347_v29 = vadd.f32 %v346_v26, %v337_v27 }
  0xa3   : > { %v354_v31 = vmul.f32 %v352_v28, %v347_v29 }
  0xa5   : > { %v361_v32 = vadd.f32 %v359_v30, %v354_v31 }
  0xa7   : > { %v363_v33 = vmul.f32 0.044715, %v361_v32  ;;  %v362_v39 = vmul.f32 0.5, %v361_v32 }
  0xa9   : > { %v364_v34 = vmul.f32 %v363_v33, %v361_v32 }
  0xab   : > { %v365_v35 = vmul.f32 %v364_v34, %v361_v32 }
  0xad   : > { %v366_v36 = vadd.f32 %v365_v35, %v361_v32 }
  0xaf   : > { %v367_v37 = vmul.f32 0.7978846, %v366_v36 }
  0xb1   : > { %648 = vtanh.f32 %v367_v37 }
  0xbe   : > { %v649_v38 = vpop.eup %648 }
  0xbf   : > { %v369_v40 = vadd.f32 1.0, %v649_v38 }
  0xc1   : > { %v370_v41 = vmul.f32 %v369_v40, %v362_v39 }
  0xc3   : > { %v374_v42 = vsel %vm371_vm0, %v370_v41, 0.0  ;;  %372 = vst.msk [vmem:[%s298_s11] sm:$0xff] %vm371_vm0, %v370_v41  ;;  %v381_v43 = vmul.f32 %v370_v41, %v370_v41  ;;  %s650_s11 = scalar_lea.vmem %s893_s17, 128 }
  0xc4   : > { %375 = vadd.xlane.f32.xlu1 %v374_v42  ;;  %p651_p12 = scmp.ne.s32.totalorder %s893_s17, %s650_s11  ;;  %p658_p2 = scmp.lt.s32.totalorder %s656_s20, %s650_s11 }
  0xc5   : > { %v382_v44 = vsel %vm371_vm0, %v381_v43, 0.0 }
  0xc6   : > { %383 = vadd.xlane.f32.xlu0 %v382_v44  ;;  %p652_p13 = pnand %p651_p12, %p840_p4  ;;  %p659_p3 = por %p658_p2, %p657_p1 }
  0xc8   : > { %p653_p0 = pneg %p652_p13 }
  0xca   : > { %p660_p5 = pnand %p659_p3, %p653_p0 }
 0x14d   : > { %v376_v47 = vpop.xlane.xlu1 %375 }
 0x14e   : > { %v377_v49 = vadd.f32 %v376_v47, %v373_v46 }
 0x14f   : > { %v384_v50 = vpop.xlane.xlu0 %383 }
 0x150   : > { %379 = vst.msk [vmem:[%s277_s14] sm:$0xff] %vm303_vm1, %v377_v49  ;;  %v385_v51 = vadd.f32 %v384_v50, %v380_v48 }
 0x151   : > { %663 = shalt.err (!%p660_p5)
}
 0x152   : > { %s664_s14 = scalar_lea.hbm %s891_s27, 128  ;;  %s668_s28 = scalar_lea.hbm %s974_s5, 256 }
 0x153   : > { %p665_p6 = scmp.ne.s32.totalorder %s891_s27, %s664_s14  ;;  %p669_p10 = scmp.lt.s32.totalorder %s891_s27, %s974_s5 }
 0x154   : > { %p670_p11 = scmp.lt.s32.totalorder %s668_s28, %s664_s14 }
 0x155   : > { %p666_p7 = pnand %p665_p6, %p840_p4 }
 0x156   : > { %p671_p12 = por %p670_p11, %p669_p10 }
 0x157   : > { %p667_p9 = pneg %p666_p7 }
 0x159   : > { %p672_p13 = pnand %p671_p12, %p667_p9 }
 0x15b   : > { %675 = shalt.err (!%p672_p13)
}
 0x15c   : > { %577 = dma.vmem_to_hbm [thread:$0]  (%p840_p4), %s893_s17, 128, %s891_s27, %s395_s8   ;;  %386 = vst.msk [vmem:[%s881_s15] sm:$0xff] %vm303_vm1, %v385_v51 }
 0x15d   : > { %s400_s11 = scalar_lea.sflag [#allocation5], %s877_s12  ;;  %s676_s0 = scalar_lea.vmem %s901_s18, 128 }
 0x15e   : > { %p677_p0 = scmp.ne.s32.totalorder %s901_s18, %s676_s0  ;;  %s764_s19 = smov [#allocation4]  }
 0x15f   : > { %s680_s20 = sshll.u32 %s764_s19, 4  ;;  %s681_s20 = int_to_ptr.vmem [resolvable:$false] %s680_s20 }
 0x160   : > { %p678_p1 = pnand %p677_p0, %p840_p4  ;;  %s682_s14 = scalar_lea.vmem %s681_s20, 256 }
 0x161   : > { %p683_p3 = scmp.lt.s32.totalorder %s901_s18, %s681_s20  ;;  %p684_p5 = scmp.lt.s32.totalorder %s682_s14, %s676_s0 }
 0x162   : > { %p679_p2 = pneg %p678_p1 }
 0x163   : > { %p685_p6 = por %p684_p5, %p683_p3 }
 0x165   : > { %p686_p7 = pnand %p685_p6, %p679_p2 }
 0x167   : > { %689 = shalt.err (!%p686_p7)
}
 0x168   : > { %s690_s15 = scalar_lea.hbm %s899_s30, 128  ;;  %s694_s27 = scalar_lea.hbm %s975_s6, 256 }
 0x169   : > { %p691_p9 = scmp.ne.s32.totalorder %s899_s30, %s690_s15  ;;  %p695_p12 = scmp.lt.s32.totalorder %s899_s30, %s975_s6 }
 0x16a   : > { %p696_p13 = scmp.lt.s32.totalorder %s694_s27, %s690_s15 }
 0x16b   : > { %p692_p10 = pnand %p691_p9, %p840_p4 }
 0x16c   : > { %p697_p0 = por %p696_p13, %p695_p12 }
 0x16d   : > { %p693_p11 = pneg %p692_p10 }
 0x16f   : > { %p698_p1 = pnand %p697_p0, %p693_p11 }
 0x171   : > { %701 = shalt.err (!%p698_p1)
}
 0x172   : > { %578 = dma.vmem_to_hbm [thread:$0]  (%p840_p4), %s901_s18, 128, %s899_s30, %s400_s11  }
 0x173 PF: > { %p588_p2 = scmp.ge.s32.totalorder %s756_s26, 2  ;;  %s451_s24 = sand.u32 1, %s736_s21  }
 0x174   : > { %s452_s28 = scalar_lea.sflag [#allocation3], %s451_s24 }
 0x175   : > { %p582_p3 = pnand %p588_p2, %p847_p8 }
 0x177   : > { %p583_p5 = pneg %p582_p3 }
 0x179   : > { %727 = dma.done.wait (%p583_p5), %s452_s28, 128  }
 0x17a   : > { %729 = vsyncadd (%p583_p5), %s452_s28, 4294967168  ;;  %s461_s13 = scalar_lea.sflag [#allocation5], %s451_s24 }
 0x17b   : > { %731 = dma.done.wait (%p583_p5), %s461_s13, 128  }
 0x17c   : > { %733 = vsyncadd (%p583_p5), %s461_s13, 4294967168  ;;  %s23_s26 = sadd.s32 1, %s756_s26   ;;  %s980_s21 = smov %s740_s22 }
 0x17d   : > { %p20_p6 = scmp.ge.s32.totalorder %s23_s26, 4   ;;  %s981_s22 = smov %s744_s23 }
 0x17e   : > { %s982_s23 = smov %s853_s10  ;;  %s983_s24 = smov %s752_s25 }
 0x17f   : > { %s984_s25 = smov %s986_s29  ;;  %22 = sbr.rel (!%p20_p6) target bundleno = 8 (0x8), region = 104 }
 0x184   :  { %466 = vsyncpa [#allocation3], 1 }
 0x185   :  { %468 = vsyncpa [#allocation3 + $0x1], 1 }
 0x186   :  { %469 = vsyncpa [#allocation5], 1 }
 0x187   :  { %471 = vsyncpa [#allocation5 + $0x1], 1 }

// kernel: msse_forward.21
= control target key start
LH: loop header
LB: loop body
LE: loop exit
PB: predicated region body
PF: predicated region fallthrough
CT: control target
= control target key end

     0   :  { %s967_s0 = inlined_call_operand.vmem [shape: f32[2,4,64], index: 0, kind: input, shape index: {}]   ;;  %s968_s1 = inlined_call_operand.vmem [shape: f32[8,4], index: 1, kind: input, shape index: {}]   ;;  %s969_s2 = inlined_call_operand.vmem [shape: f32[2,8,1], index: 2, kind: output, shape index: {0}]   ;;  %s970_s3 = inlined_call_operand.vmem [shape: f32[2,8,1], index: 3, kind: output, shape index: {1}]   ;;  %s971_s4 = inlined_call_operand.hbm [shape: f32[2,4,1], index: 4, kind: output, shape index: {2}]   ;;  %s972_s5 = inlined_call_operand.hbm [shape: f32[2,4,1], index: 5, kind: output, shape index: {3}]  }
   0x1   :  { %974 = sst [smem:[#allocation8_spill]] %s967_s0 }
   0x2   :  { %11 = vsyncpa [#allocation3], 0 }
   0x3   :  { %13 = vsyncpa [#allocation3 + $0x1], 0 }
   0x4   :  { %14 = vsyncpa [#allocation5], 0 }
   0x5   :  { %16 = vsyncpa [#allocation5 + $0x1], 0  ;;  %s783_s18 = smov 0   ;;  %s785_s19 = smov 0  }
   0x6   :  { %s787_s20 = smov 0   ;;  %s789_s21 = smov 0  }
   0x7   :  { %s791_s22 = smov 0   ;;  %s793_s23 = smov 0  }
   0x8 LB: > { %s552_s24 = sadd.s32 4294967295, %s744_s23   ;;  %s553_s25 = sadd.s32 4294967294, %s744_s23   ;;  %s744_s23 = sphi %s793_s23, %s22_s23   ;;  %s740_s22 = sphi %s791_s22, %s984_s22   ;;  %s736_s21 = sphi %s789_s21, %s983_s21   ;;  %s732_s20 = sphi %s787_s20, %s982_s20   ;;  %s728_s19 = sphi %s785_s19, %s981_s19   ;;  %s724_s18 = sphi %s783_s18, %s980_s18  }
   0x9   : > { %s34_s26 = sadd.s32 1, %s740_s22  ;;  %s142_s27 = sadd.s32 1, %s732_s20 }
   0xa   : > { %p36_p0 = scmp.ge.s32.totalorder %s34_s26, 2  ;;  %p152_p1 = scmp.ne.s32.totalorder %s732_s20, %s728_s19 }
   0xb   : > { %p153_p2 = scmp.eq.s32.totalorder %s552_s24, 1  ;;  %p158_p3 = scmp.ne.s32.totalorder %s728_s19, %s724_s18 }
   0xc   : > { %s986_s26 = smov (%p36_p0, %s34_s26), 0  ;;  %p159_p5 = scmp.eq.s32.totalorder %s553_s25, 1 }
   0xd   : > { %p823_p4 = por %p153_p2, %p152_p1  ;;  %s139_s29 = ssub.s32 %s740_s22, %s986_s26 }
   0xe   : > { %p556_p6 = scmp.ge.s32.totalorder %s744_s23, 1  ;;  %p140_p7 = scmp.eq.s32.totalorder %s139_s29, 0 }
   0xf   : > { %p830_p8 = por %p159_p5, %p158_p3  ;;  %p216_p9 = scmp.lt.s32.totalorder %s744_s23, 3 }
  0x10   : > { %s836_s6 = scalar_select %p140_p7, %s732_s20, %s142_s27  }
  0x11   : > { %p217_p10 = pnand %p556_p6, %p216_p9 }
  0x12   : > { %p259_p11 = scmp.lt.s32.totalorder (!%p217_p10), %s736_s21, 1  ;;  %s977_s0 = sld [smem:[#allocation8_spill]] (!%p217_p10) }
  0x13   : > { %220 = sbr.rel (%p217_p10) target bundleno = 307 (0x133), region = 28  ;;  %s850_s14 = sand.u32 (!%p217_p10), 1, %s728_s19  }
  0x14   : > { %s557_s15 = sshll.u32 (!%p217_p10), %s850_s14, 2  ;;  %s973_s11 = sshll.u32 (!%p217_p10), %s736_s21, 6 }
  0x15   : > { %s853_s16 = scalar_lea.vmem (!%p217_p10), [#allocation4], %s557_s15  ;;  %s857_s17 = scalar_lea.vmem (!%p217_p10), [#allocation2], %s557_s15 }
  0x16   : > { %s402_s12 = sshll.u32 (!%p217_p10), %s853_s16, 4  ;;  %s888_s25 = scalar_lea.hbm (!%p217_p10), %s972_s5, %s973_s11  ;;  %s890_s12 = int_to_ptr.vmem [resolvable:$true] %s402_s12 }
  0x17   : > { %s638_s27 = scalar_lea.vmem (!%p217_p10), %s890_s12, 64  ;;  %s751_s7 = smov (!%p217_p10), [#allocation4]  }
  0x18   : > { %v285_v0 = vld [vmem:[%s968_s1] sm:$0xff]  ;;  %v746_v1 = vmov 0   ;;  %v747_v2 = vmov 2   ;;  %v748_v3 = vmov 1   ;;  %v749_v4 = vmov 3   ;;  %s843_s9 = scalar_select %p259_p11, %s736_s21, 1 }
  0x19   : > { %633 = vset.pattern.permute.xlu0 %v746_v1  ;;  %635 = vset.pattern.permute.xlu1 %v747_v2  ;;  %vm342_vm0 = vcmask 519168   ;;  %vm281_vm1 = vcmask 3072   ;;  %v750_v9 = vmov 0.0   ;;  %vm278_vm2 = vcmask 7168   ;;  %p639_p12 = scmp.ne.s32.totalorder %s890_s12, %s638_s27  ;;  %s642_s8 = sshll.u32 %s751_s7, 4  ;;  %s643_s8 = int_to_ptr.vmem [resolvable:$false] %s642_s8 }
  0x1a   : > { %288 = vperm.xlu0 %633, %v285_v0   ;;  %307 = vperm.xlu1 %635, %v285_v0   ;;  %s559_s10 = sshll.u32 %s843_s9, 2  ;;  %283 = vst.msk [vmem:[%s853_s16] sm:$0xf] %vm281_vm1, %v750_v9  ;;  %282 = vst.msk [vmem:[%s857_s17] sm:$0xf] %vm281_vm1, %v750_v9  ;;  %s560_s24 = sshll.u32 %s843_s9, 3  ;;  %v291_v10 = vlaneseq }
  0x1b   : > { %s265_s13 = scalar_lea.vmem %s977_s0, %s559_s10  ;;  %s867_s29 = scalar_lea.vmem %s969_s2, %s560_s24  ;;  %vm327_vm3 = vcmask 523264  }
  0x1c   : > { %v284_v5 = vld [vmem:[%s265_s13] sm:$0xf]  ;;  %279 = vst.msk [vmem:[%s867_s29] sm:$0xff] %vm278_vm2, %v750_v9  ;;  %v292_v11 = vshrl.u32 %v291_v10, 7  ;;  %s876_s10 = scalar_lea.vmem %s970_s3, %s560_s24  ;;  %s370_s24 = scalar_lea.sflag [#allocation5], %s850_s14 }
  0x1d   : > { %v350_v6 = vmul.f32 %v284_v5, %v284_v5  ;;  %v343_v8 = vsel %vm342_vm0, %v284_v5, 0.0  ;;  %280 = vst.msk [vmem:[%s876_s10] sm:$0xff] %vm278_vm2, %v750_v9  ;;  %p640_p13 = pnand %p639_p12, %p823_p4  ;;  %s644_s13 = scalar_lea.vmem %s643_s8, 128 }
  0x1e   : > { %634 = vset.pattern.permute.xlu0 %v748_v3  ;;  %636 = vset.pattern.permute.xlu1 %v749_v4  ;;  %v293_v12 = vsub.s32 0, %v292_v11  ;;  %v302_v13 = vsub.s32 1, %v292_v11  ;;  %v312_v15 = vsub.s32 2, %v292_v11  ;;  %v322_v17 = vsub.s32 3, %v292_v11  ;;  %p645_p1 = scmp.lt.s32.totalorder %s890_s12, %s643_s8  ;;  %p646_p2 = scmp.lt.s32.totalorder %s644_s13, %s638_s27 }
  0x1f   : > { %297 = vperm.xlu0 %634, %v285_v0   ;;  %317 = vperm.xlu1 %636, %v285_v0   ;;  %v351_v7 = vsel %vm342_vm0, %v350_v6, 0.0  ;;  %p641_p0 = pneg %p640_p13 }
  0x20   : > { %v294_v18 = vrot.slane %v284_v5, %v293_v12  ;;  %v303_v19 = vrot.slane %v284_v5, %v302_v13  ;;  %v313_v20 = vrot.slane %v284_v5, %v312_v15  ;;  %v323_v21 = vrot.slane %v284_v5, %v322_v17  ;;  %p647_p3 = por %p646_p2, %p645_p1 }
  0x21   : > { %v349_v34 = vld [vmem:[%s853_s16] sm:$0xf]  ;;  %v341_v37 = vld [vmem:[%s857_s17] sm:$0xf] }
  0x22   : > { %p648_p5 = pnand %p647_p3, %p641_p0 }
  0x23   : > { %637 = vset.pattern.permute.xlu0 %v749_v4 }
  0x3e   : > { %352 = vadd.xlane.f32.xlu0 %v351_v7 }
  0x43   : > { %344 = vadd.xlane.f32.xlu1 %v343_v8 }
  0x95   : > { %v289_v14 = vpop.permute.xlu0 %288  ;;  %v308_v16 = vpop.permute.xlu1 %307 }
  0x96   : > { %v295_v24 = vmul.f32 %v294_v18, %v289_v14  ;;  %v314_v26 = vmul.f32 %v313_v20, %v308_v16 }
  0x9a   : > { %v298_v22 = vpop.permute.xlu0 %297  ;;  %v318_v23 = vpop.permute.xlu1 %317 }
  0x9b   : > { %v304_v25 = vmul.f32 %v303_v19, %v298_v22  ;;  %v324_v28 = vmul.f32 %v323_v21, %v318_v23 }
  0x9d   : > { %v305_v27 = vadd.f32 %v304_v25, %v295_v24 }
  0x9f   : > { %v315_v29 = vadd.f32 %v314_v26, %v305_v27 }
  0xa1   : > { %v325_v30 = vadd.f32 %v324_v28, %v315_v29 }
  0xa3   : > { %v328_v31 = vsel %vm327_vm3, %v325_v30, 0.0  ;;  %v335_v32 = vmul.f32 %v325_v30, %v325_v30 }
  0xa4   : > { %329 = vadd.xlane.f32.xlu0 %v328_v31 }
  0xa5   : > { %v336_v33 = vsel %vm327_vm3, %v335_v32, 0.0 }
  0xa6   : > { %337 = vadd.xlane.f32.xlu1 %v336_v33 }
  0xc7   : > { %v353_v35 = vpop.xlane.xlu0 %352 }
  0xc8   : > { %v354_v36 = vadd.f32 %v353_v35, %v349_v34 }
  0xca   : > { %355 = vst.msk [vmem:[%s853_s16] sm:$0xf] %vm281_vm1, %v354_v36 }
  0xcb   : > { %651 = shalt.err (!%p648_p5)
}
  0xcc   : > { %s652_s16 = scalar_lea.hbm %s888_s25, 64  ;;  %s656_s7 = scalar_lea.hbm %s972_s5, 128 }
  0xcd   : > { %p653_p6 = scmp.ne.s32.totalorder %s888_s25, %s652_s16  ;;  %p657_p10 = scmp.lt.s32.totalorder %s888_s25, %s972_s5 }
  0xce   : > { %p658_p11 = scmp.lt.s32.totalorder %s656_s7, %s652_s16 }
  0xcf   : > { %p654_p7 = pnand %p653_p6, %p823_p4 }
  0xd0   : > { %p659_p12 = por %p658_p11, %p657_p10 }
  0xd1   : > { %p655_p9 = pneg %p654_p7 }
  0xd3   : > { %p660_p13 = pnand %p659_p12, %p655_p9 }
  0xd5   : > { %663 = shalt.err (!%p660_p13)
}
  0xd6   : > { %569 = dma.vmem_to_hbm [thread:$0]  (%p823_p4), %s890_s12, 64, %s888_s25, %s370_s24   ;;  %v345_v38 = vpop.xlane.xlu1 %344 }
  0xd7   : > { %v346_v39 = vadd.f32 %v345_v38, %v341_v37  ;;  %s978_s9 = sshll.u32 %s736_s21, 6  ;;  %s979_s8 = sshll.u32 %s857_s17, 4  ;;  %s390_s8 = int_to_ptr.vmem [resolvable:$true] %s979_s8 }
  0xd8   : > { %s387_s11 = scalar_lea.hbm %s971_s4, %s978_s9  ;;  %s365_s13 = scalar_lea.sflag [#allocation3], %s850_s14 }
  0xd9   : > { %348 = vst.msk [vmem:[%s857_s17] sm:$0xf] %vm281_vm1, %v346_v39  ;;  %s664_s16 = scalar_lea.vmem %s390_s8, 64  ;;  %s752_s15 = smov [#allocation2]  }
  0xda   : > { %p665_p0 = scmp.ne.s32.totalorder %s390_s8, %s664_s16  ;;  %s668_s7 = sshll.u32 %s752_s15, 4  ;;  %s669_s7 = int_to_ptr.vmem [resolvable:$false] %s668_s7 }
  0xdb   : > { %s670_s12 = scalar_lea.vmem %s669_s7, 128  ;;  %p671_p3 = scmp.lt.s32.totalorder %s390_s8, %s669_s7 }
  0xdc   : > { %p666_p1 = pnand %p665_p0, %p823_p4  ;;  %p672_p5 = scmp.lt.s32.totalorder %s670_s12, %s664_s16 }
  0xde   : > { %p667_p2 = pneg %p666_p1  ;;  %p673_p6 = por %p672_p5, %p671_p3 }
  0xe0   : > { %p674_p7 = pnand %p673_p6, %p667_p2 }
  0xe2   : > { %677 = shalt.err (!%p674_p7)
}
  0xe3   : > { %s678_s21 = scalar_lea.hbm %s387_s11, 64  ;;  %s682_s25 = scalar_lea.hbm %s971_s4, 128 }
  0xe4   : > { %p679_p9 = scmp.ne.s32.totalorder %s387_s11, %s678_s21  ;;  %p683_p12 = scmp.lt.s32.totalorder %s387_s11, %s971_s4 }
  0xe5   : > { %p684_p13 = scmp.lt.s32.totalorder %s682_s25, %s678_s21 }
  0xe6   : > { %p680_p10 = pnand %p679_p9, %p823_p4 }
  0xe7   : > { %p685_p0 = por %p684_p13, %p683_p12 }
  0xe8   : > { %p681_p11 = pneg %p680_p10 }
  0xea   : > { %p686_p1 = pnand %p685_p0, %p681_p11 }
  0xec   : > { %689 = shalt.err (!%p686_p1)
}
  0xed   : > { %568 = dma.vmem_to_hbm [thread:$0]  (%p823_p4), %s390_s8, 64, %s387_s11, %s365_s13   ;;  %v326_v40 = vld [vmem:[%s867_s29] sm:$0xff] }
  0xee   : > { %v334_v42 = vld [vmem:[%s876_s10] sm:$0xff] }
 0x12d   : > { %v330_v41 = vpop.xlane.xlu0 %329 }
 0x12e   : > { %v331_v43 = vadd.f32 %v330_v41, %v326_v40 }
 0x12f   : > { %v338_v44 = vpop.xlane.xlu1 %337 }
 0x130   : > { %333 = vst.msk [vmem:[%s867_s29] sm:$0xff] %vm278_vm2, %v331_v43  ;;  %v339_v45 = vadd.f32 %v338_v44, %v334_v42 }
 0x132   : > { %340 = vst.msk [vmem:[%s876_s10] sm:$0xff] %vm278_vm2, %v339_v45 }
 0x133 PF: > { %p579_p2 = scmp.ge.s32.totalorder %s744_s23, 2  ;;  %s428_s28 = sand.u32 1, %s724_s18  }
 0x134   : > { %s429_s27 = scalar_lea.sflag [#allocation3], %s428_s28 }
 0x135   : > { %p573_p3 = pnand %p579_p2, %p830_p8 }
 0x137   : > { %p574_p5 = pneg %p573_p3 }
 0x139   : > { %715 = dma.done.wait (%p574_p5), %s429_s27, 64  }
 0x13a   : > { %717 = vsyncadd (%p574_p5), %s429_s27, 4294967232  ;;  %s438_s0 = scalar_lea.sflag [#allocation5], %s428_s28 }
 0x13b   : > { %719 = dma.done.wait (%p574_p5), %s438_s0, 64  }
 0x13c   : > { %721 = vsyncadd (%p574_p5), %s438_s0, 4294967232  ;;  %s22_s23 = sadd.s32 1, %s744_s23   ;;  %s980_s18 = smov %s728_s19 }
 0x13d   : > { %p19_p4 = scmp.ge.s32.totalorder %s22_s23, 4   ;;  %s981_s19 = smov %s732_s20 }
 0x13e   : > { %s982_s20 = smov %s836_s6  ;;  %s983_s21 = smov %s740_s22 }
 0x13f   : > { %s984_s22 = smov %s986_s26  ;;  %21 = sbr.rel (!%p19_p4) target bundleno = 8 (0x8), region = 108 }
 0x144   :  { %443 = vsyncpa [#allocation3], 1 }
 0x145   :  { %445 = vsyncpa [#allocation3 + $0x1], 1 }
 0x146   :  { %446 = vsyncpa [#allocation5], 1 }
 0x147   :  { %448 = vsyncpa [#allocation5 + $0x1], 1 }

// kernel: msse_forward.19
= control target key start
LH: loop header
LB: loop body
LE: loop exit
PB: predicated region body
PF: predicated region fallthrough
CT: control target
= control target key end

     0   :  { %s705_s18 = smov 0   ;;  %s707_s19 = smov 0   ;;  %s776_s0 = inlined_call_operand.vmem [shape: f32[2,4,256], index: 0, kind: input, shape index: {}]   ;;  %s777_s1 = inlined_call_operand.vmem [shape: f32[8,4], index: 1, kind: input, shape index: {}]   ;;  %s778_s2 = inlined_call_operand.vmem [shape: f32[2,8,1], index: 2, kind: output, shape index: {0}]   ;;  %s779_s3 = inlined_call_operand.vmem [shape: f32[2,8,1], index: 3, kind: output, shape index: {1}]   ;;  %s780_s4 = inlined_call_operand.vmem [shape: f32[2,4,1], index: 4, kind: output, shape index: {2}]   ;;  %s781_s5 = inlined_call_operand.vmem [shape: f32[2,4,1], index: 5, kind: output, shape index: {3}]  }
   0x1   :  { %s709_s20 = smov 0  }
   0x2 LB: > { %s28_s21 = sadd.s32 1, %s664_s19  ;;  %p601_p0 = scmp.ge.s32.totalorder %s668_s20, 1  ;;  %s668_s20 = sphi %s709_s20, %s16_s20   ;;  %s664_s19 = sphi %s707_s19, %s783_s19   ;;  %s660_s18 = sphi %s705_s18, %s782_s18  }
   0x3   : > { %p30_p1 = scmp.ge.s32.totalorder %s28_s21, 2  ;;  %p213_p2 = scmp.lt.s32.totalorder %s668_s20, 3 }
   0x5   : > { %s785_s21 = smov (%p30_p1, %s28_s21), 0  ;;  %p214_p3 = pnand %p601_p0, %p213_p2 }
   0x6   : > { %p257_p4 = scmp.lt.s32.totalorder (!%p214_p3), %s660_s18, 1 }
   0x7   : > { %217 = sbr.rel (%p214_p3) target bundleno = 300 (0x12c), region = 28 }
   0xc   : > { %v293_v0 = vld [vmem:[%s777_s1] sm:$0xff]  ;;  %v670_v1 = vmov 0   ;;  %v671_v2 = vmov 2   ;;  %v672_v3 = vmov 1   ;;  %v673_v4 = vmov 3   ;;  %s787_s18 = smov (!%p257_p4, %s660_s18), 1 }
   0xd   : > { %640 = vset.pattern.permute.xlu0 %v670_v1  ;;  %642 = vset.pattern.permute.xlu1 %v671_v2  ;;  %s729_s24 = sshll.u32 %s787_s18, 3  ;;  %vm286_vm0 = vcmask 7168   ;;  %v674_v5 = vmov 0.0   ;;  %v300_v6 = vlaneseq  ;;  %vm416_vm1 = vcmask 1043456   ;;  %s606_s9 = sshll.u32 %s787_s18, 2 }
   0xe   : > { %296 = vperm.xlu0 %640, %v293_v0   ;;  %347 = vperm.xlu1 %642, %v293_v0   ;;  %s735_s27 = scalar_lea.vmem %s778_s2, %s729_s24  ;;  %s264_s30 = scalar_lea.vmem %s776_s0, %s729_s24  ;;  %vm289_vm2 = vcmask 3072  }
   0xf   : > { %287 = vst.msk [vmem:[%s735_s27] sm:$0xff] %vm286_vm0, %v674_v5  ;;  %v301_v7 = vshrl.u32 %v300_v6, 7  ;;  %v292_v12 = vld [vmem:[%s264_s30] sm:$0xff]  ;;  %s273_s8 = scalar_lea.vmem %s779_s3, %s729_s24  ;;  %s277_s12 = scalar_lea.vmem %s780_s4, %s606_s9 }
  0x10   : > { %v426_v37 = vmul.f32 %v292_v12, %v292_v12  ;;  %v414_v51 = vcombine.high %v292_v12, %v292_v12  ;;  %v417_v59 = vsel %vm416_vm1, %v292_v12, 0.0  ;;  %288 = vst.msk [vmem:[%s273_s8] sm:$0xff] %vm286_vm0, %v674_v5  ;;  %s281_s15 = scalar_lea.vmem %s781_s5, %s606_s9 }
  0x11   : > { %v302_v8 = vsub.s32 0, %v301_v7  ;;  %v306_v9 = vsub.s32 4, %v301_v7  ;;  %v326_v10 = vsub.s32 1, %v301_v7  ;;  %v330_v11 = vsub.s32 5, %v301_v7  ;;  %290 = vst.msk [vmem:[%s277_s12] sm:$0xf] %vm289_vm2, %v674_v5 }
  0x12   : > { %641 = vset.pattern.permute.xlu0 %v672_v3  ;;  %643 = vset.pattern.permute.xlu1 %v673_v4  ;;  %v352_v13 = vsub.s32 2, %v301_v7  ;;  %v356_v14 = vsub.s32 6, %v301_v7  ;;  %v378_v15 = vsub.s32 3, %v301_v7  ;;  %v382_v16 = vsub.s32 7, %v301_v7  ;;  %291 = vst.msk [vmem:[%s281_s15] sm:$0xf] %vm289_vm2, %v674_v5 }
  0x13   : > { %321 = vperm.xlu0 %641, %v293_v0   ;;  %373 = vperm.xlu1 %643, %v293_v0   ;;  %v303_v17 = vrot.slane %v292_v12, %v302_v8  ;;  %v307_v18 = vrot.slane %v292_v12, %v306_v9  ;;  %v327_v19 = vrot.slane %v292_v12, %v326_v10  ;;  %v430_v54 = vsel %vm416_vm1, %v426_v37, 0.0 }
  0x14   : > { %v331_v20 = vrot.slane %v292_v12, %v330_v11  ;;  %v353_v21 = vrot.slane %v292_v12, %v352_v13  ;;  %v357_v22 = vrot.slane %v292_v12, %v356_v14  ;;  %v379_v25 = vrot.slane %v292_v12, %v378_v15 }
  0x15   : > { %v383_v26 = vrot.slane %v292_v12, %v382_v16  ;;  %v313_v27 = vrot.slane %v303_v17, %v302_v8  ;;  %v317_v28 = vrot.slane %v307_v18, %v302_v8  ;;  %v337_v29 = vrot.slane %v327_v19, %v326_v10 }
  0x16   : > { %v341_v30 = vrot.slane %v331_v20, %v326_v10  ;;  %v363_v31 = vrot.slane %v353_v21, %v352_v13  ;;  %v367_v32 = vrot.slane %v357_v22, %v352_v13  ;;  %v389_v33 = vrot.slane %v379_v25, %v378_v15  ;;  %v398_v0 = vld [vmem:[%s735_s27] sm:$0xff] }
  0x17   : > { %644 = vset.pattern.permute.xlu0 %v673_v4  ;;  %v393_v34 = vrot.slane %v383_v26, %v378_v15  ;;  %v428_v48 = vcombine.high %v426_v37, %v426_v37  ;;  %v418_v60 = vsel %vm416_vm1, %v414_v51, 0.0  ;;  %v405_v2 = vld [vmem:[%s273_s8] sm:$0xff] }
  0x18   : > { %v419_v63 = vadd.f32 %v418_v60, %v417_v59  ;;  %v413_v8 = vld [vmem:[%s277_s12] sm:$0xf] }
  0x19   : > { %v431_v55 = vsel %vm416_vm1, %v428_v48, 0.0  ;;  %v425_v6 = vld [vmem:[%s281_s15] sm:$0xf] }
  0x1a   : > { %v432_v62 = vadd.f32 %v431_v55, %v430_v54 }
  0x89   : > { %v297_v23 = vpop.permute.xlu0 %296  ;;  %v348_v24 = vpop.permute.xlu1 %347 }
  0x8a   : > { %v318_v38 = vmul.f32 %v313_v27, %v297_v23  ;;  %v319_v39 = vmul.f32 %v317_v28, %v297_v23  ;;  %v368_v42 = vmul.f32 %v363_v31, %v348_v24  ;;  %v369_v43 = vmul.f32 %v367_v32, %v348_v24 }
  0x8e   : > { %v322_v35 = vpop.permute.xlu0 %321  ;;  %v374_v36 = vpop.permute.xlu1 %373 }
  0x8f   : > { %v342_v40 = vmul.f32 %v337_v29, %v322_v35  ;;  %v343_v41 = vmul.f32 %v341_v30, %v322_v35  ;;  %v394_v46 = vmul.f32 %v389_v33, %v374_v36  ;;  %v395_v47 = vmul.f32 %v393_v34, %v374_v36 }
  0x91   : > { %v344_v44 = vadd.f32 %v342_v40, %v318_v38  ;;  %v345_v45 = vadd.f32 %v343_v41, %v319_v39 }
  0x93   : > { %v370_v49 = vadd.f32 %v368_v42, %v344_v44  ;;  %v371_v50 = vadd.f32 %v369_v43, %v345_v45 }
  0x95   : > { %v396_v52 = vadd.f32 %v394_v46, %v370_v49  ;;  %v397_v53 = vadd.f32 %v395_v47, %v371_v50 }
  0x97   : > { %v399_v56 = vadd.f32 %v397_v53, %v396_v52  ;;  %v406_v57 = vmul.f32 %v396_v52, %v396_v52  ;;  %v407_v58 = vmul.f32 %v397_v53, %v397_v53 }
  0x99   : > { %400 = vadd.xlane.f32.xlu1 %v399_v56  ;;  %v408_v61 = vadd.f32 %v407_v58, %v406_v57 }
  0x9b   : > { %409 = vadd.xlane.f32.xlu0 %v408_v61 }
  0x9d   : > { %433 = vadd.xlane.f32.xlu1 %v432_v62 }
  0x9f   : > { %420 = vadd.xlane.f32.xlu0 %v419_v63 }
 0x122   : > { %v401_v1 = vpop.xlane.xlu1 %400 }
 0x123   : > { %v402_v3 = vadd.f32 %v401_v1, %v398_v0 }
 0x124   : > { %v410_v4 = vpop.xlane.xlu0 %409 }
 0x125   : > { %404 = vst.msk [vmem:[%s735_s27] sm:$0xff] %vm286_vm0, %v402_v3  ;;  %v411_v7 = vadd.f32 %v410_v4, %v405_v2 }
 0x126   : > { %v434_v9 = vpop.xlane.xlu1 %433 }
 0x127   : > { %412 = vst.msk [vmem:[%s273_s8] sm:$0xff] %vm286_vm0, %v411_v7  ;;  %v435_v10 = vadd.f32 %v434_v9, %v425_v6 }
 0x128   : > { %v421_v11 = vpop.xlane.xlu0 %420 }
 0x129   : > { %v422_v12 = vadd.f32 %v421_v11, %v413_v8  ;;  %436 = vst.msk [vmem:[%s281_s15] sm:$0xf] %vm289_vm2, %v435_v10 }
 0x12b   : > { %424 = vst.msk [vmem:[%s277_s12] sm:$0xf] %vm289_vm2, %v422_v12 }
 0x12c PF: > { %s16_s20 = sadd.s32 1, %s668_s20   ;;  %s782_s18 = smov %s664_s19 }
 0x12d   : > { %p13_p5 = scmp.ge.s32.totalorder %s16_s20, 4   ;;  %s783_s19 = smov %s785_s21 }
 0x12f   :  { %15 = sbr.rel (!%p13_p5) target bundleno = 2 (0x2), region = 98 }

// kernel: msse_forward.20
= control target key start
LH: loop header
LB: loop body
LE: loop exit
PB: predicated region body
PF: predicated region fallthrough
CT: control target
= control target key end

     0   :  { %s743_s21 = smov 0   ;;  %s745_s22 = smov 0   ;;  %s815_s0 = inlined_call_operand.vmem [shape: f32[2,4,256], index: 0, kind: input, shape index: {}]   ;;  %s816_s1 = inlined_call_operand.vmem [shape: f32[8,4], index: 1, kind: input, shape index: {}]   ;;  %s817_s2 = inlined_call_operand.vmem [shape: f32[8,1], index: 2, kind: input, shape index: {}]   ;;  %s818_s3 = inlined_call_operand.vmem [shape: f32[8,1], index: 3, kind: input, shape index: {}]   ;;  %s819_s4 = inlined_call_operand.vmem [shape: f32[2,8,256], index: 4, kind: output, shape index: {0}]   ;;  %s820_s5 = inlined_call_operand.vmem [shape: f32[2,8,1], index: 5, kind: output, shape index: {1}]   ;;  %s821_s6 = inlined_call_operand.vmem [shape: f32[2,8,1], index: 6, kind: output, shape index: {2}]  }
   0x1   :  { %s747_s23 = smov 0  }
   0x2 LB: > { %s29_s24 = sadd.s32 1, %s697_s22  ;;  %p629_p0 = scmp.ge.s32.totalorder %s701_s23, 1  ;;  %s701_s23 = sphi %s747_s23, %s17_s23   ;;  %s697_s22 = sphi %s745_s22, %s823_s22   ;;  %s693_s21 = sphi %s743_s21, %s822_s21  }
   0x3   : > { %p31_p1 = scmp.ge.s32.totalorder %s29_s24, 2  ;;  %p238_p2 = scmp.lt.s32.totalorder %s701_s23, 3 }
   0x5   : > { %s825_s24 = smov (%p31_p1, %s29_s24), 0  ;;  %p239_p3 = pnand %p629_p0, %p238_p2 }
   0x6   : > { %p285_p4 = scmp.lt.s32.totalorder (!%p239_p3), %s693_s21, 1 }
   0x7   : > { %242 = sbr.rel (%p239_p3) target bundleno = 329 (0x149), region = 36 }
   0xc   : > { %v319_v0 = vld [vmem:[%s816_s1] sm:$0xff]  ;;  %v703_v1 = vmov 0   ;;  %v704_v2 = vmov 2   ;;  %v705_v3 = vmov 1   ;;  %v706_v4 = vmov 3   ;;  %s827_s21 = smov (!%p285_p4, %s693_s21), 1 }
   0xd   : > { %669 = vset.pattern.permute.xlu0 %v703_v1  ;;  %671 = vset.pattern.permute.xlu1 %v704_v2  ;;  %v425_v5 = vld [vmem:[%s817_s2] sm:$0xff]  ;;  %s777_s7 = sshll.u32 %s827_s21, 3  ;;  %vm316_vm0 = vcmask 7168   ;;  %v707_v7 = vmov 0.0   ;;  %v327_v8 = vlaneseq  ;;  %s639_s14 = sshll.u32 %s827_s21, 4 }
   0xe   : > { %323 = vperm.xlu0 %669, %v319_v0   ;;  %374 = vperm.xlu1 %671, %v319_v0   ;;  %v433_v6 = vld [vmem:[%s818_s3] sm:$0xff]  ;;  %s783_s10 = scalar_lea.vmem %s820_s5, %s777_s7  ;;  %s292_s13 = scalar_lea.vmem %s815_s0, %s777_s7 }
   0xf   : > { %317 = vst.msk [vmem:[%s783_s10] sm:$0xff] %vm316_vm0, %v707_v7  ;;  %v328_v9 = vshrl.u32 %v327_v8, 7  ;;  %v320_v14 = vld [vmem:[%s292_s13] sm:$0xff]  ;;  %s302_s17 = scalar_lea.vmem %s819_s4, %s639_s14  ;;  %s311_s20 = scalar_lea.vmem %s821_s6, %s777_s7 }
  0x10   : > { %318 = vst.msk [vmem:[%s311_s20] sm:$0xff] %vm316_vm0, %v707_v7 }
  0x11   : > { %v329_v10 = vsub.s32 0, %v328_v9  ;;  %v333_v11 = vsub.s32 4, %v328_v9  ;;  %v353_v12 = vsub.s32 1, %v328_v9  ;;  %v357_v13 = vsub.s32 5, %v328_v9 }
  0x12   : > { %670 = vset.pattern.permute.xlu0 %v705_v3  ;;  %672 = vset.pattern.permute.xlu1 %v706_v4  ;;  %v379_v15 = vsub.s32 2, %v328_v9  ;;  %v383_v16 = vsub.s32 6, %v328_v9  ;;  %v405_v17 = vsub.s32 3, %v328_v9  ;;  %v409_v18 = vsub.s32 7, %v328_v9 }
  0x13   : > { %348 = vperm.xlu0 %670, %v319_v0   ;;  %400 = vperm.xlu1 %672, %v319_v0   ;;  %v330_v19 = vrot.slane %v320_v14, %v329_v10  ;;  %v334_v20 = vrot.slane %v320_v14, %v333_v11  ;;  %v354_v21 = vrot.slane %v320_v14, %v353_v12 }
  0x14   : > { %v358_v22 = vrot.slane %v320_v14, %v357_v13  ;;  %v380_v23 = vrot.slane %v320_v14, %v379_v15  ;;  %v384_v24 = vrot.slane %v320_v14, %v383_v16  ;;  %v406_v27 = vrot.slane %v320_v14, %v405_v17 }
  0x15   : > { %v410_v28 = vrot.slane %v320_v14, %v409_v18  ;;  %v340_v29 = vrot.slane %v330_v19, %v329_v10  ;;  %v344_v30 = vrot.slane %v334_v20, %v329_v10  ;;  %v364_v31 = vrot.slane %v354_v21, %v353_v12 }
  0x16   : > { %v368_v32 = vrot.slane %v358_v22, %v353_v12  ;;  %v390_v33 = vrot.slane %v380_v23, %v379_v15  ;;  %v394_v34 = vrot.slane %v384_v24, %v379_v15  ;;  %v416_v35 = vrot.slane %v406_v27, %v405_v17  ;;  %v461_v18 = vld [vmem:[%s783_s10] sm:$0xff] }
  0x17   : > { %673 = vset.pattern.permute.xlu1 %v703_v1  ;;  %674 = vset.pattern.permute.xlu0 %v703_v1  ;;  %v420_v36 = vrot.slane %v410_v28, %v405_v17  ;;  %v468_v20 = vld [vmem:[%s311_s20] sm:$0xff] }
  0x18   : > { %428 = vperm.xlu1 %673, %v425_v5   ;;  %436 = vperm.xlu0 %674, %v433_v6  }
  0x89   : > { %v324_v25 = vpop.permute.xlu0 %323  ;;  %v375_v26 = vpop.permute.xlu1 %374 }
  0x8a   : > { %v345_v39 = vmul.f32 %v340_v29, %v324_v25  ;;  %v346_v40 = vmul.f32 %v344_v30, %v324_v25  ;;  %v395_v43 = vmul.f32 %v390_v33, %v375_v26  ;;  %v396_v44 = vmul.f32 %v394_v34, %v375_v26 }
  0x8e   : > { %v349_v37 = vpop.permute.xlu0 %348  ;;  %v401_v38 = vpop.permute.xlu1 %400 }
  0x8f   : > { %v369_v41 = vmul.f32 %v364_v31, %v349_v37  ;;  %v370_v42 = vmul.f32 %v368_v32, %v349_v37  ;;  %v421_v47 = vmul.f32 %v416_v35, %v401_v38  ;;  %v422_v48 = vmul.f32 %v420_v36, %v401_v38 }
  0x91   : > { %v371_v45 = vadd.f32 %v369_v41, %v345_v39  ;;  %v372_v46 = vadd.f32 %v370_v42, %v346_v40 }
  0x93   : > { %v397_v49 = vadd.f32 %v395_v43, %v371_v45  ;;  %v398_v50 = vadd.f32 %v396_v44, %v372_v46  ;;  %v429_v51 = vpop.permute.xlu1 %428  ;;  %v437_v54 = vpop.permute.xlu0 %436 }
  0x95   : > { %v423_v52 = vadd.f32 %v421_v47, %v397_v49  ;;  %v424_v53 = vadd.f32 %v422_v48, %v398_v50 }
  0x97   : > { %v431_v55 = vmul.f32 %v429_v51, %v423_v52  ;;  %v432_v56 = vmul.f32 %v429_v51, %v424_v53 }
  0x99   : > { %v439_v57 = vadd.f32 %v437_v54, %v431_v55  ;;  %v440_v58 = vadd.f32 %v437_v54, %v432_v56 }
  0x9b   : > { %v443_v59 = vmul.f32 0.044715, %v439_v57  ;;  %v444_v60 = vmul.f32 0.044715, %v440_v58  ;;  %v441_v8 = vmul.f32 0.5, %v439_v57  ;;  %v442_v10 = vmul.f32 0.5, %v440_v58 }
  0x9d   : > { %v445_v61 = vmul.f32 %v443_v59, %v439_v57  ;;  %v446_v62 = vmul.f32 %v444_v60, %v440_v58 }
  0x9f   : > { %v447_v63 = vmul.f32 %v445_v61, %v439_v57  ;;  %v448_v0 = vmul.f32 %v446_v62, %v440_v58 }
  0xa1   : > { %v449_v1 = vadd.f32 %v447_v63, %v439_v57  ;;  %v450_v2 = vadd.f32 %v448_v0, %v440_v58 }
  0xa3   : > { %v451_v3 = vmul.f32 0.7978846, %v449_v1  ;;  %v452_v4 = vmul.f32 0.7978846, %v450_v2 }
  0xa5   : > { %675 = vtanh.f32 %v451_v3 }
  0xa6   : > { %677 = vtanh.f32 %v452_v4 }
  0xb2   : > { %v676_v5 = vpop.eup %675 }
  0xb3   : > { %v678_v6 = vpop.eup %677  ;;  %v455_v9 = vadd.f32 1.0, %v676_v5 }
  0xb4   : > { %v456_v11 = vadd.f32 1.0, %v678_v6 }
  0xb5   : > { %v457_v12 = vmul.f32 %v455_v9, %v441_v8 }
  0xb6   : > { %v458_v13 = vmul.f32 %v456_v11, %v442_v10 }
  0xb7   : > { %459 = vst [vmem:[%s302_s17] sm:$0xff] %v457_v12  ;;  %v469_v14 = vmul.f32 %v457_v12, %v457_v12 }
  0xb8   : > { %460 = vst [vmem:[%s302_s17 + $0x8] sm:$0xff] %v458_v13  ;;  %v462_v15 = vadd.f32 %v458_v13, %v457_v12  ;;  %v470_v16 = vmul.f32 %v458_v13, %v458_v13 }
  0xba   : > { %463 = vadd.xlane.f32.xlu1 %v462_v15  ;;  %v471_v17 = vadd.f32 %v470_v16, %v469_v14 }
  0xbc   : > { %472 = vadd.xlane.f32.xlu0 %v471_v17 }
 0x143   : > { %v464_v19 = vpop.xlane.xlu1 %463 }
 0x144   : > { %v465_v21 = vadd.f32 %v464_v19, %v461_v18 }
 0x145   : > { %v473_v22 = vpop.xlane.xlu0 %472 }
 0x146   : > { %467 = vst.msk [vmem:[%s783_s10] sm:$0xff] %vm316_vm0, %v465_v21  ;;  %v474_v23 = vadd.f32 %v473_v22, %v468_v20 }
 0x148   : > { %475 = vst.msk [vmem:[%s311_s20] sm:$0xff] %vm316_vm0, %v474_v23 }
 0x149 PF: > { %s17_s23 = sadd.s32 1, %s701_s23   ;;  %s822_s21 = smov %s697_s22 }
 0x14a   : > { %p14_p5 = scmp.ge.s32.totalorder %s17_s23, 4   ;;  %s823_s22 = smov %s825_s24 }
 0x14c   :  { %16 = sbr.rel (!%p14_p5) target bundleno = 2 (0x2), region = 94 }

// kernel: msse_forward.23
= control target key start
LH: loop header
LB: loop body
LE: loop exit
PB: predicated region body
PF: predicated region fallthrough
CT: control target
= control target key end

     0   :  { %s817_s18 = smov 0   ;;  %s954_s0 = inlined_call_operand.vmem [shape: f32[2,256], index: 0, kind: input, shape index: {}]   ;;  %s955_s1 = inlined_call_operand.vmem [shape: f32[2,8,256], index: 1, kind: input, shape index: {}]   ;;  %s956_s2 = inlined_call_operand.vmem [shape: f32[2,8,256], index: 2, kind: input, shape index: {}]   ;;  %s957_s3 = inlined_call_operand.vmem [shape: f32[8,72], index: 3, kind: input, shape index: {}]   ;;  %s958_s4 = inlined_call_operand.vmem [shape: f32[2,8,1], index: 4, kind: output, shape index: {0}]   ;;  %s959_s5 = inlined_call_operand.vmem [shape: f32[2,8,1], index: 5, kind: output, shape index: {1}]  }
   0x1 LB: > { %s728_s19 = sadd.s32 4294967295, %s772_s18   ;;  %p732_p0 = scmp.ge.s32.totalorder %s772_s18, 1  ;;  %s772_s18 = sphi %s817_s18, %s16_s18  }
   0x2   : > { %p200_p1 = scmp.lt.s32.totalorder %s772_s18, 3 }
   0x4   : > { %p201_p2 = pnand %p732_p0, %p200_p1 }
   0x5   : > { %p236_p3 = scmp.lt.s32.totalorder (!%p201_p2), %s728_s19, 1  ;;  %s775_s24 = smov (!%p201_p2), 17  }
   0x6   : > { %204 = sbr.rel (%p201_p2) target bundleno = 786 (0x312), region = 36  ;;  %s776_s25 = smov (!%p201_p2), 15  }
   0x7   : > { %s777_s27 = smov (!%p201_p2), 1   ;;  %s778_s9 = smov (!%p201_p2), 127  }
   0x8   : > { %s779_s10 = smov (!%p201_p2), 113   ;;  %s780_s11 = smov (!%p201_p2), 95  }
   0x9   : > { %s781_s12 = smov (!%p201_p2), 111   ;;  %s782_s13 = smov (!%p201_p2), 94  }
   0xa   : > { %s783_s14 = smov (!%p201_p2), 96   ;;  %s784_s15 = smov (!%p201_p2), 110  }
   0xb   : > { %v273_v0 = vlaneseq  ;;  %v774_v1 = vmov 0.0   ;;  %v739_v3 = vld [vmem:[%s954_s0 + $0x1] ss:$2 sm:$0x3]  ;;  %s961_s19 = smov (!%p236_p3, %s728_s19), 1  ;;  %vm357_vm0 = vcmask 138240  }
   0xc   : > { %615 = vmatprep.mubr.f32.mxu0 %v774_v1  ;;  %v266_v4 = vld [vmem:[%s954_s0] ss:$2 sm:$0x3]  ;;  %s743_s26 = sshll.u32 %s961_s19, 4  ;;  %vm333_vm1 = vcmask 7168   ;;  %s785_s16 = smov 112  }
   0xd   : > { %v274_v2 = vshrl.u32 %v273_v0, 7  ;;  %s240_s30 = scalar_lea.vmem %s955_s1, %s743_s26  ;;  %s245_s8 = scalar_lea.vmem %s956_s2, %s743_s26  ;;  %vm345_vm2 = vcmask 121856   ;;  %vm318_vm3 = vcmask 1039360   ;;  %vm306_vm4 = vcmask 924672  }
   0xe   : > { %v255_v11 = vld [vmem:[%s240_s30 + $0x8] sm:$0xff]  ;;  %v254_v13 = vld [vmem:[%s240_s30] sm:$0xff]  ;;  %s786_s17 = smov 126   ;;  %vm438_vm5 = vcmask 777216   ;;  %vm285_vm6 = vcmask 908288   ;;  %vm450_vm7 = vcmask 769024  }
   0xf   : > { %v275_v5 = vsub.s32 0, %v274_v2  ;;  %v279_v6 = vsub.s32 1, %v274_v2  ;;  %v257_v12 = vld [vmem:[%s245_s8 + $0x8] sm:$0xff]  ;;  %v256_v14 = vld [vmem:[%s245_s8] sm:$0xff]  ;;  %vm426_vm8 = vcmask 785408   ;;  %vm414_vm9 = vcmask 900096  }
  0x10   : > { %v849_v15 = vadd.f32 %v257_v12, %v255_v11  ;;  %v851_v16 = vadd.f32 %v256_v14, %v254_v13  ;;  %vm397_vm10 = vcmask 916480   ;;  %vm385_vm11 = vcmask 1031168   ;;  %s737_s22 = sshll.u32 %s961_s19, 3 }
  0x11   : > { %v297_v7 = vrot.slane %v739_v3, %v275_v5  ;;  %v276_v8 = vrot.slane %v266_v4, %v275_v5  ;;  %v301_v9 = vrot.slane %v739_v3, %v279_v6  ;;  %v833_v10 = vrot.slane %v266_v4, %v279_v6  ;;  %s253_s28 = scalar_lea.vmem %s959_s5, %s737_s22 }
  0x12   : > { %vm547_vm12 = vcmask 588800  }
  0x13   : > { %353 = vrot.lane.b32.xlu0 %v297_v7, %s775_s24  ;;  %341 = vrot.lane.b32.xlu1 %v276_v8, %s776_s25 }
  0x17   : > { %355 = vrot.lane.b32.xlu0 %v301_v9, %s775_s24  ;;  %343 = vrot.lane.b32.xlu1 %v833_v10, %s776_s25  ;;  %s249_s25 = scalar_lea.vmem %s958_s4, %s737_s22 }
  0x1b   : > { %329 = vrot.lane.b32.xlu0 %v297_v7, %s777_s27  ;;  %331 = vrot.lane.b32.xlu1 %v301_v9, %s777_s27 }
  0x1f   : > { %314 = vrot.lane.b32.xlu0 %v276_v8, %s778_s9  ;;  %316 = vrot.lane.b32.xlu1 %v833_v10, %s778_s9 }
  0x23   : > { %302 = vrot.lane.b32.xlu0 %v297_v7, %s779_s10  ;;  %304 = vrot.lane.b32.xlu1 %v301_v9, %s779_s10 }
  0x27   : > { %434 = vrot.lane.b32.xlu0 %v849_v15, %s780_s11  ;;  %432 = vrot.lane.b32.xlu1 %v851_v16, %s780_s11 }
  0x2b   : > { %400 = vrot.lane.b32.xlu0 %v851_v16, %s781_s12  ;;  %436 = vrot.lane.b32.xlu1 %v774_v1, %s780_s11 }
  0x2f   : > { %281 = vrot.lane.b32.xlu0 %v276_v8, %s781_s12  ;;  %402 = vrot.lane.b32.xlu1 %v849_v15, %s781_s12 }
  0x85   : > { %v354_v17 = vpop.permute.xlu0 %353  ;;  %v342_v18 = vpop.permute.xlu1 %341 }
  0x86   : > { %v362_v19 = vmul.f32 %v354_v17, %v851_v16  ;;  %v350_v25 = vmul.f32 %v342_v18, %v851_v16 }
  0x88   : > { %444 = vrot.lane.b32.xlu0 %v362_v19, %s782_s13 }
  0x89   : > { %v356_v20 = vpop.permute.xlu0 %355  ;;  %v344_v21 = vpop.permute.xlu1 %343 }
  0x8a   : > { %v364_v22 = vmul.f32 0.0, %v356_v20  ;;  %v352_v30 = vmul.f32 0.0, %v344_v21  ;;  %v358_v37 = vsel %vm357_vm0, %v354_v17, %v356_v20  ;;  %v346_v41 = vsel %vm345_vm2, %v342_v18, %v344_v21 }
  0x8b   : > { %v363_v39 = vmul.f32 %v358_v37, %v849_v15  ;;  %v351_v43 = vmul.f32 %v346_v41, %v849_v15 }
  0x8c   : > { %448 = vrot.lane.b32.xlu0 %v364_v22, %s782_s13 }
  0x8d   : > { %v330_v23 = vpop.permute.xlu0 %329  ;;  %v332_v24 = vpop.permute.xlu1 %331 }
  0x8e   : > { %v338_v26 = vmul.f32 %v330_v23, %v851_v16  ;;  %v340_v27 = vmul.f32 0.0, %v332_v24  ;;  %v334_v38 = vsel %vm333_vm1, %v330_v23, %v332_v24 }
  0x8f   : > { %v339_v40 = vmul.f32 %v334_v38, %v849_v15 }
  0x90   : > { %420 = vrot.lane.b32.xlu0 %v350_v25, %s783_s14  ;;  %408 = vrot.lane.b32.xlu1 %v338_v26, %s784_s15 }
  0x91   : > { %v315_v28 = vpop.permute.xlu0 %314  ;;  %v317_v29 = vpop.permute.xlu1 %316 }
  0x92   : > { %v323_v31 = vmul.f32 0.0, %v315_v28  ;;  %v325_v32 = vmul.f32 %v317_v29, %v849_v15  ;;  %v319_v42 = vsel %vm318_vm3, %v315_v28, %v317_v29 }
  0x93   : > { %v324_v44 = vmul.f32 %v319_v42, %v851_v16 }
  0x94   : > { %424 = vrot.lane.b32.xlu0 %v352_v30, %s783_s14  ;;  %412 = vrot.lane.b32.xlu1 %v340_v27, %s784_s15 }
  0x95   : > { %v303_v33 = vpop.permute.xlu0 %302  ;;  %v305_v34 = vpop.permute.xlu1 %304 }
  0x96   : > { %v311_v35 = vmul.f32 0.0, %v303_v33  ;;  %v313_v36 = vmul.f32 %v305_v34, %v849_v15  ;;  %v307_v46 = vsel %vm306_vm4, %v303_v33, %v305_v34 }
  0x97   : > { %v312_v47 = vmul.f32 %v307_v46, %v851_v16 }
  0x98   : > { %391 = vrot.lane.b32.xlu0 %v323_v31, %s785_s16  ;;  %395 = vrot.lane.b32.xlu1 %v325_v32, %s785_s16 }
  0x99   : > { %v433_v45 = vpop.permute.xlu1 %432  ;;  %v435_v48 = vpop.permute.xlu0 %434 }
  0x9a   : > { %v439_v50 = vsel %vm438_vm5, %v433_v45, %v435_v48 }
  0x9c   : > { %383 = vrot.lane.b32.xlu0 %v313_v36, %s786_s17  ;;  %379 = vrot.lane.b32.xlu1 %v311_v35, %s786_s17 }
  0x9d   : > { %v437_v49 = vpop.permute.xlu1 %436  ;;  %v401_v53 = vpop.permute.xlu0 %400 }
  0x9e   : > { %v440_v51 = vsel %vm438_vm5, %v435_v48, %v437_v49 }
  0xa0   : > { %410 = vrot.lane.b32.xlu0 %v339_v40, %s784_s15  ;;  %446 = vrot.lane.b32.xlu1 %v363_v39, %s782_s13 }
  0xa1   : > { %v403_v52 = vpop.permute.xlu1 %402  ;;  %v282_v55 = vpop.permute.xlu0 %281 }
  0xa2   : > { %v404_v54 = vsel %vm285_vm6, %v401_v53, %v403_v52 }
  0xa4   : > { %422 = vrot.lane.b32.xlu1 %v351_v43, %s783_s14  ;;  %393 = vrot.lane.b32.xlu0 %v324_v44, %s785_s16 }
  0xa8   : > { %283 = vrot.lane.b32.xlu1 %v833_v10, %s781_s12  ;;  %370 = vrot.lane.b32.xlu0 %v851_v16, %s778_s9 }
  0xac   : > { %381 = vrot.lane.b32.xlu1 %v312_v47, %s786_s17  ;;  %368 = vrot.lane.b32.xlu0 %v774_v1, %s778_s9 }
  0xb0   : > { %372 = vrot.lane.b32.xlu1 %v849_v15, %s778_s9  ;;  %501 = vrot.lane.b32.xlu0 %v439_v50, %s775_s24 }
  0xb4   : > { %503 = vrot.lane.b32.xlu1 %v440_v51, %s775_s24  ;;  %499 = vrot.lane.b32.xlu0 %v433_v45, %s775_s24 }
  0xb8   : > { %483 = vrot.lane.b32.xlu1 %v404_v54, %s775_s24  ;;  %485 = vrot.lane.b32.xlu0 %v403_v52, %s775_s24 }
  0xbc   : > { %481 = vrot.lane.b32.xlu1 %v401_v53, %s775_s24 }
  0xfa   : > { %v445_v56 = vpop.permute.xlu0 %444 }
  0xfe   : > { %v449_v57 = vpop.permute.xlu0 %448 }
 0x102   : > { %v421_v58 = vpop.permute.xlu0 %420  ;;  %v409_v59 = vpop.permute.xlu1 %408 }
 0x106   : > { %v425_v60 = vpop.permute.xlu0 %424  ;;  %v413_v61 = vpop.permute.xlu1 %412 }
 0x10a   : > { %v396_v62 = vpop.permute.xlu1 %395  ;;  %v392_v63 = vpop.permute.xlu0 %391 }
 0x10e   : > { %v380_v0 = vpop.permute.xlu1 %379  ;;  %v384_v1 = vpop.permute.xlu0 %383 }
 0x112   : > { %v447_v2 = vpop.permute.xlu1 %446  ;;  %v411_v4 = vpop.permute.xlu0 %410 }
 0x113   : > { %v452_v11 = vsel %vm450_vm7, %v447_v2, %v449_v57  ;;  %v451_v12 = vsel %vm450_vm7, %v445_v56, %v447_v2  ;;  %v415_v17 = vsel %vm414_vm9, %v409_v59, %v411_v4  ;;  %v416_v19 = vsel %vm414_vm9, %v411_v4, %v413_v61 }
 0x116   : > { %v423_v3 = vpop.permute.xlu1 %422  ;;  %v394_v6 = vpop.permute.xlu0 %393 }
 0x117   : > { %v428_v13 = vsel %vm426_vm8, %v423_v3, %v425_v60  ;;  %v427_v14 = vsel %vm426_vm8, %v421_v58, %v423_v3  ;;  %v399_v20 = vsel %vm397_vm10, %v394_v6, %v396_v62  ;;  %v398_v22 = vsel %vm397_vm10, %v392_v63, %v394_v6 }
 0x11a   : > { %v284_v5 = vpop.permute.xlu1 %283  ;;  %v371_v8 = vpop.permute.xlu0 %370 }
 0x11b   : > { %v286_v18 = vsel %vm285_vm6, %v282_v55, %v284_v5  ;;  %v292_v26 = vmul.f32 %v284_v5, %v849_v15 }
 0x11c   : > { %v291_v21 = vmul.f32 %v286_v18, %v851_v16  ;;  %v290_v16 = vmul.f32 0.0, %v282_v55 }
 0x11e   : > { %v382_v7 = vpop.permute.xlu1 %381  ;;  %v369_v23 = vpop.permute.xlu0 %368 }
 0x11f   : > { %v387_v24 = vsel %vm385_vm11, %v382_v7, %v384_v1  ;;  %v374_v25 = vsel %vm318_vm3, %v369_v23, %v371_v8  ;;  %v386_v27 = vsel %vm385_vm11, %v380_v0, %v382_v7  ;;  %v453_v7 = vld [vmem:[%s957_s3] sm:$0xff] }
 0x122   : > { %v373_v9 = vpop.permute.xlu1 %372  ;;  %v502_v29 = vpop.permute.xlu0 %501 }
 0x123   : > { %467 = vrot.lane.b32.xlu1 %v373_v9, %s775_s24  ;;  %v375_v10 = vsel %vm318_vm3, %v371_v8, %v373_v9 }
 0x124   : > { %465 = vrot.lane.b32.xlu0 %v375_v10, %s775_s24 }
 0x126   : > { %v504_v28 = vpop.permute.xlu1 %503  ;;  %v500_v31 = vpop.permute.xlu0 %499 }
 0x127   : > { %505 = vrot.lane.b32.xlu1 %v445_v56, %s775_s24  ;;  %v526_v45 = vsel %vm357_vm0, %v502_v29, %v504_v28  ;;  %v525_v47 = vsel %vm357_vm0, %v500_v31, %v502_v29 }
 0x128   : > { %487 = vrot.lane.b32.xlu0 %v409_v59, %s775_s24 }
 0x12a   : > { %v484_v30 = vpop.permute.xlu1 %483  ;;  %v486_v33 = vpop.permute.xlu0 %485 }
 0x12b   : > { %493 = vrot.lane.b32.xlu1 %v421_v58, %s775_s24  ;;  %v520_v55 = vsel %vm357_vm0, %v484_v30, %v486_v33 }
 0x12c   : > { %473 = vrot.lane.b32.xlu0 %v384_v1, %s775_s24 }
 0x12e   : > { %v482_v32 = vpop.permute.xlu1 %481 }
 0x12f   : > { %479 = vrot.lane.b32.xlu1 %v396_v62, %s775_s24  ;;  %v519_v57 = vsel %vm357_vm0, %v482_v32, %v484_v30 }
 0x130   : > { %509 = vrot.lane.b32.xlu0 %v452_v11, %s775_s24 }
 0x133   : > { %507 = vrot.lane.b32.xlu1 %v451_v12, %s775_s24 }
 0x134   : > { %497 = vrot.lane.b32.xlu0 %v428_v13, %s775_s24 }
 0x137   : > { %495 = vrot.lane.b32.xlu1 %v427_v14, %s775_s24 }
 0x138   : > { %489 = vrot.lane.b32.xlu0 %v415_v17, %s775_s24 }
 0x13b   : > { %491 = vrot.lane.b32.xlu1 %v416_v19, %s775_s24 }
 0x13c   : > { %477 = vrot.lane.b32.xlu0 %v399_v20, %s775_s24 }
 0x13f   : > { %459 = vrot.lane.b32.xlu1 %v291_v21, %s775_s24 }
 0x140   : > { %475 = vrot.lane.b32.xlu0 %v398_v22, %s775_s24 }
 0x143   : > { %471 = vrot.lane.b32.xlu1 %v387_v24, %s775_s24 }
 0x144   : > { %463 = vrot.lane.b32.xlu0 %v374_v25, %s775_s24 }
 0x147   : > { %469 = vrot.lane.b32.xlu1 %v386_v27, %s775_s24 }
 0x148   : > { %461 = vrot.lane.b32.xlu0 %v292_v26, %s775_s24 }
 0x14b   : > { %457 = vrot.lane.b32.xlu1 %v290_v16, %s775_s24 }
 0x195   : > { %v468_v34 = vpop.permute.xlu1 %467 }
 0x196   : > { %v466_v35 = vpop.permute.xlu0 %465 }
 0x197   : > { %v514_v3 = vsel %vm357_vm0, %v466_v35, %v468_v34 }
 0x199   : > { %v506_v36 = vpop.permute.xlu1 %505 }
 0x19a   : > { %v488_v37 = vpop.permute.xlu0 %487 }
 0x19d   : > { %v494_v38 = vpop.permute.xlu1 %493 }
 0x19e   : > { %v474_v15 = vpop.permute.xlu0 %473 }
 0x1a1   : > { %v480_v39 = vpop.permute.xlu1 %479 }
 0x1a2   : > { %v510_v40 = vpop.permute.xlu0 %509 }
 0x1a5   : > { %v508_v41 = vpop.permute.xlu1 %507 }
 0x1a6   : > { %v498_v42 = vpop.permute.xlu0 %497  ;;  %v528_v43 = vsel %vm357_vm0, %v508_v41, %v510_v40  ;;  %v527_v44 = vsel %vm357_vm0, %v506_v36, %v508_v41 }
 0x1a7   : > { %565 = vmatprep.subr.mxu0 %v528_v43 }
 0x1a8   : > { %566 = vmatpush1.msra.mxu0 %v527_v44 }
 0x1a9   : > { %567 = vmatprep.subr.mxu0 %v526_v45  ;;  %v496_v46 = vpop.permute.xlu1 %495 }
 0x1aa   : > { %v490_v48 = vpop.permute.xlu0 %489  ;;  %568 = vmatpush1.msra.mxu0 %v525_v47  ;;  %v524_v49 = vsel %vm357_vm0, %v496_v46, %v498_v42  ;;  %v523_v50 = vsel %vm357_vm0, %v494_v38, %v496_v46 }
 0x1ab   : > { %569 = vmatprep.subr.mxu0 %v524_v49  ;;  %v521_v54 = vsel %vm357_vm0, %v488_v37, %v490_v48 }
 0x1ac   : > { %570 = vmatpush1.msra.mxu0 %v523_v50 }
 0x1ad   : > { %v492_v51 = vpop.permute.xlu1 %491 }
 0x1ae   : > { %v478_v52 = vpop.permute.xlu0 %477  ;;  %v522_v53 = vsel %vm357_vm0, %v490_v48, %v492_v51 }
 0x1af   : > { %571 = vmatprep.subr.mxu0 %v522_v53  ;;  %v518_v59 = vsel %vm357_vm0, %v478_v52, %v480_v39 }
 0x1b0   : > { %572 = vmatpush1.msra.mxu0 %v521_v54 }
 0x1b1   : > { %573 = vmatprep.subr.mxu0 %v520_v55  ;;  %v460_v56 = vpop.permute.xlu1 %459 }
 0x1b2   : > { %v476_v58 = vpop.permute.xlu0 %475  ;;  %574 = vmatpush1.msra.mxu0 %v519_v57 }
 0x1b3   : > { %575 = vmatprep.subr.mxu0 %v518_v59  ;;  %v517_v60 = vsel %vm357_vm0, %v476_v58, %v478_v52 }
 0x1b4   : > { %576 = vmatpush1.msra.mxu0 %v517_v60 }
 0x1b5   : > { %v472_v61 = vpop.permute.xlu1 %471 }
 0x1b6   : > { %v464_v62 = vpop.permute.xlu0 %463  ;;  %v516_v63 = vsel %vm357_vm0, %v472_v61, %v474_v15 }
 0x1b7   : > { %577 = vmatprep.subr.mxu0 %v516_v63  ;;  %v513_v4 = vsel %vm357_vm0, %v464_v62, %v466_v35 }
 0x1b9   : > { %v470_v0 = vpop.permute.xlu1 %469 }
 0x1ba   : > { %v462_v1 = vpop.permute.xlu0 %461  ;;  %v515_v2 = vsel %vm357_vm0, %v470_v0, %v472_v61 }
 0x1bb   : > { %578 = vmatpush1.msra.mxu0 %v515_v2  ;;  %v512_v6 = vsel %vm357_vm0, %v460_v56, %v462_v1 }
 0x1bc   : > { %579 = vmatprep.subr.mxu0 %v514_v3 }
 0x1bd   : > { %580 = vmatpush1.msra.mxu0 %v513_v4  ;;  %v458_v5 = vpop.permute.xlu1 %457 }
 0x1be   : > { %581 = vmatprep.subr.mxu0 %v512_v6  ;;  %v511_v8 = vsel %vm357_vm0, %v458_v5, %v460_v56 }
 0x1bf   : > { %582 = vmatpush1.msra.mxu0 %v511_v8 }
 0x1c0   : > { %740 = vmatmul.mubr.msk.f32.vlgmr.msra.gmra.mxu0 %vm547_vm12, %v453_v7 }
 0x280   : > { %v617_v9 = vpop.f32.mrf.mxu0 }
 0x281   : > { %v626_v11 = vmul.f32 %v617_v9, %v617_v9 }
 0x282   : > { %v619_v10 = vpop.f32.mrf.mxu0 }
 0x283   : > { %v622_v12 = vadd.f32 %v619_v10, %v617_v9  ;;  %v627_v13 = vmul.f32 %v619_v10, %v619_v10 }
 0x285   : > { %623 = vadd.xlane.f32.xlu0 %v622_v12  ;;  %v628_v14 = vadd.f32 %v627_v13, %v626_v11 }
 0x287   : > { %629 = vadd.xlane.f32.xlu1 %v628_v14 }
 0x30e   : > { %v624_v17 = vpop.xlane.xlu0 %623 }
 0x30f   : > { %625 = vst.msk [vmem:[%s249_s25] sm:$0xff] %vm333_vm1, %v624_v17 }
 0x310   : > { %v630_v18 = vpop.xlane.xlu1 %629 }
 0x311   : > { %631 = vst.msk [vmem:[%s253_s28] sm:$0xff] %vm333_vm1, %v630_v18 }
 0x312 PF: > { %s16_s18 = sadd.s32 1, %s772_s18  }
 0x313   : > { %p13_p4 = scmp.ge.s32.totalorder %s16_s18, 4  }
 0x315   :  { %15 = sbr.rel (!%p13_p4) target bundleno = 1 (0x1), region = 82 }

// kernel: msse_forward.24
= control target key start
LH: loop header
LB: loop body
LE: loop exit
PB: predicated region body
PF: predicated region fallthrough
CT: control target
= control target key end

     0   :  { %s1005_s27 = smov 0   ;;  %s1156_s0 = inlined_call_operand.vmem [shape: f32[2,256], index: 0, kind: input, shape index: {}]   ;;  %s1157_s1 = inlined_call_operand.vmem [shape: f32[2,8,256], index: 1, kind: input, shape index: {}]   ;;  %s1158_s2 = inlined_call_operand.vmem [shape: f32[2,8,256], index: 2, kind: input, shape index: {}]   ;;  %s1159_s3 = inlined_call_operand.vmem [shape: f32[8,72], index: 3, kind: input, shape index: {}]   ;;  %s1160_s4 = inlined_call_operand.vmem [shape: f32[8,1], index: 4, kind: input, shape index: {}]   ;;  %s1161_s5 = inlined_call_operand.vmem [shape: f32[8,1], index: 5, kind: input, shape index: {}]   ;;  %s1162_s6 = inlined_call_operand.vmem [shape: f32[2,8,256], index: 6, kind: output, shape index: {0}]   ;;  %s1163_s7 = inlined_call_operand.vmem [shape: f32[2,8,1], index: 7, kind: output, shape index: {1}]   ;;  %s1164_s8 = inlined_call_operand.vmem [shape: f32[2,8,1], index: 8, kind: output, shape index: {2}]  }
   0x1 LB: > { %s890_s28 = sadd.s32 4294967295, %s944_s27   ;;  %p894_p0 = scmp.ge.s32.totalorder %s944_s27, 1  ;;  %s944_s27 = sphi %s1005_s27, %s19_s27  }
   0x2   : > { %p277_p1 = scmp.lt.s32.totalorder %s944_s27, 3 }
   0x4   : > { %p278_p2 = pnand %p894_p0, %p277_p1 }
   0x5   : > { %p324_p3 = scmp.lt.s32.totalorder (!%p278_p2), %s890_s28, 1  ;;  %s947_s11 = smov (!%p278_p2), 17  }
   0x6   : > { %281 = sbr.rel (%p278_p2) target bundleno = 818 (0x332), region = 44  ;;  %s948_s12 = smov (!%p278_p2), 15  }
   0x7   : > { %s949_s14 = smov (!%p278_p2), 1   ;;  %s950_s21 = smov (!%p278_p2), 127  }
   0x8   : > { %s951_s22 = smov (!%p278_p2), 113   ;;  %s952_s23 = smov (!%p278_p2), 95  }
   0x9   : > { %s953_s24 = smov (!%p278_p2), 111   ;;  %s954_s25 = smov (!%p278_p2), 94  }
   0xa   : > { %s955_s26 = smov (!%p278_p2), 96   ;;  %s956_s29 = smov (!%p278_p2), 110  }
   0xb   : > { %v366_v0 = vlaneseq  ;;  %v946_v1 = vmov 0.0   ;;  %v903_v3 = vld [vmem:[%s1156_s0 + $0x1] ss:$2 sm:$0x3]  ;;  %s1166_s28 = smov (!%p324_p3, %s890_s28), 1  ;;  %vm450_vm0 = vcmask 138240  }
   0xc   : > { %708 = vmatprep.mubr.f32.mxu0 %v946_v1  ;;  %v359_v4 = vld [vmem:[%s1156_s0] ss:$2 sm:$0x3]  ;;  %s1028_s13 = sshll.u32 %s1166_s28, 4  ;;  %vm426_vm1 = vcmask 7168   ;;  %s957_s30 = smov 112  }
   0xd   : > { %v367_v2 = vshrl.u32 %v366_v0, 7  ;;  %s328_s17 = scalar_lea.vmem %s1157_s1, %s1028_s13  ;;  %s333_s20 = scalar_lea.vmem %s1158_s2, %s1028_s13  ;;  %vm438_vm2 = vcmask 121856   ;;  %vm411_vm3 = vcmask 1039360   ;;  %vm399_vm4 = vcmask 924672  }
   0xe   : > { %v348_v11 = vld [vmem:[%s328_s17 + $0x8] sm:$0xff]  ;;  %v347_v13 = vld [vmem:[%s328_s17] sm:$0xff]  ;;  %s958_s9 = smov 126   ;;  %vm531_vm5 = vcmask 777216   ;;  %vm378_vm6 = vcmask 908288   ;;  %vm543_vm7 = vcmask 769024   ;;  %s338_s19 = scalar_lea.vmem %s1162_s6, %s1028_s13 }
   0xf   : > { %v368_v5 = vsub.s32 0, %v367_v2  ;;  %v372_v6 = vsub.s32 1, %v367_v2  ;;  %v350_v12 = vld [vmem:[%s333_s20 + $0x8] sm:$0xff]  ;;  %v349_v14 = vld [vmem:[%s333_s20] sm:$0xff]  ;;  %vm519_vm8 = vcmask 785408   ;;  %vm507_vm9 = vcmask 900096  }
  0x10   : > { %v1041_v15 = vadd.f32 %v350_v12, %v348_v11  ;;  %v1043_v16 = vadd.f32 %v349_v14, %v347_v13  ;;  %vm490_vm10 = vcmask 916480   ;;  %vm478_vm11 = vcmask 1031168   ;;  %s901_s20 = sshll.u32 %s1166_s28, 3 }
  0x11   : > { %v390_v7 = vrot.slane %v903_v3, %v368_v5  ;;  %v369_v8 = vrot.slane %v359_v4, %v368_v5  ;;  %v394_v9 = vrot.slane %v903_v3, %v372_v6  ;;  %v1021_v10 = vrot.slane %v359_v4, %v372_v6 }
  0x12   : > { %vm640_vm12 = vcmask 588800  }
  0x13   : > { %446 = vrot.lane.b32.xlu0 %v390_v7, %s947_s11  ;;  %434 = vrot.lane.b32.xlu1 %v369_v8, %s948_s12 }
  0x17   : > { %448 = vrot.lane.b32.xlu0 %v394_v9, %s947_s11  ;;  %436 = vrot.lane.b32.xlu1 %v1021_v10, %s948_s12 }
  0x1b   : > { %422 = vrot.lane.b32.xlu0 %v390_v7, %s949_s14  ;;  %424 = vrot.lane.b32.xlu1 %v394_v9, %s949_s14 }
  0x1f   : > { %407 = vrot.lane.b32.xlu0 %v369_v8, %s950_s21  ;;  %409 = vrot.lane.b32.xlu1 %v1021_v10, %s950_s21 }
  0x23   : > { %395 = vrot.lane.b32.xlu0 %v390_v7, %s951_s22  ;;  %397 = vrot.lane.b32.xlu1 %v394_v9, %s951_s22 }
  0x27   : > { %527 = vrot.lane.b32.xlu0 %v1041_v15, %s952_s23  ;;  %525 = vrot.lane.b32.xlu1 %v1043_v16, %s952_s23 }
  0x2b   : > { %493 = vrot.lane.b32.xlu0 %v1043_v16, %s953_s24  ;;  %529 = vrot.lane.b32.xlu1 %v946_v1, %s952_s23  ;;  %s342_s23 = scalar_lea.vmem %s1163_s7, %s901_s20 }
  0x2f   : > { %374 = vrot.lane.b32.xlu0 %v369_v8, %s953_s24  ;;  %495 = vrot.lane.b32.xlu1 %v1041_v15, %s953_s24 }
  0x85   : > { %v447_v17 = vpop.permute.xlu0 %446  ;;  %v435_v18 = vpop.permute.xlu1 %434 }
  0x86   : > { %v455_v19 = vmul.f32 %v447_v17, %v1043_v16  ;;  %v443_v25 = vmul.f32 %v435_v18, %v1043_v16 }
  0x88   : > { %537 = vrot.lane.b32.xlu0 %v455_v19, %s954_s25 }
  0x89   : > { %v449_v20 = vpop.permute.xlu0 %448  ;;  %v437_v21 = vpop.permute.xlu1 %436 }
  0x8a   : > { %v457_v22 = vmul.f32 0.0, %v449_v20  ;;  %v445_v30 = vmul.f32 0.0, %v437_v21  ;;  %v451_v37 = vsel %vm450_vm0, %v447_v17, %v449_v20  ;;  %v439_v41 = vsel %vm438_vm2, %v435_v18, %v437_v21 }
  0x8b   : > { %v456_v39 = vmul.f32 %v451_v37, %v1041_v15  ;;  %v444_v43 = vmul.f32 %v439_v41, %v1041_v15 }
  0x8c   : > { %541 = vrot.lane.b32.xlu0 %v457_v22, %s954_s25 }
  0x8d   : > { %v423_v23 = vpop.permute.xlu0 %422  ;;  %v425_v24 = vpop.permute.xlu1 %424 }
  0x8e   : > { %v431_v26 = vmul.f32 %v423_v23, %v1043_v16  ;;  %v433_v27 = vmul.f32 0.0, %v425_v24  ;;  %v427_v38 = vsel %vm426_vm1, %v423_v23, %v425_v24  ;;  %v959_v24 = vmov 0  }
  0x8f   : > { %v432_v40 = vmul.f32 %v427_v38, %v1041_v15  ;;  %932 = vset.pattern.permute.xlu0 %v959_v24  ;;  %933 = vset.pattern.permute.xlu1 %v959_v24 }
  0x90   : > { %513 = vrot.lane.b32.xlu0 %v443_v25, %s955_s26  ;;  %501 = vrot.lane.b32.xlu1 %v431_v26, %s956_s29 }
  0x91   : > { %v408_v28 = vpop.permute.xlu0 %407  ;;  %v410_v29 = vpop.permute.xlu1 %409 }
  0x92   : > { %v416_v31 = vmul.f32 0.0, %v408_v28  ;;  %v418_v32 = vmul.f32 %v410_v29, %v1041_v15  ;;  %v412_v42 = vsel %vm411_vm3, %v408_v28, %v410_v29  ;;  %v715_v29 = vld [vmem:[%s1160_s4] sm:$0xff] }
  0x93   : > { %v417_v44 = vmul.f32 %v412_v42, %v1043_v16 }
  0x94   : > { %517 = vrot.lane.b32.xlu0 %v445_v30, %s955_s26  ;;  %505 = vrot.lane.b32.xlu1 %v433_v27, %s956_s29  ;;  %v723_v30 = vld [vmem:[%s1161_s5] sm:$0xff] }
  0x95   : > { %v396_v33 = vpop.permute.xlu0 %395  ;;  %v398_v34 = vpop.permute.xlu1 %397 }
  0x96   : > { %v404_v35 = vmul.f32 0.0, %v396_v33  ;;  %v406_v36 = vmul.f32 %v398_v34, %v1041_v15  ;;  %v400_v46 = vsel %vm399_vm4, %v396_v33, %v398_v34 }
  0x97   : > { %v405_v47 = vmul.f32 %v400_v46, %v1043_v16 }
  0x98   : > { %484 = vrot.lane.b32.xlu0 %v416_v31, %s957_s30  ;;  %488 = vrot.lane.b32.xlu1 %v418_v32, %s957_s30 }
  0x99   : > { %v526_v45 = vpop.permute.xlu1 %525  ;;  %v528_v48 = vpop.permute.xlu0 %527 }
  0x9a   : > { %v532_v50 = vsel %vm531_vm5, %v526_v45, %v528_v48 }
  0x9c   : > { %476 = vrot.lane.b32.xlu0 %v406_v36, %s958_s9  ;;  %472 = vrot.lane.b32.xlu1 %v404_v35, %s958_s9 }
  0x9d   : > { %v530_v49 = vpop.permute.xlu1 %529  ;;  %v494_v53 = vpop.permute.xlu0 %493 }
  0x9e   : > { %v533_v51 = vsel %vm531_vm5, %v528_v48, %v530_v49 }
  0xa0   : > { %503 = vrot.lane.b32.xlu0 %v432_v40, %s956_s29  ;;  %539 = vrot.lane.b32.xlu1 %v456_v39, %s954_s25  ;;  %s346_s25 = scalar_lea.vmem %s1164_s8, %s901_s20 }
  0xa1   : > { %v496_v52 = vpop.permute.xlu1 %495  ;;  %v375_v55 = vpop.permute.xlu0 %374 }
  0xa2   : > { %v497_v54 = vsel %vm378_vm6, %v494_v53, %v496_v52  ;;  %v383_v28 = vmul.f32 0.0, %v375_v55 }
  0xa4   : > { %515 = vrot.lane.b32.xlu1 %v444_v43, %s955_s26  ;;  %486 = vrot.lane.b32.xlu0 %v417_v44, %s957_s30 }
  0xa8   : > { %376 = vrot.lane.b32.xlu1 %v1021_v10, %s953_s24  ;;  %463 = vrot.lane.b32.xlu0 %v1043_v16, %s950_s21 }
  0xac   : > { %474 = vrot.lane.b32.xlu1 %v405_v47, %s958_s9  ;;  %461 = vrot.lane.b32.xlu0 %v946_v1, %s950_s21 }
  0xb0   : > { %465 = vrot.lane.b32.xlu1 %v1041_v15, %s950_s21  ;;  %594 = vrot.lane.b32.xlu0 %v532_v50, %s947_s11 }
  0xb4   : > { %596 = vrot.lane.b32.xlu1 %v533_v51, %s947_s11  ;;  %592 = vrot.lane.b32.xlu0 %v526_v45, %s947_s11 }
  0xb8   : > { %576 = vrot.lane.b32.xlu1 %v497_v54, %s947_s11  ;;  %578 = vrot.lane.b32.xlu0 %v496_v52, %s947_s11 }
  0xbc   : > { %574 = vrot.lane.b32.xlu1 %v494_v53, %s947_s11 }
  0xfa   : > { %v538_v56 = vpop.permute.xlu0 %537 }
  0xfe   : > { %v542_v57 = vpop.permute.xlu0 %541 }
 0x102   : > { %v514_v58 = vpop.permute.xlu0 %513  ;;  %v502_v59 = vpop.permute.xlu1 %501 }
 0x106   : > { %v518_v60 = vpop.permute.xlu0 %517  ;;  %v506_v61 = vpop.permute.xlu1 %505 }
 0x10a   : > { %v489_v62 = vpop.permute.xlu1 %488  ;;  %v485_v63 = vpop.permute.xlu0 %484 }
 0x10e   : > { %v473_v0 = vpop.permute.xlu1 %472  ;;  %v477_v1 = vpop.permute.xlu0 %476 }
 0x112   : > { %v540_v2 = vpop.permute.xlu1 %539  ;;  %v504_v4 = vpop.permute.xlu0 %503 }
 0x113   : > { %v545_v11 = vsel %vm543_vm7, %v540_v2, %v542_v57  ;;  %v544_v12 = vsel %vm543_vm7, %v538_v56, %v540_v2  ;;  %v508_v17 = vsel %vm507_vm9, %v502_v59, %v504_v4  ;;  %v509_v19 = vsel %vm507_vm9, %v504_v4, %v506_v61 }
 0x116   : > { %v516_v3 = vpop.permute.xlu1 %515  ;;  %v487_v6 = vpop.permute.xlu0 %486 }
 0x117   : > { %v521_v13 = vsel %vm519_vm8, %v516_v3, %v518_v60  ;;  %v520_v14 = vsel %vm519_vm8, %v514_v58, %v516_v3  ;;  %v492_v20 = vsel %vm490_vm10, %v487_v6, %v489_v62  ;;  %v491_v22 = vsel %vm490_vm10, %v485_v63, %v487_v6 }
 0x11a   : > { %v377_v5 = vpop.permute.xlu1 %376  ;;  %v464_v8 = vpop.permute.xlu0 %463 }
 0x11b   : > { %v379_v18 = vsel %vm378_vm6, %v375_v55, %v377_v5  ;;  %v385_v27 = vmul.f32 %v377_v5, %v1041_v15 }
 0x11c   : > { %v384_v21 = vmul.f32 %v379_v18, %v1043_v16 }
 0x11e   : > { %v475_v7 = vpop.permute.xlu1 %474  ;;  %v462_v23 = vpop.permute.xlu0 %461 }
 0x11f   : > { %v480_v25 = vsel %vm478_vm11, %v475_v7, %v477_v1  ;;  %v467_v26 = vsel %vm411_vm3, %v462_v23, %v464_v8  ;;  %v479_v16 = vsel %vm478_vm11, %v473_v0, %v475_v7 }
 0x122   : > { %v466_v9 = vpop.permute.xlu1 %465  ;;  %v595_v15 = vpop.permute.xlu0 %594 }
 0x123   : > { %560 = vrot.lane.b32.xlu1 %v466_v9, %s947_s11  ;;  %v468_v10 = vsel %vm411_vm3, %v464_v8, %v466_v9 }
 0x124   : > { %558 = vrot.lane.b32.xlu0 %v468_v10, %s947_s11  ;;  %v546_v10 = vld [vmem:[%s1159_s3] sm:$0xff] }
 0x126   : > { %v597_v31 = vpop.permute.xlu1 %596  ;;  %v593_v33 = vpop.permute.xlu0 %592 }
 0x127   : > { %598 = vrot.lane.b32.xlu1 %v538_v56, %s947_s11  ;;  %v619_v48 = vsel %vm450_vm0, %v595_v15, %v597_v31  ;;  %v618_v50 = vsel %vm450_vm0, %v593_v33, %v595_v15 }
 0x128   : > { %580 = vrot.lane.b32.xlu0 %v502_v59, %s947_s11 }
 0x12a   : > { %v577_v32 = vpop.permute.xlu1 %576  ;;  %v579_v35 = vpop.permute.xlu0 %578 }
 0x12b   : > { %586 = vrot.lane.b32.xlu1 %v514_v58, %s947_s11  ;;  %v613_v58 = vsel %vm450_vm0, %v577_v32, %v579_v35 }
 0x12c   : > { %566 = vrot.lane.b32.xlu0 %v477_v1, %s947_s11 }
 0x12e   : > { %v575_v34 = vpop.permute.xlu1 %574 }
 0x12f   : > { %572 = vrot.lane.b32.xlu1 %v489_v62, %s947_s11  ;;  %v612_v60 = vsel %vm450_vm0, %v575_v34, %v577_v32 }
 0x130   : > { %602 = vrot.lane.b32.xlu0 %v545_v11, %s947_s11 }
 0x133   : > { %600 = vrot.lane.b32.xlu1 %v544_v12, %s947_s11 }
 0x134   : > { %590 = vrot.lane.b32.xlu0 %v521_v13, %s947_s11 }
 0x137   : > { %588 = vrot.lane.b32.xlu1 %v520_v14, %s947_s11 }
 0x138   : > { %582 = vrot.lane.b32.xlu0 %v508_v17, %s947_s11 }
 0x13b   : > { %584 = vrot.lane.b32.xlu1 %v509_v19, %s947_s11 }
 0x13c   : > { %570 = vrot.lane.b32.xlu0 %v492_v20, %s947_s11 }
 0x13f   : > { %552 = vrot.lane.b32.xlu1 %v384_v21, %s947_s11 }
 0x140   : > { %568 = vrot.lane.b32.xlu0 %v491_v22, %s947_s11 }
 0x143   : > { %564 = vrot.lane.b32.xlu1 %v480_v25, %s947_s11 }
 0x144   : > { %556 = vrot.lane.b32.xlu0 %v467_v26, %s947_s11 }
 0x147   : > { %562 = vrot.lane.b32.xlu1 %v479_v16, %s947_s11 }
 0x148   : > { %554 = vrot.lane.b32.xlu0 %v385_v27, %s947_s11 }
 0x14b   : > { %550 = vrot.lane.b32.xlu1 %v383_v28, %s947_s11 }
 0x14c   : > { %718 = vperm.xlu0 %932, %v715_v29  }
 0x14f   : > { %726 = vperm.xlu1 %933, %v723_v30  }
 0x195   : > { %v561_v36 = vpop.permute.xlu1 %560 }
 0x196   : > { %v559_v37 = vpop.permute.xlu0 %558 }
 0x197   : > { %v607_v6 = vsel %vm450_vm0, %v559_v37, %v561_v36 }
 0x199   : > { %v599_v38 = vpop.permute.xlu1 %598 }
 0x19a   : > { %v581_v39 = vpop.permute.xlu0 %580 }
 0x19d   : > { %v587_v40 = vpop.permute.xlu1 %586 }
 0x19e   : > { %v567_v41 = vpop.permute.xlu0 %566 }
 0x1a1   : > { %v573_v42 = vpop.permute.xlu1 %572 }
 0x1a2   : > { %v603_v43 = vpop.permute.xlu0 %602 }
 0x1a5   : > { %v601_v44 = vpop.permute.xlu1 %600 }
 0x1a6   : > { %v591_v45 = vpop.permute.xlu0 %590  ;;  %v621_v46 = vsel %vm450_vm0, %v601_v44, %v603_v43  ;;  %v620_v47 = vsel %vm450_vm0, %v599_v38, %v601_v44 }
 0x1a7   : > { %658 = vmatprep.subr.mxu0 %v621_v46 }
 0x1a8   : > { %659 = vmatpush1.msra.mxu0 %v620_v47 }
 0x1a9   : > { %660 = vmatprep.subr.mxu0 %v619_v48  ;;  %v589_v49 = vpop.permute.xlu1 %588 }
 0x1aa   : > { %v583_v51 = vpop.permute.xlu0 %582  ;;  %661 = vmatpush1.msra.mxu0 %v618_v50  ;;  %v617_v52 = vsel %vm450_vm0, %v589_v49, %v591_v45  ;;  %v616_v53 = vsel %vm450_vm0, %v587_v40, %v589_v49 }
 0x1ab   : > { %662 = vmatprep.subr.mxu0 %v617_v52  ;;  %v614_v57 = vsel %vm450_vm0, %v581_v39, %v583_v51 }
 0x1ac   : > { %663 = vmatpush1.msra.mxu0 %v616_v53 }
 0x1ad   : > { %v585_v54 = vpop.permute.xlu1 %584 }
 0x1ae   : > { %v571_v55 = vpop.permute.xlu0 %570  ;;  %v615_v56 = vsel %vm450_vm0, %v583_v51, %v585_v54 }
 0x1af   : > { %664 = vmatprep.subr.mxu0 %v615_v56  ;;  %v611_v62 = vsel %vm450_vm0, %v571_v55, %v573_v42 }
 0x1b0   : > { %665 = vmatpush1.msra.mxu0 %v614_v57 }
 0x1b1   : > { %666 = vmatprep.subr.mxu0 %v613_v58  ;;  %v553_v59 = vpop.permute.xlu1 %552 }
 0x1b2   : > { %v569_v61 = vpop.permute.xlu0 %568  ;;  %667 = vmatpush1.msra.mxu0 %v612_v60 }
 0x1b3   : > { %668 = vmatprep.subr.mxu0 %v611_v62  ;;  %v610_v63 = vsel %vm450_vm0, %v569_v61, %v571_v55 }
 0x1b4   : > { %669 = vmatpush1.msra.mxu0 %v610_v63 }
 0x1b5   : > { %v565_v0 = vpop.permute.xlu1 %564 }
 0x1b6   : > { %v557_v1 = vpop.permute.xlu0 %556  ;;  %v609_v2 = vsel %vm450_vm0, %v565_v0, %v567_v41 }
 0x1b7   : > { %670 = vmatprep.subr.mxu0 %v609_v2  ;;  %v606_v7 = vsel %vm450_vm0, %v557_v1, %v559_v37 }
 0x1b9   : > { %v563_v3 = vpop.permute.xlu1 %562 }
 0x1ba   : > { %v555_v4 = vpop.permute.xlu0 %554  ;;  %v608_v5 = vsel %vm450_vm0, %v563_v3, %v565_v0 }
 0x1bb   : > { %671 = vmatpush1.msra.mxu0 %v608_v5  ;;  %v605_v9 = vsel %vm450_vm0, %v553_v59, %v555_v4 }
 0x1bc   : > { %672 = vmatprep.subr.mxu0 %v607_v6 }
 0x1bd   : > { %673 = vmatpush1.msra.mxu0 %v606_v7  ;;  %v551_v8 = vpop.permute.xlu1 %550 }
 0x1be   : > { %674 = vmatprep.subr.mxu0 %v605_v9  ;;  %v604_v11 = vsel %vm450_vm0, %v551_v8, %v553_v59 }
 0x1bf   : > { %675 = vmatpush1.msra.mxu0 %v604_v11 }
 0x1c0   : > { %904 = vmatmul.mubr.msk.f32.vlgmr.msra.gmra.mxu0 %vm640_vm12, %v546_v10 }
 0x1c7   : > { %v719_v12 = vpop.permute.xlu0 %718 }
 0x1ca   : > { %v727_v14 = vpop.permute.xlu1 %726 }
 0x280   : > { %v710_v13 = vpop.f32.mrf.mxu0 }
 0x281   : > { %v721_v17 = vmul.f32 %v719_v12, %v710_v13 }
 0x282   : > { %v712_v18 = vpop.f32.mrf.mxu0 }
 0x283   : > { %v722_v19 = vmul.f32 %v719_v12, %v712_v18  ;;  %v729_v20 = vadd.f32 %v727_v14, %v721_v17 }
 0x285   : > { %v730_v21 = vadd.f32 %v727_v14, %v722_v19  ;;  %v733_v22 = vmul.f32 0.044715, %v729_v20  ;;  %v731_v15 = vmul.f32 0.5, %v729_v20 }
 0x287   : > { %v734_v23 = vmul.f32 0.044715, %v730_v21  ;;  %v735_v24 = vmul.f32 %v733_v22, %v729_v20  ;;  %v732_v34 = vmul.f32 0.5, %v730_v21 }
 0x289   : > { %v736_v25 = vmul.f32 %v734_v23, %v730_v21  ;;  %v737_v26 = vmul.f32 %v735_v24, %v729_v20 }
 0x28b   : > { %v738_v27 = vmul.f32 %v736_v25, %v730_v21  ;;  %v739_v16 = vadd.f32 %v737_v26, %v729_v20 }
 0x28d   : > { %v740_v28 = vadd.f32 %v738_v27, %v730_v21  ;;  %v741_v29 = vmul.f32 0.7978846, %v739_v16 }
 0x28f   : > { %v742_v30 = vmul.f32 0.7978846, %v740_v28  ;;  %934 = vtanh.f32 %v741_v29 }
 0x291   : > { %936 = vtanh.f32 %v742_v30 }
 0x29c   : > { %v935_v31 = vpop.eup %934 }
 0x29d   : > { %v745_v32 = vadd.f32 1.0, %v935_v31 }
 0x29e   : > { %v937_v33 = vpop.eup %936 }
 0x29f   : > { %v746_v35 = vadd.f32 1.0, %v937_v33  ;;  %v747_v36 = vmul.f32 %v745_v32, %v731_v15 }
 0x2a1   : > { %v748_v37 = vmul.f32 %v746_v35, %v732_v34  ;;  %749 = vst [vmem:[%s338_s19] sm:$0xff] %v747_v36  ;;  %v755_v39 = vmul.f32 %v747_v36, %v747_v36 }
 0x2a3   : > { %750 = vst [vmem:[%s338_s19 + $0x8] sm:$0xff] %v748_v37  ;;  %v751_v38 = vadd.f32 %v748_v37, %v747_v36  ;;  %v756_v40 = vmul.f32 %v748_v37, %v748_v37 }
 0x2a5   : > { %752 = vadd.xlane.f32.xlu1 %v751_v38  ;;  %v757_v41 = vadd.f32 %v756_v40, %v755_v39 }
 0x2a7   : > { %758 = vadd.xlane.f32.xlu0 %v757_v41 }
 0x32e   : > { %v753_v42 = vpop.xlane.xlu1 %752 }
 0x32f   : > { %754 = vst.msk [vmem:[%s342_s23] sm:$0xff] %vm426_vm1, %v753_v42 }
 0x330   : > { %v759_v43 = vpop.xlane.xlu0 %758 }
 0x331   : > { %760 = vst.msk [vmem:[%s346_s25] sm:$0xff] %vm426_vm1, %v759_v43 }
 0x332 PF: > { %s19_s27 = sadd.s32 1, %s944_s27  }
 0x333   : > { %p16_p4 = scmp.ge.s32.totalorder %s19_s27, 4  }
 0x335   :  { %18 = sbr.rel (!%p16_p4) target bundleno = 1 (0x1), region = 102 }

// kernel: msse_forward.25
= control target key start
LH: loop header
LB: loop body
LE: loop exit
PB: predicated region body
PF: predicated region fallthrough
CT: control target
= control target key end

     0   :  { %s967_s0 = inlined_call_operand.vmem [shape: f32[2,4,16], index: 0, kind: input, shape index: {}]   ;;  %s968_s1 = inlined_call_operand.vmem [shape: f32[8,4], index: 1, kind: input, shape index: {}]   ;;  %s969_s2 = inlined_call_operand.vmem [shape: f32[2,8,1], index: 2, kind: output, shape index: {0}]   ;;  %s970_s3 = inlined_call_operand.vmem [shape: f32[2,8,1], index: 3, kind: output, shape index: {1}]   ;;  %s971_s4 = inlined_call_operand.hbm [shape: f32[2,4,1], index: 4, kind: output, shape index: {2}]   ;;  %s972_s5 = inlined_call_operand.hbm [shape: f32[2,4,1], index: 5, kind: output, shape index: {3}]  }
   0x1   :  { %974 = sst [smem:[#allocation8_spill]] %s967_s0 }
   0x2   :  { %11 = vsyncpa [#allocation3], 0 }
   0x3   :  { %13 = vsyncpa [#allocation3 + $0x1], 0 }
   0x4   :  { %14 = vsyncpa [#allocation5], 0 }
   0x5   :  { %16 = vsyncpa [#allocation5 + $0x1], 0  ;;  %s783_s18 = smov 0   ;;  %s785_s19 = smov 0  }
   0x6   :  { %s787_s20 = smov 0   ;;  %s789_s21 = smov 0  }
   0x7   :  { %s791_s22 = smov 0   ;;  %s793_s23 = smov 0  }
   0x8 LB: > { %s552_s24 = sadd.s32 4294967295, %s744_s23   ;;  %s553_s25 = sadd.s32 4294967294, %s744_s23   ;;  %s744_s23 = sphi %s793_s23, %s22_s23   ;;  %s740_s22 = sphi %s791_s22, %s984_s22   ;;  %s736_s21 = sphi %s789_s21, %s983_s21   ;;  %s732_s20 = sphi %s787_s20, %s982_s20   ;;  %s728_s19 = sphi %s785_s19, %s981_s19   ;;  %s724_s18 = sphi %s783_s18, %s980_s18  }
   0x9   : > { %s34_s26 = sadd.s32 1, %s740_s22  ;;  %s142_s27 = sadd.s32 1, %s732_s20 }
   0xa   : > { %p36_p0 = scmp.ge.s32.totalorder %s34_s26, 2  ;;  %p152_p1 = scmp.ne.s32.totalorder %s732_s20, %s728_s19 }
   0xb   : > { %p153_p2 = scmp.eq.s32.totalorder %s552_s24, 1  ;;  %p158_p3 = scmp.ne.s32.totalorder %s728_s19, %s724_s18 }
   0xc   : > { %s986_s26 = smov (%p36_p0, %s34_s26), 0  ;;  %p159_p5 = scmp.eq.s32.totalorder %s553_s25, 1 }
   0xd   : > { %p823_p4 = por %p153_p2, %p152_p1  ;;  %s139_s29 = ssub.s32 %s740_s22, %s986_s26 }
   0xe   : > { %p556_p6 = scmp.ge.s32.totalorder %s744_s23, 1  ;;  %p140_p7 = scmp.eq.s32.totalorder %s139_s29, 0 }
   0xf   : > { %p830_p8 = por %p159_p5, %p158_p3  ;;  %p216_p9 = scmp.lt.s32.totalorder %s744_s23, 3 }
  0x10   : > { %s836_s6 = scalar_select %p140_p7, %s732_s20, %s142_s27  }
  0x11   : > { %p217_p10 = pnand %p556_p6, %p216_p9 }
  0x12   : > { %p259_p11 = scmp.lt.s32.totalorder (!%p217_p10), %s736_s21, 1  ;;  %s977_s0 = sld [smem:[#allocation8_spill]] (!%p217_p10) }
  0x13   : > { %220 = sbr.rel (%p217_p10) target bundleno = 307 (0x133), region = 28  ;;  %s850_s14 = sand.u32 (!%p217_p10), 1, %s728_s19  }
  0x14   : > { %s557_s15 = sshll.u32 (!%p217_p10), %s850_s14, 2  ;;  %s973_s11 = sshll.u32 (!%p217_p10), %s736_s21, 6 }
  0x15   : > { %s853_s16 = scalar_lea.vmem (!%p217_p10), [#allocation4], %s557_s15  ;;  %s857_s17 = scalar_lea.vmem (!%p217_p10), [#allocation2], %s557_s15 }
  0x16   : > { %s402_s12 = sshll.u32 (!%p217_p10), %s853_s16, 4  ;;  %s888_s25 = scalar_lea.hbm (!%p217_p10), %s972_s5, %s973_s11  ;;  %s890_s12 = int_to_ptr.vmem [resolvable:$true] %s402_s12 }
  0x17   : > { %s638_s27 = scalar_lea.vmem (!%p217_p10), %s890_s12, 64  ;;  %s751_s7 = smov (!%p217_p10), [#allocation4]  }
  0x18   : > { %v285_v0 = vld [vmem:[%s968_s1] sm:$0xff]  ;;  %v746_v1 = vmov 0   ;;  %v747_v2 = vmov 2   ;;  %v748_v3 = vmov 1   ;;  %v749_v4 = vmov 3   ;;  %s843_s9 = scalar_select %p259_p11, %s736_s21, 1 }
  0x19   : > { %633 = vset.pattern.permute.xlu0 %v746_v1  ;;  %635 = vset.pattern.permute.xlu1 %v747_v2  ;;  %vm342_vm0 = vcmask 125952   ;;  %vm281_vm1 = vcmask 3072   ;;  %v750_v9 = vmov 0.0   ;;  %vm278_vm2 = vcmask 7168   ;;  %p639_p12 = scmp.ne.s32.totalorder %s890_s12, %s638_s27  ;;  %s642_s8 = sshll.u32 %s751_s7, 4  ;;  %s643_s8 = int_to_ptr.vmem [resolvable:$false] %s642_s8 }
  0x1a   : > { %288 = vperm.xlu0 %633, %v285_v0   ;;  %307 = vperm.xlu1 %635, %v285_v0   ;;  %s559_s10 = sshll.u32 %s843_s9, 2  ;;  %283 = vst.msk [vmem:[%s853_s16] sm:$0xf] %vm281_vm1, %v750_v9  ;;  %282 = vst.msk [vmem:[%s857_s17] sm:$0xf] %vm281_vm1, %v750_v9  ;;  %s560_s24 = sshll.u32 %s843_s9, 3  ;;  %v291_v10 = vlaneseq }
  0x1b   : > { %s265_s13 = scalar_lea.vmem %s977_s0, %s559_s10  ;;  %s867_s29 = scalar_lea.vmem %s969_s2, %s560_s24  ;;  %vm327_vm3 = vcmask 130048  }
  0x1c   : > { %v284_v5 = vld [vmem:[%s265_s13] sm:$0xf]  ;;  %279 = vst.msk [vmem:[%s867_s29] sm:$0xff] %vm278_vm2, %v750_v9  ;;  %v292_v11 = vshrl.u32 %v291_v10, 7  ;;  %s876_s10 = scalar_lea.vmem %s970_s3, %s560_s24  ;;  %s370_s24 = scalar_lea.sflag [#allocation5], %s850_s14 }
  0x1d   : > { %v350_v6 = vmul.f32 %v284_v5, %v284_v5  ;;  %v343_v8 = vsel %vm342_vm0, %v284_v5, 0.0  ;;  %280 = vst.msk [vmem:[%s876_s10] sm:$0xff] %vm278_vm2, %v750_v9  ;;  %p640_p13 = pnand %p639_p12, %p823_p4  ;;  %s644_s13 = scalar_lea.vmem %s643_s8, 128 }
  0x1e   : > { %634 = vset.pattern.permute.xlu0 %v748_v3  ;;  %636 = vset.pattern.permute.xlu1 %v749_v4  ;;  %v293_v12 = vsub.s32 0, %v292_v11  ;;  %v302_v13 = vsub.s32 1, %v292_v11  ;;  %v312_v15 = vsub.s32 2, %v292_v11  ;;  %v322_v17 = vsub.s32 3, %v292_v11  ;;  %p645_p1 = scmp.lt.s32.totalorder %s890_s12, %s643_s8  ;;  %p646_p2 = scmp.lt.s32.totalorder %s644_s13, %s638_s27 }
  0x1f   : > { %297 = vperm.xlu0 %634, %v285_v0   ;;  %317 = vperm.xlu1 %636, %v285_v0   ;;  %v351_v7 = vsel %vm342_vm0, %v350_v6, 0.0  ;;  %p641_p0 = pneg %p640_p13 }
  0x20   : > { %v294_v18 = vrot.slane %v284_v5, %v293_v12  ;;  %v303_v19 = vrot.slane %v284_v5, %v302_v13  ;;  %v313_v20 = vrot.slane %v284_v5, %v312_v15  ;;  %v323_v21 = vrot.slane %v284_v5, %v322_v17  ;;  %p647_p3 = por %p646_p2, %p645_p1 }
  0x21   : > { %v349_v34 = vld [vmem:[%s853_s16] sm:$0xf]  ;;  %v341_v37 = vld [vmem:[%s857_s17] sm:$0xf] }
  0x22   : > { %p648_p5 = pnand %p647_p3, %p641_p0 }
  0x23   : > { %637 = vset.pattern.permute.xlu0 %v749_v4 }
  0x3e   : > { %352 = vadd.xlane.f32.xlu0 %v351_v7 }
  0x43   : > { %344 = vadd.xlane.f32.xlu1 %v343_v8 }
  0x95   : > { %v289_v14 = vpop.permute.xlu0 %288  ;;  %v308_v16 = vpop.permute.xlu1 %307 }
  0x96   : > { %v295_v24 = vmul.f32 %v294_v18, %v289_v14  ;;  %v314_v26 = vmul.f32 %v313_v20, %v308_v16 }
  0x9a   : > { %v298_v22 = vpop.permute.xlu0 %297  ;;  %v318_v23 = vpop.permute.xlu1 %317 }
  0x9b   : > { %v304_v25 = vmul.f32 %v303_v19, %v298_v22  ;;  %v324_v28 = vmul.f32 %v323_v21, %v318_v23 }
  0x9d   : > { %v305_v27 = vadd.f32 %v304_v25, %v295_v24 }
  0x9f   : > { %v315_v29 = vadd.f32 %v314_v26, %v305_v27 }
  0xa1   : > { %v325_v30 = vadd.f32 %v324_v28, %v315_v29 }
  0xa3   : > { %v328_v31 = vsel %vm327_vm3, %v325_v30, 0.0  ;;  %v335_v32 = vmul.f32 %v325_v30, %v325_v30 }
  0xa4   : > { %329 = vadd.xlane.f32.xlu0 %v328_v31 }
  0xa5   : > { %v336_v33 = vsel %vm327_vm3, %v335_v32, 0.0 }
  0xa6   : > { %337 = vadd.xlane.f32.xlu1 %v336_v33 }
  0xc7   : > { %v353_v35 = vpop.xlane.xlu0 %352 }
  0xc8   : > { %v354_v36 = vadd.f32 %v353_v35, %v349_v34 }
  0xca   : > { %355 = vst.msk [vmem:[%s853_s16] sm:$0xf] %vm281_vm1, %v354_v36 }
  0xcb   : > { %651 = shalt.err (!%p648_p5)
}
  0xcc   : > { %s652_s16 = scalar_lea.hbm %s888_s25, 64  ;;  %s656_s7 = scalar_lea.hbm %s972_s5, 128 }
  0xcd   : > { %p653_p6 = scmp.ne.s32.totalorder %s888_s25, %s652_s16  ;;  %p657_p10 = scmp.lt.s32.totalorder %s888_s25, %s972_s5 }
  0xce   : > { %p658_p11 = scmp.lt.s32.totalorder %s656_s7, %s652_s16 }
  0xcf   : > { %p654_p7 = pnand %p653_p6, %p823_p4 }
  0xd0   : > { %p659_p12 = por %p658_p11, %p657_p10 }
  0xd1   : > { %p655_p9 = pneg %p654_p7 }
  0xd3   : > { %p660_p13 = pnand %p659_p12, %p655_p9 }
  0xd5   : > { %663 = shalt.err (!%p660_p13)
}
  0xd6   : > { %569 = dma.vmem_to_hbm [thread:$0]  (%p823_p4), %s890_s12, 64, %s888_s25, %s370_s24   ;;  %v345_v38 = vpop.xlane.xlu1 %344 }
  0xd7   : > { %v346_v39 = vadd.f32 %v345_v38, %v341_v37  ;;  %s978_s9 = sshll.u32 %s736_s21, 6  ;;  %s979_s8 = sshll.u32 %s857_s17, 4  ;;  %s390_s8 = int_to_ptr.vmem [resolvable:$true] %s979_s8 }
  0xd8   : > { %s387_s11 = scalar_lea.hbm %s971_s4, %s978_s9  ;;  %s365_s13 = scalar_lea.sflag [#allocation3], %s850_s14 }
  0xd9   : > { %348 = vst.msk [vmem:[%s857_s17] sm:$0xf] %vm281_vm1, %v346_v39  ;;  %s664_s16 = scalar_lea.vmem %s390_s8, 64  ;;  %s752_s15 = smov [#allocation2]  }
  0xda   : > { %p665_p0 = scmp.ne.s32.totalorder %s390_s8, %s664_s16  ;;  %s668_s7 = sshll.u32 %s752_s15, 4  ;;  %s669_s7 = int_to_ptr.vmem [resolvable:$false] %s668_s7 }
  0xdb   : > { %s670_s12 = scalar_lea.vmem %s669_s7, 128  ;;  %p671_p3 = scmp.lt.s32.totalorder %s390_s8, %s669_s7 }
  0xdc   : > { %p666_p1 = pnand %p665_p0, %p823_p4  ;;  %p672_p5 = scmp.lt.s32.totalorder %s670_s12, %s664_s16 }
  0xde   : > { %p667_p2 = pneg %p666_p1  ;;  %p673_p6 = por %p672_p5, %p671_p3 }
  0xe0   : > { %p674_p7 = pnand %p673_p6, %p667_p2 }
  0xe2   : > { %677 = shalt.err (!%p674_p7)
}
  0xe3   : > { %s678_s21 = scalar_lea.hbm %s387_s11, 64  ;;  %s682_s25 = scalar_lea.hbm %s971_s4, 128 }
  0xe4   : > { %p679_p9 = scmp.ne.s32.totalorder %s387_s11, %s678_s21  ;;  %p683_p12 = scmp.lt.s32.totalorder %s387_s11, %s971_s4 }
  0xe5   : > { %p684_p13 = scmp.lt.s32.totalorder %s682_s25, %s678_s21 }
  0xe6   : > { %p680_p10 = pnand %p679_p9, %p823_p4 }
  0xe7   : > { %p685_p0 = por %p684_p13, %p683_p12 }
  0xe8   : > { %p681_p11 = pneg %p680_p10 }
  0xea   : > { %p686_p1 = pnand %p685_p0, %p681_p11 }
  0xec   : > { %689 = shalt.err (!%p686_p1)
}
  0xed   : > { %568 = dma.vmem_to_hbm [thread:$0]  (%p823_p4), %s390_s8, 64, %s387_s11, %s365_s13   ;;  %v326_v40 = vld [vmem:[%s867_s29] sm:$0xff] }
  0xee   : > { %v334_v42 = vld [vmem:[%s876_s10] sm:$0xff] }
 0x12d   : > { %v330_v41 = vpop.xlane.xlu0 %329 }
 0x12e   : > { %v331_v43 = vadd.f32 %v330_v41, %v326_v40 }
 0x12f   : > { %v338_v44 = vpop.xlane.xlu1 %337 }
 0x130   : > { %333 = vst.msk [vmem:[%s867_s29] sm:$0xff] %vm278_vm2, %v331_v43  ;;  %v339_v45 = vadd.f32 %v338_v44, %v334_v42 }
 0x132   : > { %340 = vst.msk [vmem:[%s876_s10] sm:$0xff] %vm278_vm2, %v339_v45 }
 0x133 PF: > { %p579_p2 = scmp.ge.s32.totalorder %s744_s23, 2  ;;  %s428_s28 = sand.u32 1, %s724_s18  }
 0x134   : > { %s429_s27 = scalar_lea.sflag [#allocation3], %s428_s28 }
 0x135   : > { %p573_p3 = pnand %p579_p2, %p830_p8 }
 0x137   : > { %p574_p5 = pneg %p573_p3 }
 0x139   : > { %715 = dma.done.wait (%p574_p5), %s429_s27, 64  }
 0x13a   : > { %717 = vsyncadd (%p574_p5), %s429_s27, 4294967232  ;;  %s438_s0 = scalar_lea.sflag [#allocation5], %s428_s28 }
 0x13b   : > { %719 = dma.done.wait (%p574_p5), %s438_s0, 64  }
 0x13c   : > { %721 = vsyncadd (%p574_p5), %s438_s0, 4294967232  ;;  %s22_s23 = sadd.s32 1, %s744_s23   ;;  %s980_s18 = smov %s728_s19 }
 0x13d   : > { %p19_p4 = scmp.ge.s32.totalorder %s22_s23, 4   ;;  %s981_s19 = smov %s732_s20 }
 0x13e   : > { %s982_s20 = smov %s836_s6  ;;  %s983_s21 = smov %s740_s22 }
 0x13f   : > { %s984_s22 = smov %s986_s26  ;;  %21 = sbr.rel (!%p19_p4) target bundleno = 8 (0x8), region = 108 }
 0x144   :  { %443 = vsyncpa [#allocation3], 1 }
 0x145   :  { %445 = vsyncpa [#allocation3 + $0x1], 1 }
 0x146   :  { %446 = vsyncpa [#allocation5], 1 }
 0x147   :  { %448 = vsyncpa [#allocation5 + $0x1], 1 }

// kernel: msse_forward.26
= control target key start
LH: loop header
LB: loop body
LE: loop exit
PB: predicated region body
PF: predicated region fallthrough
CT: control target
= control target key end

     0   :  { %s969_s0 = inlined_call_operand.vmem [shape: f32[2,4,16], index: 0, kind: input, shape index: {}]   ;;  %s970_s1 = inlined_call_operand.vmem [shape: f32[8,4], index: 1, kind: input, shape index: {}]   ;;  %s971_s2 = inlined_call_operand.vmem [shape: f32[8,1], index: 2, kind: input, shape index: {}]   ;;  %s972_s3 = inlined_call_operand.vmem [shape: f32[8,1], index: 3, kind: input, shape index: {}]   ;;  %s973_s4 = inlined_call_operand.vmem [shape: f32[2,8,16], index: 4, kind: output, shape index: {0}]   ;;  %s974_s5 = inlined_call_operand.hbm [shape: f32[2,8,1], index: 5, kind: output, shape index: {1}]   ;;  %s975_s6 = inlined_call_operand.hbm [shape: f32[2,8,1], index: 6, kind: output, shape index: {2}]  }
   0x1   :  { %976 = sst [smem:[#allocation8_spill]] %s969_s0 }
   0x2   :  { %12 = vsyncpa [#allocation3], 0 }
   0x3   :  { %14 = vsyncpa [#allocation3 + $0x1], 0 }
   0x4   :  { %15 = vsyncpa [#allocation5], 0 }
   0x5   :  { %17 = vsyncpa [#allocation5 + $0x1], 0  ;;  %s800_s21 = smov 0   ;;  %s802_s22 = smov 0  }
   0x6   :  { %s804_s23 = smov 0   ;;  %s806_s24 = smov 0  }
   0x7   :  { %s808_s25 = smov 0   ;;  %s810_s26 = smov 0  }
   0x8 LB: > { %s562_s27 = sadd.s32 4294967295, %s756_s26   ;;  %s563_s28 = sadd.s32 4294967294, %s756_s26   ;;  %s756_s26 = sphi %s810_s26, %s23_s26   ;;  %s752_s25 = sphi %s808_s25, %s984_s25   ;;  %s748_s24 = sphi %s806_s24, %s983_s24   ;;  %s744_s23 = sphi %s804_s23, %s982_s23   ;;  %s740_s22 = sphi %s802_s22, %s981_s22   ;;  %s736_s21 = sphi %s800_s21, %s980_s21  }
   0x9   : > { %s35_s29 = sadd.s32 1, %s752_s25  ;;  %s161_s30 = sadd.s32 1, %s744_s23 }
   0xa   : > { %p37_p0 = scmp.ge.s32.totalorder %s35_s29, 2  ;;  %p171_p1 = scmp.ne.s32.totalorder %s744_s23, %s740_s22 }
   0xb   : > { %p172_p2 = scmp.eq.s32.totalorder %s562_s27, 1  ;;  %p177_p3 = scmp.ne.s32.totalorder %s740_s22, %s736_s21 }
   0xc   : > { %s986_s29 = smov (%p37_p0, %s35_s29), 0  ;;  %p178_p5 = scmp.eq.s32.totalorder %s563_s28, 1 }
   0xd   : > { %p840_p4 = por %p172_p2, %p171_p1  ;;  %s158_s8 = ssub.s32 %s752_s25, %s986_s29 }
   0xe   : > { %p566_p6 = scmp.ge.s32.totalorder %s756_s26, 1  ;;  %p159_p7 = scmp.eq.s32.totalorder %s158_s8, 0 }
   0xf   : > { %p847_p8 = por %p178_p5, %p177_p3  ;;  %p241_p9 = scmp.lt.s32.totalorder %s756_s26, 3 }
  0x10   : > { %s853_s10 = scalar_select %p159_p7, %s744_s23, %s161_s30  }
  0x11   : > { %p242_p10 = pnand %p566_p6, %p241_p9 }
  0x12   : > { %p285_p11 = scmp.lt.s32.totalorder (!%p242_p10), %s748_s24, 1  ;;  %s979_s0 = sld [smem:[#allocation8_spill]] (!%p242_p10) }
  0x13   : > { %245 = sbr.rel (%p242_p10) target bundleno = 371 (0x173), region = 36  ;;  %s877_s12 = sand.u32 (!%p242_p10), 1, %s740_s22  }
  0x14   : > { %s567_s13 = sshll.u32 (!%p242_p10), %s877_s12, 3  ;;  %s573_s16 = sshll.u32 (!%p242_p10), %s748_s24, 7 }
  0x15   : > { %s277_s14 = scalar_lea.vmem (!%p242_p10), [#allocation2], %s567_s13  ;;  %s881_s15 = scalar_lea.vmem (!%p242_p10), [#allocation4], %s567_s13 }
  0x16   : > { %s899_s30 = scalar_lea.hbm (!%p242_p10), %s975_s6, %s573_s16  ;;  %s395_s8 = scalar_lea.sflag (!%p242_p10), [#allocation3], %s877_s12 }
  0x17   : > { %s763_s13 = smov (!%p242_p10), [#allocation2]  }
  0x18   : > { %v306_v0 = vld [vmem:[%s970_s1] sm:$0xff]  ;;  %v758_v1 = vmov 0   ;;  %v759_v2 = vmov 2   ;;  %v760_v3 = vmov 1   ;;  %v761_v4 = vmov 3   ;;  %s866_s17 = scalar_select %p285_p11, %s748_s24, 1 }
  0x19   : > { %642 = vset.pattern.permute.xlu0 %v758_v1  ;;  %644 = vset.pattern.permute.xlu1 %v759_v2  ;;  %v348_v5 = vld [vmem:[%s971_s2] sm:$0xff]  ;;  %v313_v7 = vlaneseq  ;;  %vm371_vm0 = vcmask 130048   ;;  %vm303_vm1 = vcmask 7168   ;;  %v762_v45 = vmov 0.0   ;;  %s654_s19 = sshll.u32 %s763_s13, 4  ;;  %s655_s19 = int_to_ptr.vmem [resolvable:$false] %s654_s19 }
  0x1a   : > { %310 = vperm.xlu0 %642, %v306_v0   ;;  %329 = vperm.xlu1 %644, %v306_v0   ;;  %v355_v6 = vld [vmem:[%s972_s3] sm:$0xff]  ;;  %s569_s18 = sshll.u32 %s866_s17, 2  ;;  %s570_s28 = sshll.u32 %s866_s17, 3  ;;  %304 = vst.msk [vmem:[%s277_s14] sm:$0xff] %vm303_vm1, %v762_v45  ;;  %305 = vst.msk [vmem:[%s881_s15] sm:$0xff] %vm303_vm1, %v762_v45 }
  0x1b   : > { %v314_v8 = vshrl.u32 %v313_v7, 7  ;;  %s291_s27 = scalar_lea.vmem %s979_s0, %s569_s18  ;;  %s298_s11 = scalar_lea.vmem %s973_s4, %s570_s28 }
  0x1c   : > { %v307_v11 = vld [vmem:[%s291_s27] sm:$0xf]  ;;  %s416_s17 = sshll.u32 %s277_s14, 4  ;;  %s429_s18 = sshll.u32 %s881_s15, 4  ;;  %s893_s17 = int_to_ptr.vmem [resolvable:$true] %s416_s17  ;;  %s901_s18 = int_to_ptr.vmem [resolvable:$true] %s429_s18 }
  0x1d   : > { %v315_v9 = vsub.s32 0, %v314_v8  ;;  %v324_v10 = vsub.s32 1, %v314_v8  ;;  %v334_v13 = vsub.s32 2, %v314_v8  ;;  %v344_v15 = vsub.s32 3, %v314_v8  ;;  %s891_s27 = scalar_lea.hbm %s974_s5, %s573_s16  ;;  %s656_s20 = scalar_lea.vmem %s655_s19, 256 }
  0x1e   : > { %643 = vset.pattern.permute.xlu0 %v760_v3  ;;  %645 = vset.pattern.permute.xlu1 %v761_v4  ;;  %p657_p1 = scmp.lt.s32.totalorder %s893_s17, %s655_s19 }
  0x1f   : > { %319 = vperm.xlu0 %643, %v306_v0   ;;  %339 = vperm.xlu1 %645, %v306_v0   ;;  %v316_v16 = vrot.slane %v307_v11, %v315_v9  ;;  %v325_v17 = vrot.slane %v307_v11, %v324_v10  ;;  %v335_v18 = vrot.slane %v307_v11, %v334_v13 }
  0x20   : > { %v345_v19 = vrot.slane %v307_v11, %v344_v15 }
  0x21   : > { %v373_v46 = vld [vmem:[%s277_s14] sm:$0xff]  ;;  %v380_v48 = vld [vmem:[%s881_s15] sm:$0xff] }
  0x23   : > { %646 = vset.pattern.permute.xlu1 %v758_v1  ;;  %647 = vset.pattern.permute.xlu0 %v758_v1 }
  0x24   : > { %351 = vperm.xlu1 %646, %v348_v5   ;;  %358 = vperm.xlu0 %647, %v355_v6  }
  0x95   : > { %v311_v12 = vpop.permute.xlu0 %310  ;;  %v330_v14 = vpop.permute.xlu1 %329 }
  0x96   : > { %v317_v22 = vmul.f32 %v316_v16, %v311_v12  ;;  %v336_v24 = vmul.f32 %v335_v18, %v330_v14 }
  0x9a   : > { %v320_v20 = vpop.permute.xlu0 %319  ;;  %v340_v21 = vpop.permute.xlu1 %339 }
  0x9b   : > { %v326_v23 = vmul.f32 %v325_v17, %v320_v20  ;;  %v346_v26 = vmul.f32 %v345_v19, %v340_v21 }
  0x9d   : > { %v327_v25 = vadd.f32 %v326_v23, %v317_v22 }
  0x9f   : > { %v337_v27 = vadd.f32 %v336_v24, %v327_v25  ;;  %v352_v28 = vpop.permute.xlu1 %351  ;;  %v359_v30 = vpop.permute.xlu0 %358 }
  0xa1   : > { %v347_v29 = vadd.f32 %v346_v26, %v337_v27 }
  0xa3   : > { %v354_v31 = vmul.f32 %v352_v28, %v347_v29 }
  0xa5   : > { %v361_v32 = vadd.f32 %v359_v30, %v354_v31 }
  0xa7   : > { %v363_v33 = vmul.f32 0.044715, %v361_v32  ;;  %v362_v39 = vmul.f32 0.5, %v361_v32 }
  0xa9   : > { %v364_v34 = vmul.f32 %v363_v33, %v361_v32 }
  0xab   : > { %v365_v35 = vmul.f32 %v364_v34, %v361_v32 }
  0xad   : > { %v366_v36 = vadd.f32 %v365_v35, %v361_v32 }
  0xaf   : > { %v367_v37 = vmul.f32 0.7978846, %v366_v36 }
  0xb1   : > { %648 = vtanh.f32 %v367_v37 }
  0xbe   : > { %v649_v38 = vpop.eup %648 }
  0xbf   : > { %v369_v40 = vadd.f32 1.0, %v649_v38 }
  0xc1   : > { %v370_v41 = vmul.f32 %v369_v40, %v362_v39 }
  0xc3   : > { %v374_v42 = vsel %vm371_vm0, %v370_v41, 0.0  ;;  %372 = vst.msk [vmem:[%s298_s11] sm:$0xff] %vm371_vm0, %v370_v41  ;;  %v381_v43 = vmul.f32 %v370_v41, %v370_v41  ;;  %s650_s11 = scalar_lea.vmem %s893_s17, 128 }
  0xc4   : > { %375 = vadd.xlane.f32.xlu1 %v374_v42  ;;  %p651_p12 = scmp.ne.s32.totalorder %s893_s17, %s650_s11  ;;  %p658_p2 = scmp.lt.s32.totalorder %s656_s20, %s650_s11 }
  0xc5   : > { %v382_v44 = vsel %vm371_vm0, %v381_v43, 0.0 }
  0xc6   : > { %383 = vadd.xlane.f32.xlu0 %v382_v44  ;;  %p652_p13 = pnand %p651_p12, %p840_p4  ;;  %p659_p3 = por %p658_p2, %p657_p1 }
  0xc8   : > { %p653_p0 = pneg %p652_p13 }
  0xca   : > { %p660_p5 = pnand %p659_p3, %p653_p0 }
 0x14d   : > { %v376_v47 = vpop.xlane.xlu1 %375 }
 0x14e   : > { %v377_v49 = vadd.f32 %v376_v47, %v373_v46 }
 0x14f   : > { %v384_v50 = vpop.xlane.xlu0 %383 }
 0x150   : > { %379 = vst.msk [vmem:[%s277_s14] sm:$0xff] %vm303_vm1, %v377_v49  ;;  %v385_v51 = vadd.f32 %v384_v50, %v380_v48 }
 0x151   : > { %663 = shalt.err (!%p660_p5)
}
 0x152   : > { %s664_s14 = scalar_lea.hbm %s891_s27, 128  ;;  %s668_s28 = scalar_lea.hbm %s974_s5, 256 }
 0x153   : > { %p665_p6 = scmp.ne.s32.totalorder %s891_s27, %s664_s14  ;;  %p669_p10 = scmp.lt.s32.totalorder %s891_s27, %s974_s5 }
 0x154   : > { %p670_p11 = scmp.lt.s32.totalorder %s668_s28, %s664_s14 }
 0x155   : > { %p666_p7 = pnand %p665_p6, %p840_p4 }
 0x156   : > { %p671_p12 = por %p670_p11, %p669_p10 }
 0x157   : > { %p667_p9 = pneg %p666_p7 }
 0x159   : > { %p672_p13 = pnand %p671_p12, %p667_p9 }
 0x15b   : > { %675 = shalt.err (!%p672_p13)
}
 0x15c   : > { %577 = dma.vmem_to_hbm [thread:$0]  (%p840_p4), %s893_s17, 128, %s891_s27, %s395_s8   ;;  %386 = vst.msk [vmem:[%s881_s15] sm:$0xff] %vm303_vm1, %v385_v51 }
 0x15d   : > { %s400_s11 = scalar_lea.sflag [#allocation5], %s877_s12  ;;  %s676_s0 = scalar_lea.vmem %s901_s18, 128 }
 0x15e   : > { %p677_p0 = scmp.ne.s32.totalorder %s901_s18, %s676_s0  ;;  %s764_s19 = smov [#allocation4]  }
 0x15f   : > { %s680_s20 = sshll.u32 %s764_s19, 4  ;;  %s681_s20 = int_to_ptr.vmem [resolvable:$false] %s680_s20 }
 0x160   : > { %p678_p1 = pnand %p677_p0, %p840_p4  ;;  %s682_s14 = scalar_lea.vmem %s681_s20, 256 }
 0x161   : > { %p683_p3 = scmp.lt.s32.totalorder %s901_s18, %s681_s20  ;;  %p684_p5 = scmp.lt.s32.totalorder %s682_s14, %s676_s0 }
 0x162   : > { %p679_p2 = pneg %p678_p1 }
 0x163   : > { %p685_p6 = por %p684_p5, %p683_p3 }
 0x165   : > { %p686_p7 = pnand %p685_p6, %p679_p2 }
 0x167   : > { %689 = shalt.err (!%p686_p7)
}
 0x168   : > { %s690_s15 = scalar_lea.hbm %s899_s30, 128  ;;  %s694_s27 = scalar_lea.hbm %s975_s6, 256 }
 0x169   : > { %p691_p9 = scmp.ne.s32.totalorder %s899_s30, %s690_s15  ;;  %p695_p12 = scmp.lt.s32.totalorder %s899_s30, %s975_s6 }
 0x16a   : > { %p696_p13 = scmp.lt.s32.totalorder %s694_s27, %s690_s15 }
 0x16b   : > { %p692_p10 = pnand %p691_p9, %p840_p4 }
 0x16c   : > { %p697_p0 = por %p696_p13, %p695_p12 }
 0x16d   : > { %p693_p11 = pneg %p692_p10 }
 0x16f   : > { %p698_p1 = pnand %p697_p0, %p693_p11 }
 0x171   : > { %701 = shalt.err (!%p698_p1)
}
 0x172   : > { %578 = dma.vmem_to_hbm [thread:$0]  (%p840_p4), %s901_s18, 128, %s899_s30, %s400_s11  }
 0x173 PF: > { %p588_p2 = scmp.ge.s32.totalorder %s756_s26, 2  ;;  %s451_s24 = sand.u32 1, %s736_s21  }
 0x174   : > { %s452_s28 = scalar_lea.sflag [#allocation3], %s451_s24 }
 0x175   : > { %p582_p3 = pnand %p588_p2, %p847_p8 }
 0x177   : > { %p583_p5 = pneg %p582_p3 }
 0x179   : > { %727 = dma.done.wait (%p583_p5), %s452_s28, 128  }
 0x17a   : > { %729 = vsyncadd (%p583_p5), %s452_s28, 4294967168  ;;  %s461_s13 = scalar_lea.sflag [#allocation5], %s451_s24 }
 0x17b   : > { %731 = dma.done.wait (%p583_p5), %s461_s13, 128  }
 0x17c   : > { %733 = vsyncadd (%p583_p5), %s461_s13, 4294967168  ;;  %s23_s26 = sadd.s32 1, %s756_s26   ;;  %s980_s21 = smov %s740_s22 }
 0x17d   : > { %p20_p6 = scmp.ge.s32.totalorder %s23_s26, 4   ;;  %s981_s22 = smov %s744_s23 }
 0x17e   : > { %s982_s23 = smov %s853_s10  ;;  %s983_s24 = smov %s752_s25 }
 0x17f   : > { %s984_s25 = smov %s986_s29  ;;  %22 = sbr.rel (!%p20_p6) target bundleno = 8 (0x8), region = 104 }
 0x184   :  { %466 = vsyncpa [#allocation3], 1 }
 0x185   :  { %468 = vsyncpa [#allocation3 + $0x1], 1 }
 0x186   :  { %469 = vsyncpa [#allocation5], 1 }
 0x187   :  { %471 = vsyncpa [#allocation5 + $0x1], 1 }

// kernel: msse_forward.30
= control target key start
LH: loop header
LB: loop body
LE: loop exit
PB: predicated region body
PF: predicated region fallthrough
CT: control target
= control target key end

     0   :  { %s969_s0 = inlined_call_operand.vmem [shape: f32[2,4,4], index: 0, kind: input, shape index: {}]   ;;  %s970_s1 = inlined_call_operand.vmem [shape: f32[8,4], index: 1, kind: input, shape index: {}]   ;;  %s971_s2 = inlined_call_operand.vmem [shape: f32[8,1], index: 2, kind: input, shape index: {}]   ;;  %s972_s3 = inlined_call_operand.vmem [shape: f32[8,1], index: 3, kind: input, shape index: {}]   ;;  %s973_s4 = inlined_call_operand.vmem [shape: f32[2,8,4], index: 4, kind: output, shape index: {0}]   ;;  %s974_s5 = inlined_call_operand.hbm [shape: f32[2,8,1], index: 5, kind: output, shape index: {1}]   ;;  %s975_s6 = inlined_call_operand.hbm [shape: f32[2,8,1], index: 6, kind: output, shape index: {2}]  }
   0x1   :  { %976 = sst [smem:[#allocation8_spill]] %s969_s0 }
   0x2   :  { %12 = vsyncpa [#allocation3], 0 }
   0x3   :  { %14 = vsyncpa [#allocation3 + $0x1], 0 }
   0x4   :  { %15 = vsyncpa [#allocation5], 0 }
   0x5   :  { %17 = vsyncpa [#allocation5 + $0x1], 0  ;;  %s800_s21 = smov 0   ;;  %s802_s22 = smov 0  }
   0x6   :  { %s804_s23 = smov 0   ;;  %s806_s24 = smov 0  }
   0x7   :  { %s808_s25 = smov 0   ;;  %s810_s26 = smov 0  }
   0x8 LB: > { %s562_s27 = sadd.s32 4294967295, %s756_s26   ;;  %s563_s28 = sadd.s32 4294967294, %s756_s26   ;;  %s756_s26 = sphi %s810_s26, %s23_s26   ;;  %s752_s25 = sphi %s808_s25, %s984_s25   ;;  %s748_s24 = sphi %s806_s24, %s983_s24   ;;  %s744_s23 = sphi %s804_s23, %s982_s23   ;;  %s740_s22 = sphi %s802_s22, %s981_s22   ;;  %s736_s21 = sphi %s800_s21, %s980_s21  }
   0x9   : > { %s35_s29 = sadd.s32 1, %s752_s25  ;;  %s161_s30 = sadd.s32 1, %s744_s23 }
   0xa   : > { %p37_p0 = scmp.ge.s32.totalorder %s35_s29, 2  ;;  %p171_p1 = scmp.ne.s32.totalorder %s744_s23, %s740_s22 }
   0xb   : > { %p172_p2 = scmp.eq.s32.totalorder %s562_s27, 1  ;;  %p177_p3 = scmp.ne.s32.totalorder %s740_s22, %s736_s21 }
   0xc   : > { %s986_s29 = smov (%p37_p0, %s35_s29), 0  ;;  %p178_p5 = scmp.eq.s32.totalorder %s563_s28, 1 }
   0xd   : > { %p840_p4 = por %p172_p2, %p171_p1  ;;  %s158_s8 = ssub.s32 %s752_s25, %s986_s29 }
   0xe   : > { %p566_p6 = scmp.ge.s32.totalorder %s756_s26, 1  ;;  %p159_p7 = scmp.eq.s32.totalorder %s158_s8, 0 }
   0xf   : > { %p847_p8 = por %p178_p5, %p177_p3  ;;  %p241_p9 = scmp.lt.s32.totalorder %s756_s26, 3 }
  0x10   : > { %s853_s10 = scalar_select %p159_p7, %s744_s23, %s161_s30  }
  0x11   : > { %p242_p10 = pnand %p566_p6, %p241_p9 }
  0x12   : > { %p285_p11 = scmp.lt.s32.totalorder (!%p242_p10), %s748_s24, 1  ;;  %s979_s0 = sld [smem:[#allocation8_spill]] (!%p242_p10) }
  0x13   : > { %245 = sbr.rel (%p242_p10) target bundleno = 371 (0x173), region = 36  ;;  %s877_s12 = sand.u32 (!%p242_p10), 1, %s740_s22  }
  0x14   : > { %s567_s13 = sshll.u32 (!%p242_p10), %s877_s12, 3  ;;  %s573_s16 = sshll.u32 (!%p242_p10), %s748_s24, 7 }
  0x15   : > { %s277_s14 = scalar_lea.vmem (!%p242_p10), [#allocation2], %s567_s13  ;;  %s881_s15 = scalar_lea.vmem (!%p242_p10), [#allocation4], %s567_s13 }
  0x16   : > { %s899_s30 = scalar_lea.hbm (!%p242_p10), %s975_s6, %s573_s16  ;;  %s395_s8 = scalar_lea.sflag (!%p242_p10), [#allocation3], %s877_s12 }
  0x17   : > { %s763_s13 = smov (!%p242_p10), [#allocation2]  }
  0x18   : > { %v306_v0 = vld [vmem:[%s970_s1] sm:$0xff]  ;;  %v758_v1 = vmov 0   ;;  %v759_v2 = vmov 2   ;;  %v760_v3 = vmov 1   ;;  %v761_v4 = vmov 3   ;;  %s866_s17 = scalar_select %p285_p11, %s748_s24, 1 }
  0x19   : > { %642 = vset.pattern.permute.xlu0 %v758_v1  ;;  %644 = vset.pattern.permute.xlu1 %v759_v2  ;;  %v348_v5 = vld [vmem:[%s971_s2] sm:$0xff]  ;;  %v313_v7 = vlaneseq  ;;  %vm371_vm0 = vcmask 31744   ;;  %vm303_vm1 = vcmask 7168   ;;  %v762_v45 = vmov 0.0   ;;  %s654_s19 = sshll.u32 %s763_s13, 4  ;;  %s655_s19 = int_to_ptr.vmem [resolvable:$false] %s654_s19 }
  0x1a   : > { %310 = vperm.xlu0 %642, %v306_v0   ;;  %329 = vperm.xlu1 %644, %v306_v0   ;;  %v355_v6 = vld [vmem:[%s972_s3] sm:$0xff]  ;;  %s569_s18 = sshll.u32 %s866_s17, 2  ;;  %s570_s28 = sshll.u32 %s866_s17, 3  ;;  %304 = vst.msk [vmem:[%s277_s14] sm:$0xff] %vm303_vm1, %v762_v45  ;;  %305 = vst.msk [vmem:[%s881_s15] sm:$0xff] %vm303_vm1, %v762_v45 }
  0x1b   : > { %v314_v8 = vshrl.u32 %v313_v7, 7  ;;  %s291_s27 = scalar_lea.vmem %s979_s0, %s569_s18  ;;  %s298_s11 = scalar_lea.vmem %s973_s4, %s570_s28 }
  0x1c   : > { %v307_v11 = vld [vmem:[%s291_s27] sm:$0xf]  ;;  %s416_s17 = sshll.u32 %s277_s14, 4  ;;  %s429_s18 = sshll.u32 %s881_s15, 4  ;;  %s893_s17 = int_to_ptr.vmem [resolvable:$true] %s416_s17  ;;  %s901_s18 = int_to_ptr.vmem [resolvable:$true] %s429_s18 }
  0x1d   : > { %v315_v9 = vsub.s32 0, %v314_v8  ;;  %v324_v10 = vsub.s32 1, %v314_v8  ;;  %v334_v13 = vsub.s32 2, %v314_v8  ;;  %v344_v15 = vsub.s32 3, %v314_v8  ;;  %s891_s27 = scalar_lea.hbm %s974_s5, %s573_s16  ;;  %s656_s20 = scalar_lea.vmem %s655_s19, 256 }
  0x1e   : > { %643 = vset.pattern.permute.xlu0 %v760_v3  ;;  %645 = vset.pattern.permute.xlu1 %v761_v4  ;;  %p657_p1 = scmp.lt.s32.totalorder %s893_s17, %s655_s19 }
  0x1f   : > { %319 = vperm.xlu0 %643, %v306_v0   ;;  %339 = vperm.xlu1 %645, %v306_v0   ;;  %v316_v16 = vrot.slane %v307_v11, %v315_v9  ;;  %v325_v17 = vrot.slane %v307_v11, %v324_v10  ;;  %v335_v18 = vrot.slane %v307_v11, %v334_v13 }
  0x20   : > { %v345_v19 = vrot.slane %v307_v11, %v344_v15 }
  0x21   : > { %v373_v46 = vld [vmem:[%s277_s14] sm:$0xff]  ;;  %v380_v48 = vld [vmem:[%s881_s15] sm:$0xff] }
  0x23   : > { %646 = vset.pattern.permute.xlu1 %v758_v1  ;;  %647 = vset.pattern.permute.xlu0 %v758_v1 }
  0x24   : > { %351 = vperm.xlu1 %646, %v348_v5   ;;  %358 = vperm.xlu0 %647, %v355_v6  }
  0x95   : > { %v311_v12 = vpop.permute.xlu0 %310  ;;  %v330_v14 = vpop.permute.xlu1 %329 }
  0x96   : > { %v317_v22 = vmul.f32 %v316_v16, %v311_v12  ;;  %v336_v24 = vmul.f32 %v335_v18, %v330_v14 }
  0x9a   : > { %v320_v20 = vpop.permute.xlu0 %319  ;;  %v340_v21 = vpop.permute.xlu1 %339 }
  0x9b   : > { %v326_v23 = vmul.f32 %v325_v17, %v320_v20  ;;  %v346_v26 = vmul.f32 %v345_v19, %v340_v21 }
  0x9d   : > { %v327_v25 = vadd.f32 %v326_v23, %v317_v22 }
  0x9f   : > { %v337_v27 = vadd.f32 %v336_v24, %v327_v25  ;;  %v352_v28 = vpop.permute.xlu1 %351  ;;  %v359_v30 = vpop.permute.xlu0 %358 }
  0xa1   : > { %v347_v29 = vadd.f32 %v346_v26, %v337_v27 }
  0xa3   : > { %v354_v31 = vmul.f32 %v352_v28, %v347_v29 }
  0xa5   : > { %v361_v32 = vadd.f32 %v359_v30, %v354_v31 }
  0xa7   : > { %v363_v33 = vmul.f32 0.044715, %v361_v32  ;;  %v362_v39 = vmul.f32 0.5, %v361_v32 }
  0xa9   : > { %v364_v34 = vmul.f32 %v363_v33, %v361_v32 }
  0xab   : > { %v365_v35 = vmul.f32 %v364_v34, %v361_v32 }
  0xad   : > { %v366_v36 = vadd.f32 %v365_v35, %v361_v32 }
  0xaf   : > { %v367_v37 = vmul.f32 0.7978846, %v366_v36 }
  0xb1   : > { %648 = vtanh.f32 %v367_v37 }
  0xbe   : > { %v649_v38 = vpop.eup %648 }
  0xbf   : > { %v369_v40 = vadd.f32 1.0, %v649_v38 }
  0xc1   : > { %v370_v41 = vmul.f32 %v369_v40, %v362_v39 }
  0xc3   : > { %v374_v42 = vsel %vm371_vm0, %v370_v41, 0.0  ;;  %372 = vst.msk [vmem:[%s298_s11] sm:$0xff] %vm371_vm0, %v370_v41  ;;  %v381_v43 = vmul.f32 %v370_v41, %v370_v41  ;;  %s650_s11 = scalar_lea.vmem %s893_s17, 128 }
  0xc4   : > { %375 = vadd.xlane.f32.xlu1 %v374_v42  ;;  %p651_p12 = scmp.ne.s32.totalorder %s893_s17, %s650_s11  ;;  %p658_p2 = scmp.lt.s32.totalorder %s656_s20, %s650_s11 }
  0xc5   : > { %v382_v44 = vsel %vm371_vm0, %v381_v43, 0.0 }
  0xc6   : > { %383 = vadd.xlane.f32.xlu0 %v382_v44  ;;  %p652_p13 = pnand %p651_p12, %p840_p4  ;;  %p659_p3 = por %p658_p2, %p657_p1 }
  0xc8   : > { %p653_p0 = pneg %p652_p13 }
  0xca   : > { %p660_p5 = pnand %p659_p3, %p653_p0 }
 0x14d   : > { %v376_v47 = vpop.xlane.xlu1 %375 }
 0x14e   : > { %v377_v49 = vadd.f32 %v376_v47, %v373_v46 }
 0x14f   : > { %v384_v50 = vpop.xlane.xlu0 %383 }
 0x150   : > { %379 = vst.msk [vmem:[%s277_s14] sm:$0xff] %vm303_vm1, %v377_v49  ;;  %v385_v51 = vadd.f32 %v384_v50, %v380_v48 }
 0x151   : > { %663 = shalt.err (!%p660_p5)
}
 0x152   : > { %s664_s14 = scalar_lea.hbm %s891_s27, 128  ;;  %s668_s28 = scalar_lea.hbm %s974_s5, 256 }
 0x153   : > { %p665_p6 = scmp.ne.s32.totalorder %s891_s27, %s664_s14  ;;  %p669_p10 = scmp.lt.s32.totalorder %s891_s27, %s974_s5 }
 0x154   : > { %p670_p11 = scmp.lt.s32.totalorder %s668_s28, %s664_s14 }
 0x155   : > { %p666_p7 = pnand %p665_p6, %p840_p4 }
 0x156   : > { %p671_p12 = por %p670_p11, %p669_p10 }
 0x157   : > { %p667_p9 = pneg %p666_p7 }
 0x159   : > { %p672_p13 = pnand %p671_p12, %p667_p9 }
 0x15b   : > { %675 = shalt.err (!%p672_p13)
}
 0x15c   : > { %577 = dma.vmem_to_hbm [thread:$0]  (%p840_p4), %s893_s17, 128, %s891_s27, %s395_s8   ;;  %386 = vst.msk [vmem:[%s881_s15] sm:$0xff] %vm303_vm1, %v385_v51 }
 0x15d   : > { %s400_s11 = scalar_lea.sflag [#allocation5], %s877_s12  ;;  %s676_s0 = scalar_lea.vmem %s901_s18, 128 }
 0x15e   : > { %p677_p0 = scmp.ne.s32.totalorder %s901_s18, %s676_s0  ;;  %s764_s19 = smov [#allocation4]  }
 0x15f   : > { %s680_s20 = sshll.u32 %s764_s19, 4  ;;  %s681_s20 = int_to_ptr.vmem [resolvable:$false] %s680_s20 }
 0x160   : > { %p678_p1 = pnand %p677_p0, %p840_p4  ;;  %s682_s14 = scalar_lea.vmem %s681_s20, 256 }
 0x161   : > { %p683_p3 = scmp.lt.s32.totalorder %s901_s18, %s681_s20  ;;  %p684_p5 = scmp.lt.s32.totalorder %s682_s14, %s676_s0 }
 0x162   : > { %p679_p2 = pneg %p678_p1 }
 0x163   : > { %p685_p6 = por %p684_p5, %p683_p3 }
 0x165   : > { %p686_p7 = pnand %p685_p6, %p679_p2 }
 0x167   : > { %689 = shalt.err (!%p686_p7)
}
 0x168   : > { %s690_s15 = scalar_lea.hbm %s899_s30, 128  ;;  %s694_s27 = scalar_lea.hbm %s975_s6, 256 }
 0x169   : > { %p691_p9 = scmp.ne.s32.totalorder %s899_s30, %s690_s15  ;;  %p695_p12 = scmp.lt.s32.totalorder %s899_s30, %s975_s6 }
 0x16a   : > { %p696_p13 = scmp.lt.s32.totalorder %s694_s27, %s690_s15 }
 0x16b   : > { %p692_p10 = pnand %p691_p9, %p840_p4 }
 0x16c   : > { %p697_p0 = por %p696_p13, %p695_p12 }
 0x16d   : > { %p693_p11 = pneg %p692_p10 }
 0x16f   : > { %p698_p1 = pnand %p697_p0, %p693_p11 }
 0x171   : > { %701 = shalt.err (!%p698_p1)
}
 0x172   : > { %578 = dma.vmem_to_hbm [thread:$0]  (%p840_p4), %s901_s18, 128, %s899_s30, %s400_s11  }
 0x173 PF: > { %p588_p2 = scmp.ge.s32.totalorder %s756_s26, 2  ;;  %s451_s24 = sand.u32 1, %s736_s21  }
 0x174   : > { %s452_s28 = scalar_lea.sflag [#allocation3], %s451_s24 }
 0x175   : > { %p582_p3 = pnand %p588_p2, %p847_p8 }
 0x177   : > { %p583_p5 = pneg %p582_p3 }
 0x179   : > { %727 = dma.done.wait (%p583_p5), %s452_s28, 128  }
 0x17a   : > { %729 = vsyncadd (%p583_p5), %s452_s28, 4294967168  ;;  %s461_s13 = scalar_lea.sflag [#allocation5], %s451_s24 }
 0x17b   : > { %731 = dma.done.wait (%p583_p5), %s461_s13, 128  }
 0x17c   : > { %733 = vsyncadd (%p583_p5), %s461_s13, 4294967168  ;;  %s23_s26 = sadd.s32 1, %s756_s26   ;;  %s980_s21 = smov %s740_s22 }
 0x17d   : > { %p20_p6 = scmp.ge.s32.totalorder %s23_s26, 4   ;;  %s981_s22 = smov %s744_s23 }
 0x17e   : > { %s982_s23 = smov %s853_s10  ;;  %s983_s24 = smov %s752_s25 }
 0x17f   : > { %s984_s25 = smov %s986_s29  ;;  %22 = sbr.rel (!%p20_p6) target bundleno = 8 (0x8), region = 104 }
 0x184   :  { %466 = vsyncpa [#allocation3], 1 }
 0x185   :  { %468 = vsyncpa [#allocation3 + $0x1], 1 }
 0x186   :  { %469 = vsyncpa [#allocation5], 1 }
 0x187   :  { %471 = vsyncpa [#allocation5 + $0x1], 1 }

// kernel: msse_forward.29
= control target key start
LH: loop header
LB: loop body
LE: loop exit
PB: predicated region body
PF: predicated region fallthrough
CT: control target
= control target key end

     0   :  { %s967_s0 = inlined_call_operand.vmem [shape: f32[2,4,4], index: 0, kind: input, shape index: {}]   ;;  %s968_s1 = inlined_call_operand.vmem [shape: f32[8,4], index: 1, kind: input, shape index: {}]   ;;  %s969_s2 = inlined_call_operand.vmem [shape: f32[2,8,1], index: 2, kind: output, shape index: {0}]   ;;  %s970_s3 = inlined_call_operand.vmem [shape: f32[2,8,1], index: 3, kind: output, shape index: {1}]   ;;  %s971_s4 = inlined_call_operand.hbm [shape: f32[2,4,1], index: 4, kind: output, shape index: {2}]   ;;  %s972_s5 = inlined_call_operand.hbm [shape: f32[2,4,1], index: 5, kind: output, shape index: {3}]  }
   0x1   :  { %974 = sst [smem:[#allocation8_spill]] %s967_s0 }
   0x2   :  { %11 = vsyncpa [#allocation3], 0 }
   0x3   :  { %13 = vsyncpa [#allocation3 + $0x1], 0 }
   0x4   :  { %14 = vsyncpa [#allocation5], 0 }
   0x5   :  { %16 = vsyncpa [#allocation5 + $0x1], 0  ;;  %s783_s18 = smov 0   ;;  %s785_s19 = smov 0  }
   0x6   :  { %s787_s20 = smov 0   ;;  %s789_s21 = smov 0  }
   0x7   :  { %s791_s22 = smov 0   ;;  %s793_s23 = smov 0  }
   0x8 LB: > { %s552_s24 = sadd.s32 4294967295, %s744_s23   ;;  %s553_s25 = sadd.s32 4294967294, %s744_s23   ;;  %s744_s23 = sphi %s793_s23, %s22_s23   ;;  %s740_s22 = sphi %s791_s22, %s984_s22   ;;  %s736_s21 = sphi %s789_s21, %s983_s21   ;;  %s732_s20 = sphi %s787_s20, %s982_s20   ;;  %s728_s19 = sphi %s785_s19, %s981_s19   ;;  %s724_s18 = sphi %s783_s18, %s980_s18  }
   0x9   : > { %s34_s26 = sadd.s32 1, %s740_s22  ;;  %s142_s27 = sadd.s32 1, %s732_s20 }
   0xa   : > { %p36_p0 = scmp.ge.s32.totalorder %s34_s26, 2  ;;  %p152_p1 = scmp.ne.s32.totalorder %s732_s20, %s728_s19 }
   0xb   : > { %p153_p2 = scmp.eq.s32.totalorder %s552_s24, 1  ;;  %p158_p3 = scmp.ne.s32.totalorder %s728_s19, %s724_s18 }
   0xc   : > { %s986_s26 = smov (%p36_p0, %s34_s26), 0  ;;  %p159_p5 = scmp.eq.s32.totalorder %s553_s25, 1 }
   0xd   : > { %p823_p4 = por %p153_p2, %p152_p1  ;;  %s139_s29 = ssub.s32 %s740_s22, %s986_s26 }
   0xe   : > { %p556_p6 = scmp.ge.s32.totalorder %s744_s23, 1  ;;  %p140_p7 = scmp.eq.s32.totalorder %s139_s29, 0 }
   0xf   : > { %p830_p8 = por %p159_p5, %p158_p3  ;;  %p216_p9 = scmp.lt.s32.totalorder %s744_s23, 3 }
  0x10   : > { %s836_s6 = scalar_select %p140_p7, %s732_s20, %s142_s27  }
  0x11   : > { %p217_p10 = pnand %p556_p6, %p216_p9 }
  0x12   : > { %p259_p11 = scmp.lt.s32.totalorder (!%p217_p10), %s736_s21, 1  ;;  %s977_s0 = sld [smem:[#allocation8_spill]] (!%p217_p10) }
  0x13   : > { %220 = sbr.rel (%p217_p10) target bundleno = 307 (0x133), region = 28  ;;  %s850_s14 = sand.u32 (!%p217_p10), 1, %s728_s19  }
  0x14   : > { %s557_s15 = sshll.u32 (!%p217_p10), %s850_s14, 2  ;;  %s973_s11 = sshll.u32 (!%p217_p10), %s736_s21, 6 }
  0x15   : > { %s853_s16 = scalar_lea.vmem (!%p217_p10), [#allocation4], %s557_s15  ;;  %s857_s17 = scalar_lea.vmem (!%p217_p10), [#allocation2], %s557_s15 }
  0x16   : > { %s402_s12 = sshll.u32 (!%p217_p10), %s853_s16, 4  ;;  %s888_s25 = scalar_lea.hbm (!%p217_p10), %s972_s5, %s973_s11  ;;  %s890_s12 = int_to_ptr.vmem [resolvable:$true] %s402_s12 }
  0x17   : > { %s638_s27 = scalar_lea.vmem (!%p217_p10), %s890_s12, 64  ;;  %s751_s7 = smov (!%p217_p10), [#allocation4]  }
  0x18   : > { %v285_v0 = vld [vmem:[%s968_s1] sm:$0xff]  ;;  %v746_v1 = vmov 0   ;;  %v747_v2 = vmov 2   ;;  %v748_v3 = vmov 1   ;;  %v749_v4 = vmov 3   ;;  %s843_s9 = scalar_select %p259_p11, %s736_s21, 1 }
  0x19   : > { %633 = vset.pattern.permute.xlu0 %v746_v1  ;;  %635 = vset.pattern.permute.xlu1 %v747_v2  ;;  %vm342_vm0 = vcmask 27648   ;;  %vm281_vm1 = vcmask 3072   ;;  %v750_v9 = vmov 0.0   ;;  %vm278_vm2 = vcmask 7168   ;;  %p639_p12 = scmp.ne.s32.totalorder %s890_s12, %s638_s27  ;;  %s642_s8 = sshll.u32 %s751_s7, 4  ;;  %s643_s8 = int_to_ptr.vmem [resolvable:$false] %s642_s8 }
  0x1a   : > { %288 = vperm.xlu0 %633, %v285_v0   ;;  %307 = vperm.xlu1 %635, %v285_v0   ;;  %s559_s10 = sshll.u32 %s843_s9, 2  ;;  %283 = vst.msk [vmem:[%s853_s16] sm:$0xf] %vm281_vm1, %v750_v9  ;;  %282 = vst.msk [vmem:[%s857_s17] sm:$0xf] %vm281_vm1, %v750_v9  ;;  %s560_s24 = sshll.u32 %s843_s9, 3  ;;  %v291_v10 = vlaneseq }
  0x1b   : > { %s265_s13 = scalar_lea.vmem %s977_s0, %s559_s10  ;;  %s867_s29 = scalar_lea.vmem %s969_s2, %s560_s24  ;;  %vm327_vm3 = vcmask 31744  }
  0x1c   : > { %v284_v5 = vld [vmem:[%s265_s13] sm:$0xf]  ;;  %279 = vst.msk [vmem:[%s867_s29] sm:$0xff] %vm278_vm2, %v750_v9  ;;  %v292_v11 = vshrl.u32 %v291_v10, 7  ;;  %s876_s10 = scalar_lea.vmem %s970_s3, %s560_s24  ;;  %s370_s24 = scalar_lea.sflag [#allocation5], %s850_s14 }
  0x1d   : > { %v350_v6 = vmul.f32 %v284_v5, %v284_v5  ;;  %v343_v8 = vsel %vm342_vm0, %v284_v5, 0.0  ;;  %280 = vst.msk [vmem:[%s876_s10] sm:$0xff] %vm278_vm2, %v750_v9  ;;  %p640_p13 = pnand %p639_p12, %p823_p4  ;;  %s644_s13 = scalar_lea.vmem %s643_s8, 128 }
  0x1e   : > { %634 = vset.pattern.permute.xlu0 %v748_v3  ;;  %636 = vset.pattern.permute.xlu1 %v749_v4  ;;  %v293_v12 = vsub.s32 0, %v292_v11  ;;  %v302_v13 = vsub.s32 1, %v292_v11  ;;  %v312_v15 = vsub.s32 2, %v292_v11  ;;  %v322_v17 = vsub.s32 3, %v292_v11  ;;  %p645_p1 = scmp.lt.s32.totalorder %s890_s12, %s643_s8  ;;  %p646_p2 = scmp.lt.s32.totalorder %s644_s13, %s638_s27 }
  0x1f   : > { %297 = vperm.xlu0 %634, %v285_v0   ;;  %317 = vperm.xlu1 %636, %v285_v0   ;;  %v351_v7 = vsel %vm342_vm0, %v350_v6, 0.0  ;;  %p641_p0 = pneg %p640_p13 }
  0x20   : > { %v294_v18 = vrot.slane %v284_v5, %v293_v12  ;;  %v303_v19 = vrot.slane %v284_v5, %v302_v13  ;;  %v313_v20 = vrot.slane %v284_v5, %v312_v15  ;;  %v323_v21 = vrot.slane %v284_v5, %v322_v17  ;;  %p647_p3 = por %p646_p2, %p645_p1 }
  0x21   : > { %v349_v34 = vld [vmem:[%s853_s16] sm:$0xf]  ;;  %v341_v37 = vld [vmem:[%s857_s17] sm:$0xf] }
  0x22   : > { %p648_p5 = pnand %p647_p3, %p641_p0 }
  0x23   : > { %637 = vset.pattern.permute.xlu0 %v749_v4 }
  0x3e   : > { %352 = vadd.xlane.f32.xlu0 %v351_v7 }
  0x43   : > { %344 = vadd.xlane.f32.xlu1 %v343_v8 }
  0x95   : > { %v289_v14 = vpop.permute.xlu0 %288  ;;  %v308_v16 = vpop.permute.xlu1 %307 }
  0x96   : > { %v295_v24 = vmul.f32 %v294_v18, %v289_v14  ;;  %v314_v26 = vmul.f32 %v313_v20, %v308_v16 }
  0x9a   : > { %v298_v22 = vpop.permute.xlu0 %297  ;;  %v318_v23 = vpop.permute.xlu1 %317 }
  0x9b   : > { %v304_v25 = vmul.f32 %v303_v19, %v298_v22  ;;  %v324_v28 = vmul.f32 %v323_v21, %v318_v23 }
  0x9d   : > { %v305_v27 = vadd.f32 %v304_v25, %v295_v24 }
  0x9f   : > { %v315_v29 = vadd.f32 %v314_v26, %v305_v27 }
  0xa1   : > { %v325_v30 = vadd.f32 %v324_v28, %v315_v29 }
  0xa3   : > { %v328_v31 = vsel %vm327_vm3, %v325_v30, 0.0  ;;  %v335_v32 = vmul.f32 %v325_v30, %v325_v30 }
  0xa4   : > { %329 = vadd.xlane.f32.xlu0 %v328_v31 }
  0xa5   : > { %v336_v33 = vsel %vm327_vm3, %v335_v32, 0.0 }
  0xa6   : > { %337 = vadd.xlane.f32.xlu1 %v336_v33 }
  0xc7   : > { %v353_v35 = vpop.xlane.xlu0 %352 }
  0xc8   : > { %v354_v36 = vadd.f32 %v353_v35, %v349_v34 }
  0xca   : > { %355 = vst.msk [vmem:[%s853_s16] sm:$0xf] %vm281_vm1, %v354_v36 }
  0xcb   : > { %651 = shalt.err (!%p648_p5)
}
  0xcc   : > { %s652_s16 = scalar_lea.hbm %s888_s25, 64  ;;  %s656_s7 = scalar_lea.hbm %s972_s5, 128 }
  0xcd   : > { %p653_p6 = scmp.ne.s32.totalorder %s888_s25, %s652_s16  ;;  %p657_p10 = scmp.lt.s32.totalorder %s888_s25, %s972_s5 }
  0xce   : > { %p658_p11 = scmp.lt.s32.totalorder %s656_s7, %s652_s16 }
  0xcf   : > { %p654_p7 = pnand %p653_p6, %p823_p4 }
  0xd0   : > { %p659_p12 = por %p658_p11, %p657_p10 }
  0xd1   : > { %p655_p9 = pneg %p654_p7 }
  0xd3   : > { %p660_p13 = pnand %p659_p12, %p655_p9 }
  0xd5   : > { %663 = shalt.err (!%p660_p13)
}
  0xd6   : > { %569 = dma.vmem_to_hbm [thread:$0]  (%p823_p4), %s890_s12, 64, %s888_s25, %s370_s24   ;;  %v345_v38 = vpop.xlane.xlu1 %344 }
  0xd7   : > { %v346_v39 = vadd.f32 %v345_v38, %v341_v37  ;;  %s978_s9 = sshll.u32 %s736_s21, 6  ;;  %s979_s8 = sshll.u32 %s857_s17, 4  ;;  %s390_s8 = int_to_ptr.vmem [resolvable:$true] %s979_s8 }
  0xd8   : > { %s387_s11 = scalar_lea.hbm %s971_s4, %s978_s9  ;;  %s365_s13 = scalar_lea.sflag [#allocation3], %s850_s14 }
  0xd9   : > { %348 = vst.msk [vmem:[%s857_s17] sm:$0xf] %vm281_vm1, %v346_v39  ;;  %s664_s16 = scalar_lea.vmem %s390_s8, 64  ;;  %s752_s15 = smov [#allocation2]  }
  0xda   : > { %p665_p0 = scmp.ne.s32.totalorder %s390_s8, %s664_s16  ;;  %s668_s7 = sshll.u32 %s752_s15, 4  ;;  %s669_s7 = int_to_ptr.vmem [resolvable:$false] %s668_s7 }
  0xdb   : > { %s670_s12 = scalar_lea.vmem %s669_s7, 128  ;;  %p671_p3 = scmp.lt.s32.totalorder %s390_s8, %s669_s7 }
  0xdc   : > { %p666_p1 = pnand %p665_p0, %p823_p4  ;;  %p672_p5 = scmp.lt.s32.totalorder %s670_s12, %s664_s16 }
  0xde   : > { %p667_p2 = pneg %p666_p1  ;;  %p673_p6 = por %p672_p5, %p671_p3 }
  0xe0   : > { %p674_p7 = pnand %p673_p6, %p667_p2 }
  0xe2   : > { %677 = shalt.err (!%p674_p7)
}
  0xe3   : > { %s678_s21 = scalar_lea.hbm %s387_s11, 64  ;;  %s682_s25 = scalar_lea.hbm %s971_s4, 128 }
  0xe4   : > { %p679_p9 = scmp.ne.s32.totalorder %s387_s11, %s678_s21  ;;  %p683_p12 = scmp.lt.s32.totalorder %s387_s11, %s971_s4 }
  0xe5   : > { %p684_p13 = scmp.lt.s32.totalorder %s682_s25, %s678_s21 }
  0xe6   : > { %p680_p10 = pnand %p679_p9, %p823_p4 }
  0xe7   : > { %p685_p0 = por %p684_p13, %p683_p12 }
  0xe8   : > { %p681_p11 = pneg %p680_p10 }
  0xea   : > { %p686_p1 = pnand %p685_p0, %p681_p11 }
  0xec   : > { %689 = shalt.err (!%p686_p1)
}
  0xed   : > { %568 = dma.vmem_to_hbm [thread:$0]  (%p823_p4), %s390_s8, 64, %s387_s11, %s365_s13   ;;  %v326_v40 = vld [vmem:[%s867_s29] sm:$0xff] }
  0xee   : > { %v334_v42 = vld [vmem:[%s876_s10] sm:$0xff] }
 0x12d   : > { %v330_v41 = vpop.xlane.xlu0 %329 }
 0x12e   : > { %v331_v43 = vadd.f32 %v330_v41, %v326_v40 }
 0x12f   : > { %v338_v44 = vpop.xlane.xlu1 %337 }
 0x130   : > { %333 = vst.msk [vmem:[%s867_s29] sm:$0xff] %vm278_vm2, %v331_v43  ;;  %v339_v45 = vadd.f32 %v338_v44, %v334_v42 }
 0x132   : > { %340 = vst.msk [vmem:[%s876_s10] sm:$0xff] %vm278_vm2, %v339_v45 }
 0x133 PF: > { %p579_p2 = scmp.ge.s32.totalorder %s744_s23, 2  ;;  %s428_s28 = sand.u32 1, %s724_s18  }
 0x134   : > { %s429_s27 = scalar_lea.sflag [#allocation3], %s428_s28 }
 0x135   : > { %p573_p3 = pnand %p579_p2, %p830_p8 }
 0x137   : > { %p574_p5 = pneg %p573_p3 }
 0x139   : > { %715 = dma.done.wait (%p574_p5), %s429_s27, 64  }
 0x13a   : > { %717 = vsyncadd (%p574_p5), %s429_s27, 4294967232  ;;  %s438_s0 = scalar_lea.sflag [#allocation5], %s428_s28 }
 0x13b   : > { %719 = dma.done.wait (%p574_p5), %s438_s0, 64  }
 0x13c   : > { %721 = vsyncadd (%p574_p5), %s438_s0, 4294967232  ;;  %s22_s23 = sadd.s32 1, %s744_s23   ;;  %s980_s18 = smov %s728_s19 }
 0x13d   : > { %p19_p4 = scmp.ge.s32.totalorder %s22_s23, 4   ;;  %s981_s19 = smov %s732_s20 }
 0x13e   : > { %s982_s20 = smov %s836_s6  ;;  %s983_s21 = smov %s740_s22 }
 0x13f   : > { %s984_s22 = smov %s986_s26  ;;  %21 = sbr.rel (!%p19_p4) target bundleno = 8 (0x8), region = 108 }
 0x144   :  { %443 = vsyncpa [#allocation3], 1 }
 0x145   :  { %445 = vsyncpa [#allocation3 + $0x1], 1 }
 0x146   :  { %446 = vsyncpa [#allocation5], 1 }
 0x147   :  { %448 = vsyncpa [#allocation5 + $0x1], 1 }

// kernel: msse_forward.33
= control target key start
LH: loop header
LB: loop body
LE: loop exit
PB: predicated region body
PF: predicated region fallthrough
CT: control target
= control target key end

     0   :  { %s819_s18 = smov 0   ;;  %s981_s0 = inlined_call_operand.vmem [shape: f32[2,256], index: 0, kind: input, shape index: {}]   ;;  %s982_s1 = inlined_call_operand.vmem [shape: f32[2,8,1], index: 1, kind: input, shape index: {}]   ;;  %s983_s2 = inlined_call_operand.vmem [shape: f32[2,8,256], index: 2, kind: input, shape index: {}]   ;;  %s984_s3 = inlined_call_operand.vmem [shape: f32[8,72], index: 3, kind: input, shape index: {}]   ;;  %s985_s4 = inlined_call_operand.vmem [shape: f32[2,8,1], index: 4, kind: output, shape index: {0}]   ;;  %s986_s5 = inlined_call_operand.vmem [shape: f32[2,8,1], index: 5, kind: output, shape index: {1}]  }
   0x1 LB: > { %s729_s19 = sadd.s32 4294967295, %s773_s18   ;;  %p733_p0 = scmp.ge.s32.totalorder %s773_s18, 1  ;;  %s773_s18 = sphi %s819_s18, %s16_s18  }
   0x2   : > { %p199_p1 = scmp.lt.s32.totalorder %s773_s18, 3 }
   0x4   : > { %p200_p2 = pnand %p733_p0, %p199_p1 }
   0x5   : > { %p234_p3 = scmp.lt.s32.totalorder (!%p200_p2), %s729_s19, 1  ;;  %s777_s28 = smov (!%p200_p2), 17  }
   0x6   : > { %203 = sbr.rel (%p200_p2) target bundleno = 807 (0x327), region = 36  ;;  %s778_s29 = smov (!%p200_p2), 15  }
   0x7   : > { %s779_s30 = smov (!%p200_p2), 1   ;;  %s780_s6 = smov (!%p200_p2), 127  }
   0x8   : > { %s781_s7 = smov (!%p200_p2), 113   ;;  %s782_s8 = smov (!%p200_p2), 111  }
   0x9   : > { %s783_s9 = smov (!%p200_p2), 95   ;;  %s784_s10 = smov (!%p200_p2), 94  }
   0xa   : > { %s785_s15 = smov (!%p200_p2), 96   ;;  %s786_s16 = smov (!%p200_p2), 112  }
   0xb   : > { %v274_v0 = vlaneseq  ;;  %v775_v1 = vmov 0   ;;  %s988_s19 = smov (!%p234_p3, %s729_s19), 1  ;;  %v776_v3 = vmov 0.0   ;;  %v739_v4 = vld [vmem:[%s981_s0 + $0x1] ss:$2 sm:$0x3] }
   0xc   : > { %766 = vset.pattern.permute.xlu0 %v775_v1  ;;  %616 = vmatprep.mubr.f32.mxu0 %v776_v3  ;;  %s834_s22 = sshll.u32 %s988_s19, 3  ;;  %v267_v7 = vld [vmem:[%s981_s0] ss:$2 sm:$0x3]  ;;  %s743_s11 = sshll.u32 %s988_s19, 4  ;;  %vm358_vm0 = vcmask 138240  }
   0xd   : > { %v275_v2 = vshrl.u32 %v274_v0, 7  ;;  %s237_s25 = scalar_lea.vmem %s982_s1, %s834_s22  ;;  %s242_s14 = scalar_lea.vmem %s983_s2, %s743_s11  ;;  %vm346_vm1 = vcmask 121856   ;;  %vm334_vm2 = vcmask 7168   ;;  %vm319_vm3 = vcmask 1039360  }
   0xe   : > { %v251_v8 = vld [vmem:[%s237_s25] sm:$0xff]  ;;  %v253_v26 = vld [vmem:[%s242_s14 + $0x8] sm:$0xff]  ;;  %s787_s17 = smov 110   ;;  %s788_s19 = smov 126   ;;  %vm307_vm4 = vcmask 924672   ;;  %vm439_vm5 = vcmask 777216  }
   0xf   : > { %v280_v5 = vsub.s32 1, %v275_v2  ;;  %v276_v6 = vsub.s32 0, %v275_v2  ;;  %256 = vperm.xlu0 %766, %v251_v8   ;;  %v252_v29 = vld [vmem:[%s242_s14] sm:$0xff]  ;;  %vm286_vm6 = vcmask 908288   ;;  %vm451_vm7 = vcmask 769024   ;;  %s246_s25 = scalar_lea.vmem %s985_s4, %s834_s22 }
  0x10   : > { %vm427_vm8 = vcmask 785408   ;;  %vm415_vm9 = vcmask 900096   ;;  %vm398_vm10 = vcmask 916480   ;;  %vm386_vm11 = vcmask 1031168  }
  0x11   : > { %v302_v9 = vrot.slane %v739_v4, %v280_v5  ;;  %v277_v10 = vrot.slane %v267_v7, %v276_v6  ;;  %v298_v11 = vrot.slane %v739_v4, %v276_v6  ;;  %v281_v12 = vrot.slane %v267_v7, %v280_v5 }
  0x12   : > { %vm548_vm12 = vcmask 588800  }
  0x13   : > { %356 = vrot.lane.b32.xlu1 %v302_v9, %s777_s28  ;;  %354 = vrot.lane.b32.xlu0 %v298_v11, %s777_s28 }
  0x17   : > { %342 = vrot.lane.b32.xlu1 %v277_v10, %s778_s29  ;;  %344 = vrot.lane.b32.xlu0 %v281_v12, %s778_s29 }
  0x1b   : > { %330 = vrot.lane.b32.xlu1 %v298_v11, %s779_s30  ;;  %332 = vrot.lane.b32.xlu0 %v302_v9, %s779_s30 }
  0x1f   : > { %315 = vrot.lane.b32.xlu1 %v277_v10, %s780_s6  ;;  %317 = vrot.lane.b32.xlu0 %v281_v12, %s780_s6 }
  0x23   : > { %303 = vrot.lane.b32.xlu1 %v298_v11, %s781_s7  ;;  %305 = vrot.lane.b32.xlu0 %v302_v9, %s781_s7 }
  0x27   : > { %282 = vrot.lane.b32.xlu1 %v277_v10, %s782_s8  ;;  %437 = vrot.lane.b32.xlu0 %v776_v3, %s783_s9 }
  0x2b   : > { %284 = vrot.lane.b32.xlu0 %v281_v12, %s782_s8 }
  0x85   : > { %v357_v13 = vpop.permute.xlu1 %356 }
  0x86   : > { %v365_v14 = vmul.f32 0.0, %v357_v13 }
  0x88   : > { %449 = vrot.lane.b32.xlu1 %v365_v14, %s784_s10 }
  0x89   : > { %v343_v15 = vpop.permute.xlu1 %342 }
  0x8a   : > { %v257_v16 = vpop.permute.xlu0 %256 }
  0x8b   : > { %v859_v28 = vadd.f32 %v257_v16, %v253_v26  ;;  %v864_v30 = vadd.f32 %v257_v16, %v252_v29 }
  0x8d   : > { %v331_v17 = vpop.permute.xlu1 %330  ;;  %v351_v37 = vmul.f32 %v343_v15, %v864_v30 }
  0x8e   : > { %v355_v18 = vpop.permute.xlu0 %354  ;;  %v339_v39 = vmul.f32 %v331_v17, %v864_v30 }
  0x8f   : > { %v359_v31 = vsel %vm358_vm0, %v355_v18, %v357_v13  ;;  %v363_v32 = vmul.f32 %v355_v18, %v864_v30 }
  0x90   : > { %v364_v33 = vmul.f32 %v359_v31, %v859_v28 }
  0x91   : > { %v316_v19 = vpop.permute.xlu1 %315 }
  0x92   : > { %v345_v20 = vpop.permute.xlu0 %344  ;;  %v324_v22 = vmul.f32 0.0, %v316_v19 }
  0x93   : > { %v353_v21 = vmul.f32 0.0, %v345_v20  ;;  %v347_v34 = vsel %vm346_vm1, %v343_v15, %v345_v20 }
  0x94   : > { %v352_v35 = vmul.f32 %v347_v34, %v859_v28 }
  0x95   : > { %425 = vrot.lane.b32.xlu1 %v353_v21, %s785_s15  ;;  %v304_v24 = vpop.permute.xlu1 %303 }
  0x96   : > { %v333_v23 = vpop.permute.xlu0 %332  ;;  %v312_v27 = vmul.f32 0.0, %v304_v24 }
  0x97   : > { %v341_v25 = vmul.f32 0.0, %v333_v23  ;;  %v335_v38 = vsel %vm334_vm2, %v331_v17, %v333_v23 }
  0x98   : > { %v340_v40 = vmul.f32 %v335_v38, %v859_v28 }
  0x99   : > { %392 = vrot.lane.b32.xlu1 %v324_v22, %s786_s16  ;;  %413 = vrot.lane.b32.xlu0 %v341_v25, %s787_s17  ;;  %v901_v48 = vpop.permute.xlu1 %282 }
  0x9a   : > { %v318_v36 = vpop.permute.xlu0 %317 }
  0x9b   : > { %v320_v41 = vsel %vm319_vm3, %v316_v19, %v318_v36  ;;  %v326_v44 = vmul.f32 %v318_v36, %v859_v28 }
  0x9c   : > { %v325_v43 = vmul.f32 %v320_v41, %v864_v30 }
  0x9d   : > { %435 = vrot.lane.b32.xlu1 %v859_v28, %s783_s9  ;;  %380 = vrot.lane.b32.xlu0 %v312_v27, %s788_s19  ;;  %v291_v27 = vmul.f32 0.0, %v901_v48 }
  0x9e   : > { %v306_v42 = vpop.permute.xlu0 %305 }
  0x9f   : > { %v308_v45 = vsel %vm307_vm4, %v304_v24, %v306_v42  ;;  %v314_v47 = vmul.f32 %v306_v42, %v859_v28 }
  0xa0   : > { %v313_v46 = vmul.f32 %v308_v45, %v864_v30 }
  0xa1   : > { %401 = vrot.lane.b32.xlu1 %v864_v30, %s782_s8  ;;  %433 = vrot.lane.b32.xlu0 %v864_v30, %s783_s9 }
  0xa2   : > { %v438_v49 = vpop.permute.xlu0 %437 }
  0xa5   : > { %371 = vrot.lane.b32.xlu1 %v864_v30, %s780_s6  ;;  %403 = vrot.lane.b32.xlu0 %v859_v28, %s782_s8 }
  0xa6   : > { %v903_v51 = vpop.permute.xlu0 %284 }
  0xa7   : > { %v287_v20 = vsel %vm286_vm6, %v901_v48, %v903_v51  ;;  %v293_v24 = vmul.f32 %v903_v51, %v859_v28 }
  0xa8   : > { %v292_v23 = vmul.f32 %v287_v20, %v864_v30 }
  0xa9   : > { %445 = vrot.lane.b32.xlu1 %v363_v32, %s784_s10  ;;  %447 = vrot.lane.b32.xlu0 %v364_v33, %s784_s10 }
  0xad   : > { %421 = vrot.lane.b32.xlu1 %v351_v37, %s785_s15  ;;  %423 = vrot.lane.b32.xlu0 %v352_v35, %s785_s15 }
  0xb1   : > { %409 = vrot.lane.b32.xlu0 %v339_v39, %s787_s17  ;;  %411 = vrot.lane.b32.xlu1 %v340_v40, %s787_s17 }
  0xb5   : > { %396 = vrot.lane.b32.xlu0 %v326_v44, %s786_s16  ;;  %394 = vrot.lane.b32.xlu1 %v325_v43, %s786_s16 }
  0xb9   : > { %384 = vrot.lane.b32.xlu1 %v314_v47, %s788_s19  ;;  %382 = vrot.lane.b32.xlu0 %v313_v46, %s788_s19 }
  0xbd   : > { %369 = vrot.lane.b32.xlu1 %v776_v3, %s780_s6  ;;  %373 = vrot.lane.b32.xlu0 %v859_v28, %s780_s6 }
  0xfa   : > { %v450_v50 = vpop.permute.xlu1 %449 }
 0x107   : > { %v426_v52 = vpop.permute.xlu1 %425 }
 0x10b   : > { %v393_v53 = vpop.permute.xlu1 %392  ;;  %v414_v54 = vpop.permute.xlu0 %413 }
 0x10f   : > { %v436_v55 = vpop.permute.xlu1 %435  ;;  %v905_v56 = vpop.permute.xlu0 %380 }
 0x110   : > { %v441_v9 = vsel %vm439_vm5, %v436_v55, %v438_v49 }
 0x113   : > { %v402_v57 = vpop.permute.xlu1 %401  ;;  %v434_v58 = vpop.permute.xlu0 %433 }
 0x114   : > { %482 = vrot.lane.b32.xlu0 %v402_v57, %s777_s28  ;;  %500 = vrot.lane.b32.xlu1 %v434_v58, %s777_s28  ;;  %v440_v62 = vsel %vm439_vm5, %v434_v58, %v436_v55 }
 0x117   : > { %v404_v59 = vpop.permute.xlu0 %403  ;;  %v372_v60 = vpop.permute.xlu1 %371 }
 0x118   : > { %486 = vrot.lane.b32.xlu1 %v404_v59, %s777_s28  ;;  %v405_v10 = vsel %vm286_vm6, %v402_v57, %v404_v59 }
 0x11b   : > { %v448_v61 = vpop.permute.xlu0 %447  ;;  %v446_v0 = vpop.permute.xlu1 %445 }
 0x11c   : > { %502 = vrot.lane.b32.xlu1 %v440_v62, %s777_s28  ;;  %v453_v12 = vsel %vm451_vm7, %v448_v61, %v450_v50  ;;  %v452_v15 = vsel %vm451_vm7, %v446_v0, %v448_v61 }
 0x11f   : > { %v424_v63 = vpop.permute.xlu0 %423  ;;  %v422_v2 = vpop.permute.xlu1 %421 }
 0x120   : > { %v429_v13 = vsel %vm427_vm8, %v424_v63, %v426_v52  ;;  %v428_v17 = vsel %vm427_vm8, %v422_v2, %v424_v63 }
 0x123   : > { %v410_v1 = vpop.permute.xlu0 %409  ;;  %v412_v5 = vpop.permute.xlu1 %411 }
 0x124   : > { %v416_v14 = vsel %vm415_vm9, %v410_v1, %v412_v5  ;;  %v417_v21 = vsel %vm415_vm9, %v412_v5, %v414_v54 }
 0x127   : > { %v397_v3 = vpop.permute.xlu0 %396  ;;  %v395_v8 = vpop.permute.xlu1 %394 }
 0x128   : > { %v400_v16 = vsel %vm398_vm10, %v395_v8, %v397_v3  ;;  %v399_v18 = vsel %vm398_vm10, %v393_v53, %v395_v8  ;;  %v454_v8 = vld [vmem:[%s984_s3] sm:$0xff] }
 0x12b   : > { %v383_v4 = vpop.permute.xlu0 %382  ;;  %v385_v11 = vpop.permute.xlu1 %384 }
 0x12c   : > { %v388_v25 = vsel %vm386_vm11, %v383_v4, %v385_v11  ;;  %v387_v26 = vsel %vm386_vm11, %v905_v56, %v383_v4 }
 0x12f   : > { %v374_v6 = vpop.permute.xlu0 %373  ;;  %v370_v19 = vpop.permute.xlu1 %369 }
 0x130   : > { %468 = vrot.lane.b32.xlu0 %v374_v6, %s777_s28  ;;  %v376_v7 = vsel %vm319_vm3, %v372_v60, %v374_v6  ;;  %v375_v22 = vsel %vm319_vm3, %v370_v19, %v372_v60 }
 0x131   : > { %466 = vrot.lane.b32.xlu1 %v376_v7, %s777_s28 }
 0x134   : > { %504 = vrot.lane.b32.xlu0 %v441_v9, %s777_s28 }
 0x135   : > { %488 = vrot.lane.b32.xlu1 %v410_v1, %s777_s28 }
 0x138   : > { %484 = vrot.lane.b32.xlu0 %v405_v10, %s777_s28 }
 0x139   : > { %474 = vrot.lane.b32.xlu1 %v385_v11, %s777_s28 }
 0x13c   : > { %506 = vrot.lane.b32.xlu0 %v446_v0, %s777_s28 }
 0x13d   : > { %510 = vrot.lane.b32.xlu1 %v453_v12, %s777_s28 }
 0x140   : > { %494 = vrot.lane.b32.xlu0 %v422_v2, %s777_s28 }
 0x141   : > { %498 = vrot.lane.b32.xlu1 %v429_v13, %s777_s28 }
 0x144   : > { %480 = vrot.lane.b32.xlu0 %v397_v3, %s777_s28 }
 0x145   : > { %490 = vrot.lane.b32.xlu1 %v416_v14, %s777_s28 }
 0x148   : > { %508 = vrot.lane.b32.xlu0 %v452_v15, %s777_s28 }
 0x149   : > { %478 = vrot.lane.b32.xlu1 %v400_v16, %s777_s28 }
 0x14c   : > { %496 = vrot.lane.b32.xlu0 %v428_v17, %s777_s28 }
 0x14d   : > { %476 = vrot.lane.b32.xlu1 %v399_v18, %s777_s28 }
 0x150   : > { %492 = vrot.lane.b32.xlu0 %v417_v21, %s777_s28 }
 0x151   : > { %464 = vrot.lane.b32.xlu1 %v375_v22, %s777_s28 }
 0x154   : > { %460 = vrot.lane.b32.xlu0 %v292_v23, %s777_s28 }
 0x155   : > { %462 = vrot.lane.b32.xlu1 %v293_v24, %s777_s28 }
 0x158   : > { %472 = vrot.lane.b32.xlu0 %v388_v25, %s777_s28 }
 0x15c   : > { %470 = vrot.lane.b32.xlu0 %v387_v26, %s777_s28 }
 0x160   : > { %458 = vrot.lane.b32.xlu0 %v291_v27, %s777_s28  ;;  %s250_s28 = scalar_lea.vmem %s986_s5, %s834_s22 }
 0x186   : > { %v501_v29 = vpop.permute.xlu1 %500  ;;  %v483_v31 = vpop.permute.xlu0 %482 }
 0x18a   : > { %v487_v30 = vpop.permute.xlu1 %486 }
 0x18e   : > { %v503_v28 = vpop.permute.xlu1 %502 }
 0x18f   : > { %v526_v50 = vsel %vm358_vm0, %v501_v29, %v503_v28 }
 0x1a2   : > { %v469_v32 = vpop.permute.xlu0 %468 }
 0x1a3   : > { %v467_v33 = vpop.permute.xlu1 %466 }
 0x1a4   : > { %v515_v4 = vsel %vm358_vm0, %v467_v33, %v469_v32 }
 0x1a6   : > { %v505_v34 = vpop.permute.xlu0 %504 }
 0x1a7   : > { %v489_v35 = vpop.permute.xlu1 %488  ;;  %v527_v48 = vsel %vm358_vm0, %v503_v28, %v505_v34 }
 0x1aa   : > { %v485_v36 = vpop.permute.xlu0 %484 }
 0x1ab   : > { %v475_v37 = vpop.permute.xlu1 %474  ;;  %v521_v57 = vsel %vm358_vm0, %v485_v36, %v487_v30  ;;  %v520_v59 = vsel %vm358_vm0, %v483_v31, %v485_v36 }
 0x1ae   : > { %v507_v38 = vpop.permute.xlu0 %506 }
 0x1af   : > { %v511_v39 = vpop.permute.xlu1 %510 }
 0x1b2   : > { %v495_v40 = vpop.permute.xlu0 %494 }
 0x1b3   : > { %v499_v41 = vpop.permute.xlu1 %498 }
 0x1b6   : > { %v481_v42 = vpop.permute.xlu0 %480 }
 0x1b7   : > { %v491_v43 = vpop.permute.xlu1 %490 }
 0x1b8   : > { %v522_v56 = vsel %vm358_vm0, %v489_v35, %v491_v43 }
 0x1ba   : > { %v509_v44 = vpop.permute.xlu0 %508 }
 0x1bb   : > { %v529_v45 = vsel %vm358_vm0, %v509_v44, %v511_v39  ;;  %v528_v46 = vsel %vm358_vm0, %v507_v38, %v509_v44  ;;  %v479_v47 = vpop.permute.xlu1 %478 }
 0x1bc   : > { %566 = vmatprep.subr.mxu0 %v529_v45  ;;  %v519_v60 = vsel %vm358_vm0, %v479_v47, %v481_v42 }
 0x1bd   : > { %567 = vmatpush1.msra.mxu0 %v528_v46 }
 0x1be   : > { %568 = vmatprep.subr.mxu0 %v527_v48  ;;  %v497_v49 = vpop.permute.xlu0 %496 }
 0x1bf   : > { %569 = vmatpush1.msra.mxu0 %v526_v50  ;;  %v525_v51 = vsel %vm358_vm0, %v497_v49, %v499_v41  ;;  %v524_v52 = vsel %vm358_vm0, %v495_v40, %v497_v49  ;;  %v477_v54 = vpop.permute.xlu1 %476 }
 0x1c0   : > { %570 = vmatprep.subr.mxu0 %v525_v51  ;;  %v518_v61 = vsel %vm358_vm0, %v477_v54, %v479_v47 }
 0x1c1   : > { %571 = vmatpush1.msra.mxu0 %v524_v52 }
 0x1c2   : > { %v493_v53 = vpop.permute.xlu0 %492 }
 0x1c3   : > { %v523_v55 = vsel %vm358_vm0, %v491_v43, %v493_v53  ;;  %v465_v62 = vpop.permute.xlu1 %464 }
 0x1c4   : > { %572 = vmatprep.subr.mxu0 %v523_v55  ;;  %v514_v5 = vsel %vm358_vm0, %v465_v62, %v467_v33 }
 0x1c5   : > { %573 = vmatpush1.msra.mxu0 %v522_v56 }
 0x1c6   : > { %574 = vmatprep.subr.mxu0 %v521_v57  ;;  %v461_v58 = vpop.permute.xlu0 %460 }
 0x1c7   : > { %575 = vmatpush1.msra.mxu0 %v520_v59  ;;  %v463_v2 = vpop.permute.xlu1 %462 }
 0x1c8   : > { %576 = vmatprep.subr.mxu0 %v519_v60  ;;  %v513_v7 = vsel %vm358_vm0, %v461_v58, %v463_v2 }
 0x1c9   : > { %577 = vmatpush1.msra.mxu0 %v518_v61 }
 0x1ca   : > { %v473_v63 = vpop.permute.xlu0 %472 }
 0x1cb   : > { %v517_v0 = vsel %vm358_vm0, %v473_v63, %v475_v37 }
 0x1cc   : > { %578 = vmatprep.subr.mxu0 %v517_v0 }
 0x1ce   : > { %v471_v1 = vpop.permute.xlu0 %470 }
 0x1cf   : > { %v516_v3 = vsel %vm358_vm0, %v471_v1, %v473_v63 }
 0x1d0   : > { %579 = vmatpush1.msra.mxu0 %v516_v3 }
 0x1d1   : > { %580 = vmatprep.subr.mxu0 %v515_v4 }
 0x1d2   : > { %581 = vmatpush1.msra.mxu0 %v514_v5  ;;  %v459_v6 = vpop.permute.xlu0 %458 }
 0x1d3   : > { %582 = vmatprep.subr.mxu0 %v513_v7  ;;  %v512_v9 = vsel %vm358_vm0, %v459_v6, %v461_v58 }
 0x1d4   : > { %583 = vmatpush1.msra.mxu0 %v512_v9 }
 0x1d5   : > { %740 = vmatmul.mubr.msk.f32.vlgmr.msra.gmra.mxu0 %vm548_vm12, %v454_v8 }
 0x295   : > { %v618_v10 = vpop.f32.mrf.mxu0 }
 0x296   : > { %v627_v12 = vmul.f32 %v618_v10, %v618_v10 }
 0x297   : > { %v620_v11 = vpop.f32.mrf.mxu0 }
 0x298   : > { %v623_v13 = vadd.f32 %v620_v11, %v618_v10  ;;  %v628_v14 = vmul.f32 %v620_v11, %v620_v11 }
 0x29a   : > { %624 = vadd.xlane.f32.xlu1 %v623_v13  ;;  %v629_v15 = vadd.f32 %v628_v14, %v627_v12 }
 0x29c   : > { %630 = vadd.xlane.f32.xlu0 %v629_v15 }
 0x323   : > { %v625_v16 = vpop.xlane.xlu1 %624 }
 0x324   : > { %626 = vst.msk [vmem:[%s246_s25] sm:$0xff] %vm334_vm2, %v625_v16 }
 0x325   : > { %v631_v17 = vpop.xlane.xlu0 %630 }
 0x326   : > { %632 = vst.msk [vmem:[%s250_s28] sm:$0xff] %vm334_vm2, %v631_v17 }
 0x327 PF: > { %s16_s18 = sadd.s32 1, %s773_s18  }
 0x328   : > { %p13_p4 = scmp.ge.s32.totalorder %s16_s18, 4  }
 0x32a   :  { %15 = sbr.rel (!%p13_p4) target bundleno = 1 (0x1), region = 82 }

// kernel: msse_forward.34
= control target key start
LH: loop header
LB: loop body
LE: loop exit
PB: predicated region body
PF: predicated region fallthrough
CT: control target
= control target key end

     0   :  { %s1004_s27 = smov 0   ;;  %s1179_s0 = inlined_call_operand.vmem [shape: f32[2,256], index: 0, kind: input, shape index: {}]   ;;  %s1180_s1 = inlined_call_operand.vmem [shape: f32[2,8,1], index: 1, kind: input, shape index: {}]   ;;  %s1181_s2 = inlined_call_operand.vmem [shape: f32[2,8,256], index: 2, kind: input, shape index: {}]   ;;  %s1182_s3 = inlined_call_operand.vmem [shape: f32[8,72], index: 3, kind: input, shape index: {}]   ;;  %s1183_s4 = inlined_call_operand.vmem [shape: f32[8,1], index: 4, kind: input, shape index: {}]   ;;  %s1184_s5 = inlined_call_operand.vmem [shape: f32[8,1], index: 5, kind: input, shape index: {}]   ;;  %s1185_s6 = inlined_call_operand.vmem [shape: f32[2,8,256], index: 6, kind: output, shape index: {0}]   ;;  %s1186_s7 = inlined_call_operand.vmem [shape: f32[2,8,1], index: 7, kind: output, shape index: {1}]   ;;  %s1187_s8 = inlined_call_operand.vmem [shape: f32[2,8,1], index: 8, kind: output, shape index: {2}]  }
   0x1 LB: > { %s891_s28 = sadd.s32 4294967295, %s943_s27   ;;  %p895_p0 = scmp.ge.s32.totalorder %s943_s27, 1  ;;  %s943_s27 = sphi %s1004_s27, %s19_s27  }
   0x2   : > { %p276_p1 = scmp.lt.s32.totalorder %s943_s27, 3 }
   0x4   : > { %p277_p2 = pnand %p895_p0, %p276_p1 }
   0x5   : > { %p322_p3 = scmp.lt.s32.totalorder (!%p277_p2), %s891_s28, 1  ;;  %s947_s15 = smov (!%p277_p2), 17  }
   0x6   : > { %280 = sbr.rel (%p277_p2) target bundleno = 839 (0x347), region = 44  ;;  %s948_s16 = smov (!%p277_p2), 15  }
   0x7   : > { %s949_s17 = smov (!%p277_p2), 1   ;;  %s950_s18 = smov (!%p277_p2), 127  }
   0x8   : > { %s951_s19 = smov (!%p277_p2), 113   ;;  %s952_s20 = smov (!%p277_p2), 111  }
   0x9   : > { %s953_s21 = smov (!%p277_p2), 95   ;;  %s954_s22 = smov (!%p277_p2), 94  }
   0xa   : > { %s955_s29 = smov (!%p277_p2), 96   ;;  %s956_s30 = smov (!%p277_p2), 112  }
   0xb   : > { %v367_v0 = vlaneseq  ;;  %v945_v1 = vmov 0   ;;  %s1189_s28 = smov (!%p322_p3, %s891_s28), 1  ;;  %v946_v3 = vmov 0.0   ;;  %v903_v4 = vld [vmem:[%s1179_s0 + $0x1] ss:$2 sm:$0x3] }
   0xc   : > { %931 = vset.pattern.permute.xlu0 %v945_v1  ;;  %932 = vset.pattern.permute.xlu1 %v945_v1  ;;  %s1019_s9 = sshll.u32 %s1189_s28, 3  ;;  %v360_v7 = vld [vmem:[%s1179_s0] ss:$2 sm:$0x3]  ;;  %s907_s23 = sshll.u32 %s1189_s28, 4  ;;  %vm451_vm0 = vcmask 138240  }
   0xd   : > { %v368_v2 = vshrl.u32 %v367_v0, 7  ;;  %709 = vmatprep.mubr.f32.mxu0 %v946_v3  ;;  %s325_s12 = scalar_lea.vmem %s1180_s1, %s1019_s9  ;;  %s330_s26 = scalar_lea.vmem %s1181_s2, %s907_s23  ;;  %vm439_vm1 = vcmask 121856   ;;  %vm427_vm2 = vcmask 7168   ;;  %vm412_vm3 = vcmask 1039360  }
   0xe   : > { %v344_v8 = vld [vmem:[%s325_s12] sm:$0xff]  ;;  %v346_v26 = vld [vmem:[%s330_s26 + $0x8] sm:$0xff]  ;;  %s957_s10 = smov 110   ;;  %s958_s11 = smov 126   ;;  %vm400_vm4 = vcmask 924672   ;;  %vm532_vm5 = vcmask 777216  }
   0xf   : > { %v373_v5 = vsub.s32 1, %v368_v2  ;;  %v369_v6 = vsub.s32 0, %v368_v2  ;;  %349 = vperm.xlu0 %931, %v344_v8   ;;  %v345_v29 = vld [vmem:[%s330_s26] sm:$0xff]  ;;  %vm379_vm6 = vcmask 908288   ;;  %vm544_vm7 = vcmask 769024   ;;  %s339_s28 = scalar_lea.vmem %s1186_s7, %s1019_s9 }
  0x10   : > { %vm520_vm8 = vcmask 785408   ;;  %vm508_vm9 = vcmask 900096   ;;  %vm491_vm10 = vcmask 916480   ;;  %vm479_vm11 = vcmask 1031168  }
  0x11   : > { %v395_v9 = vrot.slane %v903_v4, %v373_v5  ;;  %v370_v10 = vrot.slane %v360_v7, %v369_v6  ;;  %v391_v11 = vrot.slane %v903_v4, %v369_v6  ;;  %v374_v12 = vrot.slane %v360_v7, %v373_v5 }
  0x12   : > { %vm641_vm12 = vcmask 588800  }
  0x13   : > { %449 = vrot.lane.b32.xlu1 %v395_v9, %s947_s15  ;;  %447 = vrot.lane.b32.xlu0 %v391_v11, %s947_s15 }
  0x17   : > { %435 = vrot.lane.b32.xlu1 %v370_v10, %s948_s16  ;;  %437 = vrot.lane.b32.xlu0 %v374_v12, %s948_s16 }
  0x1b   : > { %423 = vrot.lane.b32.xlu1 %v391_v11, %s949_s17  ;;  %425 = vrot.lane.b32.xlu0 %v395_v9, %s949_s17 }
  0x1f   : > { %408 = vrot.lane.b32.xlu1 %v370_v10, %s950_s18  ;;  %410 = vrot.lane.b32.xlu0 %v374_v12, %s950_s18 }
  0x23   : > { %396 = vrot.lane.b32.xlu1 %v391_v11, %s951_s19  ;;  %398 = vrot.lane.b32.xlu0 %v395_v9, %s951_s19 }
  0x27   : > { %375 = vrot.lane.b32.xlu1 %v370_v10, %s952_s20  ;;  %530 = vrot.lane.b32.xlu0 %v946_v3, %s953_s21 }
  0x2b   : > { %377 = vrot.lane.b32.xlu0 %v374_v12, %s952_s20 }
  0x85   : > { %v450_v13 = vpop.permute.xlu1 %449 }
  0x86   : > { %v458_v14 = vmul.f32 0.0, %v450_v13 }
  0x88   : > { %542 = vrot.lane.b32.xlu1 %v458_v14, %s954_s22 }
  0x89   : > { %v436_v15 = vpop.permute.xlu1 %435 }
  0x8a   : > { %v350_v16 = vpop.permute.xlu0 %349 }
  0x8b   : > { %v1046_v28 = vadd.f32 %v350_v16, %v346_v26  ;;  %v1051_v30 = vadd.f32 %v350_v16, %v345_v29  ;;  %v716_v29 = vld [vmem:[%s1183_s4] sm:$0xff] }
  0x8d   : > { %v424_v17 = vpop.permute.xlu1 %423  ;;  %v444_v37 = vmul.f32 %v436_v15, %v1051_v30 }
  0x8e   : > { %v448_v18 = vpop.permute.xlu0 %447  ;;  %v432_v39 = vmul.f32 %v424_v17, %v1051_v30 }
  0x8f   : > { %v452_v31 = vsel %vm451_vm0, %v448_v18, %v450_v13  ;;  %v456_v32 = vmul.f32 %v448_v18, %v1051_v30 }
  0x90   : > { %v457_v33 = vmul.f32 %v452_v31, %v1046_v28 }
  0x91   : > { %v409_v19 = vpop.permute.xlu1 %408 }
  0x92   : > { %v438_v20 = vpop.permute.xlu0 %437  ;;  %v417_v22 = vmul.f32 0.0, %v409_v19 }
  0x93   : > { %v446_v21 = vmul.f32 0.0, %v438_v20  ;;  %v440_v34 = vsel %vm439_vm1, %v436_v15, %v438_v20 }
  0x94   : > { %v445_v35 = vmul.f32 %v440_v34, %v1046_v28 }
  0x95   : > { %518 = vrot.lane.b32.xlu1 %v446_v21, %s955_s29  ;;  %v397_v24 = vpop.permute.xlu1 %396 }
  0x96   : > { %v426_v23 = vpop.permute.xlu0 %425  ;;  %v405_v27 = vmul.f32 0.0, %v397_v24 }
  0x97   : > { %v434_v25 = vmul.f32 0.0, %v426_v23  ;;  %v428_v38 = vsel %vm427_vm2, %v424_v17, %v426_v23 }
  0x98   : > { %v433_v40 = vmul.f32 %v428_v38, %v1046_v28 }
  0x99   : > { %485 = vrot.lane.b32.xlu1 %v417_v22, %s956_s30  ;;  %506 = vrot.lane.b32.xlu0 %v434_v25, %s957_s10  ;;  %v1088_v48 = vpop.permute.xlu1 %375 }
  0x9a   : > { %v411_v36 = vpop.permute.xlu0 %410 }
  0x9b   : > { %v413_v41 = vsel %vm412_vm3, %v409_v19, %v411_v36  ;;  %v419_v44 = vmul.f32 %v411_v36, %v1046_v28 }
  0x9c   : > { %v418_v43 = vmul.f32 %v413_v41, %v1051_v30 }
  0x9d   : > { %528 = vrot.lane.b32.xlu1 %v1046_v28, %s953_s21  ;;  %473 = vrot.lane.b32.xlu0 %v405_v27, %s958_s11  ;;  %v384_v27 = vmul.f32 0.0, %v1088_v48 }
  0x9e   : > { %v399_v42 = vpop.permute.xlu0 %398 }
  0x9f   : > { %v401_v45 = vsel %vm400_vm4, %v397_v24, %v399_v42  ;;  %v407_v47 = vmul.f32 %v399_v42, %v1046_v28 }
  0xa0   : > { %v406_v46 = vmul.f32 %v401_v45, %v1051_v30 }
  0xa1   : > { %494 = vrot.lane.b32.xlu1 %v1051_v30, %s952_s20  ;;  %526 = vrot.lane.b32.xlu0 %v1051_v30, %s953_s21 }
  0xa2   : > { %v531_v49 = vpop.permute.xlu0 %530 }
  0xa5   : > { %464 = vrot.lane.b32.xlu1 %v1051_v30, %s950_s18  ;;  %496 = vrot.lane.b32.xlu0 %v1046_v28, %s952_s20  ;;  %s335_s20 = scalar_lea.vmem %s1185_s6, %s907_s23  ;;  %s343_s23 = scalar_lea.vmem %s1187_s8, %s1019_s9 }
  0xa6   : > { %v1090_v51 = vpop.permute.xlu0 %377 }
  0xa7   : > { %v380_v20 = vsel %vm379_vm6, %v1088_v48, %v1090_v51  ;;  %v386_v24 = vmul.f32 %v1090_v51, %v1046_v28 }
  0xa8   : > { %v385_v23 = vmul.f32 %v380_v20, %v1051_v30 }
  0xa9   : > { %538 = vrot.lane.b32.xlu1 %v456_v32, %s954_s22  ;;  %540 = vrot.lane.b32.xlu0 %v457_v33, %s954_s22 }
  0xad   : > { %514 = vrot.lane.b32.xlu1 %v444_v37, %s955_s29  ;;  %516 = vrot.lane.b32.xlu0 %v445_v35, %s955_s29 }
  0xb1   : > { %502 = vrot.lane.b32.xlu0 %v432_v39, %s957_s10  ;;  %504 = vrot.lane.b32.xlu1 %v433_v40, %s957_s10 }
  0xb5   : > { %489 = vrot.lane.b32.xlu0 %v419_v44, %s956_s30  ;;  %487 = vrot.lane.b32.xlu1 %v418_v43, %s956_s30 }
  0xb9   : > { %477 = vrot.lane.b32.xlu1 %v407_v47, %s958_s11  ;;  %475 = vrot.lane.b32.xlu0 %v406_v46, %s958_s11 }
  0xbd   : > { %462 = vrot.lane.b32.xlu1 %v946_v3, %s950_s18  ;;  %466 = vrot.lane.b32.xlu0 %v1046_v28, %s950_s18  ;;  %v724_v28 = vld [vmem:[%s1184_s5] sm:$0xff] }
  0xfa   : > { %v543_v50 = vpop.permute.xlu1 %542 }
 0x107   : > { %v519_v52 = vpop.permute.xlu1 %518 }
 0x10b   : > { %v486_v53 = vpop.permute.xlu1 %485  ;;  %v507_v54 = vpop.permute.xlu0 %506 }
 0x10f   : > { %v529_v55 = vpop.permute.xlu1 %528  ;;  %v1092_v56 = vpop.permute.xlu0 %473 }
 0x110   : > { %v534_v9 = vsel %vm532_vm5, %v529_v55, %v531_v49 }
 0x113   : > { %v495_v57 = vpop.permute.xlu1 %494  ;;  %v527_v58 = vpop.permute.xlu0 %526 }
 0x114   : > { %575 = vrot.lane.b32.xlu0 %v495_v57, %s947_s15  ;;  %593 = vrot.lane.b32.xlu1 %v527_v58, %s947_s15  ;;  %v533_v62 = vsel %vm532_vm5, %v527_v58, %v529_v55 }
 0x117   : > { %v497_v59 = vpop.permute.xlu0 %496  ;;  %v465_v60 = vpop.permute.xlu1 %464 }
 0x118   : > { %579 = vrot.lane.b32.xlu1 %v497_v59, %s947_s15  ;;  %v498_v10 = vsel %vm379_vm6, %v495_v57, %v497_v59 }
 0x11b   : > { %v541_v61 = vpop.permute.xlu0 %540  ;;  %v539_v0 = vpop.permute.xlu1 %538 }
 0x11c   : > { %595 = vrot.lane.b32.xlu1 %v533_v62, %s947_s15  ;;  %v546_v12 = vsel %vm544_vm7, %v541_v61, %v543_v50  ;;  %v545_v15 = vsel %vm544_vm7, %v539_v0, %v541_v61 }
 0x11f   : > { %v517_v63 = vpop.permute.xlu0 %516  ;;  %v515_v2 = vpop.permute.xlu1 %514 }
 0x120   : > { %v522_v13 = vsel %vm520_vm8, %v517_v63, %v519_v52  ;;  %v521_v17 = vsel %vm520_vm8, %v515_v2, %v517_v63 }
 0x123   : > { %v503_v1 = vpop.permute.xlu0 %502  ;;  %v505_v5 = vpop.permute.xlu1 %504 }
 0x124   : > { %v509_v14 = vsel %vm508_vm9, %v503_v1, %v505_v5  ;;  %v510_v21 = vsel %vm508_vm9, %v505_v5, %v507_v54 }
 0x127   : > { %v490_v3 = vpop.permute.xlu0 %489  ;;  %v488_v8 = vpop.permute.xlu1 %487 }
 0x128   : > { %v493_v16 = vsel %vm491_vm10, %v488_v8, %v490_v3  ;;  %v492_v18 = vsel %vm491_vm10, %v486_v53, %v488_v8 }
 0x12b   : > { %v476_v4 = vpop.permute.xlu0 %475  ;;  %v478_v11 = vpop.permute.xlu1 %477 }
 0x12c   : > { %v481_v25 = vsel %vm479_vm11, %v476_v4, %v478_v11  ;;  %v480_v26 = vsel %vm479_vm11, %v1092_v56, %v476_v4 }
 0x12f   : > { %v467_v6 = vpop.permute.xlu0 %466  ;;  %v463_v19 = vpop.permute.xlu1 %462 }
 0x130   : > { %561 = vrot.lane.b32.xlu0 %v467_v6, %s947_s15  ;;  %v469_v7 = vsel %vm412_vm3, %v465_v60, %v467_v6  ;;  %v468_v22 = vsel %vm412_vm3, %v463_v19, %v465_v60 }
 0x131   : > { %559 = vrot.lane.b32.xlu1 %v469_v7, %s947_s15 }
 0x134   : > { %597 = vrot.lane.b32.xlu0 %v534_v9, %s947_s15 }
 0x135   : > { %581 = vrot.lane.b32.xlu1 %v503_v1, %s947_s15 }
 0x138   : > { %577 = vrot.lane.b32.xlu0 %v498_v10, %s947_s15  ;;  %v547_v10 = vld [vmem:[%s1182_s3] sm:$0xff] }
 0x139   : > { %567 = vrot.lane.b32.xlu1 %v478_v11, %s947_s15 }
 0x13c   : > { %599 = vrot.lane.b32.xlu0 %v539_v0, %s947_s15 }
 0x13d   : > { %603 = vrot.lane.b32.xlu1 %v546_v12, %s947_s15 }
 0x140   : > { %587 = vrot.lane.b32.xlu0 %v515_v2, %s947_s15 }
 0x141   : > { %591 = vrot.lane.b32.xlu1 %v522_v13, %s947_s15 }
 0x144   : > { %573 = vrot.lane.b32.xlu0 %v490_v3, %s947_s15 }
 0x145   : > { %583 = vrot.lane.b32.xlu1 %v509_v14, %s947_s15 }
 0x148   : > { %601 = vrot.lane.b32.xlu0 %v545_v15, %s947_s15 }
 0x149   : > { %571 = vrot.lane.b32.xlu1 %v493_v16, %s947_s15 }
 0x14c   : > { %589 = vrot.lane.b32.xlu0 %v521_v17, %s947_s15 }
 0x14d   : > { %569 = vrot.lane.b32.xlu1 %v492_v18, %s947_s15 }
 0x150   : > { %585 = vrot.lane.b32.xlu0 %v510_v21, %s947_s15 }
 0x151   : > { %557 = vrot.lane.b32.xlu1 %v468_v22, %s947_s15 }
 0x154   : > { %553 = vrot.lane.b32.xlu0 %v385_v23, %s947_s15 }
 0x155   : > { %555 = vrot.lane.b32.xlu1 %v386_v24, %s947_s15 }
 0x158   : > { %565 = vrot.lane.b32.xlu0 %v481_v25, %s947_s15 }
 0x159   : > { %719 = vperm.xlu1 %932, %v716_v29  }
 0x15c   : > { %563 = vrot.lane.b32.xlu0 %v480_v26, %s947_s15 }
 0x160   : > { %551 = vrot.lane.b32.xlu0 %v384_v27, %s947_s15 }
 0x164   : > { %727 = vperm.xlu0 %931, %v724_v28  }
 0x186   : > { %v594_v30 = vpop.permute.xlu1 %593  ;;  %v576_v32 = vpop.permute.xlu0 %575 }
 0x18a   : > { %v580_v31 = vpop.permute.xlu1 %579 }
 0x18e   : > { %v596_v33 = vpop.permute.xlu1 %595 }
 0x18f   : > { %v619_v52 = vsel %vm451_vm0, %v594_v30, %v596_v33 }
 0x1a2   : > { %v562_v34 = vpop.permute.xlu0 %561 }
 0x1a3   : > { %v560_v35 = vpop.permute.xlu1 %559 }
 0x1a4   : > { %v608_v6 = vsel %vm451_vm0, %v560_v35, %v562_v34 }
 0x1a6   : > { %v598_v36 = vpop.permute.xlu0 %597 }
 0x1a7   : > { %v582_v37 = vpop.permute.xlu1 %581  ;;  %v620_v50 = vsel %vm451_vm0, %v596_v33, %v598_v36 }
 0x1aa   : > { %v578_v38 = vpop.permute.xlu0 %577 }
 0x1ab   : > { %v568_v39 = vpop.permute.xlu1 %567  ;;  %v614_v59 = vsel %vm451_vm0, %v578_v38, %v580_v31  ;;  %v613_v61 = vsel %vm451_vm0, %v576_v32, %v578_v38 }
 0x1ae   : > { %v600_v40 = vpop.permute.xlu0 %599 }
 0x1af   : > { %v604_v41 = vpop.permute.xlu1 %603 }
 0x1b2   : > { %v588_v42 = vpop.permute.xlu0 %587 }
 0x1b3   : > { %v592_v43 = vpop.permute.xlu1 %591 }
 0x1b6   : > { %v574_v44 = vpop.permute.xlu0 %573 }
 0x1b7   : > { %v584_v45 = vpop.permute.xlu1 %583 }
 0x1b8   : > { %v615_v58 = vsel %vm451_vm0, %v582_v37, %v584_v45 }
 0x1ba   : > { %v602_v46 = vpop.permute.xlu0 %601 }
 0x1bb   : > { %v622_v47 = vsel %vm451_vm0, %v602_v46, %v604_v41  ;;  %v621_v48 = vsel %vm451_vm0, %v600_v40, %v602_v46  ;;  %v572_v49 = vpop.permute.xlu1 %571 }
 0x1bc   : > { %659 = vmatprep.subr.mxu0 %v622_v47  ;;  %v612_v62 = vsel %vm451_vm0, %v572_v49, %v574_v44 }
 0x1bd   : > { %660 = vmatpush1.msra.mxu0 %v621_v48 }
 0x1be   : > { %661 = vmatprep.subr.mxu0 %v620_v50  ;;  %v590_v51 = vpop.permute.xlu0 %589 }
 0x1bf   : > { %662 = vmatpush1.msra.mxu0 %v619_v52  ;;  %v618_v53 = vsel %vm451_vm0, %v590_v51, %v592_v43  ;;  %v617_v54 = vsel %vm451_vm0, %v588_v42, %v590_v51  ;;  %v570_v56 = vpop.permute.xlu1 %569 }
 0x1c0   : > { %663 = vmatprep.subr.mxu0 %v618_v53  ;;  %v611_v63 = vsel %vm451_vm0, %v570_v56, %v572_v49 }
 0x1c1   : > { %664 = vmatpush1.msra.mxu0 %v617_v54 }
 0x1c2   : > { %v586_v55 = vpop.permute.xlu0 %585 }
 0x1c3   : > { %v616_v57 = vsel %vm451_vm0, %v584_v45, %v586_v55  ;;  %v558_v0 = vpop.permute.xlu1 %557 }
 0x1c4   : > { %665 = vmatprep.subr.mxu0 %v616_v57  ;;  %v607_v7 = vsel %vm451_vm0, %v558_v0, %v560_v35 }
 0x1c5   : > { %666 = vmatpush1.msra.mxu0 %v615_v58 }
 0x1c6   : > { %667 = vmatprep.subr.mxu0 %v614_v59  ;;  %v554_v60 = vpop.permute.xlu0 %553 }
 0x1c7   : > { %668 = vmatpush1.msra.mxu0 %v613_v61  ;;  %v556_v4 = vpop.permute.xlu1 %555 }
 0x1c8   : > { %669 = vmatprep.subr.mxu0 %v612_v62  ;;  %v606_v9 = vsel %vm451_vm0, %v554_v60, %v556_v4 }
 0x1c9   : > { %670 = vmatpush1.msra.mxu0 %v611_v63 }
 0x1ca   : > { %v566_v1 = vpop.permute.xlu0 %565 }
 0x1cb   : > { %v610_v2 = vsel %vm451_vm0, %v566_v1, %v568_v39 }
 0x1cc   : > { %671 = vmatprep.subr.mxu0 %v610_v2 }
 0x1ce   : > { %v564_v3 = vpop.permute.xlu0 %563 }
 0x1cf   : > { %v609_v5 = vsel %vm451_vm0, %v564_v3, %v566_v1 }
 0x1d0   : > { %672 = vmatpush1.msra.mxu0 %v609_v5 }
 0x1d1   : > { %673 = vmatprep.subr.mxu0 %v608_v6 }
 0x1d2   : > { %674 = vmatpush1.msra.mxu0 %v607_v7  ;;  %v552_v8 = vpop.permute.xlu0 %551 }
 0x1d3   : > { %675 = vmatprep.subr.mxu0 %v606_v9  ;;  %v605_v11 = vsel %vm451_vm0, %v552_v8, %v554_v60 }
 0x1d4   : > { %676 = vmatpush1.msra.mxu0 %v605_v11  ;;  %v720_v12 = vpop.permute.xlu1 %719 }
 0x1d5   : > { %904 = vmatmul.mubr.msk.f32.vlgmr.msra.gmra.mxu0 %vm641_vm12, %v547_v10 }
 0x1df   : > { %v728_v15 = vpop.permute.xlu0 %727 }
 0x295   : > { %v711_v13 = vpop.f32.mrf.mxu0 }
 0x296   : > { %v722_v14 = vmul.f32 %v720_v12, %v711_v13 }
 0x297   : > { %v713_v16 = vpop.f32.mrf.mxu0 }
 0x298   : > { %v730_v17 = vadd.f32 %v728_v15, %v722_v14  ;;  %v723_v18 = vmul.f32 %v720_v12, %v713_v16 }
 0x29a   : > { %v734_v19 = vmul.f32 0.044715, %v730_v17  ;;  %v731_v20 = vadd.f32 %v728_v15, %v723_v18  ;;  %v732_v31 = vmul.f32 0.5, %v730_v17 }
 0x29c   : > { %v736_v21 = vmul.f32 %v734_v19, %v730_v17  ;;  %v735_v22 = vmul.f32 0.044715, %v731_v20  ;;  %v733_v34 = vmul.f32 0.5, %v731_v20 }
 0x29e   : > { %v737_v23 = vmul.f32 %v735_v22, %v731_v20  ;;  %v738_v24 = vmul.f32 %v736_v21, %v730_v17 }
 0x2a0   : > { %v739_v25 = vmul.f32 %v737_v23, %v731_v20  ;;  %v740_v26 = vadd.f32 %v738_v24, %v730_v17 }
 0x2a2   : > { %v741_v27 = vadd.f32 %v739_v25, %v731_v20  ;;  %v742_v29 = vmul.f32 0.7978846, %v740_v26 }
 0x2a4   : > { %v743_v28 = vmul.f32 0.7978846, %v741_v27  ;;  %933 = vtanh.f32 %v742_v29 }
 0x2a6   : > { %935 = vtanh.f32 %v743_v28 }
 0x2b1   : > { %v934_v30 = vpop.eup %933 }
 0x2b2   : > { %v746_v32 = vadd.f32 1.0, %v934_v30 }
 0x2b3   : > { %v936_v33 = vpop.eup %935 }
 0x2b4   : > { %v747_v35 = vadd.f32 1.0, %v936_v33  ;;  %v748_v36 = vmul.f32 %v746_v32, %v732_v31 }
 0x2b6   : > { %v749_v37 = vmul.f32 %v747_v35, %v733_v34  ;;  %750 = vst [vmem:[%s335_s20] sm:$0xff] %v748_v36  ;;  %v756_v39 = vmul.f32 %v748_v36, %v748_v36 }
 0x2b8   : > { %751 = vst [vmem:[%s335_s20 + $0x8] sm:$0xff] %v749_v37  ;;  %v752_v38 = vadd.f32 %v749_v37, %v748_v36  ;;  %v757_v40 = vmul.f32 %v749_v37, %v749_v37 }
 0x2ba   : > { %753 = vadd.xlane.f32.xlu1 %v752_v38  ;;  %v758_v41 = vadd.f32 %v757_v40, %v756_v39 }
 0x2bc   : > { %759 = vadd.xlane.f32.xlu0 %v758_v41 }
 0x343   : > { %v754_v42 = vpop.xlane.xlu1 %753 }
 0x344   : > { %755 = vst.msk [vmem:[%s339_s28] sm:$0xff] %vm427_vm2, %v754_v42 }
 0x345   : > { %v760_v43 = vpop.xlane.xlu0 %759 }
 0x346   : > { %761 = vst.msk [vmem:[%s343_s23] sm:$0xff] %vm427_vm2, %v760_v43 }
 0x347 PF: > { %s19_s27 = sadd.s32 1, %s943_s27  }
 0x348   : > { %p16_p4 = scmp.ge.s32.totalorder %s19_s27, 4  }
 0x34a   :  { %18 = sbr.rel (!%p16_p4) target bundleno = 1 (0x1), region = 102 }

// kernel: msse_forward.35
= control target key start
LH: loop header
LB: loop body
LE: loop exit
PB: predicated region body
PF: predicated region fallthrough
CT: control target
= control target key end

     0   :  { %s1175_s30 = smov 0   ;;  %s1177_s10 = smov 0   ;;  %s1357_s0 = inlined_call_operand.vmem [shape: f32[2,8,256], index: 0, kind: input, shape index: {}]   ;;  %s1358_s1 = inlined_call_operand.vmem [shape: f32[2,8,256], index: 1, kind: input, shape index: {}]   ;;  %s1359_s2 = inlined_call_operand.vmem [shape: f32[2,8,256], index: 2, kind: input, shape index: {}]   ;;  %s1360_s3 = inlined_call_operand.vmem [shape: f32[2,8,256], index: 3, kind: input, shape index: {}]   ;;  %s1361_s4 = inlined_call_operand.vmem [shape: f32[2,8,256], index: 4, kind: input, shape index: {}]   ;;  %s1362_s5 = inlined_call_operand.vmem [shape: f32[40,1], index: 5, kind: input, shape index: {}]   ;;  %s1363_s6 = inlined_call_operand.vmem [shape: f32[40,1], index: 6, kind: input, shape index: {}]   ;;  %s1364_s7 = inlined_call_operand.vmem [shape: f32[16,40], index: 7, kind: input, shape index: {}]   ;;  %s1365_s8 = inlined_call_operand.vmem [shape: f32[2,16,256], index: 8, kind: output, shape index: {0}]   ;;  %s1366_s9 = inlined_call_operand.vmem [shape: f32[2,16,1], index: 9, kind: output, shape index: {1}]  }
   0x1   :  { %s1179_s11 = smov 0  }
   0x2 LB: > { %s32_s12 = sadd.s32 1, %s1117_s10  ;;  %p1015_p0 = scmp.ge.s32.totalorder %s1121_s11, 1  ;;  %s1121_s11 = sphi %s1179_s11, %s20_s11   ;;  %s1117_s10 = sphi %s1177_s10, %s1368_s10   ;;  %s1113_s30 = sphi %s1175_s30, %s1367_s30  }
   0x3   : > { %p34_p1 = scmp.ge.s32.totalorder %s32_s12, 2  ;;  %p379_p2 = scmp.lt.s32.totalorder %s1121_s11, 3 }
   0x5   : > { %s1370_s12 = smov (%p34_p1, %s32_s12), 0  ;;  %p380_p3 = pnand %p1015_p0, %p379_p2 }
   0x6   : > { %p465_p4 = scmp.lt.s32.totalorder (!%p380_p3), %s1113_s30, 1 }
   0x7   : > { %383 = sbr.rel (%p380_p3) target bundleno = 526 (0x20e), region = 52 }
   0xc   : > { %v590_v0 = vld [vmem:[%s1363_s6 + $0x20] sm:$0xff]  ;;  %v1123_v2 = vmov 0   ;;  %v549_v3 = vld [vmem:[%s1362_s5 + $0x18] sm:$0xff]  ;;  %v548_v4 = vld [vmem:[%s1362_s5 + $0x10] sm:$0xff]  ;;  %s1372_s30 = smov (!%p465_p4, %s1113_s30), 1  ;;  %vm533_vm0 = vcmask 7168  }
   0xd   : > { %v550_v1 = vld [vmem:[%s1362_s5 + $0x20] sm:$0xff]  ;;  %1078 = vset.pattern.permute.xlu1 %v1123_v2  ;;  %1077 = vset.pattern.permute.xlu0 %v1123_v2  ;;  %v589_v5 = vld [vmem:[%s1363_s6 + $0x18] sm:$0xff]  ;;  %v547_v6 = vld [vmem:[%s1362_s5 + $0x8] sm:$0xff]  ;;  %s1230_s16 = sshll.u32 %s1372_s30, 4  ;;  %v1124_v11 = vmov 0.0   ;;  %vm718_vm1 = vcmask 326656  }
   0xe   : > { %613 = vperm.xlu1 %1078, %v590_v0   ;;  %573 = vperm.xlu0 %1077, %v550_v1   ;;  %v588_v7 = vld [vmem:[%s1363_s6 + $0x10] sm:$0xff]  ;;  %v546_v8 = vld [vmem:[%s1362_s5] sm:$0xff]  ;;  %v587_v9 = vld [vmem:[%s1363_s6 + $0x8] sm:$0xff]  ;;  %s1236_s19 = scalar_lea.vmem %s1366_s9, %s1230_s16  ;;  %s512_s22 = scalar_lea.vmem %s1361_s4, %s1230_s16 }
   0xf   : > { %v586_v10 = vld [vmem:[%s1363_s6] sm:$0xff]  ;;  %534 = vst.msk [vmem:[%s1236_s19] sm:$0xff] %vm533_vm0, %v1124_v11  ;;  %535 = vst.msk [vmem:[%s1236_s19 + $0x8] sm:$0xff] %vm533_vm0, %v1124_v11  ;;  %789 = vmatprep.mubr.f32.mxu0 %v1124_v11  ;;  %795 = vmatprep.mubr.f32.mxu1 %v1124_v11  ;;  %v545_v13 = vld [vmem:[%s512_s22 + $0x8] sm:$0xff]  ;;  %s502_s25 = scalar_lea.vmem %s1360_s3, %s1230_s16  ;;  %s492_s28 = scalar_lea.vmem %s1359_s2, %s1230_s16 }
  0x10   : > { %v544_v12 = vld [vmem:[%s512_s22] sm:$0xff]  ;;  %v543_v22 = vld [vmem:[%s502_s25 + $0x8] sm:$0xff]  ;;  %s482_s14 = scalar_lea.vmem %s1358_s1, %s1230_s16  ;;  %s472_s18 = scalar_lea.vmem %s1357_s0, %s1230_s16 }
  0x11   : > { %v542_v21 = vld [vmem:[%s502_s25] sm:$0xff]  ;;  %v541_v29 = vld [vmem:[%s492_s28 + $0x8] sm:$0xff]  ;;  %s1039_s23 = sshll.u32 %s1372_s30, 5 }
  0x12   : > { %568 = vperm.xlu0 %1077, %v549_v3   ;;  %563 = vperm.xlu1 %1078, %v548_v4   ;;  %v540_v28 = vld [vmem:[%s492_s28] sm:$0xff]  ;;  %v539_v43 = vld [vmem:[%s482_s14 + $0x8] sm:$0xff]  ;;  %s522_s26 = scalar_lea.vmem %s1365_s8, %s1039_s23 }
  0x13   : > { %v538_v42 = vld [vmem:[%s482_s14] sm:$0xff]  ;;  %v537_v53 = vld [vmem:[%s472_s18 + $0x8] sm:$0xff] }
  0x14   : > { %v536_v52 = vld [vmem:[%s472_s18] sm:$0xff] }
  0x16   : > { %608 = vperm.xlu0 %1077, %v589_v5   ;;  %558 = vperm.xlu1 %1078, %v547_v6  }
  0x1a   : > { %603 = vperm.xlu0 %1077, %v588_v7   ;;  %553 = vperm.xlu1 %1078, %v546_v8  }
  0x1e   : > { %598 = vperm.xlu0 %1077, %v587_v9   ;;  %593 = vperm.xlu1 %1078, %v586_v10  }
  0x89   : > { %v614_v14 = vpop.permute.xlu1 %613  ;;  %v574_v15 = vpop.permute.xlu0 %573 }
  0x8a   : > { %v584_v16 = vmul.f32 %v574_v15, %v544_v12  ;;  %v585_v17 = vmul.f32 %v574_v15, %v545_v13 }
  0x8c   : > { %v1250_v18 = vadd.f32 %v614_v14, %v584_v16  ;;  %v1252_v19 = vadd.f32 %v614_v14, %v585_v17 }
  0x8d   : > { %v569_v20 = vpop.permute.xlu0 %568  ;;  %v564_v23 = vpop.permute.xlu1 %563 }
  0x8e   : > { %v645_v24 = vmul.f32 0.044715, %v1252_v19  ;;  %v644_v25 = vmul.f32 0.044715, %v1250_v18  ;;  %v582_v26 = vmul.f32 %v569_v20, %v542_v21  ;;  %v583_v27 = vmul.f32 %v569_v20, %v543_v22 }
  0x8f   : > { %v580_v38 = vmul.f32 %v564_v23, %v540_v28  ;;  %v581_v39 = vmul.f32 %v564_v23, %v541_v29 }
  0x90   : > { %v655_v32 = vmul.f32 %v645_v24, %v1252_v19  ;;  %v654_v33 = vmul.f32 %v644_v25, %v1250_v18 }
  0x91   : > { %v609_v30 = vpop.permute.xlu0 %608  ;;  %v559_v31 = vpop.permute.xlu1 %558 }
  0x92   : > { %v1266_v34 = vadd.f32 %v609_v30, %v582_v26  ;;  %v1268_v35 = vadd.f32 %v609_v30, %v583_v27  ;;  %v665_v36 = vmul.f32 %v655_v32, %v1252_v19  ;;  %v664_v37 = vmul.f32 %v654_v33, %v1250_v18 }
  0x93   : > { %v578_v54 = vmul.f32 %v559_v31, %v538_v42  ;;  %v579_v55 = vmul.f32 %v559_v31, %v539_v43  ;;  %v635_v42 = vmul.f32 0.5, %v1252_v19 }
  0x94   : > { %v642_v40 = vmul.f32 0.044715, %v1266_v34  ;;  %v643_v41 = vmul.f32 0.044715, %v1268_v35  ;;  %v675_v46 = vadd.f32 %v665_v36, %v1252_v19  ;;  %v674_v47 = vadd.f32 %v664_v37, %v1250_v18 }
  0x95   : > { %v604_v44 = vpop.permute.xlu0 %603  ;;  %v554_v45 = vpop.permute.xlu1 %553 }
  0x96   : > { %v652_v48 = vmul.f32 %v642_v40, %v1266_v34  ;;  %v653_v49 = vmul.f32 %v643_v41, %v1268_v35  ;;  %v1282_v50 = vadd.f32 %v604_v44, %v580_v38  ;;  %v1284_v51 = vadd.f32 %v604_v44, %v581_v39 }
  0x97   : > { %v685_v56 = vmul.f32 0.7978846, %v675_v46  ;;  %v684_v57 = vmul.f32 0.7978846, %v674_v47  ;;  %v576_v62 = vmul.f32 %v554_v45, %v536_v52  ;;  %v577_v63 = vmul.f32 %v554_v45, %v537_v53 }
  0x98   : > { %v640_v58 = vmul.f32 0.044715, %v1282_v50  ;;  %v641_v59 = vmul.f32 0.044715, %v1284_v51  ;;  %v663_v60 = vmul.f32 %v653_v49, %v1268_v35  ;;  %v662_v61 = vmul.f32 %v652_v48, %v1266_v34 }
  0x99   : > { %v599_v0 = vpop.permute.xlu0 %598  ;;  %v594_v1 = vpop.permute.xlu1 %593  ;;  %1079 = vtanh.f32 %v685_v56  ;;  %v634_v47 = vmul.f32 0.5, %v1250_v18  ;;  %v631_v18 = vmul.f32 0.5, %v1284_v51 }
  0x9a   : > { %v650_v2 = vmul.f32 %v640_v58, %v1282_v50  ;;  %v651_v3 = vmul.f32 %v641_v59, %v1284_v51  ;;  %v1292_v4 = vadd.f32 %v599_v0, %v578_v54  ;;  %v1294_v5 = vadd.f32 %v599_v0, %v579_v55 }
  0x9b   : > { %v1296_v6 = vadd.f32 %v594_v1, %v576_v62  ;;  %v1298_v7 = vadd.f32 %v594_v1, %v577_v63  ;;  %1081 = vtanh.f32 %v684_v57  ;;  %v673_v8 = vadd.f32 %v663_v60, %v1268_v35 }
  0x9c   : > { %v638_v9 = vmul.f32 0.044715, %v1292_v4  ;;  %v639_v10 = vmul.f32 0.044715, %v1294_v5  ;;  %v672_v11 = vadd.f32 %v662_v61, %v1266_v34  ;;  %v661_v12 = vmul.f32 %v651_v3, %v1284_v51 }
  0x9d   : > { %v636_v13 = vmul.f32 0.044715, %v1296_v6  ;;  %v637_v14 = vmul.f32 0.044715, %v1298_v7  ;;  %v683_v15 = vmul.f32 0.7978846, %v673_v8  ;;  %v660_v16 = vmul.f32 %v650_v2, %v1282_v50 }
  0x9e   : > { %v648_v17 = vmul.f32 %v638_v9, %v1292_v4  ;;  %v649_v20 = vmul.f32 %v639_v10, %v1294_v5  ;;  %v682_v21 = vmul.f32 0.7978846, %v672_v11  ;;  %v671_v22 = vadd.f32 %v661_v12, %v1284_v51 }
  0x9f   : > { %v646_v23 = vmul.f32 %v636_v13, %v1296_v6  ;;  %v647_v24 = vmul.f32 %v637_v14, %v1298_v7  ;;  %1083 = vtanh.f32 %v683_v15  ;;  %v670_v25 = vadd.f32 %v660_v16, %v1282_v50 }
  0xa0   : > { %1085 = vtanh.f32 %v682_v21  ;;  %v681_v26 = vmul.f32 0.7978846, %v671_v22  ;;  %v659_v27 = vmul.f32 %v649_v20, %v1294_v5  ;;  %v658_v29 = vmul.f32 %v648_v17, %v1292_v4 }
  0xa1   : > { %v680_v28 = vmul.f32 0.7978846, %v670_v25  ;;  %v657_v31 = vmul.f32 %v647_v24, %v1298_v7  ;;  %v656_v33 = vmul.f32 %v646_v23, %v1296_v6  ;;  %v633_v54 = vmul.f32 0.5, %v1268_v35  ;;  %v807_v24 = vld [vmem:[%s1236_s19 + $0x8] sm:$0xff]  ;;  %v806_v25 = vld [vmem:[%s1236_s19] sm:$0xff] }
  0xa2   : > { %1087 = vtanh.f32 %v681_v26  ;;  %v669_v30 = vadd.f32 %v659_v27, %v1294_v5  ;;  %v668_v32 = vadd.f32 %v658_v29, %v1292_v4  ;;  %v632_v55 = vmul.f32 0.5, %v1266_v34 }
  0xa3   : > { %1089 = vtanh.f32 %v680_v28  ;;  %v667_v37 = vadd.f32 %v657_v31, %v1298_v7  ;;  %v666_v39 = vadd.f32 %v656_v33, %v1296_v6  ;;  %v630_v62 = vmul.f32 0.5, %v1282_v50 }
  0xa4   : > { %v679_v36 = vmul.f32 0.7978846, %v669_v30  ;;  %v678_v38 = vmul.f32 0.7978846, %v668_v32  ;;  %v629_v34 = vmul.f32 0.5, %v1294_v5  ;;  %v628_v51 = vmul.f32 0.5, %v1292_v4 }
  0xa5   : > { %v677_v41 = vmul.f32 0.7978846, %v667_v37  ;;  %v676_v44 = vmul.f32 0.7978846, %v666_v39  ;;  %v627_v11 = vmul.f32 0.5, %v1298_v7  ;;  %v626_v14 = vmul.f32 0.5, %v1296_v6 }
  0xa6   : > { %v1080_v40 = vpop.eup %1079  ;;  %1091 = vtanh.f32 %v679_v36  ;;  %v716_v4 = vld [vmem:[%s1364_s7] sm:$0xff]  ;;  %v717_v7 = vld [vmem:[%s1364_s7 + $0x8] sm:$0xff] }
  0xa7   : > { %v705_v43 = vadd.f32 1.0, %v1080_v40  ;;  %1093 = vtanh.f32 %v678_v38 }
  0xa8   : > { %v1082_v45 = vpop.eup %1081  ;;  %1095 = vtanh.f32 %v677_v41 }
  0xa9   : > { %v715_v46 = vmul.f32 %v705_v43, %v635_v42  ;;  %v704_v48 = vadd.f32 1.0, %v1082_v45  ;;  %1097 = vtanh.f32 %v676_v44 }
  0xab   : > { %747 = vmatprep.subr.mxu0 %v715_v46  ;;  %1041 = vmatprep.subr.mxu1 %v715_v46  ;;  %v714_v49 = vmul.f32 %v704_v48, %v634_v47 }
  0xac   : > { %v1084_v52 = vpop.eup %1083 }
  0xad   : > { %v1086_v53 = vpop.eup %1085  ;;  %748 = vmatpush1.msra.mxu0 %v714_v49  ;;  %1046 = vmatpush1.msra.mxu1 %v714_v49  ;;  %v703_v19 = vadd.f32 1.0, %v1084_v52 }
  0xae   : > { %v702_v56 = vadd.f32 1.0, %v1086_v53 }
  0xaf   : > { %v1088_v57 = vpop.eup %1087  ;;  %v713_v58 = vmul.f32 %v703_v19, %v633_v54 }
  0xb0   : > { %v1090_v59 = vpop.eup %1089  ;;  %v712_v60 = vmul.f32 %v702_v56, %v632_v55  ;;  %v701_v61 = vadd.f32 1.0, %v1088_v57 }
  0xb1   : > { %749 = vmatprep.subr.mxu0 %v713_v58  ;;  %1042 = vmatprep.subr.mxu1 %v713_v58  ;;  %v700_v63 = vadd.f32 1.0, %v1090_v59 }
  0xb2   : > { %750 = vmatpush1.msra.mxu0 %v712_v60  ;;  %1047 = vmatpush1.msra.mxu1 %v712_v60  ;;  %v711_v0 = vmul.f32 %v701_v61, %v631_v18 }
  0xb3   : > { %v1092_v35 = vpop.eup %1091  ;;  %v710_v1 = vmul.f32 %v700_v63, %v630_v62 }
  0xb4   : > { %v1094_v2 = vpop.eup %1093  ;;  %751 = vmatprep.subr.mxu0 %v711_v0  ;;  %1043 = vmatprep.subr.mxu1 %v711_v0  ;;  %v699_v3 = vadd.f32 1.0, %v1092_v35 }
  0xb5   : > { %v1096_v8 = vpop.eup %1095  ;;  %752 = vmatpush1.msra.mxu0 %v710_v1  ;;  %1048 = vmatpush1.msra.mxu1 %v710_v1  ;;  %v698_v9 = vadd.f32 1.0, %v1094_v2 }
  0xb6   : > { %v1098_v10 = vpop.eup %1097  ;;  %v709_v50 = vmul.f32 %v699_v3, %v629_v34  ;;  %v697_v12 = vadd.f32 1.0, %v1096_v8 }
  0xb7   : > { %v708_v13 = vmul.f32 %v698_v9, %v628_v51  ;;  %v696_v15 = vadd.f32 1.0, %v1098_v10 }
  0xb8   : > { %753 = vmatprep.subr.mxu0 %v709_v50  ;;  %1044 = vmatprep.subr.mxu1 %v709_v50  ;;  %v707_v5 = vmul.f32 %v697_v12, %v627_v11 }
  0xb9   : > { %754 = vmatpush1.msra.mxu0 %v708_v13  ;;  %1049 = vmatpush1.msra.mxu1 %v708_v13  ;;  %v706_v16 = vmul.f32 %v696_v15, %v626_v14 }
  0xba   : > { %755 = vmatprep.subr.mxu0 %v707_v5  ;;  %1045 = vmatprep.subr.mxu1 %v707_v5 }
  0xbb   : > { %756 = vmatpush1.msra.mxu0 %v706_v16  ;;  %1050 = vmatpush1.msra.mxu1 %v706_v16 }
  0xbc   : > { %1030 = vmatmul.mubr.msk.f32.vlgmr.msra.gmra.mxu0 %vm718_vm1, %v716_v4  ;;  %1031 = vmatmul.mubr.msk.f32.vlgmr.msra.gmra.mxu1 %vm718_vm1, %v717_v7 }
 0x17c   : > { %v791_v6 = vpop.f32.mrf.mxu0  ;;  %v797_v17 = vpop.f32.mrf.mxu1 }
 0x17d   : > { %802 = vst [vmem:[%s522_s26] sm:$0xff] %v791_v6  ;;  %804 = vst [vmem:[%s522_s26 + $0x10] sm:$0xff] %v797_v17 }
 0x17e   : > { %v793_v20 = vpop.f32.mrf.mxu0  ;;  %v799_v21 = vpop.f32.mrf.mxu1 }
 0x17f   : > { %803 = vst [vmem:[%s522_s26 + $0x8] sm:$0xff] %v793_v20  ;;  %v808_v22 = vadd.f32 %v793_v20, %v791_v6  ;;  %805 = vst [vmem:[%s522_s26 + $0x18] sm:$0xff] %v799_v21  ;;  %v811_v23 = vadd.f32 %v799_v21, %v797_v17 }
 0x181   : > { %812 = vadd.xlane.f32.xlu1 %v811_v23  ;;  %809 = vadd.xlane.f32.xlu0 %v808_v22 }
 0x20a   : > { %v813_v26 = vpop.xlane.xlu1 %812  ;;  %v810_v27 = vpop.xlane.xlu0 %809 }
 0x20b   : > { %v815_v28 = vadd.f32 %v813_v26, %v807_v24  ;;  %v814_v29 = vadd.f32 %v810_v27, %v806_v25 }
 0x20d   : > { %818 = vst.msk [vmem:[%s1236_s19 + $0x8] sm:$0xff] %vm533_vm0, %v815_v28  ;;  %817 = vst.msk [vmem:[%s1236_s19] sm:$0xff] %vm533_vm0, %v814_v29 }
 0x20e PF: > { %s20_s11 = sadd.s32 1, %s1121_s11   ;;  %s1367_s30 = smov %s1117_s10 }
 0x20f   : > { %p17_p5 = scmp.ge.s32.totalorder %s20_s11, 4   ;;  %s1368_s10 = smov %s1370_s12 }
 0x211   :  { %19 = sbr.rel (!%p17_p5) target bundleno = 2 (0x2), region = 110 }

// kernel: msse_forward.36
= control target key start
LH: loop header
LB: loop body
LE: loop exit
PB: predicated region body
PF: predicated region fallthrough
CT: control target
= control target key end

     0   :  { %s712_s18 = smov 0   ;;  %s714_s19 = smov 0   ;;  %s781_s0 = inlined_call_operand.vmem [shape: f32[2,4,256], index: 0, kind: input, shape index: {}]   ;;  %s782_s1 = inlined_call_operand.vmem [shape: f32[4,1], index: 1, kind: input, shape index: {}]   ;;  %s783_s2 = inlined_call_operand.vmem [shape: f32[4,1], index: 2, kind: input, shape index: {}]   ;;  %s784_s3 = inlined_call_operand.vmem [shape: f32[16,4], index: 3, kind: input, shape index: {}]   ;;  %s785_s4 = inlined_call_operand.vmem [shape: f32[2,16,256], index: 4, kind: output, shape index: {0}]   ;;  %s786_s5 = inlined_call_operand.vmem [shape: f32[2,16,1], index: 5, kind: output, shape index: {1}]  }
   0x1   :  { %s716_s20 = smov 0  }
   0x2 LB: > { %s28_s21 = sadd.s32 1, %s670_s19  ;;  %p600_p0 = scmp.ge.s32.totalorder %s674_s20, 1  ;;  %s674_s20 = sphi %s716_s20, %s16_s20   ;;  %s670_s19 = sphi %s714_s19, %s788_s19   ;;  %s666_s18 = sphi %s712_s18, %s787_s18  }
   0x3   : > { %p30_p1 = scmp.ge.s32.totalorder %s28_s21, 2  ;;  %p211_p2 = scmp.lt.s32.totalorder %s674_s20, 3 }
   0x5   : > { %s790_s21 = smov (%p30_p1, %s28_s21), 0  ;;  %p212_p3 = pnand %p600_p0, %p211_p2 }
   0x6   : > { %p253_p4 = scmp.lt.s32.totalorder (!%p212_p3), %s666_s18, 1 }
   0x7   : > { %215 = sbr.rel (%p212_p3) target bundleno = 330 (0x14a), region = 36 }
   0xc   : > { %v285_v0 = vld [vmem:[%s782_s1] sm:$0xf]  ;;  %v676_v2 = vmov 0   ;;  %v323_v4 = vld [vmem:[%s784_s3 + $0x8] sm:$0xff]  ;;  %v677_v5 = vmov 1   ;;  %v678_v6 = vmov 2   ;;  %v293_v11 = vlaneseq }
   0xd   : > { %v322_v1 = vld [vmem:[%s784_s3] sm:$0xff]  ;;  %642 = vset.pattern.permute.xlu0 %v676_v2  ;;  %643 = vset.pattern.permute.xlu1 %v676_v2  ;;  %v679_v7 = vmov 3   ;;  %s792_s18 = smov (!%p253_p4, %s666_s18), 1  ;;  %vm281_vm0 = vcmask 7168   ;;  %v680_v8 = vmov 0.0  }
   0xe   : > { %288 = vperm.xlu0 %642, %v285_v0   ;;  %326 = vperm.xlu1 %643, %v322_v1   ;;  %v299_v3 = vld [vmem:[%s783_s2] sm:$0xf]  ;;  %s611_s30 = sshll.u32 %s792_s18, 4  ;;  %v681_v9 = vmov 839922192   ;;  %v294_v13 = vshrl.u32 %v293_v11, 7 }
   0xf   : > { %s752_s8 = scalar_lea.vmem %s786_s5, %s611_s30  ;;  %v291_v10 = vunpack.c.l.s4 %v681_v9  ;;  %s609_s9 = sshll.u32 %s792_s18, 3 }
  0x10   : > { %283 = vst.msk [vmem:[%s752_s8 + $0x8] sm:$0xff] %vm281_vm0, %v680_v8  ;;  %282 = vst.msk [vmem:[%s752_s8] sm:$0xff] %vm281_vm0, %v680_v8  ;;  %s260_s12 = scalar_lea.vmem %s781_s0, %s609_s9  ;;  %v337_v32 = vsub.s32 0, %v294_v13  ;;  %v341_v33 = vsub.s32 4, %v294_v13  ;;  %v367_v36 = vsub.s32 1, %v294_v13  ;;  %v371_v37 = vsub.s32 5, %v294_v13 }
  0x11   : > { %v292_v12 = vunpack.c.0.s8 %v291_v10  ;;  %v284_v17 = vld [vmem:[%s260_s12] sm:$0xff]  ;;  %v401_v38 = vsub.s32 2, %v294_v13  ;;  %v405_v39 = vsub.s32 6, %v294_v13  ;;  %v435_v40 = vsub.s32 3, %v294_v13  ;;  %s610_s13 = sshll.u32 %s792_s18, 5 }
  0x12   : > { %302 = vperm.xlu0 %642, %v299_v3   ;;  %331 = vperm.xlu1 %643, %v323_v4   ;;  %v439_v41 = vsub.s32 7, %v294_v13  ;;  %s270_s16 = scalar_lea.vmem %s785_s4, %s610_s13 }
  0x13   : > { %v295_v14 = vsub.s32 %v292_v12, %v294_v13 }
  0x16   : > { %645 = vset.pattern.permute.xlu1 %v677_v5  ;;  %644 = vset.pattern.permute.xlu0 %v677_v5 }
  0x17   : > { %362 = vperm.xlu1 %645, %v323_v4   ;;  %358 = vperm.xlu0 %644, %v322_v1  }
  0x1b   : > { %646 = vset.pattern.permute.xlu1 %v678_v6  ;;  %647 = vset.pattern.permute.xlu0 %v678_v6 }
  0x1c   : > { %392 = vperm.xlu1 %646, %v322_v1   ;;  %396 = vperm.xlu0 %647, %v323_v4  }
  0x20   : > { %648 = vset.pattern.permute.xlu1 %v679_v7  ;;  %649 = vset.pattern.permute.xlu0 %v679_v7 }
  0x21   : > { %426 = vperm.xlu1 %648, %v322_v1  }
  0x25   : > { %430 = vperm.xlu1 %648, %v323_v4  }
  0x89   : > { %v289_v15 = vpop.permute.xlu0 %288  ;;  %v327_v26 = vpop.permute.xlu1 %326 }
  0x8a   : > { %v296_v16 = vrot.slane %v289_v15, %v295_v14 }
  0x8c   : > { %v298_v19 = vmul.f32 %v296_v16, %v284_v17 }
  0x8d   : > { %v303_v18 = vpop.permute.xlu0 %302  ;;  %v332_v28 = vpop.permute.xlu1 %331 }
  0x8e   : > { %v310_v20 = vrot.slane %v303_v18, %v295_v14 }
  0x90   : > { %v312_v21 = vadd.f32 %v310_v20, %v298_v19 }
  0x92   : > { %v314_v22 = vmul.f32 0.044715, %v312_v21  ;;  %v363_v29 = vpop.permute.xlu1 %362  ;;  %v313_v34 = vmul.f32 0.5, %v312_v21  ;;  %v359_v43 = vpop.permute.xlu0 %358 }
  0x94   : > { %v315_v23 = vmul.f32 %v314_v22, %v312_v21 }
  0x96   : > { %v316_v24 = vmul.f32 %v315_v23, %v312_v21 }
  0x97   : > { %v393_v30 = vpop.permute.xlu1 %392  ;;  %v397_v3 = vpop.permute.xlu0 %396 }
  0x98   : > { %v317_v25 = vadd.f32 %v316_v24, %v312_v21 }
  0x9a   : > { %v318_v27 = vmul.f32 0.7978846, %v317_v25 }
  0x9c   : > { %650 = vtanh.f32 %v318_v27  ;;  %v427_v48 = vpop.permute.xlu1 %426 }
  0xa0   : > { %v431_v6 = vpop.permute.xlu1 %430 }
  0xa9   : > { %v651_v31 = vpop.eup %650 }
  0xaa   : > { %v320_v35 = vadd.f32 1.0, %v651_v31 }
  0xac   : > { %v321_v42 = vmul.f32 %v320_v35, %v313_v34 }
  0xae   : > { %v338_v44 = vrot.slane %v321_v42, %v337_v32  ;;  %v342_v45 = vrot.slane %v321_v42, %v341_v33  ;;  %v368_v46 = vrot.slane %v321_v42, %v367_v36  ;;  %v372_v47 = vrot.slane %v321_v42, %v371_v37 }
  0xaf   : > { %v402_v49 = vrot.slane %v321_v42, %v401_v38  ;;  %v406_v50 = vrot.slane %v321_v42, %v405_v39  ;;  %v436_v51 = vrot.slane %v321_v42, %v435_v40  ;;  %v440_v52 = vrot.slane %v321_v42, %v439_v41 }
  0xb0   : > { %v348_v53 = vrot.slane %v338_v44, %v337_v32  ;;  %v352_v54 = vrot.slane %v342_v45, %v337_v32  ;;  %v378_v55 = vrot.slane %v368_v46, %v367_v36  ;;  %v382_v56 = vrot.slane %v372_v47, %v367_v36 }
  0xb1   : > { %v412_v57 = vrot.slane %v402_v49, %v401_v38  ;;  %v416_v58 = vrot.slane %v406_v50, %v401_v38  ;;  %v446_v1 = vrot.slane %v436_v51, %v435_v40  ;;  %v450_v2 = vrot.slane %v440_v52, %v435_v40 }
  0xb2   : > { %v353_v59 = vmul.f32 %v348_v53, %v327_v26  ;;  %v354_v60 = vmul.f32 %v352_v54, %v327_v26  ;;  %v355_v61 = vmul.f32 %v348_v53, %v332_v28  ;;  %v356_v62 = vmul.f32 %v352_v54, %v332_v28 }
  0xb3   : > { %v385_v63 = vmul.f32 %v378_v55, %v363_v29  ;;  %v386_v0 = vmul.f32 %v382_v56, %v363_v29  ;;  %v383_v4 = vmul.f32 %v378_v55, %v359_v43  ;;  %v384_v5 = vmul.f32 %v382_v56, %v359_v43  ;;  %v464_v29 = vld [vmem:[%s752_s8 + $0x8] sm:$0xff] }
  0xb4   : > { %v417_v9 = vmul.f32 %v412_v57, %v393_v30  ;;  %v418_v10 = vmul.f32 %v416_v58, %v393_v30  ;;  %v419_v13 = vmul.f32 %v412_v57, %v397_v3  ;;  %v420_v14 = vmul.f32 %v416_v58, %v397_v3  ;;  %v463_v30 = vld [vmem:[%s752_s8] sm:$0xff] }
  0xb5   : > { %v389_v7 = vadd.f32 %v385_v63, %v355_v61  ;;  %v390_v8 = vadd.f32 %v386_v0, %v356_v62  ;;  %v387_v11 = vadd.f32 %v383_v4, %v353_v59  ;;  %v388_v12 = vadd.f32 %v384_v5, %v354_v60 }
  0xb6   : > { %v451_v15 = vmul.f32 %v446_v1, %v427_v48  ;;  %v452_v16 = vmul.f32 %v450_v2, %v427_v48  ;;  %v453_v17 = vmul.f32 %v446_v1, %v431_v6  ;;  %v454_v18 = vmul.f32 %v450_v2, %v431_v6 }
  0xb7   : > { %v423_v19 = vadd.f32 %v419_v13, %v389_v7  ;;  %v424_v20 = vadd.f32 %v420_v14, %v390_v8  ;;  %v421_v21 = vadd.f32 %v417_v9, %v387_v11  ;;  %v422_v22 = vadd.f32 %v418_v10, %v388_v12 }
  0xb9   : > { %v457_v23 = vadd.f32 %v453_v17, %v423_v19  ;;  %v458_v24 = vadd.f32 %v454_v18, %v424_v20  ;;  %v455_v25 = vadd.f32 %v451_v15, %v421_v21  ;;  %v456_v26 = vadd.f32 %v452_v16, %v422_v22 }
  0xbb   : > { %462 = vst [vmem:[%s270_s16 + $0x18] sm:$0xff] %v458_v24  ;;  %v468_v27 = vadd.f32 %v458_v24, %v457_v23  ;;  %461 = vst [vmem:[%s270_s16 + $0x10] sm:$0xff] %v457_v23  ;;  %v465_v28 = vadd.f32 %v456_v26, %v455_v25 }
  0xbc   : > { %460 = vst [vmem:[%s270_s16 + $0x8] sm:$0xff] %v456_v26  ;;  %459 = vst [vmem:[%s270_s16] sm:$0xff] %v455_v25 }
  0xbd   : > { %469 = vadd.xlane.f32.xlu1 %v468_v27  ;;  %466 = vadd.xlane.f32.xlu0 %v465_v28 }
 0x146   : > { %v470_v31 = vpop.xlane.xlu1 %469  ;;  %v467_v32 = vpop.xlane.xlu0 %466 }
 0x147   : > { %v472_v33 = vadd.f32 %v470_v31, %v464_v29  ;;  %v471_v34 = vadd.f32 %v467_v32, %v463_v30 }
 0x149   : > { %475 = vst.msk [vmem:[%s752_s8 + $0x8] sm:$0xff] %vm281_vm0, %v472_v33  ;;  %474 = vst.msk [vmem:[%s752_s8] sm:$0xff] %vm281_vm0, %v471_v34 }
 0x14a PF: > { %s16_s20 = sadd.s32 1, %s674_s20   ;;  %s787_s18 = smov %s670_s19 }
 0x14b   : > { %p13_p5 = scmp.ge.s32.totalorder %s16_s20, 4   ;;  %s788_s19 = smov %s790_s21 }
 0x14d   :  { %15 = sbr.rel (!%p13_p5) target bundleno = 2 (0x2), region = 82 }

// kernel: msse_forward.37
= control target key start
LH: loop header
LB: loop body
LE: loop exit
PB: predicated region body
PF: predicated region fallthrough
CT: control target
= control target key end

     0   :  { %s589_s15 = smov 0   ;;  %s591_s16 = smov 0   ;;  %s631_s0 = inlined_call_operand.vmem [shape: f32[2,16,256], index: 0, kind: input, shape index: {}]   ;;  %s632_s1 = inlined_call_operand.vmem [shape: f32[2,16,256], index: 1, kind: input, shape index: {}]   ;;  %s633_s2 = inlined_call_operand.vmem [shape: f32[2,16,1], index: 2, kind: input, shape index: {}]   ;;  %s634_s3 = inlined_call_operand.vmem [shape: f32[2,16,1], index: 3, kind: input, shape index: {}]   ;;  %s635_s4 = inlined_call_operand.vmem [shape: f32[2,16,256], index: 4, kind: output, shape index: {}]  }
   0x1   :  { %s593_s17 = smov 0  }
   0x2 LB: > { %s26_s18 = sadd.s32 1, %s557_s16  ;;  %p494_p0 = scmp.ge.s32.totalorder %s561_s17, 1  ;;  %s561_s17 = sphi %s593_s17, %s14_s17   ;;  %s557_s16 = sphi %s591_s16, %s637_s16   ;;  %s553_s15 = sphi %s589_s15, %s636_s15  }
   0x3   : > { %p28_p1 = scmp.ge.s32.totalorder %s26_s18, 2  ;;  %p220_p2 = scmp.lt.s32.totalorder %s561_s17, 3 }
   0x5   : > { %s639_s18 = smov (%p28_p1, %s26_s18), 0  ;;  %p221_p3 = pnand %p494_p0, %p220_p2 }
   0x6   : > { %p274_p4 = scmp.lt.s32.totalorder (!%p221_p3), %s553_s15, 1 }
   0x7   : > { %224 = sbr.rel (%p221_p3) target bundleno = 150 (0x96), region = 36 }
   0xc   : > { %v563_v0 = vmov 0   ;;  %s641_s15 = smov (!%p274_p4, %s553_s15), 1 }
   0xd   : > { %538 = vset.pattern.permute.xlu1 %v563_v0  ;;  %537 = vset.pattern.permute.xlu0 %v563_v0  ;;  %s509_s19 = sshll.u32 %s641_s15, 4  ;;  %s507_s26 = sshll.u32 %s641_s15, 5 }
   0xe   : > { %s302_s22 = scalar_lea.vmem %s634_s3, %s509_s19  ;;  %s297_s25 = scalar_lea.vmem %s633_s2, %s509_s19 }
   0xf   : > { %v337_v1 = vld [vmem:[%s302_s22] sm:$0xff]  ;;  %v338_v3 = vld [vmem:[%s302_s22 + $0x8] sm:$0xff]  ;;  %s291_s29 = scalar_lea.vmem %s632_s1, %s507_s26  ;;  %s281_s6 = scalar_lea.vmem %s631_s0, %s507_s26 }
  0x10   : > { %341 = vperm.xlu1 %538, %v337_v1   ;;  %v317_v2 = vld [vmem:[%s297_s25] sm:$0xff]  ;;  %v318_v4 = vld [vmem:[%s297_s25 + $0x8] sm:$0xff]  ;;  %v335_v15 = vld [vmem:[%s291_s29 + $0x10] sm:$0xff]  ;;  %s311_s9 = scalar_lea.vmem %s635_s4, %s507_s26 }
  0x11   : > { %321 = vperm.xlu0 %537, %v317_v2   ;;  %v333_v5 = vld [vmem:[%s291_s29] sm:$0xff]  ;;  %v334_v6 = vld [vmem:[%s291_s29 + $0x8] sm:$0xff]  ;;  %v336_v16 = vld [vmem:[%s291_s29 + $0x18] sm:$0xff] }
  0x12   : > { %v313_v7 = vld [vmem:[%s281_s6] sm:$0xff]  ;;  %v314_v8 = vld [vmem:[%s281_s6 + $0x8] sm:$0xff]  ;;  %v315_v17 = vld [vmem:[%s281_s6 + $0x10] sm:$0xff] }
  0x13   : > { %v316_v18 = vld [vmem:[%s281_s6 + $0x18] sm:$0xff] }
  0x14   : > { %346 = vperm.xlu1 %538, %v338_v3  }
  0x15   : > { %326 = vperm.xlu0 %537, %v318_v4  }
  0x8b   : > { %v342_v9 = vpop.permute.xlu1 %341 }
  0x8c   : > { %v349_v10 = vmul.f32 %v342_v9, %v333_v5  ;;  %v350_v11 = vmul.f32 %v342_v9, %v334_v6  ;;  %v322_v12 = vpop.permute.xlu0 %321 }
  0x8d   : > { %v329_v13 = vmul.f32 %v322_v12, %v313_v7  ;;  %v330_v14 = vmul.f32 %v322_v12, %v314_v8 }
  0x8f   : > { %v353_v19 = vadd.f32 %v349_v10, %v329_v13  ;;  %v354_v20 = vadd.f32 %v350_v11, %v330_v14  ;;  %v347_v21 = vpop.permute.xlu1 %346 }
  0x90   : > { %v351_v22 = vmul.f32 %v347_v21, %v335_v15  ;;  %v352_v23 = vmul.f32 %v347_v21, %v336_v16  ;;  %v327_v24 = vpop.permute.xlu0 %326 }
  0x91   : > { %357 = vst [vmem:[%s311_s9] sm:$0xff] %v353_v19  ;;  %358 = vst [vmem:[%s311_s9 + $0x8] sm:$0xff] %v354_v20  ;;  %v331_v25 = vmul.f32 %v327_v24, %v315_v17  ;;  %v332_v26 = vmul.f32 %v327_v24, %v316_v18 }
  0x93   : > { %v355_v27 = vadd.f32 %v351_v22, %v331_v25  ;;  %v356_v28 = vadd.f32 %v352_v23, %v332_v26 }
  0x95   : > { %359 = vst [vmem:[%s311_s9 + $0x10] sm:$0xff] %v355_v27  ;;  %360 = vst [vmem:[%s311_s9 + $0x18] sm:$0xff] %v356_v28 }
  0x96 PF: > { %s14_s17 = sadd.s32 1, %s561_s17   ;;  %s636_s15 = smov %s557_s16 }
  0x97   : > { %p11_p5 = scmp.ge.s32.totalorder %s14_s17, 4   ;;  %s637_s16 = smov %s639_s18 }
  0x99   :  { %13 = sbr.rel (!%p11_p5) target bundleno = 2 (0x2), region = 75 }

</bundles_post_ra>
